<compile_context>
chip_gen: v7x
topology: tpu7x:2x2x1
jax: 0.10.0
libtpu: 0.0.40
codegen_flags: <defaults>
</compile_context>

<pallas_src>
import jax
import jax.numpy as jnp
from jax.experimental import pallas as pl
from jax.experimental.pallas import tpu as pltpu

EPS = 1e-5
NUM_CLASSES = 10
KERNEL_SIZES = (1, 2, 3, 4)
SEQ_LEN = 30           # MaxPool1d(30 - 2k + 2) then reduces the length to exactly 1
L_PAD = 32             # sequence length padded to a sublane-tile multiple
C_TRUE, C_PAD = 250, 256
FC_TRUE, FC_PAD = 1000, 1024
OUT_PAD = 128          # logits padded 10 -> 128 for a lane-dense store


# ------------------------------- Pallas kernel -------------------------------


def _shift_rows(a, j):
    """b[r] = a[r + j]; wrapped rows are only consumed at masked positions."""
    if j == 0:
        return a
    return jnp.concatenate([a[j:, :], a[:j, :]], axis=0)


def _make_fused_kernel(tb, emb_dim):
    m = tb * L_PAD  # rows per grid step: tb batch rows x 32 (padded) positions

    def kernel(x_ref, w1_ref, t1_ref, w2_ref, t2_ref,
               fw1_ref, ft_ref, fw2_ref, fb2_ref, o_ref):
        x = x_ref[...]                                              # (M, E) bf16
        # sequence position of each flattened row (L_PAD is a power of two)
        t_idx = jax.lax.broadcasted_iota(jnp.int32, (m, 1), 0) & (L_PAD - 1)

        pooled = []
        w1_off = 0
        w2_off = 0
        for idx, k in enumerate(KERNEL_SIZES):
            valid_len = SEQ_LEN - 2 * k + 2          # length fed to the MaxPool
            # Conv1d(E->250, k) + folded bias/BN + ReLU as one im2col matmul.
            xw = x if k == 1 else jnp.concatenate(
                [_shift_rows(x, j) for j in range(k)], axis=-1)     # (M, k*E)
            h1 = jnp.dot(xw, w1_ref[w1_off:w1_off + k * emb_dim, :],
                         preferred_element_type=jnp.float32)        # (M, 256) f32
            h1 = jnp.maximum(h1 + t1_ref[idx:idx + 1, :], 0.0).astype(jnp.bfloat16)
            # Conv1d(250->250, k) + folded bias/BN + ReLU as one im2col matmul.
            hw = h1 if k == 1 else jnp.concatenate(
                [_shift_rows(h1, j) for j in range(k)], axis=-1)    # (M, k*256)
            h2 = jnp.dot(hw, w2_ref[w2_off:w2_off + k * C_PAD, :],
                         preferred_element_type=jnp.float32)        # (M, 256) f32
            h2 = jnp.maximum(h2 + t2_ref[idx:idx + 1, :], 0.0)
            # Full-length MaxPool1d: zero invalid positions (ReLU output >= 0)
            # and reduce over each batch element's 32-row group.
            h2 = jnp.where(t_idx < valid_len, h2, 0.0)
            pooled.append(jnp.max(h2.reshape(tb, L_PAD, C_PAD), axis=1))  # (TB, 256)
            w1_off += k * emb_dim
            w2_off += k * C_PAD

        conv_out = jnp.concatenate(pooled, axis=-1)                 # (TB, 1024) f32
        # Linear(1000,1000) -> BN -> ReLU -> Linear(1000,10)   (padded 1024/128)
        h = jnp.dot(conv_out.astype(jnp.bfloat16), fw1_ref[...],
                    preferred_element_type=jnp.float32)
        h = jnp.maximum(h + ft_ref[...], 0.0)
        o_ref[...] = jnp.dot(h.astype(jnp.bfloat16), fw2_ref[...],
                             preferred_element_type=jnp.float32) + fb2_ref[...]

    return kernel


def forward(params, reviews, features):
    del features                                   # unused by the reference forward()
    b, seq = reviews.shape
    assert seq == SEQ_LEN, "MaxPool1d(30 - 2k + 2) requires sequence length 30"
    emb_dim = params["emb"].shape[1]

    tb = min(64, 8 * ((b + 7) // 8))               # batch rows per grid step
    b_pad = ((b + tb - 1) // tb) * tb

    # Embedding lookup (XLA gather), pad time 30->32 and batch->B_pad, then
    # flatten to a lane-dense 2D (B_pad*32, E) activation for the kernel.
    x = params["emb"][reviews].astype(jnp.bfloat16)                 # (B, 30, E)
    x = jnp.pad(x, ((0, b_pad - b), (0, L_PAD - SEQ_LEN), (0, 0)))
    x2 = x.reshape(b_pad * L_PAD, emb_dim)

    full = lambda a: pl.BlockSpec(a.shape, lambda i: (0, 0))
    out = pl.pallas_call(
        _make_fused_kernel(tb, emb_dim),
        out_shape=jax.ShapeDtypeStruct((b_pad, OUT_PAD), jnp.float32),
        grid=(b_pad // tb,),
        in_specs=[
            pl.BlockSpec((tb * L_PAD, emb_dim), lambda i: (i, 0)),
            full(params["w1"]), full(params["t1"]),
            full(params["w2"]), full(params["t2"]),
            full(params["fw1"]), full(params["ft"]),
            full(params["fw2"]), full(params["fb2"]),
        ],
        out_specs=pl.BlockSpec((tb, OUT_PAD), lambda i: (i, 0)),
        compiler_params=pltpu.CompilerParams(
            dimension_semantics=("parallel",),
            vmem_limit_bytes=40 * 1024 * 1024),
    )(x2, params["w1"], params["t1"], params["w2"], params["t2"],
      params["fw1"], params["ft"], params["fw2"], params["fb2"])
    return out[:b, :NUM_CLASSES]


# ------------------------------ parameter glue -------------------------------


def init_params(key, vocab, emb_dim):
    """Random parameters in the folded + padded layout consumed by the kernel."""
    keys = iter(jax.random.split(key, 64))
    nxt = lambda: next(keys)
    normal = lambda shape, s=0.05: (s * jax.random.normal(nxt(), shape)).astype(jnp.float32)
    rand_var = lambda shape: jax.random.uniform(
        nxt(), shape, minval=0.5, maxval=1.5).astype(jnp.float32)

    params = {"emb": normal((vocab, emb_dim), 0.1)}

    w1_blocks, w2_blocks, t1_rows, t2_rows = [], [], [], []
    for k in KERNEL_SIZES:
        w1 = normal((k, emb_dim, C_TRUE))     # tap-major; matches in-kernel im2col order
        b1 = normal((C_TRUE,))
        g1, be1 = 1.0 + normal((C_TRUE,), 0.1), normal((C_TRUE,), 0.1)
        m1, v1 = normal((C_TRUE,), 0.1), rand_var((C_TRUE,))
        w2 = normal((k, C_TRUE, C_TRUE))
        b2 = normal((C_TRUE,))
        g2, be2 = 1.0 + normal((C_TRUE,), 0.1), normal((C_TRUE,), 0.1)
        m2, v2 = normal((C_TRUE,), 0.1), rand_var((C_TRUE,))

        # fold conv bias + BatchNorm(eval) into the weight columns (scale) and a
        # per-channel shift (kept in-kernel); pad channels 250 -> 256 with zeros.
        s1 = g1 / jnp.sqrt(v1 + EPS); t1 = be1 + (b1 - m1) * s1
        s2 = g2 / jnp.sqrt(v2 + EPS); t2 = be2 + (b2 - m2) * s2
        w1p = jnp.pad(w1 * s1, ((0, 0), (0, 0), (0, C_PAD - C_TRUE)))
        w2p = jnp.pad(w2 * s2, ((0, 0), (0, C_PAD - C_TRUE), (0, C_PAD - C_TRUE)))
        w1_blocks.append(w1p.reshape(k * emb_dim, C_PAD))
        w2_blocks.append(w2p.reshape(k * C_PAD, C_PAD))
        t1_rows.append(jnp.pad(t1, (0, C_PAD - C_TRUE)))
        t2_rows.append(jnp.pad(t2, (0, C_PAD - C_TRUE)))

    params["w1"] = jnp.concatenate(w1_blocks, axis=0).astype(jnp.bfloat16)  # (10E, 256)
    params["w2"] = jnp.concatenate(w2_blocks, axis=0).astype(jnp.bfloat16)  # (2560, 256)
    params["t1"] = jnp.stack(t1_rows).astype(jnp.float32)                   # (4, 256)
    params["t2"] = jnp.stack(t2_rows).astype(jnp.float32)                   # (4, 256)

    # FC head: Linear(1000,1000) -> BN -> ReLU -> Linear(1000,10)
    fw1 = normal((FC_TRUE, FC_TRUE))
    fb1 = normal((FC_TRUE,))
    fg, fbe = 1.0 + normal((FC_TRUE,), 0.1), normal((FC_TRUE,), 0.1)
    fm, fv = normal((FC_TRUE,), 0.1), rand_var((FC_TRUE,))
    fw2 = normal((FC_TRUE, NUM_CLASSES))
    fb2 = normal((NUM_CLASSES,))

    fs = fg / jnp.sqrt(fv + EPS); ft = fbe + (fb1 - fm) * fs
    # input rows: true index br*250+c -> padded row br*256+c (matches the kernel's
    # concat of the four 256-wide pooled branch outputs); fold BN scale into cols.
    fw1p = jnp.pad((fw1 * fs).reshape(len(KERNEL_SIZES), C_TRUE, FC_TRUE),
                   ((0, 0), (0, C_PAD - C_TRUE), (0, 0)))
    fw1p = fw1p.reshape(len(KERNEL_SIZES) * C_PAD, FC_TRUE)
    fw1p = jnp.pad(fw1p, ((0, 0), (0, FC_PAD - FC_TRUE)))
    params["fw1"] = fw1p.astype(jnp.bfloat16)                               # (1024, 1024)
    params["ft"] = jnp.pad(ft, (0, FC_PAD - FC_TRUE)).reshape(1, FC_PAD).astype(jnp.float32)
    params["fw2"] = jnp.pad(fw2, ((0, FC_PAD - FC_TRUE),
                                  (0, OUT_PAD - NUM_CLASSES))).astype(jnp.bfloat16)
    params["fb2"] = jnp.pad(fb2, (0, OUT_PAD - NUM_CLASSES)).reshape(1, OUT_PAD).astype(jnp.float32)
    return params


# ----------------------------------- main ------------------------------------

if __name__ == "__main__":
    B, VOCAB, EMB = 2, 50, 32
    key = jax.random.PRNGKey(0)
    pkey, rkey, fkey = jax.random.split(key, 3)

    params = init_params(pkey, VOCAB, EMB)
    reviews = jax.random.randint(rkey, (B, SEQ_LEN), 0, VOCAB, dtype=jnp.int32)
    features = jax.random.normal(fkey, (B, 8), dtype=jnp.float32)  # unused, as in reference

    logits = jax.jit(forward)(params, reviews, features)
    jax.block_until_ready(logits)
    assert logits.shape == (B, NUM_CLASSES) and logits.dtype == jnp.float32
    print("KERNEL_OK")
</pallas_src>

<mosaic_0001>
module attributes {stable_mosaic.version = 11 : i64} {
  func.func @kernel(%arg0: i32, %arg1: memref<256x32xbf16, #tpu.memory_space<vmem>>, %arg2: memref<320x256xbf16, #tpu.memory_space<vmem>>, %arg3: memref<4x256xf32, #tpu.memory_space<vmem>>, %arg4: memref<2560x256xbf16, #tpu.memory_space<vmem>>, %arg5: memref<4x256xf32, #tpu.memory_space<vmem>>, %arg6: memref<1024x1024xbf16, #tpu.memory_space<vmem>>, %arg7: memref<1x1024xf32, #tpu.memory_space<vmem>>, %arg8: memref<1024x128xbf16, #tpu.memory_space<vmem>>, %arg9: memref<1x128xf32, #tpu.memory_space<vmem>>, %arg10: memref<8x128xf32, #tpu.memory_space<vmem>>) attributes {dimension_semantics = [#tpu.dimension_semantics<parallel>], iteration_bounds = array<i64: 1>, scalar_prefetch = 0 : i64, scratch_operands = 0 : i64, tpu.core_type = #tpu.core_type<tc>, window_params = [{transform_indices = @transform_0, window_bounds = array<i64: 256, 32>}, {pipeline_mode = #tpu.pipeline_mode<synchronous>, transform_indices = @transform_1, window_bounds = array<i64: 320, 256>}, {pipeline_mode = #tpu.pipeline_mode<synchronous>, transform_indices = @transform_2, window_bounds = array<i64: 4, 256>}, {pipeline_mode = #tpu.pipeline_mode<synchronous>, transform_indices = @transform_3, window_bounds = array<i64: 2560, 256>}, {pipeline_mode = #tpu.pipeline_mode<synchronous>, transform_indices = @transform_4, window_bounds = array<i64: 4, 256>}, {pipeline_mode = #tpu.pipeline_mode<synchronous>, transform_indices = @transform_5, window_bounds = array<i64: 1024, 1024>}, {pipeline_mode = #tpu.pipeline_mode<synchronous>, transform_indices = @transform_6, window_bounds = array<i64: 1, 1024>}, {pipeline_mode = #tpu.pipeline_mode<synchronous>, transform_indices = @transform_7, window_bounds = array<i64: 1024, 128>}, {pipeline_mode = #tpu.pipeline_mode<synchronous>, transform_indices = @transform_8, window_bounds = array<i64: 1, 128>}, {transform_indices = @transform_9, window_bounds = array<i64: 8, 128>}]} {
    %c0 = arith.constant 0 : index
    %c0_0 = arith.constant 0 : index
    %0 = vector.load %arg1[%c0, %c0_0] : memref<256x32xbf16, #tpu.memory_space<vmem>>, vector<256x32xbf16>
    %1 = tpu.iota {dimensions = array<i32: 0>} : vector<256x1xi32>
    %c31_i32 = arith.constant 31 : i32
    %2 = vector.broadcast %c31_i32 : i32 to vector<256x1xi32>
    %3 = arith.andi %1, %2 : vector<256x1xi32>
    %c0_1 = arith.constant 0 : index
    %c0_2 = arith.constant 0 : index
    %4 = vector.load %arg2[%c0_1, %c0_2] : memref<320x256xbf16, #tpu.memory_space<vmem>>, vector<32x256xbf16>
    %cst = arith.constant dense<0.000000e+00> : vector<256x256xf32>
    %5 = tpu.matmul %0, %4, %cst {dimension_numbers = #tpu.dot_dimension_numbers<[1], [0], [0], [1], [0, 0, 1, 1], [], []>} : vector<256x32xbf16>, vector<32x256xbf16>, vector<256x256xf32> -> vector<256x256xf32>
    %c0_3 = arith.constant 0 : index
    %c0_4 = arith.constant 0 : index
    %6 = vector.load %arg3[%c0_3, %c0_4] : memref<4x256xf32, #tpu.memory_space<vmem>>, vector<1x256xf32>
    %7 = vector.broadcast %6 : vector<1x256xf32> to vector<256x256xf32>
    %8 = arith.addf %5, %7 : vector<256x256xf32>
    %cst_5 = arith.constant 0.000000e+00 : f32
    %9 = vector.broadcast %cst_5 : f32 to vector<256x256xf32>
    %10 = arith.maximumf %8, %9 : vector<256x256xf32>
    %11 = arith.truncf %10 : vector<256x256xf32> to vector<256x256xbf16>
    %c0_6 = arith.constant 0 : index
    %c0_7 = arith.constant 0 : index
    %12 = vector.load %arg4[%c0_6, %c0_7] : memref<2560x256xbf16, #tpu.memory_space<vmem>>, vector<256x256xbf16>
    %cst_8 = arith.constant dense<0.000000e+00> : vector<256x256xf32>
    %13 = tpu.matmul %11, %12, %cst_8 {dimension_numbers = #tpu.dot_dimension_numbers<[1], [0], [0], [1], [0, 0, 1, 1], [], []>} : vector<256x256xbf16>, vector<256x256xbf16>, vector<256x256xf32> -> vector<256x256xf32>
    %c0_9 = arith.constant 0 : index
    %c0_10 = arith.constant 0 : index
    %14 = vector.load %arg5[%c0_9, %c0_10] : memref<4x256xf32, #tpu.memory_space<vmem>>, vector<1x256xf32>
    %15 = vector.broadcast %14 : vector<1x256xf32> to vector<256x256xf32>
    %16 = arith.addf %13, %15 : vector<256x256xf32>
    %cst_11 = arith.constant 0.000000e+00 : f32
    %17 = vector.broadcast %cst_11 : f32 to vector<256x256xf32>
    %18 = arith.maximumf %16, %17 : vector<256x256xf32>
    %c30_i32 = arith.constant 30 : i32
    %19 = vector.broadcast %c30_i32 : i32 to vector<256x1xi32>
    %20 = arith.cmpi slt, %3, %19 : vector<256x1xi32>
    %cst_12 = arith.constant 0.000000e+00 : f32
    %21 = vector.shape_cast %20 : vector<256x1xi1> to vector<256x1xi1>
    %22 = vector.broadcast %21 : vector<256x1xi1> to vector<256x256xi1>
    %23 = vector.broadcast %cst_12 : f32 to vector<256x256xf32>
    %24 = arith.select %22, %18, %23 : vector<256x256xi1>, vector<256x256xf32>
    %25 = vector.shape_cast %24 : vector<256x256xf32> to vector<8x32x256xf32>
    %cst_13 = arith.constant dense<0xFF800000> : vector<8x256xf32>
    %26 = vector.multi_reduction <maximumf>, %25, %cst_13 [1] : vector<8x32x256xf32> to vector<8x256xf32>
    %27 = vector.extract_strided_slice %0 {offsets = [1, 0], sizes = [255, 32], strides = [1, 1]} : vector<256x32xbf16> to vector<255x32xbf16>
    %28 = vector.extract_strided_slice %0 {offsets = [0, 0], sizes = [1, 32], strides = [1, 1]} : vector<256x32xbf16> to vector<1x32xbf16>
    %29 = tpu.concatenate %27, %28 in 0 : vector<255x32xbf16>, vector<1x32xbf16> -> vector<256x32xbf16>
    %30 = tpu.concatenate %0, %29 in 1 : vector<256x32xbf16>, vector<256x32xbf16> -> vector<256x64xbf16>
    %c32 = arith.constant 32 : index
    %c0_14 = arith.constant 0 : index
    %31 = vector.load %arg2[%c32, %c0_14] : memref<320x256xbf16, #tpu.memory_space<vmem>>, vector<64x256xbf16>
    %cst_15 = arith.constant dense<0.000000e+00> : vector<256x256xf32>
    %32 = tpu.matmul %30, %31, %cst_15 {dimension_numbers = #tpu.dot_dimension_numbers<[1], [0], [0], [1], [0, 0, 1, 1], [], []>} : vector<256x64xbf16>, vector<64x256xbf16>, vector<256x256xf32> -> vector<256x256xf32>
    %c1 = arith.constant 1 : index
    %c0_16 = arith.constant 0 : index
    %33 = vector.load %arg3[%c1, %c0_16] : memref<4x256xf32, #tpu.memory_space<vmem>>, vector<1x256xf32>
    %34 = vector.broadcast %33 : vector<1x256xf32> to vector<256x256xf32>
    %35 = arith.addf %32, %34 : vector<256x256xf32>
    %cst_17 = arith.constant 0.000000e+00 : f32
    %36 = vector.broadcast %cst_17 : f32 to vector<256x256xf32>
    %37 = arith.maximumf %35, %36 : vector<256x256xf32>
    %38 = arith.truncf %37 : vector<256x256xf32> to vector<256x256xbf16>
    %39 = vector.extract_strided_slice %38 {offsets = [1, 0], sizes = [255, 256], strides = [1, 1]} : vector<256x256xbf16> to vector<255x256xbf16>
    %40 = vector.extract_strided_slice %38 {offsets = [0, 0], sizes = [1, 256], strides = [1, 1]} : vector<256x256xbf16> to vector<1x256xbf16>
    %41 = tpu.concatenate %39, %40 in 0 : vector<255x256xbf16>, vector<1x256xbf16> -> vector<256x256xbf16>
    %42 = tpu.concatenate %38, %41 in 1 : vector<256x256xbf16>, vector<256x256xbf16> -> vector<256x512xbf16>
    %c256 = arith.constant 256 : index
    %c0_18 = arith.constant 0 : index
    %43 = vector.load %arg4[%c256, %c0_18] : memref<2560x256xbf16, #tpu.memory_space<vmem>>, vector<512x256xbf16>
    %cst_19 = arith.constant dense<0.000000e+00> : vector<256x256xf32>
    %44 = tpu.matmul %42, %43, %cst_19 {dimension_numbers = #tpu.dot_dimension_numbers<[1], [0], [0], [1], [0, 0, 1, 1], [], []>} : vector<256x512xbf16>, vector<512x256xbf16>, vector<256x256xf32> -> vector<256x256xf32>
    %c1_20 = arith.constant 1 : index
    %c0_21 = arith.constant 0 : index
    %45 = vector.load %arg5[%c1_20, %c0_21] : memref<4x256xf32, #tpu.memory_space<vmem>>, vector<1x256xf32>
    %46 = vector.broadcast %45 : vector<1x256xf32> to vector<256x256xf32>
    %47 = arith.addf %44, %46 : vector<256x256xf32>
    %cst_22 = arith.constant 0.000000e+00 : f32
    %48 = vector.broadcast %cst_22 : f32 to vector<256x256xf32>
    %49 = arith.maximumf %47, %48 : vector<256x256xf32>
    %c28_i32 = arith.constant 28 : i32
    %50 = vector.broadcast %c28_i32 : i32 to vector<256x1xi32>
    %51 = arith.cmpi slt, %3, %50 : vector<256x1xi32>
    %cst_23 = arith.constant 0.000000e+00 : f32
    %52 = vector.shape_cast %51 : vector<256x1xi1> to vector<256x1xi1>
    %53 = vector.broadcast %52 : vector<256x1xi1> to vector<256x256xi1>
    %54 = vector.broadcast %cst_23 : f32 to vector<256x256xf32>
    %55 = arith.select %53, %49, %54 : vector<256x256xi1>, vector<256x256xf32>
    %56 = vector.shape_cast %55 : vector<256x256xf32> to vector<8x32x256xf32>
    %cst_24 = arith.constant dense<0xFF800000> : vector<8x256xf32>
    %57 = vector.multi_reduction <maximumf>, %56, %cst_24 [1] : vector<8x32x256xf32> to vector<8x256xf32>
    %58 = vector.extract_strided_slice %0 {offsets = [1, 0], sizes = [255, 32], strides = [1, 1]} : vector<256x32xbf16> to vector<255x32xbf16>
    %59 = vector.extract_strided_slice %0 {offsets = [0, 0], sizes = [1, 32], strides = [1, 1]} : vector<256x32xbf16> to vector<1x32xbf16>
    %60 = tpu.concatenate %58, %59 in 0 : vector<255x32xbf16>, vector<1x32xbf16> -> vector<256x32xbf16>
    %61 = vector.extract_strided_slice %0 {offsets = [2, 0], sizes = [254, 32], strides = [1, 1]} : vector<256x32xbf16> to vector<254x32xbf16>
    %62 = vector.extract_strided_slice %0 {offsets = [0, 0], sizes = [2, 32], strides = [1, 1]} : vector<256x32xbf16> to vector<2x32xbf16>
    %63 = tpu.concatenate %61, %62 in 0 : vector<254x32xbf16>, vector<2x32xbf16> -> vector<256x32xbf16>
    %64 = tpu.concatenate %0, %60, %63 in 1 : vector<256x32xbf16>, vector<256x32xbf16>, vector<256x32xbf16> -> vector<256x96xbf16>
    %c96 = arith.constant 96 : index
    %c0_25 = arith.constant 0 : index
    %65 = vector.load %arg2[%c96, %c0_25] : memref<320x256xbf16, #tpu.memory_space<vmem>>, vector<96x256xbf16>
    %cst_26 = arith.constant dense<0.000000e+00> : vector<256x256xf32>
    %66 = tpu.matmul %64, %65, %cst_26 {dimension_numbers = #tpu.dot_dimension_numbers<[1], [0], [0], [1], [0, 0, 1, 1], [], []>} : vector<256x96xbf16>, vector<96x256xbf16>, vector<256x256xf32> -> vector<256x256xf32>
    %c2 = arith.constant 2 : index
    %c0_27 = arith.constant 0 : index
    %67 = vector.load %arg3[%c2, %c0_27] : memref<4x256xf32, #tpu.memory_space<vmem>>, vector<1x256xf32>
    %68 = vector.broadcast %67 : vector<1x256xf32> to vector<256x256xf32>
    %69 = arith.addf %66, %68 : vector<256x256xf32>
    %cst_28 = arith.constant 0.000000e+00 : f32
    %70 = vector.broadcast %cst_28 : f32 to vector<256x256xf32>
    %71 = arith.maximumf %69, %70 : vector<256x256xf32>
    %72 = arith.truncf %71 : vector<256x256xf32> to vector<256x256xbf16>
    %73 = vector.extract_strided_slice %72 {offsets = [1, 0], sizes = [255, 256], strides = [1, 1]} : vector<256x256xbf16> to vector<255x256xbf16>
    %74 = vector.extract_strided_slice %72 {offsets = [0, 0], sizes = [1, 256], strides = [1, 1]} : vector<256x256xbf16> to vector<1x256xbf16>
    %75 = tpu.concatenate %73, %74 in 0 : vector<255x256xbf16>, vector<1x256xbf16> -> vector<256x256xbf16>
    %76 = vector.extract_strided_slice %72 {offsets = [2, 0], sizes = [254, 256], strides = [1, 1]} : vector<256x256xbf16> to vector<254x256xbf16>
    %77 = vector.extract_strided_slice %72 {offsets = [0, 0], sizes = [2, 256], strides = [1, 1]} : vector<256x256xbf16> to vector<2x256xbf16>
    %78 = tpu.concatenate %76, %77 in 0 : vector<254x256xbf16>, vector<2x256xbf16> -> vector<256x256xbf16>
    %79 = tpu.concatenate %72, %75, %78 in 1 : vector<256x256xbf16>, vector<256x256xbf16>, vector<256x256xbf16> -> vector<256x768xbf16>
    %c768 = arith.constant 768 : index
    %c0_29 = arith.constant 0 : index
    %80 = vector.load %arg4[%c768, %c0_29] : memref<2560x256xbf16, #tpu.memory_space<vmem>>, vector<768x256xbf16>
    %cst_30 = arith.constant dense<0.000000e+00> : vector<256x256xf32>
    %81 = tpu.matmul %79, %80, %cst_30 {dimension_numbers = #tpu.dot_dimension_numbers<[1], [0], [0], [1], [0, 0, 1, 1], [], []>} : vector<256x768xbf16>, vector<768x256xbf16>, vector<256x256xf32> -> vector<256x256xf32>
    %c2_31 = arith.constant 2 : index
    %c0_32 = arith.constant 0 : index
    %82 = vector.load %arg5[%c2_31, %c0_32] : memref<4x256xf32, #tpu.memory_space<vmem>>, vector<1x256xf32>
    %83 = vector.broadcast %82 : vector<1x256xf32> to vector<256x256xf32>
    %84 = arith.addf %81, %83 : vector<256x256xf32>
    %cst_33 = arith.constant 0.000000e+00 : f32
    %85 = vector.broadcast %cst_33 : f32 to vector<256x256xf32>
    %86 = arith.maximumf %84, %85 : vector<256x256xf32>
    %c26_i32 = arith.constant 26 : i32
    %87 = vector.broadcast %c26_i32 : i32 to vector<256x1xi32>
    %88 = arith.cmpi slt, %3, %87 : vector<256x1xi32>
    %cst_34 = arith.constant 0.000000e+00 : f32
    %89 = vector.shape_cast %88 : vector<256x1xi1> to vector<256x1xi1>
    %90 = vector.broadcast %89 : vector<256x1xi1> to vector<256x256xi1>
    %91 = vector.broadcast %cst_34 : f32 to vector<256x256xf32>
    %92 = arith.select %90, %86, %91 : vector<256x256xi1>, vector<256x256xf32>
    %93 = vector.shape_cast %92 : vector<256x256xf32> to vector<8x32x256xf32>
    %cst_35 = arith.constant dense<0xFF800000> : vector<8x256xf32>
    %94 = vector.multi_reduction <maximumf>, %93, %cst_35 [1] : vector<8x32x256xf32> to vector<8x256xf32>
    %95 = vector.extract_strided_slice %0 {offsets = [1, 0], sizes = [255, 32], strides = [1, 1]} : vector<256x32xbf16> to vector<255x32xbf16>
    %96 = vector.extract_strided_slice %0 {offsets = [0, 0], sizes = [1, 32], strides = [1, 1]} : vector<256x32xbf16> to vector<1x32xbf16>
    %97 = tpu.concatenate %95, %96 in 0 : vector<255x32xbf16>, vector<1x32xbf16> -> vector<256x32xbf16>
    %98 = vector.extract_strided_slice %0 {offsets = [2, 0], sizes = [254, 32], strides = [1, 1]} : vector<256x32xbf16> to vector<254x32xbf16>
    %99 = vector.extract_strided_slice %0 {offsets = [0, 0], sizes = [2, 32], strides = [1, 1]} : vector<256x32xbf16> to vector<2x32xbf16>
    %100 = tpu.concatenate %98, %99 in 0 : vector<254x32xbf16>, vector<2x32xbf16> -> vector<256x32xbf16>
    %101 = vector.extract_strided_slice %0 {offsets = [3, 0], sizes = [253, 32], strides = [1, 1]} : vector<256x32xbf16> to vector<253x32xbf16>
    %102 = vector.extract_strided_slice %0 {offsets = [0, 0], sizes = [3, 32], strides = [1, 1]} : vector<256x32xbf16> to vector<3x32xbf16>
    %103 = tpu.concatenate %101, %102 in 0 : vector<253x32xbf16>, vector<3x32xbf16> -> vector<256x32xbf16>
    %104 = tpu.concatenate %0, %97, %100, %103 in 1 : vector<256x32xbf16>, vector<256x32xbf16>, vector<256x32xbf16>, vector<256x32xbf16> -> vector<256x128xbf16>
    %c192 = arith.constant 192 : index
    %c0_36 = arith.constant 0 : index
    %105 = vector.load %arg2[%c192, %c0_36] : memref<320x256xbf16, #tpu.memory_space<vmem>>, vector<128x256xbf16>
    %cst_37 = arith.constant dense<0.000000e+00> : vector<256x256xf32>
    %106 = tpu.matmul %104, %105, %cst_37 {dimension_numbers = #tpu.dot_dimension_numbers<[1], [0], [0], [1], [0, 0, 1, 1], [], []>} : vector<256x128xbf16>, vector<128x256xbf16>, vector<256x256xf32> -> vector<256x256xf32>
    %c3 = arith.constant 3 : index
    %c0_38 = arith.constant 0 : index
    %107 = vector.load %arg3[%c3, %c0_38] : memref<4x256xf32, #tpu.memory_space<vmem>>, vector<1x256xf32>
    %108 = vector.broadcast %107 : vector<1x256xf32> to vector<256x256xf32>
    %109 = arith.addf %106, %108 : vector<256x256xf32>
    %cst_39 = arith.constant 0.000000e+00 : f32
    %110 = vector.broadcast %cst_39 : f32 to vector<256x256xf32>
    %111 = arith.maximumf %109, %110 : vector<256x256xf32>
    %112 = arith.truncf %111 : vector<256x256xf32> to vector<256x256xbf16>
    %113 = vector.extract_strided_slice %112 {offsets = [1, 0], sizes = [255, 256], strides = [1, 1]} : vector<256x256xbf16> to vector<255x256xbf16>
    %114 = vector.extract_strided_slice %112 {offsets = [0, 0], sizes = [1, 256], strides = [1, 1]} : vector<256x256xbf16> to vector<1x256xbf16>
    %115 = tpu.concatenate %113, %114 in 0 : vector<255x256xbf16>, vector<1x256xbf16> -> vector<256x256xbf16>
    %116 = vector.extract_strided_slice %112 {offsets = [2, 0], sizes = [254, 256], strides = [1, 1]} : vector<256x256xbf16> to vector<254x256xbf16>
    %117 = vector.extract_strided_slice %112 {offsets = [0, 0], sizes = [2, 256], strides = [1, 1]} : vector<256x256xbf16> to vector<2x256xbf16>
    %118 = tpu.concatenate %116, %117 in 0 : vector<254x256xbf16>, vector<2x256xbf16> -> vector<256x256xbf16>
    %119 = vector.extract_strided_slice %112 {offsets = [3, 0], sizes = [253, 256], strides = [1, 1]} : vector<256x256xbf16> to vector<253x256xbf16>
    %120 = vector.extract_strided_slice %112 {offsets = [0, 0], sizes = [3, 256], strides = [1, 1]} : vector<256x256xbf16> to vector<3x256xbf16>
    %121 = tpu.concatenate %119, %120 in 0 : vector<253x256xbf16>, vector<3x256xbf16> -> vector<256x256xbf16>
    %122 = tpu.concatenate %112, %115, %118, %121 in 1 : vector<256x256xbf16>, vector<256x256xbf16>, vector<256x256xbf16>, vector<256x256xbf16> -> vector<256x1024xbf16>
    %c1536 = arith.constant 1536 : index
    %c0_40 = arith.constant 0 : index
    %123 = vector.load %arg4[%c1536, %c0_40] : memref<2560x256xbf16, #tpu.memory_space<vmem>>, vector<1024x256xbf16>
    %cst_41 = arith.constant dense<0.000000e+00> : vector<256x256xf32>
    %124 = tpu.matmul %122, %123, %cst_41 {dimension_numbers = #tpu.dot_dimension_numbers<[1], [0], [0], [1], [0, 0, 1, 1], [], []>} : vector<256x1024xbf16>, vector<1024x256xbf16>, vector<256x256xf32> -> vector<256x256xf32>
    %c3_42 = arith.constant 3 : index
    %c0_43 = arith.constant 0 : index
    %125 = vector.load %arg5[%c3_42, %c0_43] : memref<4x256xf32, #tpu.memory_space<vmem>>, vector<1x256xf32>
    %126 = vector.broadcast %125 : vector<1x256xf32> to vector<256x256xf32>
    %127 = arith.addf %124, %126 : vector<256x256xf32>
    %cst_44 = arith.constant 0.000000e+00 : f32
    %128 = vector.broadcast %cst_44 : f32 to vector<256x256xf32>
    %129 = arith.maximumf %127, %128 : vector<256x256xf32>
    %c24_i32 = arith.constant 24 : i32
    %130 = vector.broadcast %c24_i32 : i32 to vector<256x1xi32>
    %131 = arith.cmpi slt, %3, %130 : vector<256x1xi32>
    %cst_45 = arith.constant 0.000000e+00 : f32
    %132 = vector.shape_cast %131 : vector<256x1xi1> to vector<256x1xi1>
    %133 = vector.broadcast %132 : vector<256x1xi1> to vector<256x256xi1>
    %134 = vector.broadcast %cst_45 : f32 to vector<256x256xf32>
    %135 = arith.select %133, %129, %134 : vector<256x256xi1>, vector<256x256xf32>
    %136 = vector.shape_cast %135 : vector<256x256xf32> to vector<8x32x256xf32>
    %cst_46 = arith.constant dense<0xFF800000> : vector<8x256xf32>
    %137 = vector.multi_reduction <maximumf>, %136, %cst_46 [1] : vector<8x32x256xf32> to vector<8x256xf32>
    %138 = tpu.concatenate %26, %57, %94, %137 in 1 : vector<8x256xf32>, vector<8x256xf32>, vector<8x256xf32>, vector<8x256xf32> -> vector<8x1024xf32>
    %139 = arith.truncf %138 : vector<8x1024xf32> to vector<8x1024xbf16>
    %c0_47 = arith.constant 0 : index
    %c0_48 = arith.constant 0 : index
    %140 = vector.load %arg6[%c0_47, %c0_48] : memref<1024x1024xbf16, #tpu.memory_space<vmem>>, vector<1024x1024xbf16>
    %cst_49 = arith.constant dense<0.000000e+00> : vector<8x1024xf32>
    %141 = tpu.matmul %139, %140, %cst_49 {dimension_numbers = #tpu.dot_dimension_numbers<[1], [0], [0], [1], [0, 0, 1, 1], [], []>} : vector<8x1024xbf16>, vector<1024x1024xbf16>, vector<8x1024xf32> -> vector<8x1024xf32>
    %c0_50 = arith.constant 0 : index
    %c0_51 = arith.constant 0 : index
    %142 = vector.load %arg7[%c0_50, %c0_51] : memref<1x1024xf32, #tpu.memory_space<vmem>>, vector<1x1024xf32>
    %143 = vector.broadcast %142 : vector<1x1024xf32> to vector<8x1024xf32>
    %144 = arith.addf %141, %143 : vector<8x1024xf32>
    %cst_52 = arith.constant 0.000000e+00 : f32
    %145 = vector.broadcast %cst_52 : f32 to vector<8x1024xf32>
    %146 = arith.maximumf %144, %145 : vector<8x1024xf32>
    %147 = arith.truncf %146 : vector<8x1024xf32> to vector<8x1024xbf16>
    %c0_53 = arith.constant 0 : index
    %c0_54 = arith.constant 0 : index
    %148 = vector.load %arg8[%c0_53, %c0_54] : memref<1024x128xbf16, #tpu.memory_space<vmem>>, vector<1024x128xbf16>
    %cst_55 = arith.constant dense<0.000000e+00> : vector<8x128xf32>
    %149 = tpu.matmul %147, %148, %cst_55 {dimension_numbers = #tpu.dot_dimension_numbers<[1], [0], [0], [1], [0, 0, 1, 1], [], []>} : vector<8x1024xbf16>, vector<1024x128xbf16>, vector<8x128xf32> -> vector<8x128xf32>
    %c0_56 = arith.constant 0 : index
    %c0_57 = arith.constant 0 : index
    %150 = vector.load %arg9[%c0_56, %c0_57] : memref<1x128xf32, #tpu.memory_space<vmem>>, vector<1x128xf32>
    %151 = vector.broadcast %150 : vector<1x128xf32> to vector<8x128xf32>
    %152 = arith.addf %149, %151 : vector<8x128xf32>
    %c0_58 = arith.constant 0 : index
    %c0_59 = arith.constant 0 : index
    %153 = vector.load %arg10[%c0_58, %c0_59] : memref<8x128xf32, #tpu.memory_space<vmem>>, vector<8x128xf32>
    tpu.vector_store %arg10[%c0_58, %c0_59], %152 {strides = array<i32>} : memref<8x128xf32, #tpu.memory_space<vmem>>, vector<8x128xf32>,
    return
  }
  func.func @transform_0(%arg0: i32) -> (i32, i32) {
    %c0_i32 = arith.constant 0 : i32
    %c0_i32_0 = arith.constant 0 : i32
    return %arg0, %c0_i32 : i32, i32
  }
  func.func @transform_1(%arg0: i32) -> (i32, i32) {
    %c0_i32 = arith.constant 0 : i32
    %c0_i32_0 = arith.constant 0 : i32
    %c0_i32_1 = arith.constant 0 : i32
    return %c0_i32, %c0_i32_0 : i32, i32
  }
  func.func @transform_2(%arg0: i32) -> (i32, i32) {
    %c0_i32 = arith.constant 0 : i32
    %c0_i32_0 = arith.constant 0 : i32
    %c0_i32_1 = arith.constant 0 : i32
    return %c0_i32, %c0_i32_0 : i32, i32
  }
  func.func @transform_3(%arg0: i32) -> (i32, i32) {
    %c0_i32 = arith.constant 0 : i32
    %c0_i32_0 = arith.constant 0 : i32
    %c0_i32_1 = arith.constant 0 : i32
    return %c0_i32, %c0_i32_0 : i32, i32
  }
  func.func @transform_4(%arg0: i32) -> (i32, i32) {
    %c0_i32 = arith.constant 0 : i32
    %c0_i32_0 = arith.constant 0 : i32
    %c0_i32_1 = arith.constant 0 : i32
    return %c0_i32, %c0_i32_0 : i32, i32
  }
  func.func @transform_5(%arg0: i32) -> (i32, i32) {
    %c0_i32 = arith.constant 0 : i32
    %c0_i32_0 = arith.constant 0 : i32
    %c0_i32_1 = arith.constant 0 : i32
    return %c0_i32, %c0_i32_0 : i32, i32
  }
  func.func @transform_6(%arg0: i32) -> (i32, i32) {
    %c0_i32 = arith.constant 0 : i32
    %c0_i32_0 = arith.constant 0 : i32
    %c0_i32_1 = arith.constant 0 : i32
    return %c0_i32, %c0_i32_0 : i32, i32
  }
  func.func @transform_7(%arg0: i32) -> (i32, i32) {
    %c0_i32 = arith.constant 0 : i32
    %c0_i32_0 = arith.constant 0 : i32
    %c0_i32_1 = arith.constant 0 : i32
    return %c0_i32, %c0_i32_0 : i32, i32
  }
  func.func @transform_8(%arg0: i32) -> (i32, i32) {
    %c0_i32 = arith.constant 0 : i32
    %c0_i32_0 = arith.constant 0 : i32
    %c0_i32_1 = arith.constant 0 : i32
    return %c0_i32, %c0_i32_0 : i32, i32
  }
  func.func @transform_9(%arg0: i32) -> (i32, i32) {
    %c0_i32 = arith.constant 0 : i32
    %c0_i32_0 = arith.constant 0 : i32
    return %arg0, %c0_i32 : i32, i32
  }
}

</mosaic_0001>

<bundles_post_ra>
// kernel: forward.1
= control target key start
LH: loop header
LB: loop body
LE: loop exit
PB: predicated region body
PF: predicated region fallthrough
CT: control target
= control target key end

     0   :  { %14 = vsyncpa [#allocation3], 0  ;;  %s19835_s0 = inlined_call_operand.vmem [shape: bf16[256,32], index: 0, kind: input, shape index: {}]   ;;  %s19836_s1 = inlined_call_operand.hbm [shape: bf16[320,256], index: 1, kind: input, shape index: {}]   ;;  %s19837_s2 = inlined_call_operand.hbm [shape: f32[4,256], index: 2, kind: input, shape index: {}]   ;;  %s19838_s3 = inlined_call_operand.hbm [shape: bf16[2560,256], index: 3, kind: input, shape index: {}]   ;;  %s19839_s4 = inlined_call_operand.hbm [shape: f32[4,256], index: 4, kind: input, shape index: {}]   ;;  %s19840_s5 = inlined_call_operand.hbm [shape: bf16[1024,1024], index: 5, kind: input, shape index: {}]   ;;  %s19841_s6 = inlined_call_operand.hbm [shape: f32[1,1024], index: 6, kind: input, shape index: {}]   ;;  %s19842_s7 = inlined_call_operand.hbm [shape: bf16[1024,128], index: 7, kind: input, shape index: {}]   ;;  %s19843_s8 = inlined_call_operand.hbm [shape: f32[1,128], index: 8, kind: input, shape index: {}]   ;;  %s19844_s9 = inlined_call_operand.vmem [shape: f32[8,128], index: 9, kind: output, shape index: {}]  }
   0x1   :  { %15 = vsyncpa [#allocation5], 0 }
   0x2   :  { %16 = vsyncpa [#allocation8], 0 }
   0x3   :  { %17 = vsyncpa [#allocation11], 0 }
   0x4   :  { %18 = vsyncpa [#allocation14], 0  ;;  %s16152_s30 = smov [#allocation4]   ;;  %s16153_s11 = smov [#allocation7]  }
   0x5   :  { %s39_s10 = sshll.u32 %s16152_s30, 4  ;;  %s61_s12 = sshll.u32 %s16153_s11, 4  ;;  %s40_s10 = int_to_ptr.vmem [resolvable:$true] %s39_s10  ;;  %s62_s12 = int_to_ptr.vmem [resolvable:$true] %s61_s12 }
   0x6   :  { %s15966_s15 = scalar_lea.hbm %s19837_s2, 128 }
   0x7   :  { %p15967_p0 = scmp.ne.s32.totalorder %s19837_s2, %s15966_s15  ;;  %p15970_p1 = scmp.lt.u32.totalorder %s15966_s15, %s19837_s2 }
   0x9   :  { %p15972_p2 = pnand %p15970_p1, %p15967_p0 }
   0xb   :  { %15975 = shalt.err (!%p15972_p2)
}
   0xc   :  { %s15976_s20 = scalar_lea.vmem %s40_s10, 128  ;;  %p15981_p4 = scmp.lt.s32.totalorder %s40_s10, %s40_s10 }
   0xd   :  { %p15977_p3 = scmp.ne.s32.totalorder %s40_s10, %s15976_s20  ;;  %p15982_p5 = scmp.lt.s32.totalorder %s15976_s20, %s15976_s20 }
   0xf   :  { %p15983_p6 = por %p15982_p5, %p15981_p4 }
  0x11   :  { %p15984_p7 = pnand %p15983_p6, %p15977_p3 }
  0x13   :  { %15987 = shalt.err (!%p15984_p7)
}
  0x14   :  { %42 = dma.hbm_to_vmem [thread:$0]  %s19837_s2, 128, %s40_s10, [#allocation5]  }
  0x15   :  { %s15988_s25 = scalar_lea.hbm %s19839_s4, 128 }
  0x16   :  { %p15989_p8 = scmp.ne.s32.totalorder %s19839_s4, %s15988_s25  ;;  %p15992_p9 = scmp.lt.u32.totalorder %s15988_s25, %s19839_s4 }
  0x18   :  { %p15994_p10 = pnand %p15992_p9, %p15989_p8 }
  0x1a   :  { %15997 = shalt.err (!%p15994_p10)
}
  0x1b   :  { %s15998_s30 = scalar_lea.vmem %s62_s12, 128  ;;  %p16003_p12 = scmp.lt.s32.totalorder %s62_s12, %s62_s12 }
  0x1c   :  { %p15999_p11 = scmp.ne.s32.totalorder %s62_s12, %s15998_s30  ;;  %p16004_p13 = scmp.lt.s32.totalorder %s15998_s30, %s15998_s30 }
  0x1e   :  { %p16005_p0 = por %p16004_p13, %p16003_p12 }
  0x20   :  { %p16006_p1 = pnand %p16005_p0, %p15999_p11 }
  0x22   :  { %16009 = shalt.err (!%p16006_p1)
}
  0x23   :  { %64 = dma.hbm_to_vmem [thread:$0]  %s19839_s4, 128, %s62_s12, [#allocation8]  }
  0x24   :  { %s16154_s11 = smov [#allocation10]   ;;  %s16155_s14 = smov [#allocation2]  }
  0x25   :  { %s83_s13 = sshll.u32 %s16154_s11, 4  ;;  %s26_s15 = sshll.u32 %s16155_s14, 4  ;;  %s84_s13 = int_to_ptr.vmem [resolvable:$true] %s83_s13  ;;  %s16242_s15 = int_to_ptr.vmem [resolvable:$true] %s26_s15 }
  0x26   :  { %s16010_s18 = scalar_lea.hbm %s19841_s6, 128 }
  0x27   :  { %p16011_p2 = scmp.ne.s32.totalorder %s19841_s6, %s16010_s18  ;;  %p16014_p3 = scmp.lt.u32.totalorder %s16010_s18, %s19841_s6 }
  0x29   :  { %p16016_p4 = pnand %p16014_p3, %p16011_p2 }
  0x2b   :  { %16019 = shalt.err (!%p16016_p4)
}
  0x2c   :  { %s16020_s4 = scalar_lea.vmem %s84_s13, 128  ;;  %p16025_p6 = scmp.lt.s32.totalorder %s84_s13, %s84_s13 }
  0x2d   :  { %p16021_p5 = scmp.ne.s32.totalorder %s84_s13, %s16020_s4  ;;  %p16026_p7 = scmp.lt.s32.totalorder %s16020_s4, %s16020_s4 }
  0x2f   :  { %p16027_p8 = por %p16026_p7, %p16025_p6 }
  0x31   :  { %p16028_p9 = pnand %p16027_p8, %p16021_p5 }
  0x33   :  { %16031 = shalt.err (!%p16028_p9)
}
  0x34   :  { %86 = dma.hbm_to_vmem [thread:$0]  %s19841_s6, 128, %s84_s13, [#allocation11]  }
  0x35   :  { %s16032_s26 = scalar_lea.hbm %s19836_s1, 5120 }
  0x36   :  { %p16033_p10 = scmp.ne.s32.totalorder %s19836_s1, %s16032_s26  ;;  %p16036_p11 = scmp.lt.u32.totalorder %s16032_s26, %s19836_s1 }
  0x38   :  { %p16038_p12 = pnand %p16036_p11, %p16033_p10 }
  0x3a   :  { %16041 = shalt.err (!%p16038_p12)
}
  0x3b   :  { %s16042_s2 = scalar_lea.vmem %s16242_s15, 5120  ;;  %p16047_p0 = scmp.lt.s32.totalorder %s16242_s15, %s16242_s15 }
  0x3c   :  { %p16043_p13 = scmp.ne.s32.totalorder %s16242_s15, %s16042_s2  ;;  %p16048_p1 = scmp.lt.s32.totalorder %s16042_s2, %s16042_s2 }
  0x3e   :  { %p16049_p2 = por %p16048_p1, %p16047_p0 }
  0x40   :  { %p16050_p3 = pnand %p16049_p2, %p16043_p13 }
  0x42   :  { %16053 = shalt.err (!%p16050_p3)
}
  0x43   :  { %s16156_s6 = smov 128   ;;  %s16157_s10 = smov 8  }
  0x44   :  { %32 = dma.hbm_to_vmem [thread:$0]  %s19836_s1, 5120, %s16242_s15, [#allocation3], %s16156_s6, %s16156_s6, %s16157_s10  }
  0x45   :  { %s16158_s14 = smov [#allocation6]   ;;  %s16159_s17 = smov [#allocation9]  }
  0x46   :  { %s48_s16 = sshll.u32 %s16158_s14, 4  ;;  %s70_s18 = sshll.u32 %s16159_s17, 4  ;;  %s49_s16 = int_to_ptr.vmem [resolvable:$true] %s48_s16  ;;  %s16273_s18 = int_to_ptr.vmem [resolvable:$true] %s70_s18 }
  0x47   :  { %s16054_s21 = scalar_lea.hbm %s19838_s3, 40960 }
  0x48   :  { %p16055_p4 = scmp.ne.s32.totalorder %s19838_s3, %s16054_s21  ;;  %p16058_p5 = scmp.lt.u32.totalorder %s16054_s21, %s19838_s3 }
  0x4a   :  { %p16060_p6 = pnand %p16058_p5, %p16055_p4 }
  0x4c   :  { %16063 = shalt.err (!%p16060_p6)
}
  0x4d   :  { %s16064_s1 = scalar_lea.vmem %s49_s16, 40960  ;;  %p16069_p8 = scmp.lt.s32.totalorder %s49_s16, %s49_s16 }
  0x4e   :  { %p16065_p7 = scmp.ne.s32.totalorder %s49_s16, %s16064_s1  ;;  %p16070_p9 = scmp.lt.s32.totalorder %s16064_s1, %s16064_s1 }
  0x50   :  { %p16071_p10 = por %p16070_p9, %p16069_p8 }
  0x52   :  { %p16072_p11 = pnand %p16071_p10, %p16065_p7 }
  0x54   :  { %16075 = shalt.err (!%p16072_p11)
}
  0x55   :  { %54 = dma.hbm_to_vmem [thread:$0]  %s19838_s3, 40960, %s49_s16, [#allocation5], %s16156_s6, %s16156_s6, %s16157_s10  }
  0x56   :  { %s16076_s27 = scalar_lea.hbm %s19840_s5, 65536 }
  0x57   :  { %p16077_p12 = scmp.ne.s32.totalorder %s19840_s5, %s16076_s27  ;;  %p16080_p13 = scmp.lt.u32.totalorder %s16076_s27, %s19840_s5 }
  0x59   :  { %p16082_p0 = pnand %p16080_p13, %p16077_p12 }
  0x5b   :  { %16085 = shalt.err (!%p16082_p0)
}
  0x5c   :  { %s16086_s11 = scalar_lea.vmem %s16273_s18, 65536  ;;  %p16091_p2 = scmp.lt.s32.totalorder %s16273_s18, %s16273_s18 }
  0x5d   :  { %p16087_p1 = scmp.ne.s32.totalorder %s16273_s18, %s16086_s11  ;;  %p16092_p3 = scmp.lt.s32.totalorder %s16086_s11, %s16086_s11 }
  0x5f   :  { %p16093_p4 = por %p16092_p3, %p16091_p2 }
  0x61   :  { %p16094_p5 = pnand %p16093_p4, %p16087_p1 }
  0x63   :  { %16097 = shalt.err (!%p16094_p5)
}
  0x64   :  { %s16160_s3 = smov 512   ;;  %s16161_s6 = smov 32  }
  0x65   :  { %76 = dma.hbm_to_vmem [thread:$0]  %s19840_s5, 65536, %s16273_s18, [#allocation8], %s16160_s3, %s16160_s3, %s16161_s6  }
  0x66   :  { %s16162_s14 = smov [#allocation12]   ;;  %s16098_s20 = scalar_lea.hbm %s19842_s7, 8192 }
  0x67   :  { %s92_s16 = sshll.u32 %s16162_s14, 4  ;;  %p16099_p6 = scmp.ne.s32.totalorder %s19842_s7, %s16098_s20  ;;  %s93_s16 = int_to_ptr.vmem [resolvable:$true] %s92_s16 }
  0x68   :  { %p16102_p7 = scmp.lt.u32.totalorder %s16098_s20, %s19842_s7 }
  0x6a   :  { %p16104_p8 = pnand %p16102_p7, %p16099_p6 }
  0x6c   :  { %16107 = shalt.err (!%p16104_p8)
}
  0x6d   :  { %s16108_s23 = scalar_lea.vmem %s93_s16, 8192  ;;  %p16113_p10 = scmp.lt.s32.totalorder %s93_s16, %s93_s16 }
  0x6e   :  { %p16109_p9 = scmp.ne.s32.totalorder %s93_s16, %s16108_s23  ;;  %p16114_p11 = scmp.lt.s32.totalorder %s16108_s23, %s16108_s23 }
  0x70   :  { %p16115_p12 = por %p16114_p11, %p16113_p10 }
  0x72   :  { %p16116_p13 = pnand %p16115_p12, %p16109_p9 }
  0x74   :  { %16119 = shalt.err (!%p16116_p13)
}
  0x75   :  { %s16163_s5 = smov 64   ;;  %s16164_s18 = smov 4  }
  0x76   :  { %98 = dma.hbm_to_vmem [thread:$0]  %s19842_s7, 8192, %s93_s16, [#allocation11], %s16163_s5, %s16163_s5, %s16164_s18  }
  0x77   :  { %s16165_s24 = smov [#allocation13]   ;;  %s16120_s28 = scalar_lea.hbm %s19843_s8, 16 }
  0x78   :  { %s105_s25 = sshll.u32 %s16165_s24, 4  ;;  %p16121_p0 = scmp.ne.s32.totalorder %s19843_s8, %s16120_s28  ;;  %s106_s25 = int_to_ptr.vmem [resolvable:$true] %s105_s25 }
  0x79   :  { %p16124_p1 = scmp.lt.u32.totalorder %s16120_s28, %s19843_s8 }
  0x7b   :  { %p16126_p2 = pnand %p16124_p1, %p16121_p0 }
  0x7d   :  { %16129 = shalt.err (!%p16126_p2)
}
  0x7e   :  { %s16130_s3 = scalar_lea.vmem %s106_s25, 16  ;;  %s16134_s7 = scalar_lea.vmem %s106_s25, 32 }
  0x7f   :  { %p16131_p3 = scmp.ne.s32.totalorder %s106_s25, %s16130_s3  ;;  %p16135_p4 = scmp.lt.s32.totalorder %s106_s25, %s106_s25 }
  0x80   :  { %p16136_p5 = scmp.lt.s32.totalorder %s16134_s7, %s16130_s3 }
  0x82   :  { %p16137_p6 = por %p16136_p5, %p16135_p4 }
  0x84   :  { %p16138_p7 = pnand %p16137_p6, %p16131_p3 }
  0x86   :  { %16141 = shalt.err (!%p16138_p7)
}
  0x87   :  { %108 = dma.hbm_to_vmem [thread:$0]  %s19843_s8, 16, %s106_s25, [#allocation14]  }
  0x88   :  { %16142 = dma.done.wait [#allocation3], 5120  }
  0x89   :  { %16143 = vsyncadd [#allocation3], 4294962176 }
  0x8a   :  { %16144 = dma.done.wait [#allocation5], 41088  }
  0x8b   :  { %16145 = vsyncadd [#allocation5], 4294926208 }
  0x8c   :  { %16146 = dma.done.wait [#allocation8], 65664  }
  0x8d   :  { %16147 = vsyncadd [#allocation8], 4294901632 }
  0x8e   :  { %16148 = dma.done.wait [#allocation11], 8320  }
  0x8f   :  { %16149 = vsyncadd [#allocation11], 4294958976 }
  0x90   :  { %16150 = dma.done.wait [#allocation14], 16  }
  0x91   :  { %16151 = vsyncadd [#allocation14], 4294967280  ;;  %v19849_v0 = vmov 0   ;;  %v15329_v1 = vld [vmem:[#allocation2 + $0x4] ss:$8 sps:$4 sm:$0xff]   ;;  %v16352_v9 = vld [vmem:[%s19835_s0 + $0x10] sm:$0xff]  }
  0x92   :  { %428 = vmatprep.mubr.bf16.mxu0 %v19849_v0  ;;  %508 = vmatprep.mubr.bf16.mxu1 %v19849_v0  ;;  %v15331_v2 = vld [vmem:[#allocation2] ss:$8 sps:$4 sm:$0xff]   ;;  %vm1450_vm0 = vsmask.f32 7424  ;;  %v15332_v3 = vld [vmem:[#allocation2 + $0x14] ss:$8 sps:$4 sm:$0xff]  }
  0x93   :  { %396 = vmatprep.subr.bf16.mxu0 %v15329_v1  ;;  %v15334_v4 = vld [vmem:[#allocation2 + $0x10] ss:$8 sps:$4 sm:$0xff]   ;;  %v16336_v5 = vld [vmem:[%s19835_s0] sm:$0xf]  ;;  %14693 = vmatprep.subr.bf16.mxu1 %v15329_v1  ;;  %v135_v6 = vld [vmem:[%s19835_s0 + $0x4] sm:$0xf] }
  0x94   :  { %397 = vmatpush1.bf16.msra.mxu0 %v15331_v2  ;;  %14695 = vmatpush1.bf16.msra.mxu1 %v15331_v2  ;;  %v16342_v7 = vcombine.low %v16336_v5, %v135_v6  ;;  %v16347_v8 = vld [vmem:[%s19835_s0 + $0x8] sm:$0xff]   ;;  %vm347_vm1 = vcmask 261120   ;;  %v16360_v13 = vld [vmem:[%s19835_s0 + $0x18] sm:$0xff]   ;;  %v16366_v15 = vld [vmem:[%s19835_s0 + $0x20] sm:$0xff]   ;;  %v1464_v16 = vshll.u32 %v16352_v9, 16  ;;  %v1468_v17 = vshrl.u32 %v16352_v9, 16 }
  0x95   :  { %398 = vmatprep.subr.bf16.mxu0 %v15332_v3  ;;  %14694 = vmatprep.subr.bf16.mxu1 %v15332_v3  ;;  %v1457_v12 = vshll.u32 %v16347_v8, 16  ;;  %v1461_v14 = vshrl.u32 %v16347_v8, 16  ;;  %v1471_v20 = vshll.u32 %v16360_v13, 16  ;;  %v1475_v21 = vshrl.u32 %v16360_v13, 16  ;;  %v16382_v24 = vld [vmem:[%s19835_s0 + $0x28] sm:$0xff]   ;;  %v16396_v29 = vld [vmem:[%s19835_s0 + $0x30] sm:$0xff]  }
  0x96   :  { %v1451_v10 = vshrl.u32 %v16342_v7, 16  ;;  %v1453_v11 = vshll.u32 %v16342_v7, 16  ;;  %v1466_v22 = vrot.slane %v1464_v16, 1  ;;  %v1478_v23 = vshll.u32 %v16366_v15, 16  ;;  %v16408_v34 = vld [vmem:[%s19835_s0 + $0x38] sm:$0xff]   ;;  %v16417_v38 = vld [vmem:[%s19835_s0 + $0x40] sm:$0xff]  }
  0x97   :  { %v1459_v19 = vrot.slane %v1457_v12, 1  ;;  %v1482_v25 = vshrl.u32 %v16366_v15, 16  ;;  %v1473_v27 = vrot.slane %v1471_v20, 1  ;;  %v1485_v32 = vshll.u32 %v16382_v24, 16  ;;  %v16434_v46 = vld [vmem:[%s19835_s0 + $0x48] sm:$0xff]   ;;  %v16451_v54 = vld [vmem:[%s19835_s0 + $0x50] sm:$0xff]  }
  0x98   :  { %399 = vmatpush1.bf16.msra.mxu0 %v15334_v4  ;;  %14696 = vmatpush1.bf16.msra.mxu1 %v15334_v4  ;;  %v1455_v18 = vrot.slane %v1453_v11, 1  ;;  %v1470_v30 = vor.u32 %v1468_v17, %v1466_v22  ;;  %v1480_v31 = vrot.slane %v1478_v23, 1  ;;  %v1489_v33 = vshrl.u32 %v16382_v24, 16  ;;  %v16460_v57 = vld [vmem:[%s19835_s0 + $0x58] sm:$0xff]   ;;  %v16474_v62 = vld [vmem:[%s19835_s0 + $0x60] sm:$0xff]   ;;  %v16484_v3 = vld [vmem:[%s19835_s0 + $0x68] sm:$0xff]  }
  0x99   :  { %v1463_v28 = vor.u32 %v1461_v14, %v1459_v19  ;;  %v1477_v36 = vor.u32 %v1475_v21, %v1473_v27  ;;  %v1492_v37 = vshll.u32 %v16396_v29, 16  ;;  %v1487_v41 = vrot.slane %v1485_v32, 1 }
  0x9a   :  { %v1456_v26 = vor.u32 %v1455_v18, %v1451_v10  ;;  %v1474_v39 = vsel %vm1450_vm0, %v1470_v30, %v1473_v27  ;;  %v1484_v40 = vor.u32 %v1482_v25, %v1480_v31  ;;  %v1496_v44 = vshrl.u32 %v16396_v29, 16 }
  0x9b   :  { %13623 = vmatmul.mubr.msk.bf16.vlgmr.msra.gmra.mrb[0].mxu0 %vm347_vm1, %v16342_v7  ;;  %1577 = vrot.lane.b32.xlu1 %v1474_v39, %s16161_s6  ;;  %v1467_v42 = vsel %vm1450_vm0, %v1463_v28, %v1466_v22  ;;  %v1494_v43 = vrot.slane %v1492_v37, 1  ;;  %v1499_v45 = vshll.u32 %v16408_v34, 16  ;;  %v1481_v47 = vsel %vm1450_vm0, %v1477_v36, %v1480_v31  ;;  %v16505_v28 = vld [vmem:[%s19835_s0 + $0x78] sm:$0xff]   ;;  %v15352_v39 = vld [vmem:[#allocation2 + $0x20] ss:$8 sps:$4 sm:$0xff]  }
  0x9c   :  { %438 = vmatprep.mubr.bf16.mxu0 %v19849_v0  ;;  %v1460_v35 = vsel %vm1450_vm0, %v1456_v26, %v1459_v19  ;;  %13631 = vmatmul.mubr.msk.bf16.vlgmr.msra.gmra.mrb[0].mxu1 %vm347_vm1, %v16417_v38  ;;  %v1491_v48 = vor.u32 %v1489_v33, %v1487_v41  ;;  %v1503_v49 = vshrl.u32 %v16408_v34, 16  ;;  %v1506_v50 = vshll.u32 %v16417_v38, 16  ;;  %v16495_v19 = vld [vmem:[%s19835_s0 + $0x70] sm:$0xff]  }
  0x9d   :  { %1573 = vrot.lane.b32.xlu0 %v1460_v35, %s16161_s6  ;;  %518 = vmatprep.mubr.bf16.mxu1 %v19849_v0  ;;  %v1501_v51 = vrot.slane %v1499_v45, 1  ;;  %v1510_v52 = vshrl.u32 %v16417_v38, 16  ;;  %v1513_v53 = vshll.u32 %v16434_v46, 16  ;;  %v1488_v55 = vsel %vm1450_vm0, %v1484_v40, %v1487_v41  ;;  %v15354_v40 = vld [vmem:[#allocation2 + $0x24] ss:$8 sps:$4 sm:$0xff]  }
  0x9e   :  { %v1508_v56 = vrot.slane %v1506_v50, 1  ;;  %v1498_v58 = vor.u32 %v1496_v44, %v1494_v43  ;;  %v1517_v60 = vshrl.u32 %v16434_v46, 16  ;;  %v1520_v61 = vshll.u32 %v16451_v54, 16  ;;  %1731 = vmatprep.subr.bf16.mxu0 %v15354_v40 }
  0x9f   :  { %1579 = vrot.lane.b32.xlu1 %v1481_v47, %s16161_s6  ;;  %v1515_v59 = vrot.slane %v1513_v53, 1  ;;  %v1495_v63 = vsel %vm1450_vm0, %v1491_v48, %v1494_v43  ;;  %v1505_v1 = vor.u32 %v1503_v49, %v1501_v51  ;;  %v1527_v2 = vshll.u32 %v16460_v57, 16  ;;  %1732 = vmatpush1.bf16.msra.mxu0 %v15352_v39  ;;  %v15358_v39 = vld [vmem:[#allocation2 + $0x40] ss:$8 sps:$4 sm:$0xff]  }
  0xa0   :  { %v1512_v4 = vor.u32 %v1510_v52, %v1508_v56  ;;  %v1522_v6 = vrot.slane %v1520_v61, 1  ;;  %v1524_v18 = vshrl.u32 %v16451_v54, 16  ;;  %v1502_v22 = vsel %vm1450_vm0, %v1498_v58, %v1501_v51 }
  0xa1   :  { %1575 = vrot.lane.b32.xlu0 %v1467_v42, %s16161_s6  ;;  %v1519_v26 = vor.u32 %v1517_v60, %v1515_v59  ;;  %v1534_v27 = vshll.u32 %v16474_v62, 16  ;;  %v1509_v30 = vsel %vm1450_vm0, %v1505_v1, %v1508_v56  ;;  %v1529_v31 = vrot.slane %v1527_v2, 1  ;;  %v15357_v56 = vld [vmem:[#allocation2 + $0x34] ss:$8 sps:$4 sm:$0xff]  }
  0xa2   :  { %v1531_v35 = vshrl.u32 %v16460_v57, 16  ;;  %v19845_v36 = vshll.u32 %v16484_v3, 16  ;;  %v1516_v41 = vsel %vm1450_vm0, %v1512_v4, %v1515_v59  ;;  %v1538_v42 = vshrl.u32 %v16474_v62, 16  ;;  %v15355_v4 = vld [vmem:[#allocation2 + $0x30] ss:$8 sps:$4 sm:$0xff]   ;;  %1733 = vmatprep.subr.bf16.mxu0 %v15357_v56 }
  0xa3   :  { %13624 = vmatmul.mubr.msk.bf16.gmra.mrb[4].mxu0 %vm347_vm1, %v16347_v8  ;;  %1583 = vrot.lane.b32.xlu1 %v1495_v63, %s16161_s6  ;;  %v16520_v43 = vcombine.low %v16336_v5, %v16336_v5  ;;  %vm1569_vm2 = vcmask 1047552   ;;  %v1523_v47 = vsel %vm1450_vm0, %v1519_v26, %v1522_v6  ;;  %v1526_v48 = vor.u32 %v1524_v18, %v1522_v6 }
  0xa4   :  { %448 = vmatprep.mubr.bf16.mxu0 %v19849_v0  ;;  %13632 = vmatmul.mubr.msk.bf16.gmra.mrb[4].mxu1 %vm347_vm1, %v16434_v46  ;;  %v1536_v51 = vrot.slane %v1534_v27, 1  ;;  %v1533_v5 = vor.u32 %v1531_v35, %v1529_v31  ;;  %v1543_v58 = vrot.slane %v19845_v36, 1  ;;  %v1545_v59 = vshrl.u32 %v16484_v3, 16  ;;  %vm16539_vm3 = vmand %vm1569_vm2, %vm1450_vm0 }
  0xa5   :  { %1581 = vrot.lane.b32.xlu0 %v1488_v55, %s16161_s6  ;;  %528 = vmatprep.mubr.bf16.mxu1 %v19849_v0  ;;  %v19846_v55 = vshll.u32 %v16495_v19, 16  ;;  %v19847_v63 = vshll.u32 %v16505_v28, 16  ;;  %v20006_v1 = vmov 0  ;;  %v19848_v6 = vshll.u32 %v16520_v43, 16 }
  0xa6   :  { %v20007_v1 = vsel %vm16539_vm3, 4294967295, %v20006_v1  ;;  %v1530_v26 = vsel %vm1450_vm0, %v1526_v48, %v1529_v31  ;;  %v1552_v36 = vshrl.u32 %v16495_v19, 16  ;;  %v1547_v56 = vor.u32 %v1545_v59, %v1543_v58  ;;  %v15363_v48 = vld [vmem:[#allocation2 + $0x54] ss:$8 sps:$4 sm:$0xff]   ;;  %1734 = vmatpush1.bf16.msra.mxu0 %v15355_v4 }
  0xa7   :  { %1587 = vrot.lane.b32.xlu1 %v1509_v30, %s16161_s6  ;;  %20008 = vst [vmem:[#allocation20_spill] sm:$0xff] %v20007_v1  ;;  %v1540_v30 = vor.u32 %v1538_v42, %v1536_v51  ;;  %v1550_v40 = vrot.slane %v19846_v55, 1  ;;  %v1557_v31 = vrot.slane %v19847_v63, 1  ;;  %v1567_v55 = vrot.slane %v19848_v6, 1 }
  0xa8   :  { %v5929_v63 = vrot.slane %v1451_v10, 1  ;;  %v5930_v4 = vrot.slane %v1453_v11, 2  ;;  %vm3461_vm4 = vcmask 1046528   ;;  %v3462_v11 = vrot.slane %v16342_v7, 1 }
  0xa9   :  { %1585 = vrot.lane.b32.xlu0 %v1502_v22, %s16161_s6  ;;  %v15360_v22 = vld [vmem:[#allocation2 + $0x44] ss:$8 sps:$4 sm:$0xff]   ;;  %v1551_v6 = vsel %vm1450_vm0, %v1547_v56, %v1550_v40  ;;  %vm5928_vm5 = vsmask.f32 6400  ;;  %vm1698_vm7 = vcmask 523264   ;;  %vm3648_vm8 = vcmask 785408  }
  0xaa   :  { %1735 = vmatprep.subr.bf16.mxu0 %v15360_v22  ;;  %vm16739_vm6 = vmand %vm3461_vm4, %vm5928_vm5  ;;  %vm9001_vm11 = vcmask 1041409   ;;  %vm9003_vm14 = vcmask 1042434   ;;  %vm9005_vm15 = vcmask 1043459   ;;  %vm9007_vm2 = vcmask 1044484  }
  0xab   :  { %13625 = vmatmul.mubr.msk.bf16.gmra.mrb[8].mxu0 %vm347_vm1, %v16352_v9  ;;  %1591 = vrot.lane.b32.xlu1 %v1523_v47, %s16161_s6  ;;  %v1559_v47 = vshrl.u32 %v16505_v28, 16 }
  0xac   :  { %458 = vmatprep.mubr.bf16.mxu0 %v19849_v0  ;;  %13633 = vmatmul.mubr.msk.bf16.gmra.mrb[8].mxu1 %vm347_vm1, %v16451_v54 }
  0xad   :  { %1589 = vrot.lane.b32.xlu0 %v1516_v41, %s16161_s6  ;;  %v1537_v41 = vsel %vm1450_vm0, %v1533_v5, %v1536_v51  ;;  %538 = vmatprep.mubr.bf16.mxu1 %v19849_v0  ;;  %v1544_v51 = vsel %vm1450_vm0, %v1540_v30, %v1543_v58  ;;  %v1554_v5 = vor.u32 %v1552_v36, %v1550_v40  ;;  %v5932_v58 = vrot.slane %v1461_v14, 1 }
  0xae   :  { %v1561_v22 = vor.u32 %v1559_v47, %v1557_v31  ;;  %v5933_v30 = vrot.slane %v1457_v12, 2  ;;  %1736 = vmatpush1.bf16.msra.mxu0 %v15358_v39  ;;  %v3463_v40 = vrot.slane %v16347_v8, 1  ;;  %v5936_v39 = vrot.slane %v1468_v17, 1  ;;  %v15364_v8 = vld [vmem:[#allocation6] ss:$8 sps:$4 sm:$0xff]  }
  0xaf   :  { %1595 = vrot.lane.b32.xlu1 %v1537_v41, %s16161_s6  ;;  %1737 = vmatprep.subr.bf16.mxu0 %v15363_v48  ;;  %v1558_v10 = vsel %vm1450_vm0, %v1554_v5, %v1557_v31  ;;  %v5931_v41 = vor.u32 %v5930_v4, %v5929_v63  ;;  %v15366_v63 = vld [vmem:[#allocation6 + $0x4] ss:$8 sps:$4 sm:$0xff]   ;;  %v3465_v17 = vrot.slane %v16352_v9, 1  ;;  %v5940_v31 = vrot.slane %v1475_v21, 1  ;;  %v15369_v5 = vld [vmem:[#allocation6 + $0x14] ss:$8 sps:$4 sm:$0xff]  }
  0xb0   :  { %v1571_v12 = vsel %vm16539_vm3, %v1561_v22, %v1567_v55  ;;  %v5934_v14 = vor.u32 %v5933_v30, %v5932_v58  ;;  %v3464_v56 = vsel %vm3461_vm4, %v3462_v11, %v3463_v40  ;;  %v5941_v48 = vrot.slane %v1471_v20, 2  ;;  %889 = vmatprep.subr.bf16.mxu1 %v15366_v63  ;;  %v15370_v58 = vld [vmem:[#allocation6 + $0x20] ss:$8 sps:$4 sm:$0xff]  }
  0xb1   :  { %1593 = vrot.lane.b32.xlu0 %v1530_v26, %s16161_s6  ;;  %v15361_v26 = vld [vmem:[#allocation2 + $0x50] ss:$8 sps:$4 sm:$0xff]   ;;  %890 = vmatpush1.bf16.msra.mxu1 %v15364_v8  ;;  %v3466_v9 = vsel %vm3461_vm4, %v3463_v40, %v3465_v17  ;;  %v3467_v4 = vrot.slane %v16360_v13, 1  ;;  %v5944_v20 = vrot.slane %v1482_v25, 1  ;;  %v5945_v22 = vrot.slane %v1478_v23, 2 }
  0xb2   :  { %1738 = vmatpush1.bf16.msra.mxu0 %v15361_v26  ;;  %v5935_v55 = vsel %vm5928_vm5, %v5931_v41, %v5934_v14  ;;  %v5942_v26 = vor.u32 %v5941_v48, %v5940_v31  ;;  %891 = vmatprep.subr.bf16.mxu1 %v15369_v5  ;;  %v3469_v30 = vrot.slane %v16366_v15, 1  ;;  %v15372_v25 = vld [vmem:[#allocation6 + $0x24] ss:$8 sps:$4 sm:$0xff]   ;;  %v5948_v11 = vrot.slane %v1489_v33, 1  ;;  %v15373_v41 = vld [vmem:[#allocation6 + $0x30] ss:$8 sps:$4 sm:$0xff]  }
  0xb3   :  { %13626 = vmatmul.mubr.msk.bf16.gmra.mrb[12].mxu0 %vm347_vm1, %v16360_v13  ;;  %1599 = vrot.lane.b32.xlu1 %v1551_v6, %s16161_s6  ;;  %v5937_v6 = vrot.slane %v1464_v16, 2  ;;  %v3468_v13 = vsel %vm3461_vm4, %v3465_v17, %v3467_v4  ;;  %v5946_v23 = vor.u32 %v5945_v22, %v5944_v20  ;;  %v5949_v40 = vrot.slane %v1485_v32, 2  ;;  %v15376_v8 = vld [vmem:[#allocation6 + $0x40] ss:$8 sps:$4 sm:$0xff]   ;;  %v15379_v31 = vld [vmem:[#allocation6 + $0x50] ss:$8 sps:$4 sm:$0xff]  }
  0xb4   :  { %468 = vmatprep.mubr.bf16.mxu0 %v19849_v0  ;;  %13634 = vmatmul.mubr.msk.bf16.gmra.mrb[12].mxu1 %vm347_vm1, %v16460_v57  ;;  %v5952_v32 = vrot.slane %v1496_v44, 1  ;;  %v3473_v44 = vrot.slane %v16396_v29, 1  ;;  %v3475_v48 = vrot.slane %v16408_v34, 1  ;;  %v5961_v5 = vrot.slane %v1506_v50, 2 }
  0xb5   :  { %1597 = vrot.lane.b32.xlu0 %v1544_v51, %s16161_s6  ;;  %548 = vmatprep.mubr.bf16.mxu1 %v19849_v0  ;;  %v5938_v16 = vor.u32 %v5937_v6, %v5936_v39  ;;  %v15367_v51 = vld [vmem:[#allocation6 + $0x10] ss:$8 sps:$4 sm:$0xff]   ;;  %v5947_v33 = vsel %vm5928_vm5, %v5942_v26, %v5946_v23  ;;  %v5950_v39 = vor.u32 %v5949_v40, %v5948_v11  ;;  %v5953_v6 = vrot.slane %v1492_v37, 2  ;;  %v15393_v40 = vld [vmem:[#allocation6 + $0x94] ss:$8 sps:$4 sm:$0xff]  }
  0xb6   :  { %892 = vmatpush1.bf16.msra.mxu1 %v15367_v51  ;;  %v5964_v22 = vrot.slane %v1517_v60, 1  ;;  %v3481_v11 = vrot.slane %v16451_v54, 1  ;;  %v3483_v54 = vrot.slane %v16460_v57, 1  ;;  %v3485_v57 = vrot.slane %v16474_v62, 1 }
  0xb7   :  { %1603 = vrot.lane.b32.xlu1 %v1571_v12, %s16161_s6  ;;  %v5939_v21 = vsel %vm5928_vm5, %v5934_v14, %v5938_v16  ;;  %893 = vmatprep.subr.bf16.mxu1 %v15372_v25  ;;  %v15375_v12 = vld [vmem:[#allocation6 + $0x34] ss:$8 sps:$4 sm:$0xff]   ;;  %v3471_v14 = vrot.slane %v16382_v24, 1  ;;  %v5951_v37 = vsel %vm5928_vm5, %v5946_v23, %v5950_v39  ;;  %v5954_v17 = vor.u32 %v5953_v6, %v5952_v32  ;;  %v15390_v23 = vld [vmem:[#allocation6 + $0x84] ss:$8 sps:$4 sm:$0xff]  }
  0xb8   :  { %v5969_v25 = vrot.slane %v1520_v61, 2  ;;  %v5973_v61 = vrot.slane %v1527_v2, 2  ;;  %v5977_v2 = vrot.slane %v1534_v27, 2  ;;  %v15394_v32 = vld [vmem:[#allocation6 + $0xa0] ss:$8 sps:$4 sm:$0xff]   ;;  %v20009_v27 = vshll.u32 %v16484_v3, 16 }
  0xb9   :  { %1601 = vrot.lane.b32.xlu0 %v1558_v10, %s16161_s6  ;;  %s16167_s6 = smov 96   ;;  %v5943_v10 = vsel %vm5928_vm5, %v5938_v16, %v5942_v26  ;;  %v3472_v63 = vsel %vm3461_vm4, %v3469_v30, %v3471_v14  ;;  %v5957_v16 = vrot.slane %v1499_v45, 2  ;;  %v5955_v51 = vsel %vm5928_vm5, %v5950_v39, %v5954_v17  ;;  %v15387_v26 = vld [vmem:[#allocation6 + $0x74] ss:$8 sps:$4 sm:$0xff]   ;;  %v15396_v6 = vld [vmem:[#allocation6 + $0xa4] ss:$8 sps:$4 sm:$0xff]  }
  0xba   :  { %894 = vmatpush1.bf16.msra.mxu1 %v15370_v58  ;;  %v5960_v45 = vrot.slane %v1510_v52, 1  ;;  %v3477_v52 = vrot.slane %v16417_v38, 1  ;;  %v5965_v58 = vrot.slane %v1513_v53, 2  ;;  %v3479_v38 = vrot.slane %v16434_v46, 1 }
  0xbb   :  { %13627 = vmatmul.mubr.msk.bf16.gmra.mrb[16].mxu0 %vm347_vm1, %v16366_v15  ;;  %6002 = vrot.lane.b32.xlu1 %v5935_v55, %s16167_s6  ;;  %v3470_v15 = vsel %vm3461_vm4, %v3467_v4, %v3469_v30  ;;  %v5956_v55 = vrot.slane %v1503_v49, 1  ;;  %v15384_v4 = vld [vmem:[#allocation6 + $0x64] ss:$8 sps:$4 sm:$0xff]   ;;  %v5968_v53 = vrot.slane %v1524_v18, 1  ;;  %v5972_v18 = vrot.slane %v1531_v35, 1 }
  0xbc   :  { %478 = vmatprep.mubr.bf16.mxu0 %v19849_v0  ;;  %13635 = vmatmul.mubr.msk.bf16.gmra.mrb[16].mxu1 %vm347_vm1, %v16474_v62  ;;  %v5962_v20 = vor.u32 %v5961_v5, %v5960_v45  ;;  %v5966_v30 = vor.u32 %v5965_v58, %v5964_v22  ;;  %v3480_v46 = vsel %vm3461_vm4, %v3477_v52, %v3479_v38  ;;  %v5976_v35 = vrot.slane %v1538_v42, 1  ;;  %v15405_v5 = vld [vmem:[#allocation6 + $0xd4] ss:$8 sps:$4 sm:$0xff]  }
  0xbd   :  { %3499 = vrot.lane.b32.xlu0 %v3464_v56, %s16163_s5  ;;  %558 = vmatprep.mubr.bf16.mxu1 %v19849_v0  ;;  %v15381_v56 = vld [vmem:[#allocation6 + $0x54] ss:$8 sps:$4 sm:$0xff]   ;;  %v5958_v49 = vor.u32 %v5957_v16, %v5956_v55  ;;  %v5974_v39 = vor.u32 %v5973_v61, %v5972_v18  ;;  %v5980_v42 = vrot.slane %v1545_v59, 1  ;;  %v3487_v62 = vrot.slane %v16484_v3, 1 }
  0xbe   :  { %895 = vmatprep.subr.bf16.mxu1 %v15375_v12  ;;  %v5970_v12 = vor.u32 %v5969_v25, %v5968_v53  ;;  %v5984_v59 = vrot.slane %v1552_v36, 1  ;;  %v5988_v45 = vrot.slane %v1559_v47, 1  ;;  %v3491_v47 = vrot.slane %v16505_v28, 1  ;;  %v15406_v53 = vld [vmem:[#allocation6 + $0xe0] ss:$8 sps:$4 sm:$0xff]  }
  0xbf   :  { %6004 = vrot.lane.b32.xlu1 %v5939_v21, %s16167_s6  ;;  %896 = vmatpush1.bf16.msra.mxu1 %v15373_v41  ;;  %v3476_v21 = vsel %vm3461_vm4, %v3473_v44, %v3475_v48  ;;  %v5959_v50 = vsel %vm5928_vm5, %v5954_v17, %v5958_v49  ;;  %v5963_v60 = vsel %vm5928_vm5, %v5958_v49, %v5962_v20 }
  0xc0   :  { %v5967_v41 = vsel %vm5928_vm5, %v5962_v20, %v5966_v30  ;;  %v3486_v17 = vsel %vm3461_vm4, %v3483_v54, %v3485_v57  ;;  %v3488_v49 = vsel %vm3461_vm4, %v3485_v57, %v3487_v62  ;;  %v15438_v57 = vld [vmem:[#allocation2 + $0xb4] ss:$8 sps:$4 sm:$0xff]  }
  0xc1   :  { %3501 = vrot.lane.b32.xlu0 %v3466_v9, %s16163_s5  ;;  %v15382_v9 = vld [vmem:[#allocation6 + $0x60] ss:$8 sps:$4 sm:$0xff]  }
  0xc3   :  { %13628 = vmatmul.mubr.msk.bf16.gmra.mrb[20].mxu0 %vm347_vm1, %v16382_v24  ;;  %6006 = vrot.lane.b32.xlu1 %v5943_v10, %s16167_s6  ;;  %v15378_v24 = vld [vmem:[#allocation6 + $0x44] ss:$8 sps:$4 sm:$0xff]   ;;  %v15388_v10 = vld [vmem:[#allocation6 + $0x80] ss:$8 sps:$4 sm:$0xff]  }
  0xc4   :  { %488 = vmatprep.mubr.bf16.mxu0 %v19849_v0  ;;  %13636 = vmatmul.mubr.msk.bf16.gmra.mrb[20].mxu1 %vm347_vm1, %v16484_v3  ;;  %v3489_v3 = vrot.slane %v16495_v19, 1 }
  0xc5   :  { %3503 = vrot.lane.b32.xlu0 %v3468_v13, %s16163_s5  ;;  %568 = vmatprep.mubr.bf16.mxu1 %v19849_v0  ;;  %v15385_v13 = vld [vmem:[#allocation6 + $0x70] ss:$8 sps:$4 sm:$0xff]  }
  0xc6   :  { %897 = vmatprep.subr.bf16.mxu1 %v15378_v24  ;;  %v15399_v24 = vld [vmem:[#allocation6 + $0xb4] ss:$8 sps:$4 sm:$0xff]  }
  0xc7   :  { %6008 = vrot.lane.b32.xlu1 %v5947_v33, %s16167_s6  ;;  %898 = vmatpush1.bf16.msra.mxu1 %v15376_v8  ;;  %v5971_v33 = vsel %vm5928_vm5, %v5966_v30, %v5970_v12  ;;  %v3484_v8 = vsel %vm3461_vm4, %v3481_v11, %v3483_v54  ;;  %v3493_v30 = vrot.slane %v16520_v43, 1  ;;  %v15421_v54 = vld [vmem:[#allocation2 + $0x80] ss:$8 sps:$4 sm:$0xff]  }
  0xc8   :  { %899 = vmatprep.subr.bf16.mxu1 %v15381_v56  ;;  %v5981_v56 = vrot.slane %v20009_v27, 2  ;;  %v15952_v27 = vld [vmem:[%s19835_s0 + $0x18] sm:$0xff]  }
  0xc9   :  { %3505 = vrot.lane.b32.xlu0 %v3470_v15, %s16163_s5  ;;  %v15391_v15 = vld [vmem:[#allocation6 + $0x90] ss:$8 sps:$4 sm:$0xff]  }
  0xca   :  { %v5982_v16 = vor.u32 %v5981_v56, %v5980_v42 }
  0xcb   :  { %13629 = vmatmul.mubr.msk.bf16.gmra.mrb[24].mxu0 %vm347_vm1, %v16396_v29  ;;  %6010 = vrot.lane.b32.xlu1 %v5951_v37, %s16167_s6  ;;  %v3474_v29 = vsel %vm3461_vm4, %v3471_v14, %v3473_v44  ;;  %v3482_v14 = vsel %vm3461_vm4, %v3479_v38, %v3481_v11  ;;  %v5978_v44 = vor.u32 %v5977_v2, %v5976_v35  ;;  %v15397_v37 = vld [vmem:[#allocation6 + $0xb0] ss:$8 sps:$4 sm:$0xff]   ;;  %v15408_v38 = vld [vmem:[#allocation6 + $0xe4] ss:$8 sps:$4 sm:$0xff]  }
  0xcc   :  { %498 = vmatprep.mubr.bf16.mxu0 %v19849_v0  ;;  %13637 = vmatmul.mubr.msk.bf16.gmra.mrb[24].mxu1 %vm347_vm1, %v16495_v19  ;;  %v15950_v35 = vld [vmem:[%s19835_s0 + $0x8] sm:$0xff]  }
  0xcd   :  { %3507 = vrot.lane.b32.xlu0 %v3472_v63, %s16163_s5  ;;  %578 = vmatprep.mubr.bf16.mxu1 %v19849_v0  ;;  %v5975_v63 = vsel %vm5928_vm5, %v5970_v12, %v5974_v39  ;;  %v5979_v55 = vsel %vm5928_vm5, %v5974_v39, %v5978_v44  ;;  %v5983_v36 = vsel %vm5928_vm5, %v5978_v44, %v5982_v16  ;;  %v15420_v12 = vld [vmem:[#allocation2 + $0x74] ss:$8 sps:$4 sm:$0xff]   ;;  %v15436_v44 = vld [vmem:[#allocation2 + $0xb0] ss:$8 sps:$4 sm:$0xff]  }
  0xce   :  { %900 = vmatpush1.bf16.msra.mxu1 %v15379_v31  ;;  %v20010_v31 = vshll.u32 %v16495_v19, 16  ;;  %v3490_v19 = vsel %vm3461_vm4, %v3487_v62, %v3489_v3  ;;  %v15429_v39 = vld [vmem:[#allocation2 + $0x94] ss:$8 sps:$4 sm:$0xff]  }
  0xcf   :  { %6012 = vrot.lane.b32.xlu1 %v5955_v51, %s16167_s6  ;;  %901 = vmatprep.subr.bf16.mxu1 %v15384_v4  ;;  %v15402_v51 = vld [vmem:[#allocation6 + $0xc4] ss:$8 sps:$4 sm:$0xff]   ;;  %v20011_v4 = vshll.u32 %v16505_v28, 16 }
  0xd1   :  { %3509 = vrot.lane.b32.xlu0 %v3474_v29, %s16163_s5  ;;  %v5985_v29 = vrot.slane %v20010_v31, 2 }
  0xd2   :  { %902 = vmatpush1.bf16.msra.mxu1 %v15382_v9 }
  0xd3   :  { %13630 = vmatmul.mubr.msk.bf16.gmra.mrb[28].mxu0 %vm347_vm1, %v16408_v34  ;;  %6014 = vrot.lane.b32.xlu1 %v5959_v50, %s16167_s6  ;;  %v3478_v34 = vsel %vm3461_vm4, %v3475_v48, %v3477_v52  ;;  %v15400_v48 = vld [vmem:[#allocation6 + $0xc0] ss:$8 sps:$4 sm:$0xff]   ;;  %v5986_v9 = vor.u32 %v5985_v29, %v5984_v59  ;;  %v5993_v52 = vshrl.u32 %v16520_v43, 16  ;;  %v20012_v50 = vmov 0 }
  0xd4   :  { %1763 = vmatprep.mubr.bf16.mxu0 %v19849_v0  ;;  %13638 = vmatmul.mubr.msk.bf16.gmra.mrb[28].mxu1 %vm347_vm1, %v16505_v28  ;;  %v20013_v50 = vsel %vm16739_vm6, 4294967295, %v20012_v50  ;;  %v15955_v29 = vld [vmem:[%s19835_s0 + $0x30] sm:$0xff]  }
  0xd5   :  { %3511 = vrot.lane.b32.xlu0 %v3476_v21, %s16163_s5  ;;  %903 = vmatprep.subr.bf16.mxu1 %v15387_v26  ;;  %v5989_v21 = vrot.slane %v20011_v4, 2  ;;  %v15403_v26 = vld [vmem:[#allocation6 + $0xd0] ss:$8 sps:$4 sm:$0xff]   ;;  %20014 = vst [vmem:[#allocation21_spill] sm:$0xff] %v20013_v50  ;;  %v5987_v20 = vsel %vm5928_vm5, %v5982_v16, %v5986_v9  ;;  %v5995_v58 = vrot.slane %v5993_v52, 1  ;;  %v15954_v16 = vld [vmem:[%s19835_s0 + $0x28] sm:$0xff]  }
  0xd6   :  { %904 = vmatpush1.bf16.msra.mxu1 %v15385_v13  ;;  %v20015_v13 = vshll.u32 %v16520_v43, 16  ;;  %v15417_v43 = vld [vmem:[#allocation6 + $0x104] ss:$8 sps:$4 sm:$0xff]  }
  0xd7   :  { %6016 = vrot.lane.b32.xlu1 %v5963_v60, %s16167_s6  ;;  %905 = vmatprep.subr.bf16.mxu1 %v15390_v23  ;;  %v5990_v22 = vor.u32 %v5989_v21, %v5988_v45  ;;  %v3492_v60 = vsel %vm3461_vm4, %v3489_v3, %v3491_v47  ;;  %v15411_v23 = vld [vmem:[#allocation6 + $0xf4] ss:$8 sps:$4 sm:$0xff]   ;;  %v15958_v4 = vld [vmem:[%s19835_s0 + $0x48] sm:$0xff]  }
  0xd8   :  { %v15588_v50 = vld [vmem:[#allocation6 + $0x404] ss:$8 sps:$4 sm:$0xff]  }
  0xd9   :  { %3513 = vrot.lane.b32.xlu0 %v3478_v34, %s16163_s5  ;;  %v5996_v34 = vrot.slane %v20015_v13, 2  ;;  %v5991_v28 = vsel %vm5928_vm5, %v5986_v9, %v5990_v22 }
  0xda   :  { %906 = vmatpush1.bf16.msra.mxu1 %v15388_v10  ;;  %v15409_v10 = vld [vmem:[#allocation6 + $0xf0] ss:$8 sps:$4 sm:$0xff]  }
  0xdb   :  { %6018 = vrot.lane.b32.xlu1 %v5967_v41, %s16167_s6  ;;  %907 = vmatprep.subr.bf16.mxu1 %v15393_v40  ;;  %v5997_v25 = vor.u32 %v5996_v34, %v5995_v58  ;;  %v15414_v40 = vld [vmem:[#allocation2 + $0x64] ss:$8 sps:$4 sm:$0xff]   ;;  %v15412_v41 = vld [vmem:[#allocation2 + $0x60] ss:$8 sps:$4 sm:$0xff]   ;;  %v15960_v58 = vld [vmem:[%s19835_s0 + $0x58] sm:$0xff]  }
  0xdc   :  { %3681 = vmatprep.subr.bf16.mxu0 %v15414_v40 }
  0xdd   :  { %3515 = vrot.lane.b32.xlu0 %v3480_v46, %s16163_s5  ;;  %v3497_v46 = vsel %vm3461_vm4, %v3491_v47, %v3493_v30  ;;  %v6000_v11 = vsel %vm16739_vm6, %v5990_v22, %v5997_v25 }
  0xde   :  { %908 = vmatpush1.bf16.msra.mxu1 %v15391_v15  ;;  %v15418_v15 = vld [vmem:[#allocation2 + $0x70] ss:$8 sps:$4 sm:$0xff]  }
  0xdf   :  { %6020 = vrot.lane.b32.xlu1 %v5971_v33, %s16167_s6  ;;  %909 = vmatprep.subr.bf16.mxu1 %v15396_v6  ;;  %v15430_v6 = vld [vmem:[#allocation2 + $0xa0] ss:$8 sps:$4 sm:$0xff]  }
  0xe1   :  { %3517 = vrot.lane.b32.xlu0 %v3482_v14, %s16163_s5  ;;  %v15423_v14 = vld [vmem:[#allocation2 + $0x84] ss:$8 sps:$4 sm:$0xff]  }
  0xe2   :  { %910 = vmatpush1.bf16.msra.mxu1 %v15394_v32  ;;  %v15432_v32 = vld [vmem:[#allocation2 + $0xa4] ss:$8 sps:$4 sm:$0xff]  }
  0xe3   :  { %6022 = vrot.lane.b32.xlu1 %v5975_v63, %s16167_s6  ;;  %911 = vmatprep.subr.bf16.mxu1 %v15399_v24  ;;  %v15951_v24 = vld [vmem:[%s19835_s0 + $0x10] sm:$0xff]  }
  0xe5   :  { %3519 = vrot.lane.b32.xlu0 %v3484_v8, %s16163_s5 }
  0xe6   :  { %912 = vmatpush1.bf16.msra.mxu1 %v15397_v37 }
  0xe7   :  { %6024 = vrot.lane.b32.xlu1 %v5979_v55, %s16167_s6  ;;  %913 = vmatprep.subr.bf16.mxu1 %v15402_v51 }
  0xe9   :  { %3521 = vrot.lane.b32.xlu0 %v3486_v17, %s16163_s5  ;;  %v15953_v17 = vld [vmem:[%s19835_s0 + $0x20] sm:$0xff]  }
  0xea   :  { %914 = vmatpush1.bf16.msra.mxu1 %v15400_v48 }
  0xeb   :  { %6026 = vrot.lane.b32.xlu1 %v5983_v36, %s16167_s6  ;;  %915 = vmatprep.subr.bf16.mxu1 %v15405_v5  ;;  %v15957_v5 = vld [vmem:[%s19835_s0 + $0x40] sm:$0xff]  }
  0xed   :  { %3523 = vrot.lane.b32.xlu0 %v3488_v49, %s16163_s5  ;;  %v15956_v49 = vld [vmem:[%s19835_s0 + $0x38] sm:$0xff]  }
  0xee   :  { %916 = vmatpush1.bf16.msra.mxu1 %v15403_v26  ;;  %v166_v26 = vlaneseq }
  0xef   :  { %6028 = vrot.lane.b32.xlu1 %v5987_v20, %s16167_s6  ;;  %917 = vmatprep.subr.bf16.mxu1 %v15408_v38  ;;  %v235_v38 = vld [vmem:[#allocation4] ss:$4 sm:$0x3] }
  0xf0   :  { %v16858_v20 = vshrl.u32 %v166_v26, 7 }
  0xf1   :  { %3525 = vrot.lane.b32.xlu0 %v3490_v19, %s16163_s5  ;;  %v15959_v19 = vld [vmem:[%s19835_s0 + $0x50] sm:$0xff]  }
  0xf2   :  { %918 = vmatpush1.bf16.msra.mxu1 %v15406_v53  ;;  %20016 = vst [vmem:[#allocation22_spill] sm:$0xff] %v16858_v20  ;;  %v16868_v34 = vsub.s32 0, %v16858_v20 }
  0xf3   :  { %6030 = vrot.lane.b32.xlu1 %v5991_v28, %s16167_s6  ;;  %919 = vmatprep.subr.bf16.mxu1 %v15411_v23 }
  0xf4   :  { %20017 = vst [vmem:[#allocation23_spill] sm:$0xff] %v16868_v34  ;;  %v16877_v30 = vrot.slane %v235_v38, %v16868_v34 }
  0xf5   :  { %3527 = vrot.lane.b32.xlu0 %v3492_v60, %s16163_s5  ;;  %v16871_v60 = vsub.s32 1, %v16858_v20 }
  0xf6   :  { %920 = vmatpush1.bf16.msra.mxu1 %v15409_v10  ;;  %v15961_v10 = vld [vmem:[%s19835_s0 + $0x60] sm:$0xff]  }
  0xf7   :  { %6032 = vrot.lane.b32.xlu1 %v6000_v11, %s16167_s6  ;;  %2707 = vmatprep.subr.bf16.mxu1 %v15417_v43  ;;  %20018 = vst [vmem:[#allocation24_spill] sm:$0xff] %v16871_v60  ;;  %v16880_v53 = vrot.slane %v235_v38, %v16871_v60  ;;  %v15424_v38 = vld [vmem:[#allocation6 + $0x110] ss:$8 sps:$4 sm:$0xff]  }
  0xf9   :  { %3529 = vrot.lane.b32.xlu0 %v3497_v46, %s16163_s5 }
 0x10d   :  { %v1578_v8 = vpop.permute.xlu1 %1577 }
 0x10e   :  { %v16782_v63 = vsel %vm347_vm1, %v15951_v24, %v1578_v8 }
 0x10f   :  { %v1574_v18 = vpop.permute.xlu0 %1573 }
 0x110   :  { %v16764_v61 = vsel %vm347_vm1, %v16342_v7, %v1574_v18  ;;  %v15427_v7 = vld [vmem:[#allocation2 + $0x90] ss:$8 sps:$4 sm:$0xff]  }
 0x111   :  { %13680 = vmatmul.mubr.msk.bf16.vlgmr.msra.gmra.mrb[32].mxu0 %vm1698_vm7, %v16764_v61  ;;  %v1580_v42 = vpop.permute.xlu1 %1579 }
 0x112   :  { %1773 = vmatprep.mubr.bf16.mxu0 %v19849_v0  ;;  %3682 = vmatpush1.bf16.msra.mxu0 %v15412_v41  ;;  %v16791_v56 = vsel %vm347_vm1, %v15952_v27, %v1580_v42 }
 0x113   :  { %3683 = vmatprep.subr.bf16.mxu0 %v15420_v12  ;;  %v1576_v33 = vpop.permute.xlu0 %1575 }
 0x114   :  { %v16773_v2 = vsel %vm347_vm1, %v15950_v35, %v1576_v33 }
 0x115   :  { %v1584_v55 = vpop.permute.xlu1 %1583 }
 0x116   :  { %3684 = vmatpush1.bf16.msra.mxu0 %v15418_v15  ;;  %v16809_v59 = vsel %vm347_vm1, %v15954_v16, %v1584_v55 }
 0x117   :  { %3685 = vmatprep.subr.bf16.mxu0 %v15423_v14  ;;  %v1582_v37 = vpop.permute.xlu0 %1581 }
 0x118   :  { %v16800_v62 = vsel %vm347_vm1, %v15953_v17, %v1582_v37  ;;  %v15415_v17 = vld [vmem:[#allocation6 + $0x100] ss:$8 sps:$4 sm:$0xff]  }
 0x119   :  { %13681 = vmatmul.mubr.msk.bf16.gmra.mrb[36].mxu0 %vm1698_vm7, %v16773_v2  ;;  %v1588_v51 = vpop.permute.xlu1 %1587 }
 0x11a   :  { %1783 = vmatprep.mubr.bf16.mxu0 %v19849_v0  ;;  %3686 = vmatpush1.bf16.msra.mxu0 %v15421_v54  ;;  %v16827_v3 = vsel %vm347_vm1, %v15956_v49, %v1588_v51 }
 0x11b   :  { %3687 = vmatprep.subr.bf16.mxu0 %v15429_v39  ;;  %v1586_v31 = vpop.permute.xlu0 %1585 }
 0x11c   :  { %v16818_v48 = vsel %vm347_vm1, %v15955_v29, %v1586_v31  ;;  %v15962_v31 = vld [vmem:[%s19835_s0 + $0x68] sm:$0xff]  }
 0x11d   :  { %v1592_v9 = vpop.permute.xlu1 %1591 }
 0x11e   :  { %3688 = vmatpush1.bf16.msra.mxu0 %v15427_v7  ;;  %v16845_v21 = vsel %vm347_vm1, %v15958_v4, %v1592_v9 }
 0x11f   :  { %3689 = vmatprep.subr.bf16.mxu0 %v15432_v32  ;;  %v1590_v45 = vpop.permute.xlu0 %1589 }
 0x120   :  { %v16836_v36 = vsel %vm347_vm1, %v15957_v5, %v1590_v45  ;;  %v15426_v45 = vld [vmem:[#allocation6 + $0x114] ss:$8 sps:$4 sm:$0xff]  }
 0x121   :  { %13682 = vmatmul.mubr.msk.bf16.gmra.mrb[40].mxu0 %vm1698_vm7, %v16782_v63  ;;  %v1596_v22 = vpop.permute.xlu1 %1595 }
 0x122   :  { %1793 = vmatprep.mubr.bf16.mxu0 %v19849_v0  ;;  %3690 = vmatpush1.bf16.msra.mxu0 %v15430_v6  ;;  %v16865_v13 = vsel %vm347_vm1, %v15960_v58, %v1596_v22 }
 0x123   :  { %3691 = vmatprep.subr.bf16.mxu0 %v15438_v57  ;;  %v1594_v52 = vpop.permute.xlu0 %1593 }
 0x124   :  { %v16854_v47 = vsel %vm347_vm1, %v15959_v19, %v1594_v52 }
 0x125   :  { %v1600_v42 = vpop.permute.xlu1 %1599 }
 0x126   :  { %3692 = vmatpush1.bf16.msra.mxu0 %v15436_v44  ;;  %v16903_v29 = vsel %vm347_vm1, %v15962_v31, %v1600_v42 }
 0x127   :  { %v1598_v28 = vpop.permute.xlu0 %1597 }
 0x128   :  { %v16886_v23 = vsel %vm347_vm1, %v15961_v10, %v1598_v28 }
 0x129   :  { %13683 = vmatmul.mubr.msk.bf16.gmra.mrb[44].mxu0 %vm1698_vm7, %v16791_v56 }
 0x12a   :  { %1803 = vmatprep.mubr.bf16.mxu0 %v19849_v0 }
 0x131   :  { %13684 = vmatmul.mubr.msk.bf16.gmra.mrb[48].mxu0 %vm1698_vm7, %v16800_v62 }
 0x132   :  { %1813 = vmatprep.mubr.bf16.mxu0 %v19849_v0 }
 0x139   :  { %13685 = vmatmul.mubr.msk.bf16.gmra.mrb[52].mxu0 %vm1698_vm7, %v16809_v59 }
 0x13a   :  { %1823 = vmatprep.mubr.bf16.mxu0 %v19849_v0 }
 0x141   :  { %13686 = vmatmul.mubr.msk.bf16.gmra.mrb[56].mxu0 %vm1698_vm7, %v16818_v48 }
 0x142   :  { %1833 = vmatprep.mubr.bf16.mxu0 %v19849_v0 }
 0x149   :  { %13687 = vmatmul.mubr.msk.bf16.gmra.mrb[60].mxu0 %vm1698_vm7, %v16827_v3 }
 0x14a   :  { %1843 = vmatprep.mubr.bf16.mxu0 %v19849_v0 }
 0x151   :  { %13688 = vmatmul.mubr.msk.bf16.gmra.mrb[64].mxu0 %vm1698_vm7, %v16836_v36 }
 0x152   :  { %1853 = vmatprep.mubr.bf16.mxu0 %v19849_v0 }
 0x159   :  { %13689 = vmatmul.mubr.msk.bf16.gmra.mrb[68].mxu0 %vm1698_vm7, %v16845_v21 }
 0x15a   :  { %1863 = vmatprep.mubr.bf16.mxu0 %v19849_v0 }
 0x161   :  { %13690 = vmatmul.mubr.msk.bf16.gmra.mrb[72].mxu0 %vm1698_vm7, %v16854_v47 }
 0x162   :  { %1873 = vmatprep.mubr.bf16.mxu0 %v19849_v0 }
 0x169   :  { %13691 = vmatmul.mubr.msk.bf16.gmra.mrb[76].mxu0 %vm1698_vm7, %v16865_v13 }
 0x16a   :  { %1883 = vmatprep.mubr.bf16.mxu0 %v19849_v0 }
 0x16e   :  { %v430_v25 = vpop.f32.mrb[0].mxu0 }
 0x16f   :  { %v431_v46 = vadd.f32 %v430_v25, %v16877_v30  ;;  %v432_v11 = vpop.f32.mrb[1].mxu0  ;;  %v510_v15 = vpop.f32.mrb[0].mxu1 }
 0x170   :  { %v433_v40 = vadd.f32 %v432_v11, %v16880_v53  ;;  %v434_v43 = vpop.f32.mrb[2].mxu0  ;;  %v512_v33 = vpop.f32.mrb[1].mxu1  ;;  %v511_v39 = vadd.f32 %v510_v15, %v16877_v30  ;;  %v15435_v11 = vld [vmem:[#allocation6 + $0x124] ss:$8 sps:$4 sm:$0xff]  }
 0x171   :  { %v435_v41 = vadd.f32 %v434_v43, %v16877_v30  ;;  %v436_v12 = vpop.f32.mrb[3].mxu0  ;;  %13692 = vmatmul.mubr.msk.bf16.gmra.mrb[80].mxu0 %vm1698_vm7, %v16886_v23  ;;  %v589_v14 = vmax.f32 %v431_v46, 0.0  ;;  %v514_v32 = vpop.f32.mrb[2].mxu1  ;;  %v513_v6 = vadd.f32 %v512_v33, %v16880_v53 }
 0x172   :  { %v437_v18 = vadd.f32 %v436_v12, %v16880_v53  ;;  %1893 = vmatprep.mubr.bf16.mxu0 %v19849_v0  ;;  %v590_v35 = vmax.f32 %v433_v40, 0.0  ;;  %v516_v57 = vpop.f32.mrb[3].mxu1  ;;  %v515_v24 = vadd.f32 %v514_v32, %v16877_v30  ;;  %v621_v44 = vmax.f32 %v511_v39, 0.0 }
 0x173   :  { %v591_v54 = vmax.f32 %v435_v41, 0.0  ;;  %v517_v55 = vadd.f32 %v516_v57, %v16880_v53  ;;  %v622_v16 = vmax.f32 %v513_v6, 0.0  ;;  %v15433_v6 = vld [vmem:[#allocation6 + $0x120] ss:$8 sps:$4 sm:$0xff]  }
 0x174   :  { %v592_v7 = vmax.f32 %v437_v18, 0.0  ;;  %v623_v5 = vmax.f32 %v515_v24, 0.0  ;;  %v15963_v24 = vld [vmem:[%s19835_s0 + $0x70] sm:$0xff]  }
 0x175   :  { %v653_v8 = vpack.c.bf16 %v591_v54, %v589_v14  ;;  %v624_v52 = vmax.f32 %v517_v55, 0.0 }
 0x176   :  { %v654_v27 = vpack.c.bf16 %v592_v7, %v590_v35  ;;  %v440_v37 = vpop.f32.mrb[4].mxu0  ;;  %v16908_v22 = vpack.c.bf16 %v623_v5, %v621_v44  ;;  %v1602_v35 = vpop.permute.xlu0 %1601 }
 0x177   :  { %v441_v51 = vadd.f32 %v440_v37, %v16877_v30  ;;  %v442_v49 = vpop.f32.mrb[5].mxu0  ;;  %v520_v28 = vpop.f32.mrb[4].mxu1  ;;  %v16913_v25 = vpack.c.bf16 %v624_v52, %v622_v16  ;;  %v16924_v44 = vsel %vm347_vm1, %v15963_v24, %v1602_v35  ;;  %v15441_v37 = vld [vmem:[#allocation6 + $0x134] ss:$8 sps:$4 sm:$0xff]  }
 0x178   :  { %v443_v9 = vadd.f32 %v442_v49, %v16880_v53  ;;  %v444_v4 = vpop.f32.mrb[6].mxu0  ;;  %921 = vmatprep.mubr.bf16.mxu1 %v654_v27  ;;  %v522_v40 = vpop.f32.mrb[5].mxu1  ;;  %v521_v43 = vadd.f32 %v520_v28, %v16877_v30 }
 0x179   :  { %v445_v26 = vadd.f32 %v444_v4, %v16877_v30  ;;  %v446_v19 = vpop.f32.mrb[7].mxu0  ;;  %922 = vmatmul.mubr.bf16.vlgmr.msra.gmra.mrb[32].mxu1 %v653_v8  ;;  %13693 = vmatmul.mubr.msk.bf16.gmra.mrb[84].mxu0 %vm1698_vm7, %v16903_v29  ;;  %v593_v10 = vmax.f32 %v441_v51, 0.0  ;;  %v524_v18 = vpop.f32.mrb[6].mxu1  ;;  %v523_v15 = vadd.f32 %v522_v40, %v16880_v53 }
 0x17a   :  { %v447_v58 = vadd.f32 %v446_v19, %v16880_v53  ;;  %2708 = vmatpush1.bf16.msra.mxu1 %v15415_v17  ;;  %1903 = vmatprep.mubr.bf16.mxu0 %v19849_v0  ;;  %v594_v41 = vmax.f32 %v443_v9, 0.0  ;;  %v526_v54 = vpop.f32.mrb[7].mxu1  ;;  %v525_v33 = vadd.f32 %v524_v18, %v16877_v30  ;;  %v625_v39 = vmax.f32 %v521_v43, 0.0  ;;  %v15439_v9 = vld [vmem:[#allocation6 + $0x130] ss:$8 sps:$4 sm:$0xff]  }
 0x17b   :  { %v595_v46 = vmax.f32 %v445_v26, 0.0  ;;  %2709 = vmatprep.subr.bf16.mxu1 %v15426_v45  ;;  %v527_v8 = vadd.f32 %v526_v54, %v16880_v53  ;;  %v626_v57 = vmax.f32 %v523_v15, 0.0  ;;  %v1604_v15 = vpop.permute.xlu1 %1603 }
 0x17c   :  { %v596_v12 = vmax.f32 %v447_v58, 0.0  ;;  %v627_v17 = vmax.f32 %v525_v33, 0.0  ;;  %v15444_v58 = vld [vmem:[#allocation6 + $0x144] ss:$8 sps:$4 sm:$0xff]   ;;  %v15442_v33 = vld [vmem:[#allocation6 + $0x140] ss:$8 sps:$4 sm:$0xff]  }
 0x17d   :  { %v655_v14 = vpack.c.bf16 %v595_v46, %v593_v10  ;;  %v628_v31 = vmax.f32 %v527_v8, 0.0 }
 0x17e   :  { %v656_v7 = vpack.c.bf16 %v596_v12, %v594_v41  ;;  %v450_v32 = vpop.f32.mrb[8].mxu0  ;;  %2710 = vmatpush1.bf16.msra.mxu1 %v15424_v38  ;;  %v16929_v45 = vpack.c.bf16 %v627_v17, %v625_v39 }
 0x17f   :  { %v451_v42 = vadd.f32 %v450_v32, %v16877_v30  ;;  %v452_v27 = vpop.f32.mrb[9].mxu0  ;;  %2711 = vmatprep.subr.bf16.mxu1 %v15435_v11  ;;  %v530_v4 = vpop.f32.mrb[8].mxu1  ;;  %v16934_v52 = vpack.c.bf16 %v628_v31, %v626_v57  ;;  %v15447_v57 = vld [vmem:[#allocation6 + $0x154] ss:$8 sps:$4 sm:$0xff]  }
 0x180   :  { %v453_v55 = vadd.f32 %v452_v27, %v16880_v53  ;;  %v454_v16 = vpop.f32.mrb[10].mxu0  ;;  %931 = vmatprep.mubr.bf16.mxu1 %v656_v7  ;;  %v532_v38 = vpop.f32.mrb[9].mxu1  ;;  %v531_v28 = vadd.f32 %v530_v4, %v16877_v30  ;;  %v15964_v7 = vld [vmem:[%s19835_s0 + $0x78] sm:$0xff]  }
 0x181   :  { %v455_v51 = vadd.f32 %v454_v16, %v16877_v30  ;;  %v456_v49 = vpop.f32.mrb[11].mxu0  ;;  %932 = vmatmul.mubr.bf16.gmra.mrb[36].mxu1 %v655_v14  ;;  %13694 = vmatmul.mubr.msk.bf16.gmra.mrb[88].mxu0 %vm1698_vm7, %v16924_v44  ;;  %v597_v26 = vmax.f32 %v451_v42, 0.0  ;;  %v534_v11 = vpop.f32.mrb[10].mxu1  ;;  %v533_v40 = vadd.f32 %v532_v38, %v16880_v53  ;;  %v16945_v32 = vsel %vm347_vm1, %v15964_v7, %v1604_v15  ;;  %v15453_v7 = vld [vmem:[#allocation6 + $0x174] ss:$8 sps:$4 sm:$0xff]  }
 0x182   :  { %v457_v5 = vadd.f32 %v456_v49, %v16880_v53  ;;  %2712 = vmatpush1.bf16.msra.mxu1 %v15433_v6  ;;  %1913 = vmatprep.mubr.bf16.mxu0 %v19849_v0  ;;  %v598_v10 = vmax.f32 %v453_v55, 0.0  ;;  %v536_v41 = vpop.f32.mrb[11].mxu1  ;;  %v535_v12 = vadd.f32 %v534_v11, %v16877_v30  ;;  %v629_v18 = vmax.f32 %v531_v28, 0.0 }
 0x183   :  { %v599_v19 = vmax.f32 %v455_v51, 0.0  ;;  %2713 = vmatprep.subr.bf16.mxu1 %v15441_v37  ;;  %v537_v39 = vadd.f32 %v536_v41, %v16880_v53  ;;  %v630_v35 = vmax.f32 %v533_v40, 0.0  ;;  %v15445_v51 = vld [vmem:[#allocation6 + $0x150] ss:$8 sps:$4 sm:$0xff]  }
 0x184   :  { %v600_v46 = vmax.f32 %v457_v5, 0.0  ;;  %v631_v24 = vmax.f32 %v535_v12, 0.0  ;;  %v3500_v12 = vpop.permute.xlu0 %3499 }
 0x185   :  { %v657_v43 = vpack.c.bf16 %v599_v19, %v597_v26  ;;  %v632_v37 = vmax.f32 %v537_v39, 0.0  ;;  %v15450_v26 = vld [vmem:[#allocation6 + $0x164] ss:$8 sps:$4 sm:$0xff]  }
 0x186   :  { %v658_v14 = vpack.c.bf16 %v600_v46, %v598_v10  ;;  %v460_v54 = vpop.f32.mrb[12].mxu0  ;;  %2714 = vmatpush1.bf16.msra.mxu1 %v15439_v9  ;;  %v16950_v16 = vpack.c.bf16 %v631_v24, %v629_v18 }
 0x187   :  { %v461_v6 = vadd.f32 %v460_v54, %v16877_v30  ;;  %v462_v8 = vpop.f32.mrb[13].mxu0  ;;  %2715 = vmatprep.subr.bf16.mxu1 %v15444_v58  ;;  %v540_v49 = vpop.f32.mrb[12].mxu1  ;;  %v16955_v5 = vpack.c.bf16 %v632_v37, %v630_v35 }
 0x188   :  { %v463_v42 = vadd.f32 %v462_v8, %v16880_v53  ;;  %v464_v27 = vpop.f32.mrb[14].mxu0  ;;  %941 = vmatprep.mubr.bf16.mxu1 %v658_v14  ;;  %v542_v19 = vpop.f32.mrb[13].mxu1  ;;  %v541_v58 = vadd.f32 %v540_v49, %v16877_v30  ;;  %v15448_v14 = vld [vmem:[#allocation6 + $0x160] ss:$8 sps:$4 sm:$0xff]  }
 0x189   :  { %v465_v17 = vadd.f32 %v464_v27, %v16877_v30  ;;  %v466_v55 = vpop.f32.mrb[15].mxu0  ;;  %942 = vmatmul.mubr.bf16.gmra.mrb[40].mxu1 %v657_v43  ;;  %13695 = vmatmul.mubr.msk.bf16.gmra.mrb[92].mxu0 %vm1698_vm7, %v16945_v32  ;;  %v601_v9 = vmax.f32 %v461_v6, 0.0  ;;  %v544_v10 = vpop.f32.mrb[14].mxu1  ;;  %v543_v46 = vadd.f32 %v542_v19, %v16880_v53 }
 0x18a   :  { %v467_v31 = vadd.f32 %v466_v55, %v16880_v53  ;;  %2716 = vmatpush1.bf16.msra.mxu1 %v15442_v33  ;;  %3713 = vmatprep.mubr.bf16.mxu0 %v19849_v0  ;;  %v602_v38 = vmax.f32 %v463_v42, 0.0  ;;  %v546_v40 = vpop.f32.mrb[15].mxu1  ;;  %v545_v43 = vadd.f32 %v544_v10, %v16877_v30  ;;  %v633_v41 = vmax.f32 %v541_v58, 0.0 }
 0x18b   :  { %v603_v4 = vmax.f32 %v465_v17, 0.0  ;;  %2717 = vmatprep.subr.bf16.mxu1 %v15447_v57  ;;  %v547_v54 = vadd.f32 %v546_v40, %v16880_v53  ;;  %v634_v33 = vmax.f32 %v543_v46, 0.0  ;;  %v16966_v42 = vsel %vm1698_vm7, %v16764_v61, %v3500_v12 }
 0x18c   :  { %v604_v28 = vmax.f32 %v467_v31, 0.0  ;;  %v635_v6 = vmax.f32 %v545_v43, 0.0  ;;  %20019 = vst [vmem:[#allocation25_spill] sm:$0xff] %v16966_v42  ;;  %v15451_v31 = vld [vmem:[#allocation6 + $0x170] ss:$8 sps:$4 sm:$0xff]  }
 0x18d   :  { %v659_v11 = vpack.c.bf16 %v603_v4, %v601_v9  ;;  %v636_v24 = vmax.f32 %v547_v54, 0.0  ;;  %v15456_v4 = vld [vmem:[#allocation6 + $0x184] ss:$8 sps:$4 sm:$0xff]  }
 0x18e   :  { %v660_v18 = vpack.c.bf16 %v604_v28, %v602_v38  ;;  %v470_v15 = vpop.f32.mrb[16].mxu0  ;;  %2718 = vmatpush1.bf16.msra.mxu1 %v15445_v51  ;;  %v16969_v17 = vpack.c.bf16 %v635_v6, %v633_v41  ;;  %v3502_v41 = vpop.permute.xlu0 %3501 }
 0x18f   :  { %v471_v39 = vadd.f32 %v470_v15, %v16877_v30  ;;  %v472_v35 = vpop.f32.mrb[17].mxu0  ;;  %2719 = vmatprep.subr.bf16.mxu1 %v15450_v26  ;;  %v550_v51 = vpop.f32.mrb[16].mxu1  ;;  %v16974_v49 = vpack.c.bf16 %v636_v24, %v634_v33  ;;  %v15454_v15 = vld [vmem:[#allocation6 + $0x180] ss:$8 sps:$4 sm:$0xff]   ;;  %v16985_v24 = vsel %vm1698_vm7, %v16773_v2, %v3502_v41  ;;  %v15462_v2 = vld [vmem:[#allocation6 + $0x1a4] ss:$8 sps:$4 sm:$0xff]  }
 0x190   :  { %v473_v8 = vadd.f32 %v472_v35, %v16880_v53  ;;  %v474_v57 = vpop.f32.mrb[18].mxu0  ;;  %951 = vmatprep.mubr.bf16.mxu1 %v660_v18  ;;  %v552_v26 = vpop.f32.mrb[17].mxu1  ;;  %v551_v19 = vadd.f32 %v550_v51, %v16877_v30  ;;  %v15459_v35 = vld [vmem:[#allocation6 + $0x194] ss:$8 sps:$4 sm:$0xff]   ;;  %20020 = vst [vmem:[#allocation26_spill] sm:$0xff] %v16985_v24 }
 0x191   :  { %v475_v27 = vadd.f32 %v474_v57, %v16877_v30  ;;  %v476_v37 = vpop.f32.mrb[19].mxu0  ;;  %952 = vmatmul.mubr.bf16.gmra.mrb[44].mxu1 %v659_v11  ;;  %13772 = vmatmul.mubr.msk.bf16.vlgmr.msra.gmra.mrb[96].mxu0 %vm3648_vm8, %v16966_v42  ;;  %v605_v9 = vmax.f32 %v471_v39, 0.0  ;;  %v554_v28 = vpop.f32.mrb[18].mxu1  ;;  %v553_v10 = vadd.f32 %v552_v26, %v16880_v53  ;;  %v15457_v51 = vld [vmem:[#allocation6 + $0x190] ss:$8 sps:$4 sm:$0xff]  }
 0x192   :  { %v477_v55 = vadd.f32 %v476_v37, %v16880_v53  ;;  %2720 = vmatpush1.bf16.msra.mxu1 %v15448_v14  ;;  %3723 = vmatprep.mubr.bf16.mxu0 %v19849_v0  ;;  %v606_v58 = vmax.f32 %v473_v8, 0.0  ;;  %v556_v11 = vpop.f32.mrb[19].mxu1  ;;  %v555_v40 = vadd.f32 %v554_v28, %v16877_v30  ;;  %v637_v43 = vmax.f32 %v551_v19, 0.0 }
 0x193   :  { %v607_v61 = vmax.f32 %v475_v27, 0.0  ;;  %2721 = vmatprep.subr.bf16.mxu1 %v15453_v7  ;;  %v557_v14 = vadd.f32 %v556_v11, %v16880_v53  ;;  %v638_v54 = vmax.f32 %v553_v10, 0.0 }
 0x194   :  { %v608_v38 = vmax.f32 %v477_v55, 0.0  ;;  %v639_v7 = vmax.f32 %v555_v40, 0.0 }
 0x195   :  { %v661_v46 = vpack.c.bf16 %v607_v61, %v605_v9  ;;  %v640_v57 = vmax.f32 %v557_v14, 0.0  ;;  %v15460_v14 = vld [vmem:[#allocation6 + $0x1a0] ss:$8 sps:$4 sm:$0xff]  }
 0x196   :  { %v662_v12 = vpack.c.bf16 %v608_v38, %v606_v58  ;;  %v480_v18 = vpop.f32.mrb[20].mxu0  ;;  %2722 = vmatpush1.bf16.msra.mxu1 %v15451_v31  ;;  %v16988_v55 = vpack.c.bf16 %v639_v7, %v637_v43  ;;  %v15465_v7 = vld [vmem:[#allocation6 + $0x1b4] ss:$8 sps:$4 sm:$0xff]  }
 0x197   :  { %v481_v33 = vadd.f32 %v480_v18, %v16877_v30  ;;  %v482_v39 = vpop.f32.mrb[21].mxu0  ;;  %2723 = vmatprep.subr.bf16.mxu1 %v15456_v4  ;;  %v560_v9 = vpop.f32.mrb[20].mxu1  ;;  %v16993_v61 = vpack.c.bf16 %v640_v57, %v638_v54 }
 0x198   :  { %v483_v6 = vadd.f32 %v482_v39, %v16880_v53  ;;  %v484_v8 = vpop.f32.mrb[22].mxu0  ;;  %961 = vmatprep.mubr.bf16.mxu1 %v662_v12  ;;  %v562_v19 = vpop.f32.mrb[21].mxu1  ;;  %v561_v58 = vadd.f32 %v560_v9, %v16877_v30 }
 0x199   :  { %v485_v27 = vadd.f32 %v484_v8, %v16877_v30  ;;  %v486_v37 = vpop.f32.mrb[23].mxu0  ;;  %962 = vmatmul.mubr.bf16.gmra.mrb[48].mxu1 %v661_v46  ;;  %13773 = vmatmul.mubr.msk.bf16.gmra.mrb[100].mxu0 %vm3648_vm8, %v16985_v24  ;;  %v609_v4 = vmax.f32 %v481_v33, 0.0  ;;  %v564_v10 = vpop.f32.mrb[22].mxu1  ;;  %v563_v46 = vadd.f32 %v562_v19, %v16880_v53 }
 0x19a   :  { %v487_v31 = vadd.f32 %v486_v37, %v16880_v53  ;;  %2724 = vmatpush1.bf16.msra.mxu1 %v15454_v15  ;;  %3733 = vmatprep.mubr.bf16.mxu0 %v19849_v0  ;;  %v610_v38 = vmax.f32 %v483_v6, 0.0  ;;  %v566_v40 = vpop.f32.mrb[23].mxu1  ;;  %v565_v43 = vadd.f32 %v564_v10, %v16877_v30  ;;  %v641_v41 = vmax.f32 %v561_v58, 0.0  ;;  %v3504_v12 = vpop.permute.xlu0 %3503 }
 0x19b   :  { %v611_v26 = vmax.f32 %v485_v27, 0.0  ;;  %2725 = vmatprep.subr.bf16.mxu1 %v15459_v35  ;;  %v567_v54 = vadd.f32 %v566_v40, %v16880_v53  ;;  %v642_v33 = vmax.f32 %v563_v46, 0.0  ;;  %v17004_v37 = vsel %vm1698_vm7, %v16782_v63, %v3504_v12  ;;  %v15468_v63 = vld [vmem:[#allocation6 + $0x1c4] ss:$8 sps:$4 sm:$0xff]  }
 0x19c   :  { %v612_v28 = vmax.f32 %v487_v31, 0.0  ;;  %v643_v6 = vmax.f32 %v565_v43, 0.0  ;;  %20021 = vst [vmem:[#allocation27_spill] sm:$0xff] %v17004_v37 }
 0x19d   :  { %v663_v11 = vpack.c.bf16 %v611_v26, %v609_v4  ;;  %v644_v27 = vmax.f32 %v567_v54, 0.0  ;;  %v15463_v26 = vld [vmem:[#allocation6 + $0x1b0] ss:$8 sps:$4 sm:$0xff]  }
 0x19e   :  { %v664_v18 = vpack.c.bf16 %v612_v28, %v610_v38  ;;  %v490_v15 = vpop.f32.mrb[24].mxu0  ;;  %2726 = vmatpush1.bf16.msra.mxu1 %v15457_v51  ;;  %v17007_v9 = vpack.c.bf16 %v643_v6, %v641_v41 }
 0x19f   :  { %v491_v39 = vadd.f32 %v490_v15, %v16877_v30  ;;  %v492_v35 = vpop.f32.mrb[25].mxu0  ;;  %2727 = vmatprep.subr.bf16.mxu1 %v15462_v2  ;;  %v570_v2 = vpop.f32.mrb[24].mxu1  ;;  %v17012_v19 = vpack.c.bf16 %v644_v27, %v642_v33 }
 0x1a0   :  { %v493_v8 = vadd.f32 %v492_v35, %v16880_v53  ;;  %v494_v57 = vpop.f32.mrb[26].mxu0  ;;  %971 = vmatprep.mubr.bf16.mxu1 %v664_v18  ;;  %v572_v28 = vpop.f32.mrb[25].mxu1  ;;  %v571_v10 = vadd.f32 %v570_v2, %v16877_v30 }
 0x1a1   :  { %v495_v31 = vadd.f32 %v494_v57, %v16877_v30  ;;  %v496_v51 = vpop.f32.mrb[27].mxu0  ;;  %972 = vmatmul.mubr.bf16.gmra.mrb[52].mxu1 %v663_v11  ;;  %13774 = vmatmul.mubr.msk.bf16.gmra.mrb[104].mxu0 %vm3648_vm8, %v17004_v37  ;;  %v613_v58 = vmax.f32 %v491_v39, 0.0  ;;  %v574_v40 = vpop.f32.mrb[26].mxu1  ;;  %v573_v43 = vadd.f32 %v572_v28, %v16880_v53  ;;  %v15466_v39 = vld [vmem:[#allocation6 + $0x1c0] ss:$8 sps:$4 sm:$0xff]  }
 0x1a2   :  { %v497_v4 = vadd.f32 %v496_v51, %v16880_v53  ;;  %2728 = vmatpush1.bf16.msra.mxu1 %v15460_v14  ;;  %3743 = vmatprep.mubr.bf16.mxu0 %v19849_v0  ;;  %v614_v46 = vmax.f32 %v493_v8, 0.0  ;;  %v576_v12 = vpop.f32.mrb[27].mxu1  ;;  %v575_v18 = vadd.f32 %v574_v40, %v16877_v30  ;;  %v645_v15 = vmax.f32 %v571_v10, 0.0  ;;  %v3506_v14 = vpop.permute.xlu0 %3505  ;;  %v15471_v57 = vld [vmem:[#allocation6 + $0x1d4] ss:$8 sps:$4 sm:$0xff]  }
 0x1a3   :  { %v615_v38 = vmax.f32 %v495_v31, 0.0  ;;  %2729 = vmatprep.subr.bf16.mxu1 %v15465_v7  ;;  %v577_v35 = vadd.f32 %v576_v12, %v16880_v53  ;;  %v646_v7 = vmax.f32 %v573_v43, 0.0  ;;  %v17023_v2 = vsel %vm1698_vm7, %v16791_v56, %v3506_v14  ;;  %v15469_v28 = vld [vmem:[#allocation6 + $0x1d0] ss:$8 sps:$4 sm:$0xff]   ;;  %v15474_v43 = vld [vmem:[#allocation6 + $0x1e4] ss:$8 sps:$4 sm:$0xff]  }
 0x1a4   :  { %v616_v11 = vmax.f32 %v497_v4, 0.0  ;;  %v647_v27 = vmax.f32 %v575_v18, 0.0  ;;  %20022 = vst [vmem:[#allocation28_spill] sm:$0xff] %v17023_v2 }
 0x1a5   :  { %v665_v41 = vpack.c.bf16 %v615_v38, %v613_v58  ;;  %v648_v4 = vmax.f32 %v577_v35, 0.0 }
 0x1a6   :  { %v666_v54 = vpack.c.bf16 %v616_v11, %v614_v46  ;;  %v500_v33 = vpop.f32.mrb[28].mxu0  ;;  %2730 = vmatpush1.bf16.msra.mxu1 %v15463_v26  ;;  %v17026_v38 = vpack.c.bf16 %v647_v27, %v645_v15  ;;  %v15501_v27 = vld [vmem:[#allocation6 + $0x304] ss:$8 sps:$4 sm:$0xff]  }
 0x1a7   :  { %v501_v6 = vadd.f32 %v500_v33, %v16877_v30  ;;  %v502_v8 = vpop.f32.mrb[29].mxu0  ;;  %2731 = vmatprep.subr.bf16.mxu1 %v15468_v63  ;;  %v580_v10 = vpop.f32.mrb[28].mxu1  ;;  %v17031_v46 = vpack.c.bf16 %v648_v4, %v646_v7  ;;  %4981 = vmatprep.subr.bf16.mxu0 %v15501_v27  ;;  %v15544_v27 = vld [vmem:[#allocation6 + $0x3a0] ss:$8 sps:$4 sm:$0xff]  }
 0x1a8   :  { %v503_v31 = vadd.f32 %v502_v8, %v16880_v53  ;;  %v504_v51 = vpop.f32.mrb[30].mxu0  ;;  %981 = vmatprep.mubr.bf16.mxu1 %v666_v54  ;;  %v582_v56 = vpop.f32.mrb[29].mxu1 }
 0x1a9   :  { %v505_v26 = vadd.f32 %v504_v51, %v16877_v30  ;;  %v506_v58 = vpop.f32.mrb[31].mxu0  ;;  %982 = vmatmul.mubr.bf16.gmra.mrb[56].mxu1 %v665_v41  ;;  %13775 = vmatmul.mubr.msk.bf16.gmra.mrb[108].mxu0 %vm3648_vm8, %v17023_v2  ;;  %v617_v11 = vmax.f32 %v501_v6, 0.0  ;;  %v581_v41 = vadd.f32 %v580_v10, %v16877_v30  ;;  %v584_v15 = vpop.f32.mrb[30].mxu1  ;;  %v583_v14 = vadd.f32 %v582_v56, %v16880_v53  ;;  %v15472_v51 = vld [vmem:[#allocation6 + $0x1e0] ss:$8 sps:$4 sm:$0xff]  }
 0x1aa   :  { %v507_v63 = vadd.f32 %v506_v58, %v16880_v53  ;;  %2732 = vmatpush1.bf16.msra.mxu1 %v15466_v39  ;;  %3753 = vmatprep.mubr.bf16.mxu0 %v19849_v0  ;;  %v618_v12 = vmax.f32 %v503_v31, 0.0  ;;  %v586_v33 = vpop.f32.mrb[31].mxu1  ;;  %v585_v39 = vadd.f32 %v584_v15, %v16877_v30  ;;  %v3508_v7 = vpop.permute.xlu0 %3507  ;;  %v15499_v58 = vld [vmem:[#allocation6 + $0x300] ss:$8 sps:$4 sm:$0xff]   ;;  %v15475_v10 = vld [vmem:[#allocation6 + $0x1f0] ss:$8 sps:$4 sm:$0xff]  }
 0x1ab   :  { %v619_v40 = vmax.f32 %v505_v26, 0.0  ;;  %2733 = vmatprep.subr.bf16.mxu1 %v15471_v57  ;;  %v649_v35 = vmax.f32 %v581_v41, 0.0  ;;  %v587_v8 = vadd.f32 %v586_v33, %v16880_v53  ;;  %v650_v57 = vmax.f32 %v583_v14, 0.0  ;;  %v15477_v26 = vld [vmem:[#allocation6 + $0x1f4] ss:$8 sps:$4 sm:$0xff]   ;;  %4982 = vmatpush1.bf16.msra.mxu0 %v15499_v58 }
 0x1ac   :  { %v620_v18 = vmax.f32 %v507_v63, 0.0  ;;  %v651_v4 = vmax.f32 %v585_v39, 0.0  ;;  %v17040_v63 = vsel %vm1698_vm7, %v16800_v62, %v3508_v7  ;;  %v15505_v62 = vld [vmem:[#allocation6 + $0x310] ss:$8 sps:$4 sm:$0xff]   ;;  %v15510_v56 = vld [vmem:[#allocation6 + $0x324] ss:$8 sps:$4 sm:$0xff]  }
 0x1ad   :  { %v667_v54 = vpack.c.bf16 %v619_v40, %v617_v11  ;;  %v652_v31 = vmax.f32 %v587_v8, 0.0  ;;  %20023 = vst [vmem:[#allocation29_spill] sm:$0xff] %v17040_v63  ;;  %v15480_v11 = vld [vmem:[#allocation6 + $0x204] ss:$8 sps:$4 sm:$0xff]   ;;  %v15516_v41 = vld [vmem:[#allocation6 + $0x334] ss:$8 sps:$4 sm:$0xff]  }
 0x1ae   :  { %v668_v6 = vpack.c.bf16 %v620_v18, %v618_v12  ;;  %2734 = vmatpush1.bf16.msra.mxu1 %v15469_v28  ;;  %v17042_v30 = vpack.c.bf16 %v651_v4, %v649_v35  ;;  %v15507_v28 = vld [vmem:[#allocation6 + $0x314] ss:$8 sps:$4 sm:$0xff]   ;;  %v3510_v40 = vpop.permute.xlu0 %3509  ;;  %v15514_v12 = vld [vmem:[#allocation6 + $0x330] ss:$8 sps:$4 sm:$0xff]   ;;  %v15519_v15 = vld [vmem:[#allocation6 + $0x344] ss:$8 sps:$4 sm:$0xff]  }
 0x1af   :  { %2735 = vmatprep.subr.bf16.mxu1 %v15474_v43  ;;  %v17047_v53 = vpack.c.bf16 %v652_v31, %v650_v57  ;;  %4983 = vmatprep.subr.bf16.mxu0 %v15507_v28  ;;  %v15508_v43 = vld [vmem:[#allocation6 + $0x320] ss:$8 sps:$4 sm:$0xff]   ;;  %v15528_v33 = vld [vmem:[#allocation6 + $0x364] ss:$8 sps:$4 sm:$0xff]  }
 0x1b0   :  { %991 = vmatprep.mubr.bf16.mxu1 %v668_v6  ;;  %4984 = vmatpush1.bf16.msra.mxu0 %v15505_v62  ;;  %v15517_v14 = vld [vmem:[#allocation6 + $0x340] ss:$8 sps:$4 sm:$0xff]   ;;  %v15537_v7 = vld [vmem:[#allocation6 + $0x384] ss:$8 sps:$4 sm:$0xff]  }
 0x1b1   :  { %992 = vmatmul.mubr.bf16.gmra.mrb[60].mxu1 %v667_v54  ;;  %13776 = vmatmul.mubr.msk.bf16.gmra.mrb[112].mxu0 %vm3648_vm8, %v17040_v63  ;;  %v15526_v39 = vld [vmem:[#allocation6 + $0x360] ss:$8 sps:$4 sm:$0xff]   ;;  %v15546_v57 = vld [vmem:[#allocation6 + $0x3a4] ss:$8 sps:$4 sm:$0xff]  }
 0x1b2   :  { %1001 = vmatprep.mubr.bf16.mxu1 %v16913_v25  ;;  %3763 = vmatprep.mubr.bf16.mxu0 %v19849_v0  ;;  %v17052_v25 = vsel %vm1698_vm7, %v16809_v59, %v3510_v40  ;;  %v3512_v18 = vpop.permute.xlu0 %3511  ;;  %v15535_v6 = vld [vmem:[#allocation6 + $0x380] ss:$8 sps:$4 sm:$0xff]   ;;  %v15555_v4 = vld [vmem:[#allocation6 + $0x3c4] ss:$8 sps:$4 sm:$0xff]  }
 0x1b3   :  { %2736 = vmatpush1.bf16.msra.mxu1 %v15472_v51  ;;  %20024 = vst [vmem:[#allocation30_spill] sm:$0xff] %v17052_v25  ;;  %4985 = vmatprep.subr.bf16.mxu0 %v15510_v56  ;;  %v17061_v59 = vsel %vm1698_vm7, %v16818_v48, %v3512_v18  ;;  %v1646_v31 = vld [vmem:[#allocation4 + $0x1] ss:$4 sm:$0x3]  ;;  %v15564_v62 = vld [vmem:[#allocation6 + $0x3e4] ss:$8 sps:$4 sm:$0xff]  }
 0x1b4   :  { %2737 = vmatprep.subr.bf16.mxu1 %v15477_v26  ;;  %4986 = vmatpush1.bf16.msra.mxu0 %v15508_v43  ;;  %20025 = vst [vmem:[#allocation31_spill] sm:$0xff] %v17061_v59  ;;  %v15561_v26 = vld [vmem:[#allocation6 + $0x3d4] ss:$8 sps:$4 sm:$0xff]   ;;  %v17108_v58 = vrot.slane %v1646_v31, %v16871_v60 }
 0x1b5   :  { %4987 = vmatprep.subr.bf16.mxu0 %v15516_v41 }
 0x1b6   :  { %v3514_v54 = vpop.permute.xlu0 %3513 }
 0x1b7   :  { %2738 = vmatpush1.bf16.msra.mxu1 %v15475_v10  ;;  %v17070_v48 = vsel %vm1698_vm7, %v16827_v3, %v3514_v54  ;;  %v15570_v54 = vld [vmem:[#allocation6 + $0x3f4] ss:$8 sps:$4 sm:$0xff]  }
 0x1b8   :  { %2900 = vmatprep.subr.bf16.mxu1 %v15480_v11  ;;  %4988 = vmatpush1.bf16.msra.mxu0 %v15514_v12  ;;  %20026 = vst [vmem:[#allocation32_spill] sm:$0xff] %v17070_v48  ;;  %v15562_v12 = vld [vmem:[#allocation6 + $0x3e0] ss:$8 sps:$4 sm:$0xff]  }
 0x1b9   :  { %1002 = vmatmul.mubr.bf16.gmra.mrb[64].mxu1 %v16908_v22  ;;  %13777 = vmatmul.mubr.msk.bf16.gmra.mrb[116].mxu0 %vm3648_vm8, %v17052_v25  ;;  %v15525_v22 = vld [vmem:[#allocation6 + $0x354] ss:$8 sps:$4 sm:$0xff]  }
 0x1ba   :  { %1011 = vmatprep.mubr.bf16.mxu1 %v16934_v52  ;;  %3773 = vmatprep.mubr.bf16.mxu0 %v19849_v0  ;;  %v15523_v52 = vld [vmem:[#allocation6 + $0x350] ss:$8 sps:$4 sm:$0xff]   ;;  %v3516_v35 = vpop.permute.xlu0 %3515 }
 0x1bb   :  { %4989 = vmatprep.subr.bf16.mxu0 %v15519_v15  ;;  %v17079_v3 = vsel %vm1698_vm7, %v16836_v36, %v3516_v35 }
 0x1bc   :  { %4990 = vmatpush1.bf16.msra.mxu0 %v15517_v14  ;;  %20027 = vst [vmem:[#allocation33_spill] sm:$0xff] %v17079_v3 }
 0x1bd   :  { %4991 = vmatprep.subr.bf16.mxu0 %v15525_v22 }
 0x1be   :  { %v3518_v8 = vpop.permute.xlu0 %3517 }
 0x1bf   :  { %v17088_v36 = vsel %vm1698_vm7, %v16845_v21, %v3518_v8  ;;  %v15553_v21 = vld [vmem:[#allocation6 + $0x3c0] ss:$8 sps:$4 sm:$0xff]  }
 0x1c0   :  { %4992 = vmatpush1.bf16.msra.mxu0 %v15523_v52  ;;  %20028 = vst [vmem:[#allocation34_spill] sm:$0xff] %v17088_v36 }
 0x1c1   :  { %1012 = vmatmul.mubr.bf16.gmra.mrb[68].mxu1 %v16929_v45  ;;  %13778 = vmatmul.mubr.msk.bf16.gmra.mrb[120].mxu0 %vm3648_vm8, %v17061_v59  ;;  %v15534_v45 = vld [vmem:[#allocation6 + $0x374] ss:$8 sps:$4 sm:$0xff]  }
 0x1c2   :  { %1021 = vmatprep.mubr.bf16.mxu1 %v16955_v5  ;;  %3783 = vmatprep.mubr.bf16.mxu0 %v19849_v0  ;;  %v15532_v5 = vld [vmem:[#allocation6 + $0x370] ss:$8 sps:$4 sm:$0xff]   ;;  %v3520_v51 = vpop.permute.xlu0 %3519 }
 0x1c3   :  { %4993 = vmatprep.subr.bf16.mxu0 %v15528_v33 }
 0x1c4   :  { %4994 = vmatpush1.bf16.msra.mxu0 %v15526_v39 }
 0x1c5   :  { %4995 = vmatprep.subr.bf16.mxu0 %v15534_v45 }
 0x1c8   :  { %4996 = vmatpush1.bf16.msra.mxu0 %v15532_v5 }
 0x1c9   :  { %1022 = vmatmul.mubr.bf16.gmra.mrb[72].mxu1 %v16950_v16  ;;  %13779 = vmatmul.mubr.msk.bf16.gmra.mrb[124].mxu0 %vm3648_vm8, %v17070_v48  ;;  %v15543_v16 = vld [vmem:[#allocation6 + $0x394] ss:$8 sps:$4 sm:$0xff]  }
 0x1ca   :  { %1031 = vmatprep.mubr.bf16.mxu1 %v16974_v49  ;;  %3793 = vmatprep.mubr.bf16.mxu0 %v19849_v0  ;;  %v15541_v49 = vld [vmem:[#allocation6 + $0x390] ss:$8 sps:$4 sm:$0xff]  }
 0x1cb   :  { %4997 = vmatprep.subr.bf16.mxu0 %v15537_v7 }
 0x1cc   :  { %4998 = vmatpush1.bf16.msra.mxu0 %v15535_v6 }
 0x1cd   :  { %4999 = vmatprep.subr.bf16.mxu0 %v15543_v16 }
 0x1d0   :  { %5000 = vmatpush1.bf16.msra.mxu0 %v15541_v49 }
 0x1d1   :  { %1032 = vmatmul.mubr.bf16.gmra.mrb[76].mxu1 %v16969_v17  ;;  %13780 = vmatmul.mubr.msk.bf16.gmra.mrb[128].mxu0 %vm3648_vm8, %v17079_v3  ;;  %v15552_v17 = vld [vmem:[#allocation6 + $0x3b4] ss:$8 sps:$4 sm:$0xff]  }
 0x1d2   :  { %1041 = vmatprep.mubr.bf16.mxu1 %v16993_v61  ;;  %3803 = vmatprep.mubr.bf16.mxu0 %v19849_v0  ;;  %v15550_v61 = vld [vmem:[#allocation6 + $0x3b0] ss:$8 sps:$4 sm:$0xff]  }
 0x1d3   :  { %5001 = vmatprep.subr.bf16.mxu0 %v15546_v57 }
 0x1d4   :  { %5002 = vmatpush1.bf16.msra.mxu0 %v15544_v27 }
 0x1d5   :  { %5003 = vmatprep.subr.bf16.mxu0 %v15552_v17 }
 0x1d8   :  { %5004 = vmatpush1.bf16.msra.mxu0 %v15550_v61 }
 0x1d9   :  { %1042 = vmatmul.mubr.bf16.gmra.mrb[80].mxu1 %v16988_v55  ;;  %13781 = vmatmul.mubr.msk.bf16.gmra.mrb[132].mxu0 %vm3648_vm8, %v17088_v36  ;;  %v17097_v55 = vsel %vm1698_vm7, %v16854_v47, %v3520_v51  ;;  %v15559_v47 = vld [vmem:[#allocation6 + $0x3d0] ss:$8 sps:$4 sm:$0xff]  }
 0x1da   :  { %1051 = vmatprep.mubr.bf16.mxu1 %v17012_v19  ;;  %3813 = vmatprep.mubr.bf16.mxu0 %v19849_v0  ;;  %20029 = vst [vmem:[#allocation35_spill] sm:$0xff] %v17097_v55  ;;  %v17104_v19 = vrot.slane %v1646_v31, %v16868_v34 }
 0x1db   :  { %5005 = vmatprep.subr.bf16.mxu0 %v15555_v4 }
 0x1dc   :  { %5006 = vmatpush1.bf16.msra.mxu0 %v15553_v21 }
 0x1dd   :  { %5007 = vmatprep.subr.bf16.mxu0 %v15561_v26 }
 0x1e0   :  { %5008 = vmatpush1.bf16.msra.mxu0 %v15559_v47 }
 0x1e1   :  { %1052 = vmatmul.mubr.bf16.gmra.mrb[84].mxu1 %v17007_v9  ;;  %13782 = vmatmul.mubr.msk.bf16.gmra.mrb[136].mxu0 %vm3648_vm8, %v17097_v55  ;;  %v3522_v9 = vpop.permute.xlu0 %3521 }
 0x1e2   :  { %1061 = vmatprep.mubr.bf16.mxu1 %v17031_v46  ;;  %3823 = vmatprep.mubr.bf16.mxu0 %v19849_v0  ;;  %v17115_v18 = vsel %vm1698_vm7, %v16865_v13, %v3522_v9  ;;  %v15568_v13 = vld [vmem:[#allocation6 + $0x3f0] ss:$8 sps:$4 sm:$0xff]  }
 0x1e3   :  { %20030 = vst [vmem:[#allocation36_spill] sm:$0xff] %v17115_v18  ;;  %5009 = vmatprep.subr.bf16.mxu0 %v15564_v62 }
 0x1e4   :  { %v1765_v28 = vpop.f32.mrb[32].mxu0  ;;  %5010 = vmatpush1.bf16.msra.mxu0 %v15562_v12 }
 0x1e5   :  { %v1766_v10 = vadd.f32 %v1765_v28, %v17104_v19  ;;  %v1767_v11 = vpop.f32.mrb[33].mxu0  ;;  %5011 = vmatprep.subr.bf16.mxu0 %v15570_v54  ;;  %v15483_v54 = vld [vmem:[#allocation6 + $0x214] ss:$8 sps:$4 sm:$0xff]  }
 0x1e6   :  { %v1768_v46 = vadd.f32 %v1767_v11, %v17108_v58  ;;  %v1769_v40 = vpop.f32.mrb[34].mxu0 }
 0x1e7   :  { %v1924_v56 = vmax.f32 %v1766_v10, 0.0  ;;  %v1770_v43 = vadd.f32 %v1769_v40, %v17104_v19  ;;  %v1771_v41 = vpop.f32.mrb[35].mxu0  ;;  %v15478_v40 = vld [vmem:[#allocation6 + $0x200] ss:$8 sps:$4 sm:$0xff]  }
 0x1e8   :  { %v1925_v15 = vmax.f32 %v1768_v46, 0.0  ;;  %v1772_v14 = vadd.f32 %v1771_v41, %v17108_v58  ;;  %5012 = vmatpush1.bf16.msra.mxu0 %v15568_v13 }
 0x1e9   :  { %1062 = vmatmul.mubr.bf16.gmra.mrb[88].mxu1 %v17026_v38  ;;  %13783 = vmatmul.mubr.msk.bf16.gmra.mrb[140].mxu0 %vm3648_vm8, %v17115_v18  ;;  %v1926_v22 = vmax.f32 %v1770_v43, 0.0  ;;  %v3524_v38 = vpop.permute.xlu0 %3523 }
 0x1ea   :  { %1071 = vmatprep.mubr.bf16.mxu1 %v17047_v53  ;;  %v1927_v52 = vmax.f32 %v1772_v14, 0.0  ;;  %3833 = vmatprep.mubr.bf16.mxu0 %v19849_v0  ;;  %v17128_v27 = vsel %vm1698_vm7, %v16886_v23, %v3524_v38 }
 0x1eb   :  { %v1988_v33 = vpack.c.bf16 %v1926_v22, %v1924_v56  ;;  %20031 = vst [vmem:[#allocation37_spill] sm:$0xff] %v17128_v27  ;;  %5174 = vmatprep.subr.bf16.mxu0 %v15588_v50 }
 0x1ec   :  { %v1989_v39 = vpack.c.bf16 %v1927_v52, %v1925_v15  ;;  %v1775_v45 = vpop.f32.mrb[36].mxu0 }
 0x1ed   :  { %v2023_v5 = vshll.u32 %v1988_v33, 16  ;;  %v1776_v35 = vadd.f32 %v1775_v45, %v17104_v19  ;;  %v1777_v7 = vpop.f32.mrb[37].mxu0  ;;  %v2021_v51 = vshrl.u32 %v1988_v33, 16  ;;  %v3526_v10 = vpop.permute.xlu0 %3525 }
 0x1ee   :  { %v2035_v6 = vshll.u32 %v1989_v39, 16  ;;  %v1778_v16 = vadd.f32 %v1777_v7, %v17108_v58  ;;  %v1779_v49 = vpop.f32.mrb[38].mxu0  ;;  %v2033_v21 = vshrl.u32 %v1989_v39, 16  ;;  %v17146_v13 = vsel %vm1698_vm7, %v16903_v29, %v3526_v10  ;;  %v15481_v7 = vld [vmem:[#allocation6 + $0x210] ss:$8 sps:$4 sm:$0xff]  }
 0x1ef   :  { %v1928_v53 = vmax.f32 %v1776_v35, 0.0  ;;  %v1780_v8 = vadd.f32 %v1779_v49, %v17104_v19  ;;  %v1781_v57 = vpop.f32.mrb[39].mxu0  ;;  %v17132_v4 = vrot.slane %v2023_v5, 1  ;;  %20034 = vst [vmem:[#allocation40_spill] sm:$0xff] %v17146_v13  ;;  %v15486_v29 = vld [vmem:[#allocation6 + $0x224] ss:$8 sps:$4 sm:$0xff]  }
 0x1f0   :  { %v1929_v17 = vmax.f32 %v1778_v16, 0.0  ;;  %v1782_v61 = vadd.f32 %v1781_v57, %v17108_v58  ;;  %v17136_v26 = vrot.slane %v2035_v6, 1 }
 0x1f1   :  { %1072 = vmatmul.mubr.bf16.gmra.mrb[92].mxu1 %v17042_v30  ;;  %20032 = vst [vmem:[#allocation38_spill] sm:$0xff] %v17132_v4  ;;  %v1930_v31 = vmax.f32 %v1780_v8, 0.0  ;;  %13784 = vmatmul.mubr.msk.bf16.gmra.mrb[144].mxu0 %vm3648_vm8, %v17128_v27  ;;  %v2026_v30 = vor.u32 %v17132_v4, %v2021_v51 }
 0x1f2   :  { %2739 = vmatprep.mubr.bf16.mxu1 %v1989_v39  ;;  %20033 = vst [vmem:[#allocation39_spill] sm:$0xff] %v17136_v26  ;;  %v1931_v47 = vmax.f32 %v1782_v61, 0.0  ;;  %3843 = vmatprep.mubr.bf16.mxu0 %v19849_v0  ;;  %v2038_v41 = vor.u32 %v17136_v26, %v2033_v21 }
 0x1f3   :  { %v1990_v23 = vpack.c.bf16 %v1930_v31, %v1928_v53 }
 0x1f4   :  { %v1991_v28 = vpack.c.bf16 %v1931_v47, %v1929_v17  ;;  %v1785_v9 = vpop.f32.mrb[40].mxu0  ;;  %v3528_v17 = vpop.permute.xlu0 %3527 }
 0x1f5   :  { %v2028_v11 = vshll.u32 %v1990_v23, 16  ;;  %v1786_v62 = vadd.f32 %v1785_v9, %v17104_v19  ;;  %v1787_v46 = vpop.f32.mrb[41].mxu0  ;;  %v2044_v5 = vshrl.u32 %v1990_v23, 16  ;;  %v15484_v9 = vld [vmem:[#allocation6 + $0x220] ss:$8 sps:$4 sm:$0xff]  }
 0x1f6   :  { %v1788_v56 = vadd.f32 %v1787_v46, %v17108_v58  ;;  %v1789_v43 = vpop.f32.mrb[42].mxu0  ;;  %v2040_v12 = vshll.u32 %v1991_v28, 16  ;;  %v2052_v16 = vshrl.u32 %v1991_v28, 16 }
 0x1f7   :  { %v2030_v15 = vrot.slane %v2028_v11, 1  ;;  %v1932_v14 = vmax.f32 %v1786_v62, 0.0  ;;  %v1790_v22 = vadd.f32 %v1789_v43, %v17104_v19  ;;  %v1791_v52 = vpop.f32.mrb[43].mxu0  ;;  %v17163_v43 = vsel %vm1698_vm7, %v16924_v44, %v3528_v17  ;;  %v15487_v44 = vld [vmem:[#allocation6 + $0x230] ss:$8 sps:$4 sm:$0xff]  }
 0x1f8   :  { %v1933_v39 = vmax.f32 %v1788_v56, 0.0  ;;  %v1792_v45 = vadd.f32 %v1791_v52, %v17108_v58  ;;  %v2042_v38 = vrot.slane %v2040_v12, 1  ;;  %20035 = vst [vmem:[#allocation41_spill] sm:$0xff] %v17163_v43 }
 0x1f9   :  { %2740 = vmatmul.mubr.bf16.vlgmr.msra.gmra.mrb[96].mxu1 %v1988_v33  ;;  %v1934_v35 = vmax.f32 %v1790_v22, 0.0  ;;  %13785 = vmatmul.mubr.msk.bf16.gmra.mrb[148].mxu0 %vm3648_vm8, %v17146_v13  ;;  %v17152_v6 = vsel %vm1450_vm0, %v2026_v30, %v2030_v15  ;;  %v2046_v31 = vor.u32 %v2044_v5, %v2030_v15 }
 0x1fa   :  { %2901 = vmatpush1.bf16.msra.mxu1 %v15478_v40  ;;  %v1935_v49 = vmax.f32 %v1792_v45, 0.0  ;;  %2749 = vmatprep.mubr.bf16.mxu1 %v1991_v28  ;;  %v17156_v53 = vsel %vm1450_vm0, %v2038_v41, %v2042_v38  ;;  %v2054_v10 = vor.u32 %v2052_v16, %v2042_v38  ;;  %v15489_v40 = vld [vmem:[#allocation6 + $0x234] ss:$8 sps:$4 sm:$0xff]   ;;  %v15492_v38 = vld [vmem:[#allocation6 + $0x244] ss:$8 sps:$4 sm:$0xff]  }
 0x1fb   :  { %3853 = vmatprep.mubr.bf16.mxu0 %v19849_v0  ;;  %v1992_v33 = vpack.c.bf16 %v1934_v35, %v1932_v14  ;;  %2902 = vmatprep.subr.bf16.mxu1 %v15483_v54 }
 0x1fc   :  { %v1993_v8 = vpack.c.bf16 %v1935_v49, %v1933_v39  ;;  %v1795_v57 = vpop.f32.mrb[44].mxu0 }
 0x1fd   :  { %v1796_v61 = vadd.f32 %v1795_v57, %v17104_v19  ;;  %v1797_v51 = vpop.f32.mrb[45].mxu0  ;;  %v2048_v21 = vshll.u32 %v1992_v33, 16  ;;  %v2060_v14 = vshrl.u32 %v1992_v33, 16 }
 0x1fe   :  { %2903 = vmatpush1.bf16.msra.mxu1 %v15481_v7  ;;  %v1798_v47 = vadd.f32 %v1797_v51, %v17108_v58  ;;  %v1799_v28 = vpop.f32.mrb[46].mxu0  ;;  %v2056_v30 = vshll.u32 %v1993_v8, 16  ;;  %v2068_v54 = vshrl.u32 %v1993_v8, 16  ;;  %v3530_v7 = vpop.permute.xlu0 %3529 }
 0x1ff   :  { %2904 = vmatprep.subr.bf16.mxu1 %v15486_v29  ;;  %v1936_v11 = vmax.f32 %v1796_v61, 0.0  ;;  %v1800_v62 = vadd.f32 %v1799_v28, %v17104_v19  ;;  %v1801_v46 = vpop.f32.mrb[47].mxu0  ;;  %v2050_v56 = vrot.slane %v2048_v21, 1  ;;  %v15490_v61 = vld [vmem:[#allocation6 + $0x240] ss:$8 sps:$4 sm:$0xff]  }
 0x200   :  { %v1937_v41 = vmax.f32 %v1798_v47, 0.0  ;;  %v1802_v12 = vadd.f32 %v1801_v46, %v17108_v58  ;;  %v2058_v15 = vrot.slane %v2056_v30, 1  ;;  %v17180_v30 = vsel %vm1698_vm7, %v16945_v32, %v3530_v7 }
 0x201   :  { %2750 = vmatmul.mubr.bf16.gmra.mrb[100].mxu1 %v1990_v23  ;;  %v1938_v22 = vmax.f32 %v1800_v62, 0.0  ;;  %13786 = vmatmul.mubr.msk.bf16.gmra.mrb[152].mxu0 %vm3648_vm8, %v17163_v43  ;;  %v17169_v52 = vsel %vm1450_vm0, %v2046_v31, %v2050_v56  ;;  %v2062_v29 = vor.u32 %v2060_v14, %v2050_v56  ;;  %20036 = vst [vmem:[#allocation42_spill] sm:$0xff] %v17180_v30 }
 0x202   :  { %2759 = vmatprep.mubr.bf16.mxu1 %v1993_v8  ;;  %v1939_v39 = vmax.f32 %v1802_v12, 0.0  ;;  %3863 = vmatprep.mubr.bf16.mxu0 %v19849_v0  ;;  %v17173_v45 = vsel %vm1450_vm0, %v2054_v10, %v2058_v15  ;;  %v2070_v51 = vor.u32 %v2068_v54, %v2058_v15  ;;  %v15493_v15 = vld [vmem:[#allocation6 + $0x250] ss:$8 sps:$4 sm:$0xff]  }
 0x203   :  { %2905 = vmatpush1.bf16.msra.mxu1 %v15484_v9  ;;  %v1994_v23 = vpack.c.bf16 %v1938_v22, %v1936_v11  ;;  %v15495_v9 = vld [vmem:[#allocation6 + $0x254] ss:$8 sps:$4 sm:$0xff]  }
 0x204   :  { %2906 = vmatprep.subr.bf16.mxu1 %v15489_v40  ;;  %v1995_v5 = vpack.c.bf16 %v1939_v39, %v1937_v41  ;;  %v1805_v35 = vpop.f32.mrb[48].mxu0 }
 0x205   :  { %v1806_v16 = vadd.f32 %v1805_v35, %v17104_v19  ;;  %v1807_v49 = vpop.f32.mrb[49].mxu0  ;;  %v2064_v57 = vshll.u32 %v1994_v23, 16  ;;  %v2076_v14 = vshrl.u32 %v1994_v23, 16 }
 0x206   :  { %v1808_v8 = vadd.f32 %v1807_v49, %v17108_v58  ;;  %v1809_v17 = vpop.f32.mrb[50].mxu0  ;;  %v2072_v31 = vshll.u32 %v1995_v5, 16  ;;  %v2084_v41 = vshrl.u32 %v1995_v5, 16 }
 0x207   :  { %2907 = vmatpush1.bf16.msra.mxu1 %v15487_v44  ;;  %v1940_v21 = vmax.f32 %v1806_v16, 0.0  ;;  %v1810_v47 = vadd.f32 %v1809_v17, %v17104_v19  ;;  %v1811_v28 = vpop.f32.mrb[51].mxu0  ;;  %v2066_v10 = vrot.slane %v2064_v57, 1  ;;  %v15504_v17 = vld [vmem:[#allocation6 + $0x274] ss:$8 sps:$4 sm:$0xff]  }
 0x208   :  { %2908 = vmatprep.subr.bf16.mxu1 %v15492_v38  ;;  %v1941_v11 = vmax.f32 %v1808_v8, 0.0  ;;  %v1812_v62 = vadd.f32 %v1811_v28, %v17108_v58  ;;  %v2074_v46 = vrot.slane %v2072_v31, 1 }
 0x209   :  { %2760 = vmatmul.mubr.bf16.gmra.mrb[104].mxu1 %v1992_v33  ;;  %v1942_v40 = vmax.f32 %v1810_v47, 0.0  ;;  %13787 = vmatmul.mubr.msk.bf16.gmra.mrb[156].mxu0 %vm3648_vm8, %v17180_v30  ;;  %v17186_v56 = vsel %vm1450_vm0, %v2062_v29, %v2066_v10  ;;  %v15498_v33 = vld [vmem:[#allocation6 + $0x264] ss:$8 sps:$4 sm:$0xff]  }
 0x20a   :  { %2769 = vmatprep.mubr.bf16.mxu1 %v1995_v5  ;;  %v1943_v12 = vmax.f32 %v1812_v62, 0.0  ;;  %v17189_v32 = vsel %vm1450_vm0, %v2070_v51, %v2074_v46  ;;  %v15496_v5 = vld [vmem:[#allocation6 + $0x260] ss:$8 sps:$4 sm:$0xff]   ;;  %v2086_v16 = vor.u32 %v2084_v41, %v2074_v46 }
 0x20b   :  { %2909 = vmatpush1.bf16.msra.mxu1 %v15490_v61  ;;  %v1996_v22 = vpack.c.bf16 %v1942_v40, %v1940_v21  ;;  %v2078_v61 = vor.u32 %v2076_v14, %v2066_v10  ;;  %v15502_v40 = vld [vmem:[#allocation6 + $0x270] ss:$8 sps:$4 sm:$0xff]   ;;  %v15513_v10 = vld [vmem:[#allocation6 + $0x284] ss:$8 sps:$4 sm:$0xff]  }
 0x20c   :  { %2910 = vmatprep.subr.bf16.mxu1 %v15495_v9  ;;  %v1997_v54 = vpack.c.bf16 %v1943_v12, %v1941_v11  ;;  %v1815_v39 = vpop.f32.mrb[52].mxu0 }
 0x20d   :  { %v1816_v44 = vadd.f32 %v1815_v39, %v17104_v19  ;;  %v1817_v38 = vpop.f32.mrb[53].mxu0  ;;  %v2080_v51 = vshll.u32 %v1996_v22, 16  ;;  %v2092_v28 = vshrl.u32 %v1996_v22, 16 }
 0x20e   :  { %v1818_v35 = vadd.f32 %v1817_v38, %v17108_v58  ;;  %v1819_v7 = vpop.f32.mrb[54].mxu0  ;;  %v2088_v49 = vshll.u32 %v1997_v54, 16  ;;  %v2100_v62 = vshrl.u32 %v1997_v54, 16 }
 0x20f   :  { %2911 = vmatpush1.bf16.msra.mxu1 %v15493_v15  ;;  %v1944_v29 = vmax.f32 %v1816_v44, 0.0  ;;  %v1820_v57 = vadd.f32 %v1819_v7, %v17104_v19  ;;  %v1821_v8 = vpop.f32.mrb[55].mxu0  ;;  %v2082_v11 = vrot.slane %v2080_v51, 1  ;;  %v15511_v7 = vld [vmem:[#allocation6 + $0x280] ss:$8 sps:$4 sm:$0xff]  }
 0x210   :  { %2912 = vmatprep.subr.bf16.mxu1 %v15498_v33  ;;  %v1945_v31 = vmax.f32 %v1818_v35, 0.0  ;;  %v1822_v21 = vadd.f32 %v1821_v8, %v17108_v58  ;;  %v2090_v47 = vrot.slane %v2088_v49, 1  ;;  %v15522_v8 = vld [vmem:[#allocation6 + $0x294] ss:$8 sps:$4 sm:$0xff]  }
 0x211   :  { %2770 = vmatmul.mubr.bf16.gmra.mrb[108].mxu1 %v1994_v23  ;;  %v1946_v9 = vmax.f32 %v1820_v57, 0.0  ;;  %v17199_v15 = vsel %vm1450_vm0, %v2078_v61, %v2082_v11  ;;  %v2094_v44 = vor.u32 %v2092_v28, %v2082_v11  ;;  %v15520_v11 = vld [vmem:[#allocation6 + $0x290] ss:$8 sps:$4 sm:$0xff]  }
 0x212   :  { %2779 = vmatprep.mubr.bf16.mxu1 %v1997_v54  ;;  %v1947_v46 = vmax.f32 %v1822_v21, 0.0  ;;  %v17196_v41 = vsel %vm1450_vm0, %v2086_v16, %v2090_v47 }
 0x213   :  { %2913 = vmatpush1.bf16.msra.mxu1 %v15496_v5  ;;  %v1998_v12 = vpack.c.bf16 %v1946_v9, %v1944_v29  ;;  %v2102_v5 = vor.u32 %v2100_v62, %v2090_v47 }
 0x214   :  { %2914 = vmatprep.subr.bf16.mxu1 %v15504_v17  ;;  %v1999_v14 = vpack.c.bf16 %v1947_v46, %v1945_v31  ;;  %v1825_v23 = vpop.f32.mrb[56].mxu0 }
 0x215   :  { %v1826_v33 = vadd.f32 %v1825_v23, %v17104_v19  ;;  %v1827_v39 = vpop.f32.mrb[57].mxu0  ;;  %v2096_v38 = vshll.u32 %v1998_v12, 16  ;;  %v2108_v46 = vshrl.u32 %v1998_v12, 16 }
 0x216   :  { %v1828_v54 = vadd.f32 %v1827_v39, %v17108_v58  ;;  %v1829_v35 = vpop.f32.mrb[58].mxu0  ;;  %v2104_v16 = vshll.u32 %v1999_v14, 16  ;;  %v2116_v9 = vshrl.u32 %v1999_v14, 16 }
 0x217   :  { %2915 = vmatpush1.bf16.msra.mxu1 %v15502_v40  ;;  %v1948_v49 = vmax.f32 %v1826_v33, 0.0  ;;  %v1830_v29 = vadd.f32 %v1829_v35, %v17104_v19  ;;  %v1831_v57 = vpop.f32.mrb[59].mxu0  ;;  %v2098_v17 = vrot.slane %v2096_v38, 1 }
 0x218   :  { %2916 = vmatprep.subr.bf16.mxu1 %v15513_v10  ;;  %v1949_v61 = vmax.f32 %v1828_v54, 0.0  ;;  %v1832_v51 = vadd.f32 %v1831_v57, %v17108_v58  ;;  %v2106_v31 = vrot.slane %v2104_v16, 1  ;;  %v15531_v10 = vld [vmem:[#allocation6 + $0x2a4] ss:$8 sps:$4 sm:$0xff]  }
 0x219   :  { %2780 = vmatmul.mubr.bf16.gmra.mrb[112].mxu1 %v1996_v22  ;;  %v1950_v21 = vmax.f32 %v1830_v29, 0.0  ;;  %v17206_v28 = vsel %vm1450_vm0, %v2094_v44, %v2098_v17  ;;  %v2110_v29 = vor.u32 %v2108_v46, %v2098_v17  ;;  %v15549_v17 = vld [vmem:[#allocation6 + $0x2c4] ss:$8 sps:$4 sm:$0xff]  }
 0x21a   :  { %2789 = vmatprep.mubr.bf16.mxu1 %v1999_v14  ;;  %v1951_v47 = vmax.f32 %v1832_v51, 0.0  ;;  %v17209_v62 = vsel %vm1450_vm0, %v2102_v5, %v2106_v31  ;;  %v15529_v14 = vld [vmem:[#allocation6 + $0x2a0] ss:$8 sps:$4 sm:$0xff]   ;;  %v2118_v54 = vor.u32 %v2116_v9, %v2106_v31  ;;  %v15538_v9 = vld [vmem:[#allocation6 + $0x2b0] ss:$8 sps:$4 sm:$0xff]  }
 0x21b   :  { %2917 = vmatpush1.bf16.msra.mxu1 %v15511_v7  ;;  %v2000_v40 = vpack.c.bf16 %v1950_v21, %v1948_v49  ;;  %v15540_v49 = vld [vmem:[#allocation6 + $0x2b4] ss:$8 sps:$4 sm:$0xff]  }
 0x21c   :  { %2918 = vmatprep.subr.bf16.mxu1 %v15522_v8  ;;  %v2001_v23 = vpack.c.bf16 %v1951_v47, %v1949_v61  ;;  %v1835_v33 = vpop.f32.mrb[60].mxu0 }
 0x21d   :  { %v1836_v22 = vadd.f32 %v1835_v33, %v17104_v19  ;;  %v1837_v39 = vpop.f32.mrb[61].mxu0  ;;  %v2112_v57 = vshll.u32 %v2000_v40, 16  ;;  %v2124_v21 = vshrl.u32 %v2000_v40, 16 }
 0x21e   :  { %v1838_v38 = vadd.f32 %v1837_v39, %v17108_v58  ;;  %v1839_v44 = vpop.f32.mrb[62].mxu0  ;;  %v2120_v35 = vshll.u32 %v2001_v23, 16  ;;  %v2132_v33 = vshrl.u32 %v2001_v23, 16 }
 0x21f   :  { %2919 = vmatpush1.bf16.msra.mxu1 %v15520_v11  ;;  %v1952_v7 = vmax.f32 %v1836_v22, 0.0  ;;  %v1840_v5 = vadd.f32 %v1839_v44, %v17104_v19  ;;  %v1841_v16 = vpop.f32.mrb[63].mxu0  ;;  %v2114_v11 = vrot.slane %v2112_v57, 1 }
 0x220   :  { %2920 = vmatprep.subr.bf16.mxu1 %v15531_v10  ;;  %v1953_v8 = vmax.f32 %v1838_v38, 0.0  ;;  %v1842_v61 = vadd.f32 %v1841_v16, %v17108_v58  ;;  %v2122_v51 = vrot.slane %v2120_v35, 1  ;;  %v15547_v16 = vld [vmem:[#allocation6 + $0x2c0] ss:$8 sps:$4 sm:$0xff]  }
 0x221   :  { %2790 = vmatmul.mubr.bf16.gmra.mrb[116].mxu1 %v1998_v12  ;;  %v1954_v47 = vmax.f32 %v1840_v5, 0.0  ;;  %v17219_v46 = vsel %vm1450_vm0, %v2110_v29, %v2114_v11  ;;  %v2126_v35 = vor.u32 %v2124_v21, %v2114_v11  ;;  %v15558_v29 = vld [vmem:[#allocation6 + $0x2d4] ss:$8 sps:$4 sm:$0xff]  }
 0x222   :  { %2799 = vmatprep.mubr.bf16.mxu1 %v2001_v23  ;;  %v1955_v31 = vmax.f32 %v1842_v61, 0.0  ;;  %v17216_v22 = vsel %vm1450_vm0, %v2118_v54, %v2122_v51  ;;  %v2134_v54 = vor.u32 %v2132_v33, %v2122_v51 }
 0x223   :  { %2921 = vmatpush1.bf16.msra.mxu1 %v15529_v14  ;;  %v2002_v10 = vpack.c.bf16 %v1954_v47, %v1952_v7 }
 0x224   :  { %2922 = vmatprep.subr.bf16.mxu1 %v15540_v49  ;;  %v2003_v39 = vpack.c.bf16 %v1955_v31, %v1953_v8  ;;  %v1845_v12 = vpop.f32.mrb[64].mxu0 }
 0x225   :  { %v1846_v38 = vadd.f32 %v1845_v12, %v17104_v19  ;;  %v1847_v44 = vpop.f32.mrb[65].mxu0  ;;  %v2128_v5 = vshll.u32 %v2002_v10, 16  ;;  %v2140_v11 = vshrl.u32 %v2002_v10, 16 }
 0x226   :  { %v1848_v23 = vadd.f32 %v1847_v44, %v17108_v58  ;;  %v1849_v14 = vpop.f32.mrb[66].mxu0  ;;  %v2136_v57 = vshll.u32 %v2003_v39, 16  ;;  %v2148_v51 = vshrl.u32 %v2003_v39, 16 }
 0x227   :  { %2923 = vmatpush1.bf16.msra.mxu1 %v15538_v9  ;;  %v1956_v7 = vmax.f32 %v1846_v38, 0.0  ;;  %v1850_v49 = vadd.f32 %v1849_v14, %v17104_v19  ;;  %v1851_v61 = vpop.f32.mrb[67].mxu0  ;;  %v2130_v8 = vrot.slane %v2128_v5, 1  ;;  %v15556_v38 = vld [vmem:[#allocation6 + $0x2d0] ss:$8 sps:$4 sm:$0xff]  }
 0x228   :  { %2924 = vmatprep.subr.bf16.mxu1 %v15549_v17  ;;  %v1957_v47 = vmax.f32 %v1848_v23, 0.0  ;;  %v1852_v31 = vadd.f32 %v1851_v61, %v17108_v58  ;;  %v2138_v21 = vrot.slane %v2136_v57, 1  ;;  %v15567_v5 = vld [vmem:[#allocation6 + $0x2e4] ss:$8 sps:$4 sm:$0xff]  }
 0x229   :  { %2800 = vmatmul.mubr.bf16.gmra.mrb[120].mxu1 %v2000_v40  ;;  %v1958_v12 = vmax.f32 %v1850_v49, 0.0  ;;  %v17226_v9 = vsel %vm1450_vm0, %v2126_v35, %v2130_v8  ;;  %v2142_v49 = vor.u32 %v2140_v11, %v2130_v8 }
 0x22a   :  { %2809 = vmatprep.mubr.bf16.mxu1 %v2003_v39  ;;  %v1959_v33 = vmax.f32 %v1852_v31, 0.0  ;;  %v17229_v44 = vsel %vm1450_vm0, %v2134_v54, %v2138_v21  ;;  %v15565_v39 = vld [vmem:[#allocation6 + $0x2e0] ss:$8 sps:$4 sm:$0xff]  }
 0x22b   :  { %2925 = vmatpush1.bf16.msra.mxu1 %v15547_v16  ;;  %v2004_v17 = vpack.c.bf16 %v1958_v12, %v1956_v7  ;;  %v2150_v16 = vor.u32 %v2148_v51, %v2138_v21 }
 0x22c   :  { %2926 = vmatprep.subr.bf16.mxu1 %v15558_v29  ;;  %v2005_v23 = vpack.c.bf16 %v1959_v33, %v1957_v47  ;;  %v1855_v14 = vpop.f32.mrb[68].mxu0  ;;  %v15573_v47 = vld [vmem:[#allocation6 + $0x2f4] ss:$8 sps:$4 sm:$0xff]  }
 0x22d   :  { %v1856_v40 = vadd.f32 %v1855_v14, %v17104_v19  ;;  %v1857_v57 = vpop.f32.mrb[69].mxu0  ;;  %v2144_v61 = vshll.u32 %v2004_v17, 16  ;;  %v2156_v11 = vshrl.u32 %v2004_v17, 16 }
 0x22e   :  { %v1858_v35 = vadd.f32 %v1857_v57, %v17108_v58  ;;  %v1859_v0 = vpop.f32.mrb[70].mxu0  ;;  %v2152_v31 = vshll.u32 %v2005_v23, 16  ;;  %v2164_v51 = vshrl.u32 %v2005_v23, 16 }
 0x22f   :  { %2927 = vmatpush1.bf16.msra.mxu1 %v15556_v38  ;;  %v1960_v54 = vmax.f32 %v1856_v40, 0.0  ;;  %v1860_v7 = vadd.f32 %v1859_v0, %v17104_v19  ;;  %v1861_v29 = vpop.f32.mrb[71].mxu0  ;;  %v2146_v12 = vrot.slane %v2144_v61, 1  ;;  %v15571_v0 = vld [vmem:[#allocation6 + $0x2f0] ss:$8 sps:$4 sm:$0xff]  }
 0x230   :  { %2928 = vmatprep.subr.bf16.mxu1 %v15567_v5  ;;  %v1961_v33 = vmax.f32 %v1858_v35, 0.0  ;;  %v1862_v14 = vadd.f32 %v1861_v29, %v17108_v58  ;;  %v2154_v8 = vrot.slane %v2152_v31, 1  ;;  %v15576_v61 = vld [vmem:[#allocation2 + $0xc4] ss:$8 sps:$4 sm:$0xff]  }
 0x231   :  { %2810 = vmatmul.mubr.bf16.gmra.mrb[124].mxu1 %v2002_v10  ;;  %v1962_v57 = vmax.f32 %v1860_v7, 0.0  ;;  %v17236_v21 = vsel %vm1450_vm0, %v2142_v49, %v2146_v12  ;;  %v2158_v7 = vor.u32 %v2156_v11, %v2146_v12 }
 0x232   :  { %2819 = vmatprep.mubr.bf16.mxu1 %v2005_v23  ;;  %v1963_v38 = vmax.f32 %v1862_v14, 0.0  ;;  %v17239_v5 = vsel %vm1450_vm0, %v2150_v16, %v2154_v8  ;;  %v2166_v23 = vor.u32 %v2164_v51, %v2154_v8 }
 0x233   :  { %2929 = vmatpush1.bf16.msra.mxu1 %v15565_v39  ;;  %v2006_v40 = vpack.c.bf16 %v1962_v57, %v1960_v54 }
 0x234   :  { %2930 = vmatprep.subr.bf16.mxu1 %v15573_v47  ;;  %v2007_v35 = vpack.c.bf16 %v1963_v38, %v1961_v33  ;;  %v1865_v10 = vpop.f32.mrb[72].mxu0 }
 0x235   :  { %v1866_v50 = vadd.f32 %v1865_v10, %v17104_v19  ;;  %v1867_v31 = vpop.f32.mrb[73].mxu0  ;;  %v2160_v29 = vshll.u32 %v2006_v40, 16  ;;  %v2172_v38 = vshrl.u32 %v2006_v40, 16 }
 0x236   :  { %v1868_v49 = vadd.f32 %v1867_v31, %v17108_v58  ;;  %v1869_v30 = vpop.f32.mrb[74].mxu0  ;;  %v2168_v39 = vshll.u32 %v2007_v35, 16 }
 0x237   :  { %2931 = vmatpush1.bf16.msra.mxu1 %v15571_v0  ;;  %v1964_v14 = vmax.f32 %v1866_v50, 0.0  ;;  %v1870_v16 = vadd.f32 %v1869_v30, %v17104_v19  ;;  %v1871_v43 = vpop.f32.mrb[75].mxu0  ;;  %v2162_v54 = vrot.slane %v2160_v29, 1  ;;  %v2180_v0 = vshrl.u32 %v2007_v35, 16 }
 0x238   :  { %6191 = vmatprep.subr.bf16.mxu1 %v15576_v61  ;;  %v1965_v47 = vmax.f32 %v1868_v49, 0.0  ;;  %v1872_v33 = vadd.f32 %v1871_v43, %v17108_v58  ;;  %v2170_v57 = vrot.slane %v2168_v39, 1 }
 0x239   :  { %2820 = vmatmul.mubr.bf16.gmra.mrb[128].mxu1 %v2004_v17  ;;  %v1966_v12 = vmax.f32 %v1870_v16, 0.0  ;;  %v17246_v11 = vsel %vm1450_vm0, %v2158_v7, %v2162_v54  ;;  %v2174_v43 = vor.u32 %v2172_v38, %v2162_v54 }
 0x23a   :  { %2829 = vmatprep.mubr.bf16.mxu1 %v2007_v35  ;;  %v1967_v8 = vmax.f32 %v1872_v33, 0.0  ;;  %v17249_v51 = vsel %vm1450_vm0, %v2166_v23, %v2170_v57  ;;  %v2182_v39 = vor.u32 %v2180_v0, %v2170_v57 }
 0x23b   :  { %v2008_v30 = vpack.c.bf16 %v1966_v12, %v1964_v14 }
 0x23c   :  { %v2009_v10 = vpack.c.bf16 %v1967_v8, %v1965_v47  ;;  %v1875_v61 = vpop.f32.mrb[76].mxu0 }
 0x23d   :  { %v1876_v50 = vadd.f32 %v1875_v61, %v17104_v19  ;;  %v1877_v31 = vpop.f32.mrb[77].mxu0  ;;  %v2176_v17 = vshll.u32 %v2008_v30, 16  ;;  %v2188_v12 = vshrl.u32 %v2008_v30, 16 }
 0x23e   :  { %v1878_v29 = vadd.f32 %v1877_v31, %v17108_v58  ;;  %v1879_v49 = vpop.f32.mrb[78].mxu0  ;;  %v2184_v16 = vshll.u32 %v2009_v10, 16  ;;  %v2196_v38 = vshrl.u32 %v2009_v10, 16 }
 0x23f   :  { %v1968_v7 = vmax.f32 %v1876_v50, 0.0  ;;  %v1880_v35 = vadd.f32 %v1879_v49, %v17104_v19  ;;  %v1881_v33 = vpop.f32.mrb[79].mxu0  ;;  %v2178_v13 = vrot.slane %v2176_v17, 1  ;;  %v717_v49 = vld [vmem:[#allocation7] ss:$4 sm:$0x3] }
 0x240   :  { %v1969_v23 = vmax.f32 %v1878_v29, 0.0  ;;  %v1882_v14 = vadd.f32 %v1881_v33, %v17108_v58  ;;  %v2186_v47 = vrot.slane %v2184_v16, 1 }
 0x241   :  { %2830 = vmatmul.mubr.bf16.gmra.mrb[132].mxu1 %v2006_v40  ;;  %v1970_v8 = vmax.f32 %v1880_v35, 0.0  ;;  %v17256_v54 = vsel %vm1450_vm0, %v2174_v43, %v2178_v13  ;;  %v2190_v40 = vor.u32 %v2188_v12, %v2178_v13 }
 0x242   :  { %2839 = vmatprep.mubr.bf16.mxu1 %v2009_v10  ;;  %20037 = vst [vmem:[#allocation43_spill] sm:$0xff] %v17256_v54  ;;  %v1971_v61 = vmax.f32 %v1882_v14, 0.0  ;;  %v17259_v57 = vsel %vm1450_vm0, %v2182_v39, %v2186_v47  ;;  %v2198_v27 = vor.u32 %v2196_v38, %v2186_v47  ;;  %v170_v39 = vadd.s32 24, %v16858_v20 }
 0x243   :  { %20038 = vst [vmem:[#allocation44_spill] sm:$0xff] %v17259_v57  ;;  %v2010_v0 = vpack.c.bf16 %v1970_v8, %v1968_v7  ;;  %v17270_v47 = vrot.slane %v717_v49, %v16871_v60 }
 0x244   :  { %v2011_v50 = vpack.c.bf16 %v1971_v61, %v1969_v23  ;;  %v1885_v31 = vpop.f32.mrb[80].mxu0  ;;  %v17267_v61 = vrot.slane %v717_v49, %v16868_v34 }
 0x245   :  { %v1886_v17 = vadd.f32 %v1885_v31, %v17104_v19  ;;  %v1887_v29 = vpop.f32.mrb[81].mxu0  ;;  %v2192_v16 = vshll.u32 %v2010_v0, 16  ;;  %v2204_v31 = vshrl.u32 %v2010_v0, 16 }
 0x246   :  { %v1888_v35 = vadd.f32 %v1887_v29, %v17108_v58  ;;  %v1889_v33 = vpop.f32.mrb[82].mxu0  ;;  %v2200_v43 = vshll.u32 %v2011_v50, 16 }
 0x247   :  { %v1972_v18 = vmax.f32 %v1886_v17, 0.0  ;;  %v1890_v10 = vadd.f32 %v1889_v33, %v17104_v19  ;;  %v1891_v14 = vpop.f32.mrb[83].mxu0  ;;  %v2194_v7 = vrot.slane %v2192_v16, 1  ;;  %v2212_v17 = vshrl.u32 %v2011_v50, 16 }
 0x248   :  { %v1973_v23 = vmax.f32 %v1888_v35, 0.0  ;;  %v1892_v8 = vadd.f32 %v1891_v14, %v17108_v58  ;;  %v2202_v13 = vrot.slane %v2200_v43, 1  ;;  %v17280_v33 = vand.u32 31, %v170_v39 }
 0x249   :  { %2840 = vmatmul.mubr.bf16.gmra.mrb[136].mxu1 %v2008_v30  ;;  %v1974_v12 = vmax.f32 %v1890_v10, 0.0  ;;  %v17273_v38 = vsel %vm1450_vm0, %v2190_v40, %v2194_v7  ;;  %v2206_v3 = vor.u32 %v2204_v31, %v2194_v7 }
 0x24a   :  { %2849 = vmatprep.mubr.bf16.mxu1 %v2011_v50  ;;  %20039 = vst [vmem:[#allocation45_spill] sm:$0xff] %v17273_v38  ;;  %v1975_v29 = vmax.f32 %v1892_v8, 0.0  ;;  %v17276_v16 = vsel %vm1450_vm0, %v2198_v27, %v2202_v13  ;;  %20041 = vst [vmem:[#allocation47_spill] sm:$0xff] %v17280_v33  ;;  %v2214_v39 = vor.u32 %v2212_v17, %v2202_v13  ;;  %vm1149_vm9 = vcmp.lt.s32.totalorder %v17280_v33, 30 }
 0x24b   :  { %20040 = vst [vmem:[#allocation46_spill] sm:$0xff] %v17276_v16  ;;  %v17278_v35 = vpack.c.bf16 %v1974_v12, %v1972_v18  ;;  %v15591_v16 = vld [vmem:[#allocation6 + $0x414] ss:$8 sps:$4 sm:$0xff]  }
 0x24c   :  { %v923_v30 = vpop.f32.mrb[32].mxu1  ;;  %v17282_v43 = vpack.c.bf16 %v1975_v29, %v1973_v23  ;;  %v1895_v10 = vpop.f32.mrb[84].mxu0 }
 0x24d   :  { %v925_v14 = vpop.f32.mrb[33].mxu1  ;;  %v924_v49 = vadd.f32 %v923_v30, %v17267_v61  ;;  %v1896_v40 = vadd.f32 %v1895_v10, %v17104_v19  ;;  %v1897_v55 = vpop.f32.mrb[85].mxu0  ;;  %v3576_v10 = vld [vmem:[#allocation4 + $0x2] ss:$4 sm:$0x3]  ;;  %v2208_v31 = vshll.u32 %v17278_v35, 16 }
 0x24e   :  { %v927_v36 = vpop.f32.mrb[34].mxu1  ;;  %v926_v50 = vadd.f32 %v925_v14, %v17270_v47  ;;  %v1898_v27 = vadd.f32 %v1897_v55, %v17108_v58  ;;  %v1899_v8 = vpop.f32.mrb[86].mxu0  ;;  %v2216_v63 = vshll.u32 %v17282_v43, 16 }
 0x24f   :  { %v929_v18 = vpop.f32.mrb[35].mxu1  ;;  %v928_v12 = vadd.f32 %v927_v36, %v17267_v61  ;;  %v1976_v23 = vmax.f32 %v1896_v40, 0.0  ;;  %v1900_v29 = vadd.f32 %v1899_v8, %v17104_v19  ;;  %v1901_v48 = vpop.f32.mrb[87].mxu0  ;;  %v1082_v59 = vmax.f32 %v924_v49, 0.0 }
 0x250   :  { %v930_v30 = vadd.f32 %v929_v18, %v17270_v47  ;;  %v1977_v25 = vmax.f32 %v1898_v27, 0.0  ;;  %v1902_v14 = vadd.f32 %v1901_v48, %v17108_v58  ;;  %v1083_v13 = vmax.f32 %v926_v50, 0.0 }
 0x251   :  { %2850 = vmatmul.mubr.bf16.gmra.mrb[140].mxu1 %v2010_v0  ;;  %v1084_v55 = vmax.f32 %v928_v12, 0.0  ;;  %v1978_v36 = vmax.f32 %v1900_v29, 0.0  ;;  %v17297_v40 = vrot.slane %v3576_v10, %v16868_v34  ;;  %v2218_v8 = vrot.slane %v2216_v63, 1 }
 0x252   :  { %v1085_v7 = vmax.f32 %v930_v30, 0.0  ;;  %2859 = vmatprep.mubr.bf16.mxu1 %v17282_v43  ;;  %v1979_v17 = vmax.f32 %v1902_v14, 0.0  ;;  %v174_v18 = vadd.s32 56, %v16858_v20  ;;  %v17302_v12 = vrot.slane %v2208_v31, 1 }
 0x253   :  { %v1306_v49 = vmax.f32 %v1082_v59, %v1084_v55  ;;  %v17299_v27 = vpack.c.bf16 %v1978_v36, %v1976_v23  ;;  %v178_v59 = vadd.s32 88, %v16858_v20  ;;  %v17309_v14 = vsel %vm1450_vm0, %v2214_v39, %v2218_v8 }
 0x254   :  { %v933_v48 = vpop.f32.mrb[36].mxu1  ;;  %v1315_v0 = vmax.f32 %v1083_v13, %v1085_v7  ;;  %v17304_v50 = vpack.c.bf16 %v1979_v17, %v1977_v25  ;;  %v1905_v29 = vpop.f32.mrb[88].mxu0  ;;  %20042 = vst [vmem:[#allocation48_spill] sm:$0xff] %v17309_v14  ;;  %v182_v13 = vadd.s32 120, %v16858_v20  ;;  %v17316_v25 = vsel %vm1450_vm0, %v2206_v3, %v17302_v12 }
 0x255   :  { %v934_v30 = vadd.f32 %v933_v48, %v17267_v61  ;;  %v935_v2 = vpop.f32.mrb[37].mxu1  ;;  %v1906_v63 = vadd.f32 %v1905_v29, %v17104_v19  ;;  %v1907_v23 = vpop.f32.mrb[89].mxu0  ;;  %20043 = vst [vmem:[#allocation49_spill] sm:$0xff] %v17316_v25  ;;  %v2228_v7 = vshrl.u32 %v17282_v43, 16 }
 0x256   :  { %v936_v55 = vadd.f32 %v935_v2, %v17270_v47  ;;  %v937_v36 = vpop.f32.mrb[38].mxu1  ;;  %v1908_v17 = vadd.f32 %v1907_v23, %v17108_v58  ;;  %v1909_v48 = vpop.f32.mrb[90].mxu0 }
 0x257   :  { %v1086_v31 = vmax.f32 %v934_v30, 0.0  ;;  %v938_v39 = vadd.f32 %v937_v36, %v17267_v61  ;;  %v939_v34 = vpop.f32.mrb[39].mxu1  ;;  %v1980_v29 = vmax.f32 %v1906_v63, 0.0  ;;  %v1910_v2 = vadd.f32 %v1909_v48, %v17104_v19  ;;  %v1911_v24 = vpop.f32.mrb[91].mxu0 }
 0x258   :  { %v1087_v37 = vmax.f32 %v936_v55, 0.0  ;;  %v940_v4 = vadd.f32 %v939_v34, %v17270_v47  ;;  %v1981_v1 = vmax.f32 %v1908_v17, 0.0  ;;  %v1912_v26 = vadd.f32 %v1911_v24, %v17108_v58 }
 0x259   :  { %v1307_v42 = vmax.f32 %v1306_v49, %v1086_v31  ;;  %v1088_v3 = vmax.f32 %v938_v39, 0.0  ;;  %2860 = vmatmul.mubr.bf16.gmra.mrb[144].mxu1 %v17278_v35  ;;  %v1982_v30 = vmax.f32 %v1910_v2, 0.0  ;;  %v2232_v63 = vshll.u32 %v17304_v50, 16 }
 0x25a   :  { %v1316_v43 = vmax.f32 %v1315_v0, %v1087_v37  ;;  %v1089_v23 = vmax.f32 %v940_v4, 0.0  ;;  %2869 = vmatprep.mubr.bf16.mxu1 %v17304_v50  ;;  %v1983_v36 = vmax.f32 %v1912_v26, 0.0  ;;  %v17330_v34 = vrot.slane %v3576_v10, %v16871_v60 }
 0x25b   :  { %v1248_v55 = vsel %vm1149_vm9, %v1088_v3, 0.0  ;;  %v17332_v49 = vand.u32 31, %v174_v18  ;;  %v17334_v31 = vpack.c.bf16 %v1982_v30, %v1980_v29  ;;  %v17338_v0 = vand.u32 31, %v178_v59 }
 0x25c   :  { %v1308_v24 = vmax.f32 %v1307_v42, %v1248_v55  ;;  %v1249_v37 = vsel %vm1149_vm9, %v1089_v23, 0.0  ;;  %v943_v4 = vpop.f32.mrb[40].mxu1  ;;  %v2220_v17 = vshrl.u32 %v17278_v35, 16  ;;  %v17341_v48 = vpack.c.bf16 %v1983_v36, %v1981_v1  ;;  %v1915_v26 = vpop.f32.mrb[92].mxu0 }
 0x25d   :  { %20044 = vst [vmem:[#allocation50_spill] sm:$0xff] %v17332_v49  ;;  %20045 = vst [vmem:[#allocation51_spill] sm:$0xff] %v17338_v0  ;;  %v1317_v39 = vmax.f32 %v1316_v43, %v1249_v37  ;;  %v945_v2 = vpop.f32.mrb[41].mxu1  ;;  %v17343_v10 = vand.u32 31, %v182_v13  ;;  %v1916_v29 = vadd.f32 %v1915_v26, %v17104_v19  ;;  %v1917_v3 = vpop.f32.mrb[93].mxu0  ;;  %v2230_v30 = vor.u32 %v2228_v7, %v2218_v8 }
 0x25e   :  { %v1309_v18 = vrot.slane %v1308_v24, 4  ;;  %v947_v42 = vpop.f32.mrb[42].mxu1  ;;  %v17346_v55 = vrot.slane %v2232_v63, 1  ;;  %v1918_v59 = vadd.f32 %v1917_v3, %v17108_v58  ;;  %v1919_v33 = vpop.f32.mrb[94].mxu0  ;;  %v944_v1 = vadd.f32 %v943_v4, %v17267_v61 }
 0x25f   :  { %20046 = vst [vmem:[#allocation52_spill] sm:$0xff] %v17343_v10  ;;  %v1318_v23 = vrot.slane %v1317_v39, 4  ;;  %v949_v35 = vpop.f32.mrb[43].mxu1  ;;  %v2224_v43 = vshll.u32 %v17299_v27, 16  ;;  %v1984_v13 = vmax.f32 %v1916_v29, 0.0  ;;  %v1920_v37 = vadd.f32 %v1919_v33, %v17104_v19  ;;  %v1921_v60 = vpop.f32.mrb[95].mxu0 }
 0x260   :  { %v1310_v36 = vmax.f32 %v1308_v24, %v1309_v18  ;;  %v946_v26 = vadd.f32 %v945_v2, %v17270_v47  ;;  %v1985_v8 = vmax.f32 %v1918_v59, 0.0  ;;  %v1922_v7 = vadd.f32 %v1921_v60, %v17108_v58 }
 0x261   :  { %v1319_v25 = vmax.f32 %v1317_v39, %v1318_v23  ;;  %v948_v63 = vadd.f32 %v947_v42, %v17267_v61  ;;  %2870 = vmatmul.mubr.bf16.gmra.mrb[148].mxu1 %v17299_v27  ;;  %v1986_v4 = vmax.f32 %v1920_v37, 0.0  ;;  %v950_v14 = vadd.f32 %v949_v35, %v17270_v47 }
 0x262   :  { %v1311_v3 = vrot.slane %v1310_v36, 2  ;;  %2879 = vmatprep.mubr.bf16.mxu1 %v17341_v48  ;;  %v17360_v19 = vsel %vm1450_vm0, %v2230_v30, %v17346_v55  ;;  %v1090_v24 = vmax.f32 %v944_v1, 0.0  ;;  %v1987_v39 = vmax.f32 %v1922_v7, 0.0 }
 0x263   :  { %20047 = vst [vmem:[#allocation53_spill] sm:$0xff] %v17360_v19  ;;  %v1320_v33 = vrot.slane %v1319_v25, 2  ;;  %v1092_v2 = vmax.f32 %v948_v63, 0.0  ;;  %vm1153_vm10 = vcmp.lt.s32.totalorder %v17332_v49, 30  ;;  %v17363_v58 = vpack.c.bf16 %v1986_v4, %v1984_v13 }
 0x264   :  { %v1312_v60 = vmax.f32 %v1310_v36, %v1311_v3  ;;  %v1091_v18 = vmax.f32 %v946_v26, 0.0  ;;  %v1093_v29 = vmax.f32 %v950_v14, 0.0  ;;  %v953_v42 = vpop.f32.mrb[44].mxu1  ;;  %v17365_v59 = vpack.c.bf16 %v1987_v39, %v1985_v8  ;;  %v3715_v37 = vpop.f32.mrb[96].mxu0 }
 0x265   :  { %v1321_v23 = vmax.f32 %v1319_v25, %v1320_v33  ;;  %v1324_v35 = vmax.f32 %v1090_v24, %v1092_v2  ;;  %v954_v30 = vadd.f32 %v953_v42, %v17267_v61  ;;  %v955_v19 = vpop.f32.mrb[45].mxu1  ;;  %v2236_v1 = vshrl.u32 %v17299_v27, 16  ;;  %v3717_v13 = vpop.f32.mrb[97].mxu0 }
 0x266   :  { %v2244_v7 = vshrl.u32 %v17304_v50, 16  ;;  %v1333_v63 = vmax.f32 %v1091_v18, %v1093_v29  ;;  %v3716_v36 = vadd.f32 %v3715_v37, %v17297_v40  ;;  %v957_v3 = vpop.f32.mrb[46].mxu1  ;;  %v3718_v14 = vadd.f32 %v3717_v13, %v17330_v34  ;;  %v3719_v26 = vpop.f32.mrb[98].mxu0 }
 0x267   :  { %v1094_v25 = vmax.f32 %v954_v30, 0.0  ;;  %v959_v8 = vpop.f32.mrb[47].mxu1  ;;  %v2222_v4 = vor.u32 %v2220_v17, %v17302_v12  ;;  %v2226_v33 = vrot.slane %v2224_v43, 1  ;;  %v1313_v24 = vrot.slane %v1312_v60, 1  ;;  %v3721_v2 = vpop.f32.mrb[99].mxu0 }
 0x268   :  { %v3720_v27 = vadd.f32 %v3719_v26, %v17297_v40  ;;  %v956_v50 = vadd.f32 %v955_v19, %v17270_v47  ;;  %v1322_v18 = vrot.slane %v1321_v23, 1  ;;  %v3874_v29 = vmax.f32 %v3716_v36, 0.0 }
 0x269   :  { %v1325_v42 = vmax.f32 %v1324_v35, %v1094_v25  ;;  %v3722_v37 = vadd.f32 %v3721_v2, %v17330_v34  ;;  %2880 = vmatmul.mubr.bf16.gmra.mrb[152].mxu1 %v17334_v31  ;;  %v958_v12 = vadd.f32 %v957_v3, %v17267_v61  ;;  %v960_v17 = vadd.f32 %v959_v8, %v17270_v47 }
 0x26a   :  { %v3876_v30 = vmax.f32 %v3720_v27, 0.0  ;;  %v1095_v13 = vmax.f32 %v956_v50, 0.0  ;;  %2889 = vmatprep.mubr.bf16.mxu1 %v17365_v59  ;;  %v3875_v43 = vmax.f32 %v3718_v14, 0.0  ;;  %v17382_v39 = vsel %vm1450_vm0, %v2222_v4, %v2226_v33 }
 0x26b   :  { %v3877_v26 = vmax.f32 %v3722_v37, 0.0  ;;  %20048 = vst [vmem:[#allocation54_spill] sm:$0xff] %v17382_v39  ;;  %v2248_v19 = vshll.u32 %v17341_v48, 16  ;;  %v1096_v25 = vmax.f32 %v958_v12, 0.0  ;;  %v1097_v2 = vmax.f32 %v960_v17, 0.0 }
 0x26c   :  { %v17385_v35 = vpack.c.bf16 %v3876_v30, %v3874_v29  ;;  %v1334_v36 = vmax.f32 %v1333_v63, %v1095_v13  ;;  %v963_v27 = vpop.f32.mrb[48].mxu1  ;;  %v17387_v50 = vmax.f32 %v1312_v60, %v1313_v24  ;;  %v3725_v8 = vpop.f32.mrb[100].mxu0  ;;  %v15586_v37 = vld [vmem:[#allocation6 + $0x400] ss:$8 sps:$4 sm:$0xff]   ;;  %v2246_v4 = vor.u32 %v2244_v7, %v17346_v55 }
 0x26d   :  { %v17389_v3 = vpack.c.bf16 %v3877_v26, %v3875_v43  ;;  %v964_v38 = vadd.f32 %v963_v27, %v17267_v61  ;;  %v965_v14 = vpop.f32.mrb[49].mxu1  ;;  %v17393_v39 = vmax.f32 %v1321_v23, %v1322_v18  ;;  %v1256_v63 = vsel %vm1153_vm10, %v1096_v25, 0.0  ;;  %v3727_v60 = vpop.f32.mrb[101].mxu0 }
 0x26e   :  { %20049 = vst [vmem:[#allocation55_spill] sm:$0xff] %v17385_v35  ;;  %v1257_v29 = vsel %vm1153_vm10, %v1097_v2, 0.0  ;;  %v967_v24 = vpop.f32.mrb[50].mxu1  ;;  %v17399_v30 = vrot.slane %v2248_v19, 1  ;;  %v1326_v13 = vmax.f32 %v1325_v42, %v1256_v63  ;;  %v3726_v17 = vadd.f32 %v3725_v8, %v17297_v40  ;;  %v3729_v26 = vpop.f32.mrb[102].mxu0 }
 0x26f   :  { %20050 = vst [vmem:[#allocation56_spill] sm:$0xff] %v17389_v3  ;;  %v1335_v12 = vmax.f32 %v1334_v36, %v1257_v29  ;;  %v3728_v43 = vadd.f32 %v3727_v60, %v17330_v34  ;;  %5013 = vmatprep.mubr.bf16.mxu0 %v17389_v3  ;;  %v969_v55 = vpop.f32.mrb[51].mxu1  ;;  %v3730_v23 = vadd.f32 %v3729_v26, %v17297_v40  ;;  %v3731_v7 = vpop.f32.mrb[103].mxu0  ;;  %v2240_v42 = vshll.u32 %v17334_v31, 16  ;;  %v15589_v8 = vld [vmem:[#allocation6 + $0x410] ss:$8 sps:$4 sm:$0xff]  }
 0x270   :  { %5014 = vmatmul.mubr.bf16.vlgmr.msra.gmra.mrb[160].mxu0 %v17385_v35  ;;  %v966_v18 = vadd.f32 %v965_v14, %v17270_v47  ;;  %v17407_v25 = vor.u32 %v2236_v1, %v2226_v33  ;;  %v1327_v19 = vrot.slane %v1326_v13, 4  ;;  %v3878_v2 = vmax.f32 %v3726_v17, 0.0  ;;  %v15594_v1 = vld [vmem:[#allocation6 + $0x424] ss:$8 sps:$4 sm:$0xff]  }
 0x271   :  { %v1336_v36 = vrot.slane %v1335_v12, 4  ;;  %v1098_v27 = vmax.f32 %v964_v38, 0.0  ;;  %2890 = vmatmul.mubr.bf16.gmra.mrb[156].mxu1 %v17363_v58  ;;  %5175 = vmatpush1.bf16.msra.mxu0 %v15586_v37  ;;  %v3879_v63 = vmax.f32 %v3728_v43, 0.0  ;;  %v3880_v29 = vmax.f32 %v3730_v23, 0.0 }
 0x272   :  { %v3732_v60 = vadd.f32 %v3731_v7, %v17330_v34  ;;  %v968_v26 = vadd.f32 %v967_v24, %v17267_v61  ;;  %2932 = vmatprep.mubr.bf16.mxu1 %v17156_v53  ;;  %5176 = vmatprep.subr.bf16.mxu0 %v15591_v16  ;;  %v1328_v33 = vmax.f32 %v1326_v13, %v1327_v19  ;;  %vm1157_vm12 = vcmp.lt.s32.totalorder %v17338_v0, 30 }
 0x273   :  { %v1337_v14 = vmax.f32 %v1335_v12, %v1336_v36  ;;  %v970_v17 = vadd.f32 %v969_v55, %v17270_v47  ;;  %v17418_v38 = vsel %vm1450_vm0, %v2246_v4, %v17399_v30  ;;  %v17420_v37 = vpack.c.bf16 %v3880_v29, %v3878_v2 }
 0x274   :  { %20051 = vst [vmem:[#allocation57_spill] sm:$0xff] %v17418_v38  ;;  %v3881_v43 = vmax.f32 %v3732_v60, 0.0  ;;  %v1099_v23 = vmax.f32 %v966_v18, 0.0  ;;  %v1100_v24 = vmax.f32 %v968_v26, 0.0  ;;  %v973_v7 = vpop.f32.mrb[52].mxu1  ;;  %v1329_v53 = vrot.slane %v1328_v33, 2 }
 0x275   :  { %20052 = vst [vmem:[#allocation58_spill] sm:$0xff] %v17420_v37  ;;  %v1338_v49 = vrot.slane %v1337_v14, 2  ;;  %v1101_v16 = vmax.f32 %v970_v17, 0.0  ;;  %v3735_v35 = vpop.f32.mrb[104].mxu0  ;;  %v974_v13 = vadd.f32 %v973_v7, %v17267_v61  ;;  %v975_v12 = vpop.f32.mrb[53].mxu1  ;;  %5177 = vmatpush1.bf16.msra.mxu0 %v15589_v8  ;;  %vm1161_vm13 = vcmp.lt.s32.totalorder %v17343_v10, 30 }
 0x276   :  { %v17423_v55 = vpack.c.bf16 %v3881_v43, %v3879_v63  ;;  %v3736_v19 = vadd.f32 %v3735_v35, %v17297_v40  ;;  %v3737_v4 = vpop.f32.mrb[105].mxu0  ;;  %v1342_v36 = vmax.f32 %v1098_v27, %v1100_v24  ;;  %v976_v2 = vadd.f32 %v975_v12, %v17270_v47  ;;  %v977_v29 = vpop.f32.mrb[54].mxu1  ;;  %v15574_v18 = vld [vmem:[#allocation2 + $0xc0] ss:$8 sps:$4 sm:$0xff]   ;;  %v15579_v60 = vld [vmem:[#allocation2 + $0xd4] ss:$8 sps:$4 sm:$0xff]   ;;  %5178 = vmatprep.subr.bf16.mxu0 %v15594_v1 }
 0x277   :  { %v1330_v26 = vmax.f32 %v1328_v33, %v1329_v53  ;;  %v1339_v3 = vmax.f32 %v1337_v14, %v1338_v49  ;;  %v3738_v17 = vadd.f32 %v3737_v4, %v17330_v34  ;;  %v3739_v38 = vpop.f32.mrb[106].mxu0  ;;  %v1102_v7 = vmax.f32 %v974_v13, 0.0  ;;  %v979_v54 = vpop.f32.mrb[55].mxu1  ;;  %v15592_v8 = vld [vmem:[#allocation6 + $0x420] ss:$8 sps:$4 sm:$0xff]  }
 0x278   :  { %20053 = vst [vmem:[#allocation59_spill] sm:$0xff] %v17423_v55  ;;  %v3740_v63 = vadd.f32 %v3739_v38, %v17297_v40  ;;  %5023 = vmatprep.mubr.bf16.mxu0 %v17423_v55  ;;  %v3741_v35 = vpop.f32.mrb[107].mxu0  ;;  %v1103_v27 = vmax.f32 %v976_v2, 0.0  ;;  %v1351_v43 = vmax.f32 %v1099_v23, %v1101_v16  ;;  %v15597_v24 = vld [vmem:[#allocation6 + $0x434] ss:$8 sps:$4 sm:$0xff]   ;;  %v17430_v12 = vrot.slane %v2240_v42, 1 }
 0x279   :  { %v1331_v57 = vrot.slane %v1330_v26, 1  ;;  %v1340_v1 = vrot.slane %v1339_v3, 1  ;;  %v3882_v33 = vmax.f32 %v3736_v19, 0.0  ;;  %v1343_v49 = vmax.f32 %v1342_v36, %v1102_v7  ;;  %5024 = vmatmul.mubr.bf16.gmra.mrb[164].mxu0 %v17420_v37  ;;  %2933 = vmatmul.mubr.bf16.vlgmr.msra.gmra.mrb[96].mxu1 %v17152_v6  ;;  %v15577_v23 = vld [vmem:[#allocation2 + $0xd0] ss:$8 sps:$4 sm:$0xff]  }
 0x27a   :  { %v3884_v14 = vmax.f32 %v3740_v63, 0.0  ;;  %v3742_v53 = vadd.f32 %v3741_v35, %v17330_v34  ;;  %v1352_v38 = vmax.f32 %v1351_v43, %v1103_v27  ;;  %v978_v13 = vadd.f32 %v977_v29, %v17267_v61  ;;  %6192 = vmatpush1.bf16.msra.mxu1 %v15574_v18  ;;  %2942 = vmatprep.mubr.bf16.mxu1 %v17173_v45  ;;  %v15582_v36 = vld [vmem:[#allocation2 + $0xe4] ss:$8 sps:$4 sm:$0xff]   ;;  %v15595_v2 = vld [vmem:[#allocation6 + $0x430] ss:$8 sps:$4 sm:$0xff]  }
 0x27b   :  { %v1332_v42 = vmax.f32 %v1330_v26, %v1331_v57  ;;  %v1341_v16 = vmax.f32 %v1339_v3, %v1340_v1  ;;  %v3883_v4 = vmax.f32 %v3738_v17, 0.0  ;;  %v980_v19 = vadd.f32 %v979_v54, %v17270_v47  ;;  %6193 = vmatprep.subr.bf16.mxu1 %v15579_v60  ;;  %5179 = vmatpush1.bf16.msra.mxu0 %v15592_v8  ;;  %v15603_v29 = vld [vmem:[#allocation6 + $0x444] ss:$8 sps:$4 sm:$0xff]   ;;  %v15580_v17 = vld [vmem:[#allocation2 + $0xe0] ss:$8 sps:$4 sm:$0xff]  }
 0x27c   :  { %v17438_v6 = vpack.c.bf16 %v3884_v14, %v3882_v33  ;;  %v3885_v7 = vmax.f32 %v3742_v53, 0.0  ;;  %v1104_v63 = vmax.f32 %v978_v13, 0.0  ;;  %v983_v35 = vpop.f32.mrb[56].mxu1  ;;  %5180 = vmatprep.subr.bf16.mxu0 %v15597_v24  ;;  %v17443_v45 = vsel %vm1450_vm0, %v17407_v25, %v17430_v12  ;;  %v3745_v18 = vpop.f32.mrb[108].mxu0  ;;  %v15585_v1 = vld [vmem:[#allocation2 + $0xf4] ss:$8 sps:$4 sm:$0xff]  }
 0x27d   :  { %v17447_v57 = vsel %vm9001_vm11, %v1332_v42, %v17387_v50  ;;  %v1105_v54 = vmax.f32 %v980_v19, 0.0  ;;  %v17451_v3 = vsel %vm9001_vm11, %v1341_v16, %v17393_v39  ;;  %v984_v60 = vadd.f32 %v983_v35, %v17267_v61  ;;  %v985_v26 = vpop.f32.mrb[57].mxu1  ;;  %v3747_v43 = vpop.f32.mrb[109].mxu0  ;;  %v15601_v42 = vld [vmem:[#allocation6 + $0x440] ss:$8 sps:$4 sm:$0xff]  }
 0x27e   :  { %20054 = vst [vmem:[#allocation60_spill] sm:$0xff] %v17438_v6  ;;  %v17454_v8 = vpack.c.bf16 %v3885_v7, %v3883_v4  ;;  %v1264_v25 = vsel %vm1157_vm12, %v1104_v63, 0.0  ;;  %v3746_v27 = vadd.f32 %v3745_v18, %v17297_v40  ;;  %v986_v50 = vadd.f32 %v985_v26, %v17270_v47  ;;  %v987_v24 = vpop.f32.mrb[58].mxu1  ;;  %6194 = vmatpush1.bf16.msra.mxu1 %v15577_v23  ;;  %v3749_v53 = vpop.f32.mrb[110].mxu0  ;;  %v15606_v63 = vld [vmem:[#allocation6 + $0x454] ss:$8 sps:$4 sm:$0xff]  }
 0x27f   :  { %v1344_v39 = vmax.f32 %v1343_v49, %v1264_v25  ;;  %v1265_v33 = vsel %vm1157_vm12, %v1105_v54, 0.0  ;;  %v3748_v14 = vadd.f32 %v3747_v43, %v17330_v34  ;;  %v989_v13 = vpop.f32.mrb[59].mxu1  ;;  %6195 = vmatprep.subr.bf16.mxu1 %v15582_v36  ;;  %5181 = vmatpush1.bf16.msra.mxu0 %v15595_v2  ;;  %v2264_v16 = vshll.u32 %v17365_v59, 16  ;;  %v3751_v49 = vpop.f32.mrb[111].mxu0 }
 0x280   :  { %20055 = vst [vmem:[#allocation61_spill] sm:$0xff] %v17454_v8  ;;  %v1353_v4 = vmax.f32 %v1352_v38, %v1265_v33  ;;  %v3886_v19 = vmax.f32 %v3746_v27, 0.0  ;;  %v3750_v7 = vadd.f32 %v3749_v53, %v17297_v40  ;;  %5033 = vmatprep.mubr.bf16.mxu0 %v17454_v8  ;;  %v1106_v23 = vmax.f32 %v984_v60, 0.0  ;;  %5182 = vmatprep.subr.bf16.mxu0 %v15603_v29  ;;  %v15583_v29 = vld [vmem:[#allocation2 + $0xf0] ss:$8 sps:$4 sm:$0xff]  }
 0x281   :  { %v1345_v35 = vrot.slane %v1344_v39, 4  ;;  %v3752_v54 = vadd.f32 %v3751_v49, %v17330_v34  ;;  %5034 = vmatmul.mubr.bf16.gmra.mrb[168].mxu0 %v17438_v6  ;;  %v1107_v36 = vmax.f32 %v986_v50, 0.0  ;;  %v988_v2 = vadd.f32 %v987_v24, %v17267_v61  ;;  %2943 = vmatmul.mubr.bf16.gmra.mrb[100].mxu1 %v17169_v52  ;;  %v15600_v50 = vld [vmem:[#allocation2 + $0x104] ss:$8 sps:$4 sm:$0xff]  }
 0x282   :  { %v1354_v38 = vrot.slane %v1353_v4, 4  ;;  %v3887_v18 = vmax.f32 %v3748_v14, 0.0  ;;  %v3888_v26 = vmax.f32 %v3750_v7, 0.0  ;;  %v990_v60 = vadd.f32 %v989_v13, %v17270_v47  ;;  %2952 = vmatprep.mubr.bf16.mxu1 %v17189_v32  ;;  %6196 = vmatpush1.bf16.msra.mxu1 %v15580_v17  ;;  %v15604_v13 = vld [vmem:[#allocation6 + $0x450] ss:$8 sps:$4 sm:$0xff]  }
 0x283   :  { %v1346_v25 = vmax.f32 %v1344_v39, %v1345_v35  ;;  %v3889_v27 = vmax.f32 %v3752_v54, 0.0  ;;  %v1108_v43 = vmax.f32 %v988_v2, 0.0  ;;  %6197 = vmatprep.subr.bf16.mxu1 %v15585_v1  ;;  %5183 = vmatpush1.bf16.msra.mxu0 %v15601_v42  ;;  %v20056_v52 = vshrl.u32 %v17341_v48, 16  ;;  %v15609_v54 = vld [vmem:[#allocation6 + $0x464] ss:$8 sps:$4 sm:$0xff]  }
 0x284   :  { %v1355_v33 = vmax.f32 %v1353_v4, %v1354_v38  ;;  %v17476_v53 = vpack.c.bf16 %v3888_v26, %v3886_v19  ;;  %v1109_v14 = vmax.f32 %v990_v60, 0.0  ;;  %v993_v7 = vpop.f32.mrb[60].mxu1  ;;  %5184 = vmatprep.subr.bf16.mxu0 %v15606_v63  ;;  %v17478_v32 = vrot.slane %v2264_v16, 1  ;;  %v3755_v1 = vpop.f32.mrb[112].mxu0  ;;  %v15598_v16 = vld [vmem:[#allocation2 + $0x100] ss:$8 sps:$4 sm:$0xff]  }
 0x285   :  { %v2262_v24 = vor.u32 %v20056_v52, %v17399_v30  ;;  %v1347_v17 = vrot.slane %v1346_v25, 2  ;;  %v17480_v39 = vpack.c.bf16 %v3889_v27, %v3887_v18  ;;  %v1360_v49 = vmax.f32 %v1106_v23, %v1108_v43  ;;  %v995_v35 = vpop.f32.mrb[61].mxu1  ;;  %v3757_v19 = vpop.f32.mrb[113].mxu0 }
 0x286   :  { %v994_v42 = vadd.f32 %v993_v7, %v17267_v61  ;;  %v1356_v48 = vrot.slane %v1355_v33, 2  ;;  %v1369_v30 = vmax.f32 %v1107_v36, %v1109_v14  ;;  %v3756_v4 = vadd.f32 %v3755_v1, %v17297_v40  ;;  %v997_v38 = vpop.f32.mrb[62].mxu1  ;;  %6198 = vmatpush1.bf16.msra.mxu1 %v15583_v29  ;;  %v3759_v26 = vpop.f32.mrb[114].mxu0  ;;  %v15615_v36 = vld [vmem:[#allocation2 + $0x114] ss:$8 sps:$4 sm:$0xff]  }
 0x287   :  { %20057 = vst [vmem:[#allocation62_spill] sm:$0xff] %v17480_v39  ;;  %v996_v2 = vadd.f32 %v995_v35, %v17270_v47  ;;  %v1348_v63 = vmax.f32 %v1346_v25, %v1347_v17  ;;  %v3758_v18 = vadd.f32 %v3757_v19, %v17330_v34  ;;  %5043 = vmatprep.mubr.bf16.mxu0 %v17480_v39  ;;  %v999_v27 = vpop.f32.mrb[63].mxu1  ;;  %v3761_v7 = vpop.f32.mrb[115].mxu0  ;;  %v15607_v29 = vld [vmem:[#allocation6 + $0x460] ss:$8 sps:$4 sm:$0xff]   ;;  %vm9009_vm9 = vcmask 1045509  }
 0x288   :  { %v1110_v23 = vmax.f32 %v994_v42, 0.0  ;;  %v998_v60 = vadd.f32 %v997_v38, %v17267_v61  ;;  %6199 = vmatprep.subr.bf16.mxu1 %v15600_v50  ;;  %v1357_v43 = vmax.f32 %v1355_v33, %v1356_v48  ;;  %v3890_v52 = vmax.f32 %v3756_v4, 0.0  ;;  %5185 = vmatpush1.bf16.msra.mxu0 %v15604_v13  ;;  %v15612_v42 = vld [vmem:[#allocation6 + $0x474] ss:$8 sps:$4 sm:$0xff]   ;;  %v15613_v4 = vld [vmem:[#allocation2 + $0x110] ss:$8 sps:$4 sm:$0xff]  }
 0x289   :  { %v3760_v14 = vadd.f32 %v3759_v26, %v17297_v40  ;;  %v1111_v1 = vmax.f32 %v996_v2, 0.0  ;;  %v1349_v25 = vrot.slane %v1348_v63, 1  ;;  %v3891_v17 = vmax.f32 %v3758_v18, 0.0  ;;  %5044 = vmatmul.mubr.bf16.gmra.mrb[172].mxu0 %v17476_v53  ;;  %2953 = vmatmul.mubr.bf16.gmra.mrb[104].mxu1 %v17186_v56 }
 0x28a   :  { %v1361_v35 = vmax.f32 %v1360_v49, %v1110_v23  ;;  %v3762_v19 = vadd.f32 %v3761_v7, %v17330_v34  ;;  %v1358_v50 = vrot.slane %v1357_v43, 1  ;;  %v1112_v48 = vmax.f32 %v998_v60, 0.0  ;;  %2962 = vmatprep.mubr.bf16.mxu1 %v17196_v41  ;;  %6200 = vmatpush1.bf16.msra.mxu1 %v15598_v16  ;;  %v15630_v49 = vld [vmem:[#allocation2 + $0x124] ss:$8 sps:$4 sm:$0xff]  }
 0x28b   :  { %v3892_v38 = vmax.f32 %v3760_v14, 0.0  ;;  %v1370_v33 = vmax.f32 %v1369_v30, %v1111_v1  ;;  %v1350_v13 = vmax.f32 %v1348_v63, %v1349_v25  ;;  %v1000_v18 = vadd.f32 %v999_v27, %v17270_v47  ;;  %5186 = vmatprep.subr.bf16.mxu0 %v15609_v54  ;;  %6201 = vmatprep.subr.bf16.mxu1 %v15615_v36  ;;  %v15610_v63 = vld [vmem:[#allocation6 + $0x470] ss:$8 sps:$4 sm:$0xff]   ;;  %v15618_v25 = vld [vmem:[#allocation6 + $0x484] ss:$8 sps:$4 sm:$0xff]  }
 0x28c   :  { %v3893_v2 = vmax.f32 %v3762_v19, 0.0  ;;  %v17496_v26 = vsel %vm1450_vm0, %v2262_v24, %v17478_v32  ;;  %v1359_v56 = vmax.f32 %v1357_v43, %v1358_v50  ;;  %v1272_v30 = vsel %vm1161_vm13, %v1112_v48, 0.0  ;;  %v1003_v41 = vpop.f32.mrb[64].mxu1  ;;  %5187 = vmatpush1.bf16.msra.mxu0 %v15607_v29  ;;  %v3765_v36 = vpop.f32.mrb[116].mxu0 }
 0x28d   :  { %v17498_v23 = vpack.c.bf16 %v3892_v38, %v3890_v52  ;;  %v186_v16 = vadd.s32 152, %v16858_v20  ;;  %v17505_v54 = vsel %vm9003_vm14, %v1350_v13, %v17447_v57  ;;  %v1362_v27 = vmax.f32 %v1361_v35, %v1272_v30  ;;  %v1005_v43 = vpop.f32.mrb[65].mxu1  ;;  %5188 = vmatprep.subr.bf16.mxu0 %v15612_v42  ;;  %v3767_v7 = vpop.f32.mrb[117].mxu0  ;;  %v15628_v38 = vld [vmem:[#allocation2 + $0x120] ss:$8 sps:$4 sm:$0xff]  }
 0x28e   :  { %v17507_v60 = vpack.c.bf16 %v3893_v2, %v3891_v17  ;;  %v1113_v24 = vmax.f32 %v1000_v18, 0.0  ;;  %v17511_v52 = vsel %vm9003_vm14, %v1359_v56, %v17451_v3  ;;  %v3766_v14 = vadd.f32 %v3765_v36, %v17297_v40  ;;  %v1007_v57 = vpop.f32.mrb[66].mxu1  ;;  %6202 = vmatpush1.bf16.msra.mxu1 %v15613_v4  ;;  %v3769_v42 = vpop.f32.mrb[118].mxu0  ;;  %v15616_v18 = vld [vmem:[#allocation6 + $0x480] ss:$8 sps:$4 sm:$0xff]  }
 0x28f   :  { %v1004_v1 = vadd.f32 %v1003_v41, %v17267_v61  ;;  %v1006_v29 = vadd.f32 %v1005_v43, %v17270_v47  ;;  %v1363_v17 = vrot.slane %v1362_v27, 4  ;;  %v3768_v19 = vadd.f32 %v3767_v7, %v17330_v34  ;;  %v1009_v50 = vpop.f32.mrb[67].mxu1  ;;  %6203 = vmatprep.subr.bf16.mxu1 %v15630_v49  ;;  %v3771_v2 = vpop.f32.mrb[119].mxu0  ;;  %v15645_v56 = vld [vmem:[#allocation2 + $0x134] ss:$8 sps:$4 sm:$0xff]  }
 0x290   :  { %20058 = vst [vmem:[#allocation63_spill] sm:$0xff] %v17507_v60  ;;  %v1273_v35 = vsel %vm1161_vm13, %v1113_v24, 0.0  ;;  %5053 = vmatprep.mubr.bf16.mxu0 %v17507_v60  ;;  %v1008_v3 = vadd.f32 %v1007_v57, %v17267_v61  ;;  %v3770_v13 = vadd.f32 %v3769_v42, %v17297_v40  ;;  %v17522_v4 = vand.u32 31, %v186_v16  ;;  %5189 = vmatpush1.bf16.msra.mxu0 %v15610_v63  ;;  %v15621_v43 = vld [vmem:[#allocation6 + $0x494] ss:$8 sps:$4 sm:$0xff]  }
 0x291   :  { %v1371_v48 = vmax.f32 %v1370_v33, %v1273_v35  ;;  %v1364_v30 = vmax.f32 %v1362_v27, %v1363_v17  ;;  %v3894_v41 = vmax.f32 %v3766_v14, 0.0  ;;  %v1114_v24 = vmax.f32 %v1004_v1, 0.0  ;;  %5054 = vmatmul.mubr.bf16.gmra.mrb[176].mxu0 %v17498_v23  ;;  %2963 = vmatmul.mubr.bf16.gmra.mrb[108].mxu1 %v17199_v15  ;;  %v15643_v1 = vld [vmem:[#allocation2 + $0x130] ss:$8 sps:$4 sm:$0xff]  }
 0x292   :  { %20059 = vst [vmem:[#allocation64_spill] sm:$0xff] %v17522_v4  ;;  %v3772_v36 = vadd.f32 %v3771_v2, %v17330_v34  ;;  %v3896_v33 = vmax.f32 %v3770_v13, 0.0  ;;  %v1116_v7 = vmax.f32 %v1008_v3, 0.0  ;;  %v1010_v57 = vadd.f32 %v1009_v50, %v17270_v47  ;;  %2972 = vmatprep.mubr.bf16.mxu1 %v17209_v62  ;;  %5190 = vmatprep.subr.bf16.mxu0 %v15618_v25  ;;  %v15619_v13 = vld [vmem:[#allocation6 + $0x490] ss:$8 sps:$4 sm:$0xff]  }
 0x293   :  { %v1372_v49 = vrot.slane %v1371_v48, 4  ;;  %v1365_v16 = vrot.slane %v1364_v30, 2  ;;  %v3895_v63 = vmax.f32 %v3768_v19, 0.0  ;;  %v1115_v14 = vmax.f32 %v1006_v29, 0.0  ;;  %6204 = vmatpush1.bf16.msra.mxu1 %v15628_v38 }
 0x294   :  { %v3897_v27 = vmax.f32 %v3772_v36, 0.0  ;;  %v17529_v35 = vpack.c.bf16 %v3896_v33, %v3894_v41  ;;  %v1378_v42 = vmax.f32 %v1114_v24, %v1116_v7  ;;  %v1117_v15 = vmax.f32 %v1010_v57, 0.0  ;;  %v1013_v2 = vpop.f32.mrb[68].mxu1  ;;  %5191 = vmatpush1.bf16.msra.mxu0 %v15616_v18  ;;  %6205 = vmatprep.subr.bf16.mxu1 %v15645_v56  ;;  %v3775_v62 = vpop.f32.mrb[120].mxu0  ;;  %v15624_v18 = vld [vmem:[#allocation6 + $0x4a4] ss:$8 sps:$4 sm:$0xff]  }
 0x295   :  { %v1373_v17 = vmax.f32 %v1371_v48, %v1372_v49  ;;  %v1366_v3 = vmax.f32 %v1364_v30, %v1365_v16  ;;  %v1014_v25 = vadd.f32 %v1013_v2, %v17267_v61  ;;  %v1015_v19 = vpop.f32.mrb[69].mxu1  ;;  %5192 = vmatprep.subr.bf16.mxu0 %v15621_v43  ;;  %v3776_v48 = vadd.f32 %v3775_v62, %v17297_v40  ;;  %v3777_v41 = vpop.f32.mrb[121].mxu0 }
 0x296   :  { %v17531_v50 = vpack.c.bf16 %v3897_v27, %v3895_v63  ;;  %v1387_v38 = vmax.f32 %v1115_v14, %v1117_v15  ;;  %v1016_v24 = vadd.f32 %v1015_v19, %v17270_v47  ;;  %v1017_v36 = vpop.f32.mrb[70].mxu1  ;;  %v3778_v56 = vadd.f32 %v3777_v41, %v17330_v34  ;;  %v3779_v30 = vpop.f32.mrb[122].mxu0  ;;  %v15622_v14 = vld [vmem:[#allocation6 + $0x4a0] ss:$8 sps:$4 sm:$0xff]  }
 0x297   :  { %v1374_v29 = vrot.slane %v1373_v17, 2  ;;  %v1367_v49 = vrot.slane %v1366_v3, 1  ;;  %v1118_v33 = vmax.f32 %v1014_v25, 0.0  ;;  %v1018_v7 = vadd.f32 %v1017_v36, %v17267_v61  ;;  %v1019_v57 = vpop.f32.mrb[71].mxu1  ;;  %6206 = vmatpush1.bf16.msra.mxu1 %v15643_v1  ;;  %v3781_v63 = vpop.f32.mrb[123].mxu0 }
 0x298   :  { %5063 = vmatprep.mubr.bf16.mxu0 %v17531_v50  ;;  %v3780_v16 = vadd.f32 %v3779_v30, %v17297_v40  ;;  %v1119_v27 = vmax.f32 %v1016_v24, 0.0  ;;  %vm1165_vm1 = vcmp.lt.s32.totalorder %v17522_v4, 30  ;;  %5193 = vmatpush1.bf16.msra.mxu0 %v15619_v13  ;;  %v3898_v2 = vmax.f32 %v3776_v48, 0.0  ;;  %v15627_v25 = vld [vmem:[#allocation6 + $0x4b4] ss:$8 sps:$4 sm:$0xff]  }
 0x299   :  { %v1375_v43 = vmax.f32 %v1373_v17, %v1374_v29  ;;  %v1368_v15 = vmax.f32 %v1366_v3, %v1367_v49  ;;  %v1379_v62 = vmax.f32 %v1378_v42, %v1118_v33  ;;  %v3782_v19 = vadd.f32 %v3781_v63, %v17330_v34  ;;  %5064 = vmatmul.mubr.bf16.gmra.mrb[180].mxu0 %v17529_v35 }
 0x29a   :  { %2973 = vmatmul.mubr.bf16.gmra.mrb[112].mxu1 %v17206_v28  ;;  %v3900_v17 = vmax.f32 %v3780_v16, 0.0  ;;  %v1388_v29 = vmax.f32 %v1387_v38, %v1119_v27  ;;  %v1120_v41 = vmax.f32 %v1018_v7, 0.0  ;;  %5194 = vmatprep.subr.bf16.mxu0 %v15624_v18  ;;  %v3899_v3 = vmax.f32 %v3778_v56, 0.0  ;;  %v15633_v27 = vld [vmem:[#allocation6 + $0x4c4] ss:$8 sps:$4 sm:$0xff]  }
 0x29b   :  { %v1376_v1 = vrot.slane %v1375_v43, 1  ;;  %2982 = vmatprep.mubr.bf16.mxu1 %v17216_v22  ;;  %v17547_v13 = vsel %vm9005_vm15, %v1368_v15, %v17505_v54  ;;  %v3901_v42 = vmax.f32 %v3782_v19, 0.0  ;;  %v1020_v48 = vadd.f32 %v1019_v57, %v17270_v47  ;;  %v15625_v22 = vld [vmem:[#allocation6 + $0x4b0] ss:$8 sps:$4 sm:$0xff]  }
 0x29c   :  { %v17550_v36 = vpack.c.bf16 %v3900_v17, %v3898_v2  ;;  %v1280_v28 = vsel %vm1165_vm1, %v1120_v41, 0.0  ;;  %v1023_v49 = vpop.f32.mrb[72].mxu1  ;;  %v190_v38 = vadd.s32 184, %v16858_v20  ;;  %5195 = vmatpush1.bf16.msra.mxu0 %v15622_v14  ;;  %v3785_v33 = vpop.f32.mrb[124].mxu0  ;;  %vm9011_vm13 = vcmask 1046534  }
 0x29d   :  { %v1377_v24 = vmax.f32 %v1375_v43, %v1376_v1  ;;  %v17555_v18 = vpack.c.bf16 %v3901_v42, %v3899_v3  ;;  %v1380_v30 = vmax.f32 %v1379_v62, %v1280_v28  ;;  %v1121_v54 = vmax.f32 %v1020_v48, 0.0  ;;  %v1025_v56 = vpop.f32.mrb[73].mxu1  ;;  %5196 = vmatprep.subr.bf16.mxu0 %v15627_v25  ;;  %v3787_v43 = vpop.f32.mrb[125].mxu0  ;;  %v15631_v3 = vld [vmem:[#allocation6 + $0x4c0] ss:$8 sps:$4 sm:$0xff]  }
 0x29e   :  { %v3786_v57 = vadd.f32 %v3785_v33, %v17297_v40  ;;  %v1024_v16 = vadd.f32 %v1023_v49, %v17267_v61  ;;  %v1027_v63 = vpop.f32.mrb[74].mxu1  ;;  %v3788_v2 = vadd.f32 %v3787_v43, %v17330_v34  ;;  %v3789_v62 = vpop.f32.mrb[126].mxu0  ;;  %v1026_v17 = vadd.f32 %v1025_v56, %v17270_v47 }
 0x29f   :  { %v17559_v7 = vsel %vm9005_vm15, %v1377_v24, %v17511_v52  ;;  %v1381_v14 = vrot.slane %v1380_v30, 4  ;;  %v1281_v15 = vsel %vm1165_vm1, %v1121_v54, 0.0  ;;  %5073 = vmatprep.mubr.bf16.mxu0 %v17555_v18  ;;  %v1029_v19 = vpop.f32.mrb[75].mxu1  ;;  %v3790_v25 = vadd.f32 %v3789_v62, %v17297_v40  ;;  %v3791_v1 = vpop.f32.mrb[127].mxu0 }
 0x2a0   :  { %v17567_v52 = vmax.f32 %v1388_v29, %v1281_v15  ;;  %v17571_v41 = vand.u32 31, %v190_v38  ;;  %5197 = vmatpush1.bf16.msra.mxu0 %v15625_v22  ;;  %v2252_v42 = vshrl.u32 %v17334_v31, 16  ;;  %v3792_v24 = vadd.f32 %v3791_v1, %v17330_v34  ;;  %v15636_v29 = vld [vmem:[#allocation6 + $0x4d4] ss:$8 sps:$4 sm:$0xff]  }
 0x2a1   :  { %v1382_v48 = vmax.f32 %v1380_v30, %v1381_v14  ;;  %5074 = vmatmul.mubr.bf16.gmra.mrb[184].mxu0 %v17550_v36  ;;  %v1028_v28 = vadd.f32 %v1027_v63, %v17267_v61  ;;  %v3902_v49 = vmax.f32 %v3786_v57, 0.0  ;;  %v3904_v54 = vmax.f32 %v3790_v25, 0.0  ;;  %5198 = vmatprep.subr.bf16.mxu0 %v15633_v27 }
 0x2a2   :  { %20060 = vst [vmem:[#allocation65_spill] sm:$0xff] %v17571_v41  ;;  %2983 = vmatmul.mubr.bf16.gmra.mrb[116].mxu1 %v17219_v46  ;;  %v1122_v33 = vmax.f32 %v1024_v16, 0.0  ;;  %v1030_v38 = vadd.f32 %v1029_v19, %v17270_v47  ;;  %v3903_v31 = vmax.f32 %v3788_v2, 0.0  ;;  %v3905_v30 = vmax.f32 %v3792_v24, 0.0  ;;  %v15634_v46 = vld [vmem:[#allocation6 + $0x4d0] ss:$8 sps:$4 sm:$0xff]  }
 0x2a3   :  { %2992 = vmatprep.mubr.bf16.mxu1 %v17229_v44  ;;  %v1383_v22 = vrot.slane %v1382_v48, 2  ;;  %v1124_v56 = vmax.f32 %v1028_v28, 0.0  ;;  %v17580_v43 = vpack.c.bf16 %v3904_v54, %v3902_v49  ;;  %v1123_v14 = vmax.f32 %v1026_v17, 0.0 }
 0x2a4   :  { %v1125_v15 = vmax.f32 %v1030_v38, 0.0  ;;  %v1033_v63 = vpop.f32.mrb[76].mxu1  ;;  %5199 = vmatpush1.bf16.msra.mxu0 %v15631_v3  ;;  %v2256_v57 = vshll.u32 %v17363_v58, 16  ;;  %v17583_v16 = vpack.c.bf16 %v3905_v30, %v3903_v31  ;;  %v3795_v25 = vpop.f32.mrb[128].mxu0  ;;  %v15639_v3 = vld [vmem:[#allocation6 + $0x4e4] ss:$8 sps:$4 sm:$0xff]   ;;  %v2254_v49 = vor.u32 %v2252_v42, %v17430_v12 }
 0x2a5   :  { %v1384_v62 = vmax.f32 %v1382_v48, %v1383_v22  ;;  %v1396_v19 = vmax.f32 %v1122_v33, %v1124_v56  ;;  %v1034_v44 = vadd.f32 %v1033_v63, %v17267_v61  ;;  %v1035_v27 = vpop.f32.mrb[77].mxu1  ;;  %5200 = vmatprep.subr.bf16.mxu0 %v15636_v29  ;;  %v3796_v1 = vadd.f32 %v3795_v25, %v17297_v40  ;;  %v3797_v24 = vpop.f32.mrb[129].mxu0 }
 0x2a6   :  { %v1405_v2 = vmax.f32 %v1123_v14, %v1125_v15  ;;  %v1036_v17 = vadd.f32 %v1035_v27, %v17270_v47  ;;  %v1037_v28 = vpop.f32.mrb[78].mxu1  ;;  %v3798_v48 = vadd.f32 %v3797_v24, %v17330_v34  ;;  %v3799_v38 = vpop.f32.mrb[130].mxu0  ;;  %5083 = vmatprep.mubr.bf16.mxu0 %v17583_v16  ;;  %vm1169_vm7 = vcmp.lt.s32.totalorder %v17571_v41, 30  ;;  %v15637_v14 = vld [vmem:[#allocation6 + $0x4e0] ss:$8 sps:$4 sm:$0xff]  }
 0x2a7   :  { %v1385_v54 = vrot.slane %v1384_v62, 1  ;;  %v1126_v33 = vmax.f32 %v1034_v44, 0.0  ;;  %v1038_v22 = vadd.f32 %v1037_v28, %v17267_v61  ;;  %v1039_v29 = vpop.f32.mrb[79].mxu1  ;;  %v3800_v31 = vadd.f32 %v3799_v38, %v17297_v40  ;;  %v3801_v30 = vpop.f32.mrb[131].mxu0  ;;  %v15642_v44 = vld [vmem:[#allocation6 + $0x4f4] ss:$8 sps:$4 sm:$0xff]  }
 0x2a8   :  { %v1127_v56 = vmax.f32 %v1036_v17, 0.0  ;;  %5201 = vmatpush1.bf16.msra.mxu0 %v15634_v46  ;;  %v17594_v15 = vrot.slane %v2256_v57, 1  ;;  %v3906_v42 = vmax.f32 %v3796_v1, 0.0  ;;  %v3802_v25 = vadd.f32 %v3801_v30, %v17330_v34 }
 0x2a9   :  { %v1386_v12 = vmax.f32 %v1384_v62, %v1385_v54  ;;  %v1397_v63 = vmax.f32 %v1396_v19, %v1126_v33  ;;  %5084 = vmatmul.mubr.bf16.gmra.mrb[188].mxu0 %v17580_v43  ;;  %v3907_v27 = vmax.f32 %v3798_v48, 0.0  ;;  %v3908_v24 = vmax.f32 %v3800_v31, 0.0  ;;  %5202 = vmatprep.subr.bf16.mxu0 %v15639_v3 }
 0x2aa   :  { %2993 = vmatmul.mubr.bf16.gmra.mrb[120].mxu1 %v17226_v9  ;;  %v1406_v28 = vmax.f32 %v1405_v2, %v1127_v56  ;;  %v1128_v17 = vmax.f32 %v1038_v22, 0.0  ;;  %v3909_v57 = vmax.f32 %v3802_v25, 0.0  ;;  %v1040_v62 = vadd.f32 %v1039_v29, %v17270_v47 }
 0x2ab   :  { %3002 = vmatprep.mubr.bf16.mxu1 %v17239_v5  ;;  %v17602_v46 = vsel %vm9007_vm2, %v1386_v12, %v17547_v13  ;;  %v17607_v19 = vsel %vm1450_vm0, %v2254_v49, %v17594_v15  ;;  %v17609_v9 = vpack.c.bf16 %v3908_v24, %v3906_v42  ;;  %v15640_v5 = vld [vmem:[#allocation6 + $0x4f0] ss:$8 sps:$4 sm:$0xff]   ;;  %vm9013_vm1 = vcmask 1047559  }
 0x2ac   :  { %v1288_v2 = vsel %vm1169_vm7, %v1128_v17, 0.0  ;;  %v1043_v1 = vpop.f32.mrb[80].mxu1  ;;  %5203 = vmatpush1.bf16.msra.mxu0 %v15637_v14  ;;  %v17613_v3 = vpack.c.bf16 %v3909_v57, %v3907_v27  ;;  %v1129_v13 = vmax.f32 %v1040_v62, 0.0  ;;  %v3805_v48 = vpop.f32.mrb[132].mxu0  ;;  %v194_v27 = vadd.s32 216, %v16858_v20 }
 0x2ad   :  { %v1398_v54 = vmax.f32 %v1397_v63, %v1288_v2  ;;  %v1045_v38 = vpop.f32.mrb[81].mxu1  ;;  %5204 = vmatprep.subr.bf16.mxu0 %v15642_v44  ;;  %v3806_v33 = vadd.f32 %v3805_v48, %v17297_v40  ;;  %v3807_v22 = vpop.f32.mrb[133].mxu0  ;;  %v1044_v49 = vadd.f32 %v1043_v1, %v17267_v61  ;;  %v15648_v62 = vld [vmem:[#allocation6 + $0x504] ss:$8 sps:$4 sm:$0xff]  }
 0x2ae   :  { %v1047_v29 = vpop.f32.mrb[82].mxu1  ;;  %v1289_v30 = vsel %vm1169_vm7, %v1129_v13, 0.0  ;;  %v3808_v56 = vadd.f32 %v3807_v22, %v17330_v34  ;;  %v3809_v14 = vpop.f32.mrb[134].mxu0  ;;  %5093 = vmatprep.mubr.bf16.mxu0 %v17613_v3  ;;  %v1046_v44 = vadd.f32 %v1045_v38, %v17270_v47 }
 0x2af   :  { %v1399_v31 = vrot.slane %v1398_v54, 4  ;;  %v1049_v12 = vpop.f32.mrb[83].mxu1  ;;  %v17621_v42 = vmax.f32 %v1406_v28, %v1289_v30  ;;  %v3810_v63 = vadd.f32 %v3809_v14, %v17297_v40  ;;  %v3811_v25 = vpop.f32.mrb[135].mxu0  ;;  %v1048_v57 = vadd.f32 %v1047_v29, %v17267_v61 }
 0x2b0   :  { %5205 = vmatpush1.bf16.msra.mxu0 %v15640_v5  ;;  %v3812_v17 = vadd.f32 %v3811_v25, %v17330_v34  ;;  %v3910_v28 = vmax.f32 %v3806_v33, 0.0  ;;  %v1130_v1 = vmax.f32 %v1044_v49, 0.0  ;;  %v1050_v13 = vadd.f32 %v1049_v12, %v17270_v47 }
 0x2b1   :  { %v1400_v24 = vmax.f32 %v1398_v54, %v1399_v31  ;;  %5094 = vmatmul.mubr.bf16.gmra.mrb[192].mxu0 %v17609_v9  ;;  %v3912_v2 = vmax.f32 %v3810_v63, 0.0  ;;  %v3911_v38 = vmax.f32 %v3808_v56, 0.0  ;;  %v1132_v54 = vmax.f32 %v1048_v57, 0.0  ;;  %5367 = vmatprep.subr.bf16.mxu0 %v15648_v62 }
 0x2b2   :  { %3003 = vmatmul.mubr.bf16.gmra.mrb[124].mxu1 %v17236_v21  ;;  %v3913_v5 = vmax.f32 %v3812_v17, 0.0  ;;  %v1131_v31 = vmax.f32 %v1046_v44, 0.0  ;;  %v1133_v30 = vmax.f32 %v1050_v13, 0.0  ;;  %v17634_v14 = vand.u32 31, %v194_v27 }
 0x2b3   :  { %3012 = vmatprep.mubr.bf16.mxu1 %v17249_v51  ;;  %v1401_v48 = vrot.slane %v1400_v24, 2  ;;  %v17632_v22 = vpack.c.bf16 %v3912_v2, %v3910_v28  ;;  %v1414_v49 = vmax.f32 %v1130_v1, %v1132_v54 }
 0x2b4   :  { %v1053_v29 = vpop.f32.mrb[84].mxu1  ;;  %20061 = vst [vmem:[#allocation66_spill] sm:$0xff] %v17634_v14  ;;  %v17636_v33 = vpack.c.bf16 %v3913_v5, %v3911_v38  ;;  %v3815_v63 = vpop.f32.mrb[136].mxu0  ;;  %v1423_v25 = vmax.f32 %v1131_v31, %v1133_v30  ;;  %vm1173_vm10 = vcmp.lt.s32.totalorder %v17634_v14, 30 }
 0x2b5   :  { %v1402_v21 = vmax.f32 %v1400_v24, %v1401_v48  ;;  %v1054_v12 = vadd.f32 %v1053_v29, %v17267_v61  ;;  %v1055_v51 = vpop.f32.mrb[85].mxu1  ;;  %v3816_v56 = vadd.f32 %v3815_v63, %v17297_v40  ;;  %v3817_v17 = vpop.f32.mrb[137].mxu0 }
 0x2b6   :  { %v1056_v57 = vadd.f32 %v1055_v51, %v17270_v47  ;;  %v1057_v62 = vpop.f32.mrb[86].mxu1  ;;  %v3818_v28 = vadd.f32 %v3817_v17, %v17330_v34  ;;  %v3819_v27 = vpop.f32.mrb[138].mxu0  ;;  %5103 = vmatprep.mubr.bf16.mxu0 %v17636_v33  ;;  %v20062_v51 = vld [vmem:[#allocation44_spill] sm:$0xff] }
 0x2b7   :  { %v1403_v44 = vrot.slane %v1402_v21, 1  ;;  %v1134_v24 = vmax.f32 %v1054_v12, 0.0  ;;  %v1058_v2 = vadd.f32 %v1057_v62, %v17267_v61  ;;  %v1059_v1 = vpop.f32.mrb[87].mxu1  ;;  %v3820_v13 = vadd.f32 %v3819_v27, %v17297_v40  ;;  %v3821_v48 = vpop.f32.mrb[139].mxu0 }
 0x2b8   :  { %v1135_v38 = vmax.f32 %v1056_v57, 0.0  ;;  %v3822_v31 = vadd.f32 %v3821_v48, %v17330_v34  ;;  %v3914_v30 = vmax.f32 %v3816_v56, 0.0  ;;  %v1060_v57 = vadd.f32 %v1059_v1, %v17270_v47 }
 0x2b9   :  { %v1404_v5 = vmax.f32 %v1402_v21, %v1403_v44  ;;  %v1415_v54 = vmax.f32 %v1414_v49, %v1134_v24  ;;  %5104 = vmatmul.mubr.bf16.gmra.mrb[196].mxu0 %v17632_v22  ;;  %v3916_v29 = vmax.f32 %v3820_v13, 0.0  ;;  %v1136_v12 = vmax.f32 %v1058_v2, 0.0 }
 0x2ba   :  { %3013 = vmatmul.mubr.bf16.gmra.mrb[128].mxu1 %v17246_v11  ;;  %v1424_v63 = vmax.f32 %v1423_v25, %v1135_v38  ;;  %v3915_v21 = vmax.f32 %v3818_v28, 0.0  ;;  %v3917_v49 = vmax.f32 %v3822_v31, 0.0  ;;  %v1137_v27 = vmax.f32 %v1060_v57, 0.0 }
 0x2bb   :  { %3022 = vmatprep.mubr.bf16.mxu1 %v20062_v51  ;;  %v17652_v17 = vsel %vm9009_vm9, %v1404_v5, %v17602_v46  ;;  %v17655_v62 = vpack.c.bf16 %v3916_v29, %v3914_v30  ;;  %v1296_v44 = vsel %vm1173_vm10, %v1136_v12, 0.0  ;;  %v198_v57 = vadd.s32 248, %v16858_v20 }
 0x2bc   :  { %v1063_v11 = vpop.f32.mrb[88].mxu1  ;;  %v17659_v56 = vpack.c.bf16 %v3917_v49, %v3915_v21  ;;  %v17661_v25 = vmax.f32 %v1415_v54, %v1296_v44  ;;  %v3825_v24 = vpop.f32.mrb[140].mxu0  ;;  %v1297_v1 = vsel %vm1173_vm10, %v1137_v27, 0.0  ;;  %v20065_v49 = vld [vmem:[#allocation43_spill] sm:$0xff]  ;;  %v20066_v27 = vld [vmem:[#allocation46_spill] sm:$0xff] }
 0x2bd   :  { %20063 = vst [vmem:[#allocation44_spill] sm:$0xff] %v17655_v62  ;;  %v1065_v2 = vpop.f32.mrb[89].mxu1  ;;  %v3826_v46 = vadd.f32 %v3825_v24, %v17297_v40  ;;  %v3827_v13 = vpop.f32.mrb[141].mxu0  ;;  %v1064_v5 = vadd.f32 %v1063_v11, %v17267_v61  ;;  %v17669_v54 = vmax.f32 %v1424_v63, %v1297_v1  ;;  %v17685_v20 = vand.u32 31, %v198_v57 }
 0x2be   :  { %20064 = vst [vmem:[#allocation67_spill] sm:$0xff] %v17659_v56  ;;  %v1067_v28 = vpop.f32.mrb[90].mxu1  ;;  %v3828_v48 = vadd.f32 %v3827_v13, %v17330_v34  ;;  %v3829_v38 = vpop.f32.mrb[142].mxu0  ;;  %5113 = vmatprep.mubr.bf16.mxu0 %v17659_v56  ;;  %v1066_v12 = vadd.f32 %v1065_v2, %v17270_v47  ;;  %v3998_v56 = vshll.u32 %v17438_v6, 16 }
 0x2bf   :  { %v1069_v31 = vpop.f32.mrb[91].mxu1  ;;  %v3830_v30 = vadd.f32 %v3829_v38, %v17297_v40  ;;  %v3831_v29 = vpop.f32.mrb[143].mxu0  ;;  %v1068_v21 = vadd.f32 %v1067_v28, %v17267_v61  ;;  %v3918_v44 = vmax.f32 %v3826_v46, 0.0  ;;  %v1138_v13 = vmax.f32 %v1064_v5, 0.0  ;;  %20067 = vst [vmem:[#allocation43_spill] sm:$0xff] %v17685_v20 }
 0x2c0   :  { %v3832_v51 = vadd.f32 %v3831_v29, %v17330_v34  ;;  %v1070_v63 = vadd.f32 %v1069_v31, %v17270_v47  ;;  %v3919_v24 = vmax.f32 %v3828_v48, 0.0  ;;  %v1139_v29 = vmax.f32 %v1066_v12, 0.0 }
 0x2c1   :  { %5114 = vmatmul.mubr.bf16.gmra.mrb[200].mxu0 %v17655_v62  ;;  %v3920_v11 = vmax.f32 %v3830_v30, 0.0  ;;  %v1140_v2 = vmax.f32 %v1068_v21, 0.0  ;;  %vm1177_vm12 = vcmp.lt.s32.totalorder %v17685_v20, 30  ;;  %v20075_v20 = vld [vmem:[#allocation55_spill] sm:$0xff] }
 0x2c2   :  { %3023 = vmatmul.mubr.bf16.gmra.mrb[132].mxu1 %v20065_v49  ;;  %v3921_v1 = vmax.f32 %v3832_v51, 0.0  ;;  %v1141_v14 = vmax.f32 %v1070_v63, 0.0  ;;  %v3973_v10 = vshll.u32 %v20075_v20, 16 }
 0x2c3   :  { %3032 = vmatprep.mubr.bf16.mxu1 %v20066_v27  ;;  %v17680_v38 = vpack.c.bf16 %v3920_v11, %v3918_v44  ;;  %v1432_v49 = vmax.f32 %v1138_v13, %v1140_v2  ;;  %v20068_v13 = vld [vmem:[#allocation45_spill] sm:$0xff] }
 0x2c4   :  { %v1073_v41 = vpop.f32.mrb[92].mxu1  ;;  %v17682_v28 = vpack.c.bf16 %v3921_v1, %v3919_v24  ;;  %v3835_v4 = vpop.f32.mrb[144].mxu0  ;;  %v1441_v31 = vmax.f32 %v1139_v29, %v1141_v14 }
 0x2c5   :  { %v1074_v46 = vadd.f32 %v1073_v41, %v17267_v61  ;;  %v1075_v30 = vpop.f32.mrb[93].mxu1  ;;  %v3836_v48 = vadd.f32 %v3835_v4, %v17297_v40  ;;  %v3837_v5 = vpop.f32.mrb[145].mxu0 }
 0x2c6   :  { %v1076_v51 = vadd.f32 %v1075_v30, %v17270_v47  ;;  %v1077_v21 = vpop.f32.mrb[94].mxu1  ;;  %v3838_v12 = vadd.f32 %v3837_v5, %v17330_v34  ;;  %v3839_v44 = vpop.f32.mrb[146].mxu0  ;;  %5123 = vmatprep.mubr.bf16.mxu0 %v17682_v28  ;;  %v20069_v30 = vld [vmem:[#allocation48_spill] sm:$0xff] }
 0x2c7   :  { %v1142_v11 = vmax.f32 %v1074_v46, 0.0  ;;  %v1078_v63 = vadd.f32 %v1077_v21, %v17267_v61  ;;  %v1079_v27 = vpop.f32.mrb[95].mxu1  ;;  %v3840_v41 = vadd.f32 %v3839_v44, %v17297_v40  ;;  %v3841_v57 = vpop.f32.mrb[147].mxu0  ;;  %v3922_v1 = vmax.f32 %v3836_v48, 0.0 }
 0x2c8   :  { %v1143_v24 = vmax.f32 %v1076_v51, 0.0  ;;  %v3842_v4 = vadd.f32 %v3841_v57, %v17330_v34  ;;  %v3923_v61 = vmax.f32 %v3838_v12, 0.0  ;;  %v1080_v21 = vadd.f32 %v1079_v27, %v17270_v47 }
 0x2c9   :  { %v1433_v14 = vmax.f32 %v1432_v49, %v1142_v11  ;;  %5124 = vmatmul.mubr.bf16.gmra.mrb[204].mxu0 %v17680_v38  ;;  %v3924_v2 = vmax.f32 %v3840_v41, 0.0  ;;  %v1144_v46 = vmax.f32 %v1078_v63, 0.0 }
 0x2ca   :  { %3033 = vmatmul.mubr.bf16.gmra.mrb[136].mxu1 %v20068_v13  ;;  %v1442_v29 = vmax.f32 %v1441_v31, %v1143_v24  ;;  %v3925_v5 = vmax.f32 %v3842_v4, 0.0  ;;  %v1145_v57 = vmax.f32 %v1080_v21, 0.0  ;;  %v20070_v13 = vld [vmem:[#allocation49_spill] sm:$0xff] }
 0x2cb   :  { %3042 = vmatprep.mubr.bf16.mxu1 %v20069_v30  ;;  %v17699_v51 = vpack.c.bf16 %v3924_v2, %v3922_v1  ;;  %v1304_v49 = vsel %vm1177_vm12, %v1144_v46, 0.0  ;;  %v20071_v46 = vld [vmem:[#allocation53_spill] sm:$0xff] }
 0x2cc   :  { %v17703_v44 = vpack.c.bf16 %v3925_v5, %v3923_v61  ;;  %v17705_v11 = vmax.f32 %v1433_v14, %v1304_v49  ;;  %v3845_v48 = vpop.f32.mrb[148].mxu0  ;;  %v1305_v12 = vsel %vm1177_vm12, %v1145_v57, 0.0 }
 0x2cd   :  { %v3846_v31 = vadd.f32 %v3845_v48, %v17297_v40  ;;  %v3847_v63 = vpop.f32.mrb[149].mxu0  ;;  %v17712_v27 = vmax.f32 %v1442_v29, %v1305_v12  ;;  %v1390_v29 = vrot.slane %v17567_v52, 4 }
 0x2ce   :  { %v3848_v41 = vadd.f32 %v3847_v63, %v17330_v34  ;;  %v3849_v47 = vpop.f32.mrb[150].mxu0  ;;  %5133 = vmatprep.mubr.bf16.mxu0 %v17703_v44 }
 0x2cf   :  { %v3850_v24 = vadd.f32 %v3849_v47, %v17297_v40  ;;  %v3851_v4 = vpop.f32.mrb[151].mxu0  ;;  %v3926_v1 = vmax.f32 %v3846_v31, 0.0 }
 0x2d0   :  { %v3852_v14 = vadd.f32 %v3851_v4, %v17330_v34  ;;  %v3927_v30 = vmax.f32 %v3848_v41, 0.0  ;;  %v1391_v41 = vmax.f32 %v17567_v52, %v1390_v29  ;;  %v20072_v4 = vld [vmem:[#allocation54_spill] sm:$0xff] }
 0x2d1   :  { %5134 = vmatmul.mubr.bf16.gmra.mrb[208].mxu0 %v17699_v51  ;;  %v3928_v2 = vmax.f32 %v3850_v24, 0.0 }
 0x2d2   :  { %3043 = vmatmul.mubr.bf16.gmra.mrb[140].mxu1 %v20070_v13  ;;  %v3929_v61 = vmax.f32 %v3852_v14, 0.0 }
 0x2d3   :  { %3052 = vmatprep.mubr.bf16.mxu1 %v20071_v46  ;;  %v17719_v5 = vpack.c.bf16 %v3928_v2, %v3926_v1  ;;  %v20073_v1 = vld [vmem:[#allocation57_spill] sm:$0xff] }
 0x2d4   :  { %v17722_v21 = vpack.c.bf16 %v3929_v61, %v3927_v30  ;;  %v3855_v49 = vpop.f32.mrb[152].mxu0  ;;  %v1392_v61 = vrot.slane %v1391_v41, 2 }
 0x2d5   :  { %v3856_v57 = vadd.f32 %v3855_v49, %v17297_v40  ;;  %v3857_v48 = vpop.f32.mrb[153].mxu0 }
 0x2d6   :  { %v3858_v63 = vadd.f32 %v3857_v48, %v17330_v34  ;;  %v3859_v12 = vpop.f32.mrb[154].mxu0  ;;  %5143 = vmatprep.mubr.bf16.mxu0 %v17722_v21 }
 0x2d7   :  { %v3860_v31 = vadd.f32 %v3859_v12, %v17297_v40  ;;  %v3861_v47 = vpop.f32.mrb[155].mxu0  ;;  %v3930_v14 = vmax.f32 %v3856_v57, 0.0  ;;  %v20074_v12 = vld [vmem:[#allocation56_spill] sm:$0xff] }
 0x2d8   :  { %v3862_v24 = vadd.f32 %v3861_v47, %v17330_v34  ;;  %v3931_v2 = vmax.f32 %v3858_v63, 0.0  ;;  %v3985_v52 = vshll.u32 %v20074_v12, 16  ;;  %v2268_v63 = vshrl.u32 %v17363_v58, 16 }
 0x2d9   :  { %5144 = vmatmul.mubr.bf16.gmra.mrb[212].mxu0 %v17719_v5  ;;  %v3932_v13 = vmax.f32 %v3860_v31, 0.0 }
 0x2da   :  { %3053 = vmatmul.mubr.bf16.gmra.mrb[144].mxu1 %v20072_v4  ;;  %v3933_v46 = vmax.f32 %v3862_v24, 0.0 }
 0x2db   :  { %3062 = vmatprep.mubr.bf16.mxu1 %v20073_v1  ;;  %v17733_v30 = vpack.c.bf16 %v3932_v13, %v3930_v14  ;;  %v3990_v14 = vshll.u32 %v17423_v55, 16  ;;  %v2271_v13 = vshrl.u32 %v17365_v59, 16  ;;  %v1393_v1 = vmax.f32 %v1391_v41, %v1392_v61 }
 0x2dc   :  { %v17735_v49 = vpack.c.bf16 %v3933_v46, %v3931_v2  ;;  %v3865_v48 = vpop.f32.mrb[156].mxu0  ;;  %v17749_v46 = vrot.slane %v3985_v52, 1  ;;  %v1417_v61 = vrot.slane %v17661_v25, 4 }
 0x2dd   :  { %v3866_v29 = vadd.f32 %v3865_v48, %v17297_v40  ;;  %v3867_v47 = vpop.f32.mrb[157].mxu0  ;;  %v1408_v48 = vrot.slane %v17621_v42, 4  ;;  %v3992_v52 = vrot.slane %v3990_v14, 1  ;;  %v1394_v0 = vrot.slane %v1393_v1, 1 }
 0x2de   :  { %v3868_v57 = vadd.f32 %v3867_v47, %v17330_v34  ;;  %v3869_v31 = vpop.f32.mrb[158].mxu0  ;;  %5153 = vmatprep.mubr.bf16.mxu0 %v17735_v49  ;;  %20076 = vst [vmem:[#allocation46_spill] sm:$0xff] %v17749_v46  ;;  %v4002_v14 = vshrl.u32 %v17423_v55, 16  ;;  %v20084_v55 = vmov 0  }
 0x2df   :  { %v3870_v24 = vadd.f32 %v3869_v31, %v17297_v40  ;;  %v3871_v4 = vpop.f32.mrb[159].mxu0  ;;  %v3934_v47 = vmax.f32 %v3866_v29, 0.0  ;;  %v3978_v40 = vshll.u32 %v17420_v37, 16  ;;  %v17754_v31 = vrot.slane %v3973_v10, 1 }
 0x2e0   :  { %v3872_v2 = vadd.f32 %v3871_v4, %v17330_v34  ;;  %v3935_v59 = vmax.f32 %v3868_v57, 0.0  ;;  %v4006_v34 = vshll.u32 %v17454_v8, 16  ;;  %v3971_v29 = vshrl.u32 %v20075_v20, 16 }
 0x2e1   :  { %5154 = vmatmul.mubr.bf16.gmra.mrb[216].mxu0 %v17733_v30  ;;  %v3936_v58 = vmax.f32 %v3870_v24, 0.0  ;;  %20077 = vst [vmem:[#allocation45_spill] sm:$0xff] %v17754_v31  ;;  %v1426_v24 = vrot.slane %v17669_v54, 4  ;;  %v2273_v10 = vor.u32 %v2271_v13, %v17478_v32  ;;  %v17767_v57 = vmax.f32 %v17621_v42, %v1408_v48  ;;  %v15681_v48 = vld [vmem:[#allocation6 + $0x604] ss:$8 sps:$4 sm:$0xff]  }
 0x2e2   :  { %3063 = vmatmul.mubr.bf16.gmra.mrb[148].mxu1 %v17443_v45  ;;  %v3937_v41 = vmax.f32 %v3872_v2, 0.0  ;;  %v3983_v45 = vshrl.u32 %v20074_v12, 16  ;;  %v3980_v62 = vrot.slane %v3978_v40, 1  ;;  %v3976_v13 = vor.u32 %v17754_v31, %v3971_v29  ;;  %7845 = vmatprep.subr.bf16.mxu1 %v15681_v48 }
 0x2e3   :  { %3072 = vmatprep.mubr.bf16.mxu1 %v17496_v26  ;;  %v17758_v4 = vpack.c.bf16 %v3936_v58, %v3934_v47  ;;  %v6003_v47 = vpop.permute.xlu1 %6002  ;;  %v4008_v58 = vrot.slane %v4006_v34, 1  ;;  %v2270_v42 = vor.u32 %v2268_v63, %v17594_v15  ;;  %v17780_v40 = vmax.f32 %v17669_v54, %v1426_v24 }
 0x2e4   :  { %v17763_v26 = vpack.c.bf16 %v3937_v41, %v3935_v59  ;;  %v3988_v2 = vor.u32 %v17749_v46, %v3983_v45  ;;  %v17774_v59 = vmax.f32 %v17661_v25, %v1417_v61  ;;  %v20078_v41 = vld [vmem:[#allocation39_spill] sm:$0xff]  ;;  %v4004_v25 = vor.u32 %v4002_v14, %v3992_v52  ;;  %v20080_v61 = vld [vmem:[#allocation25_spill] sm:$0xff] }
 0x2e5   :  { %v2309_v45 = vsel %vm16539_vm3, %v2273_v10, %v20078_v41  ;;  %v17791_v29 = vmax.f32 %v1393_v1, %v1394_v0  ;;  %v3981_v54 = vsel %vm1450_vm0, %v3976_v13, %v3980_v62  ;;  %v17797_v24 = vrot.slane %v3998_v56, 1 }
 0x2e6   :  { %5163 = vmatprep.mubr.bf16.mxu0 %v17763_v26  ;;  %v3993_v32 = vsel %vm1450_vm0, %v3988_v2, %v3992_v52  ;;  %v17789_v2 = vsel %vm3648_vm8, %v20080_v61, %v6003_v47  ;;  %v4009_v63 = vsel %vm1450_vm0, %v4004_v25, %v4008_v58  ;;  %v4018_v52 = vshrl.u32 %v17454_v8, 16  ;;  %v20081_v47 = vld [vmem:[#allocation38_spill] sm:$0xff] }
 0x2e7   :  { %v2308_v0 = vsel %vm16539_vm3, %v2270_v42, %v20081_v47  ;;  %v4022_v1 = vshll.u32 %v17480_v39, 16  ;;  %v4150_v14 = vshll.u32 %v17682_v28, 16  ;;  %v4142_v56 = vshll.u32 %v17680_v38, 16  ;;  %v15646_v47 = vld [vmem:[#allocation6 + $0x500] ss:$8 sps:$4 sm:$0xff]  }
 0x2e8   :  { %v17807_v41 = vor.u32 %v4018_v52, %v4008_v58  ;;  %v4162_v25 = vshrl.u32 %v17682_v28, 16  ;;  %v4166_v61 = vshll.u32 %v17703_v44, 16  ;;  %v4158_v58 = vshll.u32 %v17699_v51, 16 }
 0x2e9   :  { %5164 = vmatmul.mubr.bf16.gmra.mrb[220].mxu0 %v17758_v4  ;;  %v17811_v48 = vrot.slane %v4150_v14, 1  ;;  %v17817_v10 = vrot.slane %v4142_v56, 1  ;;  %v17822_v52 = vrot.slane %v4022_v1, 1  ;;  %v15651_v14 = vld [vmem:[#allocation6 + $0x514] ss:$8 sps:$4 sm:$0xff]   ;;  %v4178_v56 = vshrl.u32 %v17703_v44, 16 }
 0x2ea   :  { %3073 = vmatmul.mubr.bf16.gmra.mrb[152].mxu1 %v17607_v19  ;;  %5206 = vmatprep.mubr.bf16.mxu0 %v3993_v32  ;;  %v3994_v19 = vshrl.u32 %v17420_v37, 16  ;;  %v4168_v15 = vrot.slane %v4166_v61, 1  ;;  %v4182_v37 = vshll.u32 %v17722_v21, 16  ;;  %v4014_v1 = vshll.u32 %v17476_v53, 16 }
 0x2eb   :  { %3082 = vmatprep.mubr.bf16.mxu1 %v2309_v45  ;;  %v1435_v45 = vrot.slane %v17705_v11, 4  ;;  %20082 = vst [vmem:[#allocation48_spill] sm:$0xff] %v17811_v48  ;;  %20083 = vst [vmem:[#allocation49_spill] sm:$0xff] %v17817_v10  ;;  %v4164_v32 = vor.u32 %v4162_v25, %v17811_v48  ;;  %v4194_v46 = vshrl.u32 %v17722_v21, 16 }
 0x2ec   :  { %v3996_v13 = vor.u32 %v3994_v19, %v3980_v62  ;;  %v4154_v62 = vshrl.u32 %v17680_v38, 16  ;;  %v1444_v19 = vrot.slane %v17712_v27, 4 }
 0x2ed   :  { %v17829_v31 = vmax.f32 %v17705_v11, %v1435_v45  ;;  %v17834_v25 = vsel %vm1450_vm0, %v4164_v32, %v4168_v15  ;;  %v4174_v11 = vshll.u32 %v17719_v5, 16  ;;  %v15654_v45 = vld [vmem:[#allocation6 + $0x524] ss:$8 sps:$4 sm:$0xff]   ;;  %v4198_v32 = vshll.u32 %v17735_v49, 16 }
 0x2ee   :  { %v4001_v42 = vsel %vm1450_vm0, %v3996_v13, %v17797_v24  ;;  %v4156_v8 = vor.u32 %v4154_v62, %v17817_v10  ;;  %v4160_v13 = vrot.slane %v4158_v58, 1  ;;  %20085 = vst [vmem:[#allocation53_spill] sm:$0xff] %v17834_v25  ;;  %v4180_v62 = vor.u32 %v4178_v56, %v4168_v15 }
 0x2ef   :  { %v4184_v58 = vrot.slane %v4182_v37, 1  ;;  %v4190_v15 = vshll.u32 %v17733_v30, 16  ;;  %v4200_v56 = vrot.slane %v4198_v32, 1  ;;  %v4206_v32 = vshll.u32 %v17758_v4, 16 }
 0x2f0   :  { %v17838_v61 = vsel %vm1450_vm0, %v4156_v8, %v4160_v13  ;;  %v4186_v8 = vshrl.u32 %v17719_v5, 16  ;;  %v1437_v48 = vrot.slane %v17829_v31, 2 }
 0x2f1   :  { %5207 = vmatmul.mubr.bf16.vlgmr.msra.gmra.mrb[160].mxu0 %v3981_v54  ;;  %v4170_v54 = vshrl.u32 %v17699_v51, 16  ;;  %20086 = vst [vmem:[#allocation54_spill] sm:$0xff] %v17838_v61  ;;  %v17845_v25 = vsel %vm1450_vm0, %v4180_v62, %v4184_v58  ;;  %v4196_v37 = vor.u32 %v4194_v46, %v4184_v58  ;;  %v4210_v61 = vshrl.u32 %v17735_v49, 16  ;;  %v15679_v62 = vld [vmem:[#allocation6 + $0x600] ss:$8 sps:$4 sm:$0xff]  }
 0x2f2   :  { %3083 = vmatmul.mubr.bf16.gmra.mrb[156].mxu1 %v2308_v0  ;;  %5216 = vmatprep.mubr.bf16.mxu0 %v4009_v63  ;;  %v15649_v0 = vld [vmem:[#allocation6 + $0x510] ss:$8 sps:$4 sm:$0xff]   ;;  %v1445_v63 = vmax.f32 %v17712_v27, %v1444_v19  ;;  %20087 = vst [vmem:[#allocation57_spill] sm:$0xff] %v17845_v25  ;;  %v4214_v27 = vshll.u32 %v17763_v26, 16  ;;  %v15652_v19 = vld [vmem:[#allocation6 + $0x520] ss:$8 sps:$4 sm:$0xff]  }
 0x2f3   :  { %6223 = vmatprep.mubr.bf16.mxu1 %v20084_v55  ;;  %5368 = vmatpush1.bf16.msra.mxu0 %v15646_v47  ;;  %v4172_v34 = vor.u32 %v4170_v54, %v4160_v13  ;;  %v4176_v47 = vrot.slane %v4174_v11, 1  ;;  %v4192_v54 = vrot.slane %v4190_v15, 1  ;;  %v4202_v11 = vshrl.u32 %v17733_v30, 16  ;;  %v15657_v25 = vld [vmem:[#allocation6 + $0x534] ss:$8 sps:$4 sm:$0xff]  }
 0x2f4   :  { %5369 = vmatprep.subr.bf16.mxu0 %v15651_v14  ;;  %v17856_v10 = vsel %vm1450_vm0, %v4196_v37, %v4200_v56  ;;  %v4212_v46 = vor.u32 %v4210_v61, %v4200_v56  ;;  %v17858_v58 = vrot.slane %v4214_v27, 1  ;;  %v6005_v61 = vpop.permute.xlu1 %6004  ;;  %v17875_v37 = vrot.slane %v4206_v32, 1 }
 0x2f5   :  { %v17852_v14 = vsel %vm1450_vm0, %v4172_v34, %v4176_v47  ;;  %v4188_v13 = vor.u32 %v4186_v8, %v4176_v47  ;;  %v4025_v34 = vsel %vm1450_vm0, %v17807_v41, %v17822_v52  ;;  %v1446_v8 = vrot.slane %v1445_v63, 2 }
 0x2f6   :  { %20088 = vst [vmem:[#allocation56_spill] sm:$0xff] %v17858_v58  ;;  %v17873_v15 = vsel %vm1450_vm0, %v4212_v46, %v17858_v58  ;;  %20089 = vst [vmem:[#allocation55_spill] sm:$0xff] %v17875_v37  ;;  %v20090_v41 = vrot.slane %v17767_v57, 2  ;;  %v20091_v56 = vrot.slane %v17774_v59, 2  ;;  %v17886_v46 = vsel %vm9007_vm2, %v17791_v29, %v17559_v7 }
 0x2f7   :  { %5370 = vmatpush1.bf16.msra.mxu0 %v15649_v0  ;;  %v15690_v0 = vld [vmem:[#allocation6 + $0x614] ss:$8 sps:$4 sm:$0xff]   ;;  %v17868_v47 = vsel %vm1450_vm0, %v4188_v13, %v4192_v54  ;;  %v15655_v13 = vld [vmem:[#allocation6 + $0x530] ss:$8 sps:$4 sm:$0xff]   ;;  %v4010_v32 = vshrl.u32 %v17438_v6, 16  ;;  %v4034_v7 = vshrl.u32 %v17480_v39, 16  ;;  %v1447_v58 = vmax.f32 %v1445_v63, %v1446_v8 }
 0x2f8   :  { %5371 = vmatprep.subr.bf16.mxu0 %v15654_v45  ;;  %v4038_v45 = vshll.u32 %v17507_v60, 16  ;;  %v1420_v27 = vmax.f32 %v17774_v59, %v20091_v56  ;;  %v4030_v56 = vshll.u32 %v17498_v23, 16  ;;  %v6007_v6 = vpop.permute.xlu1 %6006  ;;  %v15663_v63 = vld [vmem:[#allocation6 + $0x554] ss:$8 sps:$4 sm:$0xff]  }
 0x2f9   :  { %5217 = vmatmul.mubr.bf16.gmra.mrb[164].mxu0 %v4001_v42  ;;  %v4204_v42 = vor.u32 %v4202_v11, %v4192_v54  ;;  %v20092_v54 = vrot.slane %v17780_v40, 2 }
 0x2fa   :  { %6224 = vmatmul.mubr.bf16.vlgmr.msra.gmra.mrb[160].mxu1 %v17789_v2  ;;  %5226 = vmatprep.mubr.bf16.mxu0 %v4025_v34  ;;  %v1411_v2 = vmax.f32 %v17767_v57, %v20090_v41  ;;  %v15688_v34 = vld [vmem:[#allocation6 + $0x610] ss:$8 sps:$4 sm:$0xff]   ;;  %v4016_v57 = vrot.slane %v4014_v1, 1  ;;  %v15660_v41 = vld [vmem:[#allocation6 + $0x544] ss:$8 sps:$4 sm:$0xff]   ;;  %v4040_v29 = vrot.slane %v4038_v45, 1 }
 0x2fb   :  { %6233 = vmatprep.mubr.bf16.mxu1 %v20084_v55  ;;  %5372 = vmatpush1.bf16.msra.mxu0 %v15652_v19  ;;  %v1429_v11 = vmax.f32 %v17780_v40, %v20092_v54  ;;  %v17894_v59 = vsel %vm1450_vm0, %v4204_v42, %v17875_v37  ;;  %v15699_v19 = vld [vmem:[#allocation6 + $0x624] ss:$8 sps:$4 sm:$0xff]   ;;  %v4012_v40 = vor.u32 %v4010_v32, %v17797_v24  ;;  %v4054_v1 = vshll.u32 %v17531_v50, 16  ;;  %v15658_v42 = vld [vmem:[#allocation6 + $0x540] ss:$8 sps:$4 sm:$0xff]  }
 0x2fc   :  { %7846 = vmatpush1.bf16.msra.mxu1 %v15679_v62  ;;  %5373 = vmatprep.subr.bf16.mxu0 %v15657_v25  ;;  %v1438_v62 = vmax.f32 %v17829_v31, %v1437_v48  ;;  %v1412_v25 = vrot.slane %v1411_v2, 1  ;;  %v4036_v54 = vor.u32 %v4034_v7, %v17822_v52  ;;  %v1421_v37 = vrot.slane %v1420_v27, 1  ;;  %v20093_v45 = vld [vmem:[#allocation26_spill] sm:$0xff]  ;;  %v15705_v24 = vld [vmem:[#allocation6 + $0x634] ss:$8 sps:$4 sm:$0xff]  }
 0x2fd   :  { %7847 = vmatprep.subr.bf16.mxu1 %v15690_v0  ;;  %v15697_v0 = vld [vmem:[#allocation6 + $0x620] ss:$8 sps:$4 sm:$0xff]   ;;  %v1430_v31 = vrot.slane %v1429_v11, 1  ;;  %v4017_v48 = vsel %vm1450_vm0, %v4012_v40, %v4016_v57  ;;  %v6038_v39 = vsel %vm3648_vm8, %v20093_v45, %v6005_v61  ;;  %v1448_v32 = vrot.slane %v1447_v58, 1 }
 0x2fe   :  { %v1439_v8 = vrot.slane %v1438_v62, 1  ;;  %v4041_v52 = vsel %vm1450_vm0, %v4036_v54, %v4040_v29  ;;  %v4050_v7 = vshrl.u32 %v17507_v60, 16  ;;  %v17910_v40 = vrot.slane %v4054_v1, 1  ;;  %v15703_v54 = vld [vmem:[#allocation6 + $0x630] ss:$8 sps:$4 sm:$0xff]  }
 0x2ff   :  { %5374 = vmatpush1.bf16.msra.mxu0 %v15655_v13  ;;  %v4026_v13 = vshrl.u32 %v17476_v53, 16  ;;  %v17913_v61 = vmax.f32 %v1411_v2, %v1412_v25  ;;  %v17917_v45 = vmax.f32 %v1429_v11, %v1430_v31  ;;  %v15666_v60 = vld [vmem:[#allocation6 + $0x564] ss:$8 sps:$4 sm:$0xff]   ;;  %v4046_v25 = vshll.u32 %v17529_v35, 16  ;;  %v15664_v11 = vld [vmem:[#allocation6 + $0x560] ss:$8 sps:$4 sm:$0xff]  }
 0x300   :  { %7848 = vmatpush1.bf16.msra.mxu1 %v15688_v34  ;;  %5375 = vmatprep.subr.bf16.mxu0 %v15660_v41  ;;  %v17907_v34 = vrot.slane %v4030_v56, 1  ;;  %v1422_v56 = vmax.f32 %v1420_v27, %v1421_v37  ;;  %v1440_v1 = vmax.f32 %v1438_v62, %v1439_v8  ;;  %v4066_v37 = vshrl.u32 %v17531_v50, 16 }
 0x301   :  { %7849 = vmatprep.subr.bf16.mxu1 %v15699_v19  ;;  %5227 = vmatmul.mubr.bf16.gmra.mrb[168].mxu0 %v4017_v48  ;;  %v4028_v41 = vor.u32 %v4026_v13, %v4016_v57  ;;  %v20094_v19 = vld [vmem:[#allocation27_spill] sm:$0xff]  ;;  %v4042_v57 = vshrl.u32 %v17498_v23, 16  ;;  %v4070_v27 = vshll.u32 %v17555_v18, 16  ;;  %v19922_v62 = vrot.slane %v20075_v20, 1 }
 0x302   :  { %6234 = vmatmul.mubr.bf16.gmra.mrb[164].mxu1 %v6038_v39  ;;  %5236 = vmatprep.mubr.bf16.mxu0 %v4041_v52  ;;  %v6041_v48 = vsel %vm3648_vm8, %v20094_v19, %v6007_v6  ;;  %v15661_v39 = vld [vmem:[#allocation6 + $0x550] ss:$8 sps:$4 sm:$0xff]   ;;  %v4052_v52 = vor.u32 %v4050_v7, %v4040_v29  ;;  %v1449_v6 = vmax.f32 %v1447_v58, %v1448_v32  ;;  %v19923_v29 = vrot.slane %v20074_v12, 1  ;;  %v15669_v58 = vld [vmem:[#allocation6 + $0x574] ss:$8 sps:$4 sm:$0xff]  }
 0x303   :  { %6243 = vmatprep.mubr.bf16.mxu1 %v20084_v55  ;;  %5376 = vmatpush1.bf16.msra.mxu0 %v15658_v42  ;;  %v4033_v2 = vsel %vm1450_vm0, %v4028_v41, %v17907_v34  ;;  %v4340_v31 = vrot.slane %v17703_v44, 1  ;;  %v4344_v8 = vrot.slane %v17722_v21, 1  ;;  %v4342_v13 = vrot.slane %v17719_v5, 1  ;;  %v15708_v21 = vld [vmem:[#allocation6 + $0x644] ss:$8 sps:$4 sm:$0xff]  }
 0x304   :  { %7850 = vmatpush1.bf16.msra.mxu1 %v15697_v0  ;;  %5377 = vmatprep.subr.bf16.mxu0 %v15663_v63  ;;  %v4057_v42 = vsel %vm1450_vm0, %v4052_v52, %v17910_v40  ;;  %v19921_v0 = vrot.slane %v17682_v28, 1  ;;  %v19920_v63 = vrot.slane %v17680_v38, 1  ;;  %v4348_v7 = vrot.slane %v17735_v49, 1 }
 0x305   :  { %7851 = vmatprep.subr.bf16.mxu1 %v15705_v24  ;;  %v4338_v24 = vrot.slane %v17699_v51, 1  ;;  %v4352_v44 = vrot.slane %v17763_v26, 1  ;;  %v15706_v51 = vld [vmem:[#allocation6 + $0x640] ss:$8 sps:$4 sm:$0xff]   ;;  %v17950_v41 = vsel %vm3461_vm4, %v4340_v31, %v4344_v8  ;;  %v4048_v49 = vrot.slane %v4046_v25, 1 }
 0x306   :  { %v17938_v32 = vsel %vm3461_vm4, %v19921_v0, %v4340_v31 }
 0x307   :  { %5378 = vmatpush1.bf16.msra.mxu0 %v15661_v39  ;;  %v17947_v5 = vsel %vm3461_vm4, %v19920_v63, %v4338_v24  ;;  %v17953_v19 = vsel %vm3461_vm4, %v4338_v24, %v4342_v13  ;;  %v15711_v39 = vld [vmem:[#allocation6 + $0x654] ss:$8 sps:$4 sm:$0xff]   ;;  %v17971_v25 = vsel %vm3461_vm4, %v4352_v44, %v19923_v29  ;;  %v6009_v24 = vpop.permute.xlu1 %6008 }
 0x308   :  { %7852 = vmatpush1.bf16.msra.mxu1 %v15703_v54  ;;  %5379 = vmatprep.subr.bf16.mxu0 %v15666_v60  ;;  %v4346_v60 = vrot.slane %v17733_v30, 1  ;;  %20095 = vst [vmem:[#allocation39_spill] sm:$0xff] %v17953_v19  ;;  %v4350_v30 = vrot.slane %v17758_v4, 1  ;;  %v17957_v54 = vsel %vm3461_vm4, %v4344_v8, %v4348_v7  ;;  %20100 = vst [vmem:[#allocation68_spill] sm:$0xff] %v17971_v25  ;;  %v4072_v8 = vrot.slane %v4070_v27, 1  ;;  %v9148_v25 = vld [vmem:[#allocation9 + $0xa0] sm:$0xff] }
 0x309   :  { %5237 = vmatmul.mubr.bf16.gmra.mrb[172].mxu0 %v4033_v2  ;;  %20096 = vst [vmem:[#allocation25_spill] sm:$0xff] %v17957_v54  ;;  %v17963_v2 = vsel %vm3461_vm4, %v4348_v7, %v4352_v44  ;;  %7853 = vmatprep.subr.bf16.mxu1 %v15708_v21  ;;  %v4044_v7 = vor.u32 %v4042_v57, %v17907_v34  ;;  %v15709_v21 = vld [vmem:[#allocation6 + $0x650] ss:$8 sps:$4 sm:$0xff]   ;;  %v4058_v57 = vshrl.u32 %v17529_v35, 16 }
 0x30a   :  { %6244 = vmatmul.mubr.bf16.gmra.mrb[168].mxu1 %v6041_v48  ;;  %5246 = vmatprep.mubr.bf16.mxu0 %v4057_v42  ;;  %v15667_v48 = vld [vmem:[#allocation6 + $0x570] ss:$8 sps:$4 sm:$0xff]   ;;  %v17960_v52 = vsel %vm3461_vm4, %v4342_v13, %v4346_v60  ;;  %20098 = vst [vmem:[#allocation26_spill] sm:$0xff] %v17963_v2  ;;  %v15672_v42 = vld [vmem:[#allocation6 + $0x584] ss:$8 sps:$4 sm:$0xff]   ;;  %v17966_v31 = vsel %vm3461_vm4, %v4346_v60, %v4350_v30 }
 0x30b   :  { %6253 = vmatprep.mubr.bf16.mxu1 %v20084_v55  ;;  %5380 = vmatpush1.bf16.msra.mxu0 %v15664_v11  ;;  %20097 = vst [vmem:[#allocation38_spill] sm:$0xff] %v17960_v52  ;;  %20099 = vst [vmem:[#allocation27_spill] sm:$0xff] %v17966_v31  ;;  %v17976_v11 = vsel %vm3461_vm4, %v4350_v30, %v19922_v62  ;;  %v9012_v13 = vsel %vm9011_vm13, %v1422_v56, %v17652_v17  ;;  %v20104_v17 = vld [vmem:[#allocation28_spill] sm:$0xff] }
 0x30c   :  { %5381 = vmatprep.subr.bf16.mxu0 %v15669_v58  ;;  %20101 = vst [vmem:[#allocation69_spill] sm:$0xff] %v17976_v11  ;;  %7854 = vmatpush1.bf16.msra.mxu1 %v15706_v51  ;;  %v9019_v58 = vsel %vm9009_vm9, %v17913_v61, %v17886_v46  ;;  %v17987_v44 = vsel %vm9013_vm1, %v1440_v1, %v9012_v13  ;;  %v15670_v51 = vld [vmem:[#allocation6 + $0x580] ss:$8 sps:$4 sm:$0xff]   ;;  %v4062_v61 = vshll.u32 %v17550_v36, 16  ;;  %v15675_v56 = vld [vmem:[#allocation6 + $0x594] ss:$8 sps:$4 sm:$0xff]  }
 0x30d   :  { %7855 = vmatprep.subr.bf16.mxu1 %v15711_v39  ;;  %v9020_v60 = vsel %vm9011_vm13, %v17917_v45, %v9019_v58  ;;  %20102 = vst [vmem:[#allocation70_spill] sm:$0xff] %v17987_v44  ;;  %v4068_v27 = vor.u32 %v4066_v37, %v17910_v40  ;;  %v4049_v46 = vsel %vm1450_vm0, %v4044_v7, %v4048_v49  ;;  %v4086_v40 = vshll.u32 %v17583_v16, 16  ;;  %v15673_v1 = vld [vmem:[#allocation6 + $0x590] ss:$8 sps:$4 sm:$0xff]   ;;  %v15678_v37 = vld [vmem:[#allocation6 + $0x5a4] ss:$8 sps:$4 sm:$0xff]  }
 0x30e   :  { %v17991_v30 = vsel %vm9013_vm1, %v1449_v6, %v9020_v60  ;;  %v6044_v34 = vsel %vm3648_vm8, %v20104_v17, %v6009_v24  ;;  %v4064_v6 = vrot.slane %v4062_v61, 1  ;;  %v4082_v39 = vshrl.u32 %v17555_v18, 16  ;;  %v15676_v13 = vld [vmem:[#allocation6 + $0x5a0] ss:$8 sps:$4 sm:$0xff]   ;;  %v15717_v61 = vld [vmem:[#allocation6 + $0x674] ss:$8 sps:$4 sm:$0xff]  }
 0x30f   :  { %5382 = vmatpush1.bf16.msra.mxu0 %v15667_v48  ;;  %20103 = vst [vmem:[#allocation71_spill] sm:$0xff] %v17991_v30  ;;  %v4073_v45 = vsel %vm1450_vm0, %v4068_v27, %v4072_v8  ;;  %v6011_v48 = vpop.permute.xlu1 %6010  ;;  %v4060_v24 = vor.u32 %v4058_v57, %v4048_v49  ;;  %v20105_v60 = vld [vmem:[#allocation29_spill] sm:$0xff]  ;;  %v4102_v17 = vshll.u32 %v17613_v3, 16  ;;  %v4098_v57 = vshrl.u32 %v17583_v16, 16 }
 0x310   :  { %5383 = vmatprep.subr.bf16.mxu0 %v15672_v42  ;;  %7856 = vmatpush1.bf16.msra.mxu1 %v15709_v21  ;;  %v4088_v42 = vrot.slane %v4086_v40, 1  ;;  %v4084_v58 = vor.u32 %v4082_v39, %v4072_v8  ;;  %v6047_v27 = vsel %vm3648_vm8, %v20105_v60, %v6011_v48  ;;  %v15684_v21 = vld [vmem:[#allocation6 + $0x5b4] ss:$8 sps:$4 sm:$0xff]   ;;  %v15712_v49 = vld [vmem:[#allocation6 + $0x660] ss:$8 sps:$4 sm:$0xff]  }
 0x311   :  { %5247 = vmatmul.mubr.bf16.gmra.mrb[176].mxu0 %v4049_v46  ;;  %v4065_v7 = vsel %vm1450_vm0, %v4060_v24, %v4064_v6  ;;  %v15714_v8 = vld [vmem:[#allocation6 + $0x664] ss:$8 sps:$4 sm:$0xff]   ;;  %v15685_v24 = vld [vmem:[#allocation6 + $0x5c0] ss:$8 sps:$4 sm:$0xff]  }
 0x312   :  { %6254 = vmatmul.mubr.bf16.gmra.mrb[172].mxu1 %v6044_v34  ;;  %5256 = vmatprep.mubr.bf16.mxu0 %v4073_v45  ;;  %v4089_v46 = vsel %vm1450_vm0, %v4084_v58, %v4088_v42  ;;  %v15682_v34 = vld [vmem:[#allocation6 + $0x5b0] ss:$8 sps:$4 sm:$0xff]   ;;  %v15687_v40 = vld [vmem:[#allocation6 + $0x5c4] ss:$8 sps:$4 sm:$0xff]   ;;  %v4100_v39 = vor.u32 %v4098_v57, %v4088_v42  ;;  %v15694_v57 = vld [vmem:[#allocation6 + $0x5e0] ss:$8 sps:$4 sm:$0xff]  }
 0x313   :  { %6263 = vmatprep.mubr.bf16.mxu1 %v20084_v55  ;;  %5384 = vmatpush1.bf16.msra.mxu0 %v15670_v51  ;;  %v4078_v51 = vshll.u32 %v17580_v43, 16  ;;  %v15715_v58 = vld [vmem:[#allocation6 + $0x670] ss:$8 sps:$4 sm:$0xff]  }
 0x314   :  { %5385 = vmatprep.subr.bf16.mxu0 %v15675_v56  ;;  %v4074_v56 = vshrl.u32 %v17550_v36, 16  ;;  %7857 = vmatprep.subr.bf16.mxu1 %v15714_v8  ;;  %v15691_v42 = vld [vmem:[#allocation6 + $0x5d0] ss:$8 sps:$4 sm:$0xff]  }
 0x315   :  { %v4080_v45 = vrot.slane %v4078_v51, 1  ;;  %7858 = vmatpush1.bf16.msra.mxu1 %v15712_v49  ;;  %v15693_v51 = vld [vmem:[#allocation6 + $0x5d4] ss:$8 sps:$4 sm:$0xff]   ;;  %v15696_v49 = vld [vmem:[#allocation6 + $0x5e4] ss:$8 sps:$4 sm:$0xff]  }
 0x316   :  { %v4076_v48 = vor.u32 %v4074_v56, %v4064_v6  ;;  %7859 = vmatprep.subr.bf16.mxu1 %v15717_v61  ;;  %v4118_v6 = vshll.u32 %v17636_v33, 16 }
 0x317   :  { %5386 = vmatpush1.bf16.msra.mxu0 %v15673_v1  ;;  %v6013_v1 = vpop.permute.xlu1 %6012 }
 0x318   :  { %5387 = vmatprep.subr.bf16.mxu0 %v15678_v37  ;;  %v4104_v37 = vrot.slane %v4102_v17, 1  ;;  %v4120_v61 = vrot.slane %v4118_v6, 1 }
 0x319   :  { %5257 = vmatmul.mubr.bf16.gmra.mrb[180].mxu0 %v4065_v7  ;;  %v20106_v7 = vld [vmem:[#allocation30_spill] sm:$0xff]  ;;  %7860 = vmatpush1.bf16.msra.mxu1 %v15715_v58  ;;  %v15702_v58 = vld [vmem:[#allocation6 + $0x5f4] ss:$8 sps:$4 sm:$0xff]  }
 0x31a   :  { %6264 = vmatmul.mubr.bf16.gmra.mrb[176].mxu1 %v6047_v27  ;;  %5266 = vmatprep.mubr.bf16.mxu0 %v4089_v46  ;;  %v6050_v60 = vsel %vm3648_vm8, %v20106_v7, %v6013_v1  ;;  %v4094_v27 = vshll.u32 %v17609_v9, 16  ;;  %v4090_v46 = vshrl.u32 %v17580_v43, 16  ;;  %v4110_v1 = vshll.u32 %v17632_v22, 16  ;;  %v15720_v7 = vld [vmem:[#allocation6 + $0x684] ss:$8 sps:$4 sm:$0xff]  }
 0x31b   :  { %6273 = vmatprep.mubr.bf16.mxu1 %v20084_v55  ;;  %5388 = vmatpush1.bf16.msra.mxu0 %v15676_v13  ;;  %v4081_v13 = vsel %vm1450_vm0, %v4076_v48, %v4080_v45  ;;  %v6015_v8 = vpop.permute.xlu1 %6014 }
 0x31c   :  { %5389 = vmatprep.subr.bf16.mxu0 %v15684_v21  ;;  %v4105_v21 = vsel %vm1450_vm0, %v4100_v39, %v4104_v37  ;;  %v4096_v17 = vrot.slane %v4094_v27, 1  ;;  %v4092_v56 = vor.u32 %v4090_v46, %v4080_v45  ;;  %v20107_v39 = vld [vmem:[#allocation31_spill] sm:$0xff]  ;;  %7861 = vmatprep.subr.bf16.mxu1 %v15720_v7  ;;  %v4112_v6 = vrot.slane %v4110_v1, 1 }
 0x31d   :  { %v20108_v27 = vld [vmem:[#allocation67_spill] sm:$0xff] }
 0x31e   :  { %v4097_v48 = vsel %vm1450_vm0, %v4092_v56, %v4096_v17  ;;  %v4134_v45 = vshll.u32 %v20108_v27, 16 }
 0x31f   :  { %5390 = vmatpush1.bf16.msra.mxu0 %v15682_v34  ;;  %v4114_v34 = vshrl.u32 %v17613_v3, 16  ;;  %v6017_v46 = vpop.permute.xlu1 %6016 }
 0x320   :  { %5391 = vmatprep.subr.bf16.mxu0 %v15687_v40 }
 0x321   :  { %5267 = vmatmul.mubr.bf16.gmra.mrb[184].mxu0 %v4081_v13  ;;  %v4116_v40 = vor.u32 %v4114_v34, %v4104_v37  ;;  %v15718_v13 = vld [vmem:[#allocation6 + $0x680] ss:$8 sps:$4 sm:$0xff]   ;;  %v15723_v37 = vld [vmem:[#allocation6 + $0x694] ss:$8 sps:$4 sm:$0xff]  }
 0x322   :  { %6274 = vmatmul.mubr.bf16.gmra.mrb[180].mxu1 %v6050_v60  ;;  %5276 = vmatprep.mubr.bf16.mxu0 %v4105_v21  ;;  %v4106_v21 = vshrl.u32 %v17609_v9, 16 }
 0x323   :  { %6283 = vmatprep.mubr.bf16.mxu1 %v20084_v55  ;;  %5392 = vmatpush1.bf16.msra.mxu0 %v15685_v24  ;;  %v6053_v24 = vsel %vm3648_vm8, %v20107_v39, %v6015_v8  ;;  %v4121_v60 = vsel %vm1450_vm0, %v4116_v40, %v4120_v61  ;;  %v4136_v8 = vrot.slane %v4134_v45, 1  ;;  %v20110_v39 = vld [vmem:[#allocation44_spill] sm:$0xff] }
 0x324   :  { %5393 = vmatprep.subr.bf16.mxu0 %v15693_v51  ;;  %v15700_v51 = vld [vmem:[#allocation6 + $0x5f0] ss:$8 sps:$4 sm:$0xff]   ;;  %7862 = vmatpush1.bf16.msra.mxu1 %v15718_v13  ;;  %v4108_v34 = vor.u32 %v4106_v21, %v4096_v17  ;;  %v4146_v13 = vshrl.u32 %v20108_v27, 16  ;;  %v15724_v21 = vld [vmem:[#allocation6 + $0x6a0] ss:$8 sps:$4 sm:$0xff]  }
 0x325   :  { %7863 = vmatprep.subr.bf16.mxu1 %v15723_v37  ;;  %v20111_v37 = vld [vmem:[#allocation33_spill] sm:$0xff] }
 0x326   :  { %v4113_v40 = vsel %vm1450_vm0, %v4108_v34, %v4112_v6  ;;  %v18042_v34 = vld [vmem:[#allocation9] sm:$0xff] }
 0x327   :  { %5394 = vmatpush1.bf16.msra.mxu0 %v15691_v42  ;;  %v15721_v42 = vld [vmem:[#allocation6 + $0x690] ss:$8 sps:$4 sm:$0xff]  }
 0x328   :  { %5395 = vmatprep.subr.bf16.mxu0 %v15696_v49  ;;  %v4130_v49 = vshrl.u32 %v17636_v33, 16  ;;  %7864 = vmatpush1.bf16.msra.mxu1 %v15721_v42  ;;  %v15726_v42 = vld [vmem:[#allocation6 + $0x6a4] ss:$8 sps:$4 sm:$0xff]  }
 0x329   :  { %5277 = vmatmul.mubr.bf16.gmra.mrb[188].mxu0 %v4097_v48  ;;  %v20109_v48 = vld [vmem:[#allocation32_spill] sm:$0xff]  ;;  %7865 = vmatprep.subr.bf16.mxu1 %v15726_v42  ;;  %v20117_v42 = vld [vmem:[#allocation54_spill] sm:$0xff] }
 0x32a   :  { %6284 = vmatmul.mubr.bf16.gmra.mrb[184].mxu1 %v6053_v24  ;;  %5286 = vmatprep.mubr.bf16.mxu0 %v4121_v60  ;;  %v4132_v56 = vor.u32 %v4130_v49, %v4120_v61  ;;  %v4126_v24 = vshll.u32 %v20110_v39, 16  ;;  %v6019_v61 = vpop.permute.xlu1 %6018  ;;  %v4148_v60 = vor.u32 %v4146_v13, %v4136_v8 }
 0x32b   :  { %6293 = vmatprep.mubr.bf16.mxu1 %v20084_v55  ;;  %5396 = vmatpush1.bf16.msra.mxu0 %v15694_v57  ;;  %v6056_v57 = vsel %vm3648_vm8, %v20109_v48, %v6017_v46  ;;  %v20112_v46 = vld [vmem:[#allocation48_spill] sm:$0xff] }
 0x32c   :  { %5397 = vmatprep.subr.bf16.mxu0 %v15702_v58  ;;  %v4137_v1 = vsel %vm1450_vm0, %v4132_v56, %v4136_v8  ;;  %v4122_v58 = vshrl.u32 %v17632_v22, 16  ;;  %v4128_v17 = vrot.slane %v4126_v24, 1  ;;  %v4153_v49 = vsel %vm1450_vm0, %v4148_v60, %v20112_v46  ;;  %v18044_v56 = vld [vmem:[#allocation9 + $0x20] sm:$0xff]  ;;  %v15729_v8 = vld [vmem:[#allocation6 + $0x6b4] ss:$8 sps:$4 sm:$0xff]   ;;  %7866 = vmatpush1.bf16.msra.mxu1 %v15724_v21 }
 0x32d   :  { %v15727_v48 = vld [vmem:[#allocation6 + $0x6b0] ss:$8 sps:$4 sm:$0xff]   ;;  %7867 = vmatprep.subr.bf16.mxu1 %v15729_v8  ;;  %v15730_v21 = vld [vmem:[#allocation6 + $0x6c0] ss:$8 sps:$4 sm:$0xff]  }
 0x32e   :  { %v4124_v7 = vor.u32 %v4122_v58, %v4112_v6  ;;  %v14029_v6 = vcombine.high %v18042_v34, %v18044_v56  ;;  %v20118_v46 = vld [vmem:[#allocation23_spill] sm:$0xff]  ;;  %v20120_v8 = vld [vmem:[#allocation24_spill] sm:$0xff] }
 0x32f   :  { %5398 = vmatpush1.bf16.msra.mxu0 %v15700_v51  ;;  %v6059_v51 = vsel %vm3648_vm8, %v20111_v37, %v6019_v61  ;;  %v20114_v61 = vld [vmem:[#allocation34_spill] sm:$0xff]  ;;  %v20116_v37 = vld [vmem:[#allocation35_spill] sm:$0xff] }
 0x330   :  { %v4129_v45 = vsel %vm1450_vm0, %v4124_v7, %v4128_v17  ;;  %12242 = vmatprep.subr.bf16.mxu0 %v14029_v6  ;;  %7868 = vmatpush1.bf16.msra.mxu1 %v15727_v48  ;;  %v20115_v7 = vld [vmem:[#allocation53_spill] sm:$0xff] }
 0x331   :  { %5287 = vmatmul.mubr.bf16.gmra.mrb[192].mxu0 %v4113_v40  ;;  %v4138_v40 = vshrl.u32 %v20110_v39, 16  ;;  %v20119_v6 = vld [vmem:[#allocation57_spill] sm:$0xff] }
 0x332   :  { %6294 = vmatmul.mubr.bf16.gmra.mrb[188].mxu1 %v6056_v57  ;;  %5296 = vmatprep.mubr.bf16.mxu0 %v4137_v1  ;;  %v6021_v57 = vpop.permute.xlu1 %6020  ;;  %v20113_v1 = vld [vmem:[#allocation49_spill] sm:$0xff] }
 0x333   :  { %6303 = vmatprep.mubr.bf16.mxu1 %v20084_v55  ;;  %v4140_v24 = vor.u32 %v4138_v40, %v4128_v17  ;;  %v6062_v13 = vsel %vm3648_vm8, %v20114_v61, %v6021_v57  ;;  %v15732_v17 = vld [vmem:[#allocation6 + $0x6c4] ss:$8 sps:$4 sm:$0xff]   ;;  %v15735_v48 = vld [vmem:[#allocation6 + $0x6d4] ss:$8 sps:$4 sm:$0xff]  }
 0x334   :  { %7869 = vmatprep.subr.bf16.mxu1 %v15732_v17 }
 0x335   :  { %v4145_v58 = vsel %vm1450_vm0, %v4140_v24, %v20113_v1  ;;  %7870 = vmatpush1.bf16.msra.mxu1 %v15730_v21  ;;  %v15733_v24 = vld [vmem:[#allocation6 + $0x6d0] ss:$8 sps:$4 sm:$0xff]  }
 0x336   :  { %v6023_v60 = vpop.permute.xlu1 %6022  ;;  %7871 = vmatprep.subr.bf16.mxu1 %v15735_v48 }
 0x339   :  { %5297 = vmatmul.mubr.bf16.gmra.mrb[196].mxu0 %v4129_v45  ;;  %v2375_v45 = vld [vmem:[#allocation7 + $0x1] ss:$4 sm:$0x3]  ;;  %7872 = vmatpush1.bf16.msra.mxu1 %v15733_v24 }
 0x33a   :  { %6304 = vmatmul.mubr.bf16.gmra.mrb[192].mxu1 %v6059_v51  ;;  %5306 = vmatprep.mubr.bf16.mxu0 %v4153_v49  ;;  %v6065_v51 = vsel %vm3648_vm8, %v20116_v37, %v6023_v60  ;;  %v18060_v49 = vrot.slane %v2375_v45, %v20118_v46  ;;  %v18064_v40 = vrot.slane %v2375_v45, %v20120_v8  ;;  %v6025_v1 = vpop.permute.xlu1 %6024 }
 0x33b   :  { %6313 = vmatprep.mubr.bf16.mxu1 %v20084_v55 }
 0x33e   :  { %v6027_v63 = vpop.permute.xlu1 %6026 }
 0x341   :  { %5307 = vmatmul.mubr.bf16.gmra.mrb[200].mxu0 %v4145_v58 }
 0x342   :  { %6314 = vmatmul.mubr.bf16.gmra.mrb[196].mxu1 %v6062_v13  ;;  %5316 = vmatprep.mubr.bf16.mxu0 %v20115_v7 }
 0x343   :  { %6323 = vmatprep.mubr.bf16.mxu1 %v20084_v55 }
 0x349   :  { %5317 = vmatmul.mubr.bf16.gmra.mrb[204].mxu0 %v20117_v42 }
 0x34a   :  { %6324 = vmatmul.mubr.bf16.gmra.mrb[200].mxu1 %v6065_v51  ;;  %5326 = vmatprep.mubr.bf16.mxu0 %v20119_v6  ;;  %v20121_v51 = vld [vmem:[#allocation36_spill] sm:$0xff] }
 0x34b   :  { %6333 = vmatprep.mubr.bf16.mxu1 %v20084_v55  ;;  %v6068_v42 = vsel %vm3648_vm8, %v20121_v51, %v6025_v1  ;;  %v20122_v51 = vld [vmem:[#allocation47_spill] sm:$0xff] }
 0x34c   :  { %v2934_v57 = vpop.f32.mrb[96].mxu1  ;;  %vm3160_vm7 = vcmp.lt.s32.totalorder %v20122_v51, 28 }
 0x34d   :  { %v14697_v58 = vadd.f32 %v2934_v57, %v18060_v49  ;;  %v2936_v61 = vpop.f32.mrb[97].mxu1 }
 0x34e   :  { %v14698_v13 = vadd.f32 %v2936_v61, %v18064_v40  ;;  %v2938_v7 = vpop.f32.mrb[98].mxu1 }
 0x34f   :  { %v14699_v60 = vadd.f32 %v2938_v7, %v18060_v49  ;;  %v2940_v37 = vpop.f32.mrb[99].mxu1  ;;  %v3093_v17 = vmax.f32 %v14697_v58, 0.0 }
 0x350   :  { %v14700_v45 = vadd.f32 %v2940_v37, %v18064_v40  ;;  %v3094_v6 = vmax.f32 %v14698_v13, 0.0 }
 0x351   :  { %5327 = vmatmul.mubr.bf16.gmra.mrb[208].mxu0 %v17852_v14  ;;  %v3095_v21 = vmax.f32 %v14699_v60, 0.0 }
 0x352   :  { %6334 = vmatmul.mubr.bf16.gmra.mrb[204].mxu1 %v6068_v42  ;;  %5336 = vmatprep.mubr.bf16.mxu0 %v17856_v10  ;;  %v3096_v48 = vmax.f32 %v14700_v45, 0.0  ;;  %v20123_v45 = vld [vmem:[#allocation37_spill] sm:$0xff] }
 0x353   :  { %6343 = vmatprep.mubr.bf16.mxu1 %v20084_v55  ;;  %v3317_v57 = vmax.f32 %v3093_v17, %v3095_v21  ;;  %v6071_v42 = vsel %vm3648_vm8, %v20123_v45, %v6027_v63  ;;  %v15736_v17 = vld [vmem:[#allocation6 + $0x6e0] ss:$8 sps:$4 sm:$0xff]   ;;  %v15738_v21 = vld [vmem:[#allocation6 + $0x6e4] ss:$8 sps:$4 sm:$0xff]   ;;  %v15741_v63 = vld [vmem:[#allocation6 + $0x6f4] ss:$8 sps:$4 sm:$0xff]  }
 0x354   :  { %v3326_v61 = vmax.f32 %v3094_v6, %v3096_v48  ;;  %v2944_v7 = vpop.f32.mrb[100].mxu1  ;;  %7873 = vmatprep.subr.bf16.mxu1 %v15738_v21 }
 0x355   :  { %v14701_v37 = vadd.f32 %v2944_v7, %v18060_v49  ;;  %v2946_v0 = vpop.f32.mrb[101].mxu1  ;;  %7874 = vmatpush1.bf16.msra.mxu1 %v15736_v17 }
 0x356   :  { %v14702_v24 = vadd.f32 %v2946_v0, %v18064_v40  ;;  %v2948_v1 = vpop.f32.mrb[102].mxu1  ;;  %7875 = vmatprep.subr.bf16.mxu1 %v15741_v63 }
 0x357   :  { %v3097_v58 = vmax.f32 %v14701_v37, 0.0  ;;  %v14703_v14 = vadd.f32 %v2948_v1, %v18060_v49  ;;  %v2950_v60 = vpop.f32.mrb[103].mxu1 }
 0x358   :  { %v3098_v13 = vmax.f32 %v14702_v24, 0.0  ;;  %v14704_v10 = vadd.f32 %v2950_v60, %v18064_v40  ;;  %v4221_v24 = vshrl.u32 %v17763_v26, 16 }
 0x359   :  { %v3318_v6 = vmax.f32 %v3317_v57, %v3097_v58  ;;  %5337 = vmatmul.mubr.bf16.gmra.mrb[212].mxu0 %v17868_v47  ;;  %v3099_v48 = vmax.f32 %v14703_v14, 0.0  ;;  %v15739_v58 = vld [vmem:[#allocation6 + $0x6f0] ss:$8 sps:$4 sm:$0xff]  }
 0x35a   :  { %6344 = vmatmul.mubr.bf16.gmra.mrb[208].mxu1 %v6071_v42  ;;  %v3327_v0 = vmax.f32 %v3326_v61, %v3098_v13  ;;  %5346 = vmatprep.mubr.bf16.mxu0 %v17873_v15  ;;  %v3100_v7 = vmax.f32 %v14704_v10, 0.0  ;;  %v6029_v61 = vpop.permute.xlu1 %6028  ;;  %v20124_v13 = vld [vmem:[#allocation56_spill] sm:$0xff] }
 0x35b   :  { %6353 = vmatprep.mubr.bf16.mxu1 %v20084_v55  ;;  %v3259_v37 = vsel %vm3160_vm7, %v3099_v48, 0.0  ;;  %v4223_v10 = vor.u32 %v4221_v24, %v20124_v13  ;;  %7876 = vmatpush1.bf16.msra.mxu1 %v15739_v58  ;;  %v4218_v13 = vshrl.u32 %v17758_v4, 16 }
 0x35c   :  { %v3319_v1 = vmax.f32 %v3318_v6, %v3259_v37  ;;  %v3260_v57 = vsel %vm3160_vm7, %v3100_v7, 0.0  ;;  %v2954_v47 = vpop.f32.mrb[104].mxu1  ;;  %v15744_v6 = vld [vmem:[#allocation6 + $0x704] ss:$8 sps:$4 sm:$0xff]   ;;  %v20125_v7 = vld [vmem:[#allocation40_spill] sm:$0xff] }
 0x35d   :  { %v3328_v14 = vmax.f32 %v3327_v0, %v3260_v57  ;;  %v14705_v15 = vadd.f32 %v2954_v47, %v18060_v49  ;;  %v2956_v60 = vpop.f32.mrb[105].mxu1  ;;  %v6074_v17 = vsel %vm3648_vm8, %v20125_v7, %v6029_v61  ;;  %v20126_v37 = vld [vmem:[#allocation46_spill] sm:$0xff]  ;;  %8038 = vmatprep.subr.bf16.mxu1 %v15744_v6 }
 0x35e   :  { %v14706_v45 = vadd.f32 %v2956_v60, %v18064_v40  ;;  %v2958_v26 = vpop.f32.mrb[106].mxu1  ;;  %v4259_v24 = vsel %vm16539_vm3, %v4223_v10, %v20126_v37  ;;  %v6031_v61 = vpop.permute.xlu1 %6030  ;;  %v3320_v58 = vrot.slane %v3319_v1, 4 }
 0x35f   :  { %v14707_v42 = vadd.f32 %v2958_v26, %v18060_v49  ;;  %v2960_v21 = vpop.f32.mrb[107].mxu1  ;;  %v3101_v0 = vmax.f32 %v14705_v15, 0.0  ;;  %v3329_v62 = vrot.slane %v3328_v14, 4 }
 0x360   :  { %v14708_v48 = vadd.f32 %v2960_v21, %v18064_v40  ;;  %v3102_v47 = vmax.f32 %v14706_v45, 0.0 }
 0x361   :  { %5347 = vmatmul.mubr.bf16.gmra.mrb[216].mxu0 %v17894_v59  ;;  %v3103_v63 = vmax.f32 %v14707_v42, 0.0  ;;  %v20128_v59 = vld [vmem:[#allocation55_spill] sm:$0xff] }
 0x362   :  { %6354 = vmatmul.mubr.bf16.gmra.mrb[212].mxu1 %v6074_v17  ;;  %5356 = vmatprep.mubr.bf16.mxu0 %v4259_v24  ;;  %v3104_v60 = vmax.f32 %v14708_v48, 0.0  ;;  %v4220_v7 = vor.u32 %v4218_v13, %v20128_v59  ;;  %v20129_v17 = vld [vmem:[#allocation59_spill] sm:$0xff]  ;;  %v20132_v13 = vld [vmem:[#allocation45_spill] sm:$0xff]  ;;  %v6033_v29 = vpop.permute.xlu1 %6032 }
 0x363   :  { %6363 = vmatprep.mubr.bf16.mxu1 %v20084_v55  ;;  %v3335_v26 = vmax.f32 %v3101_v0, %v3103_v63  ;;  %v4296_v45 = vrot.slane %v20129_v17, 1  ;;  %v20130_v0 = vld [vmem:[#allocation50_spill] sm:$0xff]  ;;  %v20131_v63 = vld [vmem:[#allocation41_spill] sm:$0xff] }
 0x364   :  { %v3344_v15 = vmax.f32 %v3102_v47, %v3104_v60  ;;  %v2964_v21 = vpop.f32.mrb[108].mxu1  ;;  %vm3164_vm10 = vcmp.lt.s32.totalorder %v20130_v0, 28  ;;  %v6077_v47 = vsel %vm3648_vm8, %v20131_v63, %v6031_v61  ;;  %v3321_v60 = vmax.f32 %v3319_v1, %v3320_v58  ;;  %v20134_v58 = vld [vmem:[#allocation58_spill] sm:$0xff] }
 0x365   :  { %v14709_v10 = vadd.f32 %v2964_v21, %v18060_v49  ;;  %v2966_v42 = vpop.f32.mrb[109].mxu1  ;;  %v4258_v21 = vsel %vm16539_vm3, %v4220_v7, %v20132_v13  ;;  %v4293_v7 = vrot.slane %v20134_v58, 1  ;;  %v18129_v13 = vld [vmem:[#allocation9 + $0x400] sm:$0xff] }
 0x366   :  { %v14710_v48 = vadd.f32 %v2966_v42, %v18064_v40  ;;  %v2968_v37 = vpop.f32.mrb[110].mxu1  ;;  %v3330_v42 = vmax.f32 %v3328_v14, %v3329_v62  ;;  %v20136_v14 = vld [vmem:[#allocation60_spill] sm:$0xff]  ;;  %v18133_v58 = vld [vmem:[#allocation9 + $0x420] sm:$0xff] }
 0x367   :  { %v3105_v4 = vmax.f32 %v14709_v10, 0.0  ;;  %v14711_v24 = vadd.f32 %v2968_v37, %v18060_v49  ;;  %v2970_v6 = vpop.f32.mrb[111].mxu1  ;;  %v20133_v10 = vrot.slane %v20074_v12, 1 }
 0x368   :  { %v3106_v59 = vmax.f32 %v14710_v48, 0.0  ;;  %v14712_v17 = vadd.f32 %v2970_v6, %v18064_v40  ;;  %v20135_v48 = vld [vmem:[#allocation61_spill] sm:$0xff] }
 0x369   :  { %v3336_v51 = vmax.f32 %v3335_v26, %v3105_v4  ;;  %5357 = vmatmul.mubr.bf16.gmra.mrb[220].mxu0 %v4258_v21  ;;  %v4297_v37 = vsel %vm3461_vm4, %v20133_v10, %v4296_v45  ;;  %v3107_v44 = vmax.f32 %v14711_v24, 0.0  ;;  %v3322_v4 = vrot.slane %v3321_v60, 2  ;;  %v20138_v10 = vld [vmem:[#allocation62_spill] sm:$0xff] }
 0x36a   :  { %6364 = vmatmul.mubr.bf16.gmra.mrb[216].mxu1 %v6077_v47  ;;  %v3345_v11 = vmax.f32 %v3344_v15, %v3106_v59  ;;  %5399 = vmatprep.mubr.bf16.mxu0 %v4297_v37  ;;  %v3108_v1 = vmax.f32 %v14712_v17, 0.0  ;;  %v20137_v15 = vld [vmem:[#allocation42_spill] sm:$0xff] }
 0x36b   :  { %6373 = vmatprep.mubr.bf16.mxu1 %v20084_v55  ;;  %v3267_v61 = vsel %vm3164_vm10, %v3107_v44, 0.0  ;;  %v6080_v63 = vsel %vm3648_vm8, %v20137_v15, %v6033_v29  ;;  %v9136_v47 = vld [vmem:[#allocation9 + $0x40] sm:$0xff]  ;;  %v3331_v44 = vrot.slane %v3330_v42, 2  ;;  %v14028_v29 = vcombine.low %v18042_v34, %v18044_v56 }
 0x36c   :  { %v3337_v12 = vmax.f32 %v3336_v51, %v3267_v61  ;;  %v3268_v24 = vsel %vm3164_vm10, %v3108_v1, 0.0  ;;  %v9140_v55 = vld [vmem:[#allocation9 + $0x60] sm:$0xff]  ;;  %v3323_v57 = vmax.f32 %v3321_v60, %v3322_v4 }
 0x36d   :  { %v2974_v6 = vpop.f32.mrb[112].mxu1  ;;  %v3346_v21 = vmax.f32 %v3345_v11, %v3268_v24  ;;  %v20139_v11 = vrot.slane %v20075_v20, 1  ;;  %v14037_v62 = vcombine.high %v9136_v47, %v9140_v55  ;;  %v9144_v56 = vld [vmem:[#allocation9 + $0x80] sm:$0xff]  ;;  %v3332_v15 = vmax.f32 %v3330_v42, %v3331_v44 }
 0x36e   :  { %v14713_v59 = vadd.f32 %v2974_v6, %v18060_v49  ;;  %v2976_v17 = vpop.f32.mrb[113].mxu1  ;;  %v3338_v51 = vrot.slane %v3337_v12, 4  ;;  %v14036_v60 = vcombine.low %v9136_v47, %v9140_v55  ;;  %v20141_v42 = vld [vmem:[#allocation51_spill] sm:$0xff] }
 0x36f   :  { %v14714_v1 = vadd.f32 %v2976_v17, %v18064_v40  ;;  %v2978_v61 = vpop.f32.mrb[114].mxu1  ;;  %v3347_v26 = vrot.slane %v3346_v21, 4  ;;  %v4294_v24 = vsel %vm3461_vm4, %v20139_v11, %v4293_v7  ;;  %v20140_v17 = vrot.slane %v20135_v48, 1  ;;  %v9156_v44 = vld [vmem:[#allocation9 + $0xe0] sm:$0xff] }
 0x370   :  { %v14715_v6 = vadd.f32 %v2978_v61, %v18060_v49  ;;  %v2980_v37 = vpop.f32.mrb[115].mxu1  ;;  %v3339_v0 = vmax.f32 %v3337_v12, %v3338_v51  ;;  %v3109_v2 = vmax.f32 %v14713_v59, 0.0  ;;  %v3324_v51 = vrot.slane %v3323_v57, 1 }
 0x371   :  { %v4301_v30 = vsel %vm3461_vm4, %v4296_v45, %v20140_v17  ;;  %v14716_v34 = vadd.f32 %v2980_v37, %v18064_v40  ;;  %v3348_v31 = vmax.f32 %v3346_v21, %v3347_v26  ;;  %5400 = vmatmul.mubr.bf16.vlgmr.msra.gmra.mrb[160].mxu0 %v4294_v24  ;;  %v3110_v61 = vmax.f32 %v14714_v1, 0.0  ;;  %v9152_v26 = vld [vmem:[#allocation9 + $0xc0] sm:$0xff] }
 0x372   :  { %v3111_v20 = vmax.f32 %v14715_v6, 0.0  ;;  %6374 = vmatmul.mubr.bf16.gmra.mrb[220].mxu1 %v6080_v63  ;;  %v3340_v11 = vrot.slane %v3339_v0, 2  ;;  %5409 = vmatprep.mubr.bf16.mxu0 %v4301_v30  ;;  %v14045_v45 = vcombine.high %v9144_v56, %v9148_v25  ;;  %vm3168_vm8 = vcmp.lt.s32.totalorder %v20141_v42, 28 }
 0x373   :  { %v3112_v52 = vmax.f32 %v14716_v34, 0.0  ;;  %12243 = vmatpush1.bf16.msra.mxu0 %v14028_v29  ;;  %v3349_v4 = vrot.slane %v3348_v31, 2  ;;  %v3333_v21 = vrot.slane %v3332_v15, 1  ;;  %v20142_v30 = vrot.slane %v20136_v14, 1 }
 0x374   :  { %v3353_v12 = vmax.f32 %v3109_v2, %v3111_v20  ;;  %12244 = vmatprep.subr.bf16.mxu0 %v14037_v62  ;;  %v3341_v37 = vmax.f32 %v3339_v0, %v3340_v11  ;;  %v20143_v0 = vrot.slane %v20138_v10, 1  ;;  %v14044_v24 = vcombine.low %v9144_v56, %v9148_v25 }
 0x375   :  { %v3362_v17 = vmax.f32 %v3110_v61, %v3112_v52  ;;  %v2984_v54 = vpop.f32.mrb[116].mxu1  ;;  %v3350_v63 = vmax.f32 %v3348_v31, %v3349_v4  ;;  %v4299_v47 = vsel %vm3461_vm4, %v4293_v7, %v20142_v30  ;;  %v20144_v52 = vrot.slane %v20135_v48, 1  ;;  %v9160_v30 = vld [vmem:[#allocation9 + $0x100] sm:$0xff] }
 0x376   :  { %v14717_v59 = vadd.f32 %v2984_v54, %v18060_v49  ;;  %v2986_v55 = vpop.f32.mrb[117].mxu1  ;;  %v3342_v2 = vrot.slane %v3341_v37, 1  ;;  %v14053_v7 = vcombine.high %v9152_v26, %v9156_v44  ;;  %v3325_v20 = vmax.f32 %v3323_v57, %v3324_v51 }
 0x377   :  { %v14718_v62 = vadd.f32 %v2986_v55, %v18064_v40  ;;  %v4305_v1 = vsel %vm3461_vm4, %v20144_v52, %v20143_v0  ;;  %v2988_v29 = vpop.f32.mrb[118].mxu1  ;;  %12245 = vmatpush1.bf16.msra.mxu0 %v14036_v60  ;;  %v3351_v31 = vrot.slane %v3350_v63, 1  ;;  %v9164_v55 = vld [vmem:[#allocation9 + $0x120] sm:$0xff]  ;;  %v3334_v48 = vmax.f32 %v3332_v15, %v3333_v21 }
 0x378   :  { %v3113_v6 = vmax.f32 %v14717_v59, 0.0  ;;  %v14719_v54 = vadd.f32 %v2988_v29, %v18060_v49  ;;  %v2990_v34 = vpop.f32.mrb[119].mxu1  ;;  %12246 = vmatprep.subr.bf16.mxu0 %v14045_v45  ;;  %v3343_v11 = vmax.f32 %v3341_v37, %v3342_v2  ;;  %v14052_v45 = vcombine.low %v9152_v26, %v9156_v44 }
 0x379   :  { %v3114_v61 = vmax.f32 %v14718_v62, 0.0  ;;  %v14720_v4 = vadd.f32 %v2990_v34, %v18064_v40  ;;  %v3352_v19 = vmax.f32 %v3350_v63, %v3351_v31  ;;  %5410 = vmatmul.mubr.bf16.gmra.mrb[164].mxu0 %v4299_v47  ;;  %v14061_v15 = vcombine.high %v9160_v30, %v9164_v55  ;;  %v9172_v47 = vld [vmem:[#allocation9 + $0x160] sm:$0xff] }
 0x37a   :  { %v3354_v0 = vmax.f32 %v3353_v12, %v3113_v6  ;;  %v3115_v60 = vmax.f32 %v14719_v54, 0.0  ;;  %v18162_v25 = vsel %vm9001_vm11, %v3343_v11, %v3325_v20  ;;  %5419 = vmatprep.mubr.bf16.mxu0 %v4305_v1  ;;  %v4302_v63 = vrot.slane %v17476_v53, 1 }
 0x37b   :  { %v3363_v56 = vmax.f32 %v3362_v17, %v3114_v61  ;;  %v3116_v59 = vmax.f32 %v14720_v4, 0.0  ;;  %12247 = vmatpush1.bf16.msra.mxu0 %v14044_v24  ;;  %v18165_v57 = vsel %vm9001_vm11, %v3352_v19, %v3334_v48  ;;  %v9168_v17 = vld [vmem:[#allocation9 + $0x140] sm:$0xff]  ;;  %v14060_v24 = vcombine.low %v9160_v30, %v9164_v55 }
 0x37c   :  { %v3275_v51 = vsel %vm3168_vm8, %v3115_v60, 0.0  ;;  %12248 = vmatprep.subr.bf16.mxu0 %v14053_v7  ;;  %v20145_v19 = vld [vmem:[#allocation63_spill] sm:$0xff]  ;;  %v14069_v53 = vcombine.high %v9168_v17, %v9172_v47  ;;  %v20146_v7 = vrot.slane %v20136_v14, 1  ;;  %v4306_v61 = vrot.slane %v17498_v23, 1 }
 0x37d   :  { %v3355_v37 = vmax.f32 %v3354_v0, %v3275_v51  ;;  %v3276_v12 = vsel %vm3168_vm8, %v3116_v59, 0.0  ;;  %v2994_v21 = vpop.f32.mrb[120].mxu1  ;;  %v4308_v62 = vrot.slane %v20145_v19, 1  ;;  %v9176_v4 = vld [vmem:[#allocation9 + $0x180] sm:$0xff]  ;;  %v20147_v30 = vrot.slane %v20138_v10, 1 }
 0x37e   :  { %v3364_v2 = vmax.f32 %v3363_v56, %v3276_v12  ;;  %v14721_v26 = vadd.f32 %v2994_v21, %v18060_v49  ;;  %v2996_v44 = vpop.f32.mrb[121].mxu1  ;;  %v4303_v20 = vsel %vm3461_vm4, %v20146_v7, %v4302_v63  ;;  %v9180_v48 = vld [vmem:[#allocation9 + $0x1a0] sm:$0xff]  ;;  %v14068_v51 = vcombine.low %v9168_v17, %v9172_v47 }
 0x37f   :  { %v3356_v52 = vrot.slane %v3355_v37, 4  ;;  %v14722_v1 = vadd.f32 %v2996_v44, %v18064_v40  ;;  %v2998_v29 = vpop.f32.mrb[122].mxu1  ;;  %12249 = vmatpush1.bf16.msra.mxu0 %v14052_v45  ;;  %v4309_v55 = vsel %vm3461_vm4, %v20147_v30, %v4308_v62  ;;  %v14077_v12 = vcombine.high %v9176_v4, %v9180_v48  ;;  %v9184_v44 = vld [vmem:[#allocation9 + $0x1c0] sm:$0xff]  ;;  %v20148_v30 = vld [vmem:[#allocation52_spill] sm:$0xff] }
 0x380   :  { %v3365_v31 = vrot.slane %v3364_v2, 4  ;;  %v14723_v6 = vadd.f32 %v2998_v29, %v18060_v49  ;;  %v3000_v54 = vpop.f32.mrb[123].mxu1  ;;  %12250 = vmatprep.subr.bf16.mxu0 %v14061_v15  ;;  %v3117_v60 = vmax.f32 %v14721_v26, 0.0  ;;  %v4307_v17 = vsel %vm3461_vm4, %v4302_v63, %v4306_v61  ;;  %v9196_v63 = vld [vmem:[#allocation9 + $0x220] sm:$0xff] }
 0x381   :  { %v3357_v34 = vmax.f32 %v3355_v37, %v3356_v52  ;;  %v14724_v11 = vadd.f32 %v3000_v54, %v18064_v40  ;;  %5420 = vmatmul.mubr.bf16.gmra.mrb[168].mxu0 %v4303_v20  ;;  %v3118_v14 = vmax.f32 %v14722_v1, 0.0  ;;  %v9188_v52 = vld [vmem:[#allocation9 + $0x1e0] sm:$0xff]  ;;  %v14076_v54 = vcombine.low %v9176_v4, %v9180_v48 }
 0x382   :  { %v3366_v0 = vmax.f32 %v3364_v2, %v3365_v31  ;;  %v3119_v56 = vmax.f32 %v14723_v6, 0.0  ;;  %5429 = vmatprep.mubr.bf16.mxu0 %v4309_v55  ;;  %v4312_v6 = vrot.slane %v17531_v50, 1  ;;  %vm3172_vm12 = vcmp.lt.s32.totalorder %v20148_v30, 28 }
 0x383   :  { %v3358_v59 = vrot.slane %v3357_v34, 2  ;;  %v3120_v45 = vmax.f32 %v14724_v11, 0.0  ;;  %12251 = vmatpush1.bf16.msra.mxu0 %v14060_v24  ;;  %v14085_v11 = vcombine.high %v9184_v44, %v9188_v52 }
 0x384   :  { %v3367_v15 = vrot.slane %v3366_v0, 2  ;;  %v3371_v37 = vmax.f32 %v3117_v60, %v3119_v56  ;;  %12252 = vmatprep.subr.bf16.mxu0 %v14069_v53  ;;  %v9192_v56 = vld [vmem:[#allocation9 + $0x200] sm:$0xff]  ;;  %v4313_v4 = vsel %vm3461_vm4, %v4308_v62, %v4312_v6 }
 0x385   :  { %v3359_v21 = vmax.f32 %v3357_v34, %v3358_v59  ;;  %v3380_v2 = vmax.f32 %v3118_v14, %v3120_v45  ;;  %v3004_v26 = vpop.f32.mrb[124].mxu1  ;;  %v14093_v19 = vcombine.high %v9192_v56, %v9196_v63 }
 0x386   :  { %v3368_v29 = vmax.f32 %v3366_v0, %v3367_v15  ;;  %v14725_v10 = vadd.f32 %v3004_v26, %v18060_v49  ;;  %v3006_v31 = vpop.f32.mrb[125].mxu1 }
 0x387   :  { %v3360_v1 = vrot.slane %v3359_v21, 1  ;;  %v14726_v47 = vadd.f32 %v3006_v31, %v18064_v40  ;;  %v3008_v24 = vpop.f32.mrb[126].mxu1  ;;  %12253 = vmatpush1.bf16.msra.mxu0 %v14068_v51 }
 0x388   :  { %v3369_v53 = vrot.slane %v3368_v29, 1  ;;  %v3121_v34 = vmax.f32 %v14725_v10, 0.0  ;;  %v14727_v7 = vadd.f32 %v3008_v24, %v18060_v49  ;;  %v3010_v20 = vpop.f32.mrb[127].mxu1  ;;  %12254 = vmatprep.subr.bf16.mxu0 %v14077_v12  ;;  %v14084_v12 = vcombine.low %v9184_v44, %v9188_v52  ;;  %v9204_v10 = vld [vmem:[#allocation9 + $0x260] sm:$0xff] }
 0x389   :  { %v3361_v0 = vmax.f32 %v3359_v21, %v3360_v1  ;;  %v3122_v60 = vmax.f32 %v14726_v47, 0.0  ;;  %v14728_v55 = vadd.f32 %v3010_v20, %v18064_v40  ;;  %5430 = vmatmul.mubr.bf16.gmra.mrb[172].mxu0 %v4307_v17  ;;  %v14092_v24 = vcombine.low %v9192_v56, %v9196_v63 }
 0x38a   :  { %v3370_v59 = vmax.f32 %v3368_v29, %v3369_v53  ;;  %v3372_v14 = vmax.f32 %v3371_v37, %v3121_v34  ;;  %v3123_v48 = vmax.f32 %v14727_v7, 0.0  ;;  %5439 = vmatprep.mubr.bf16.mxu0 %v4313_v4  ;;  %v9200_v29 = vld [vmem:[#allocation9 + $0x240] sm:$0xff] }
 0x38b   :  { %v18202_v45 = vsel %vm9003_vm14, %v3361_v0, %v18162_v25  ;;  %v3381_v51 = vmax.f32 %v3380_v2, %v3122_v60  ;;  %v3124_v15 = vmax.f32 %v14728_v55, 0.0  ;;  %12255 = vmatpush1.bf16.msra.mxu0 %v14076_v54  ;;  %v4310_v2 = vrot.slane %v17529_v35, 1  ;;  %v9208_v60 = vld [vmem:[#allocation9 + $0x280] sm:$0xff] }
 0x38c   :  { %v18206_v37 = vsel %vm9003_vm14, %v3370_v59, %v18165_v57  ;;  %v3283_v21 = vsel %vm3172_vm12, %v3123_v48, 0.0  ;;  %12256 = vmatprep.subr.bf16.mxu0 %v14085_v11  ;;  %v4316_v57 = vrot.slane %v17555_v18, 1  ;;  %v14101_v35 = vcombine.high %v9200_v29, %v9204_v10  ;;  %v9212_v55 = vld [vmem:[#allocation9 + $0x2a0] sm:$0xff] }
 0x38d   :  { %v3373_v62 = vmax.f32 %v3372_v14, %v3283_v21  ;;  %v3284_v26 = vsel %vm3172_vm12, %v3124_v15, 0.0  ;;  %v3014_v25 = vpop.f32.mrb[128].mxu1  ;;  %v4311_v20 = vsel %vm3461_vm4, %v4306_v61, %v4310_v2  ;;  %v4314_v0 = vrot.slane %v17550_v36, 1 }
 0x38e   :  { %v3382_v31 = vmax.f32 %v3381_v51, %v3284_v26  ;;  %v14729_v44 = vadd.f32 %v3014_v25, %v18060_v49  ;;  %v3016_v52 = vpop.f32.mrb[129].mxu1  ;;  %v4317_v56 = vsel %vm3461_vm4, %v4312_v6, %v4316_v57  ;;  %v14100_v48 = vcombine.low %v9200_v29, %v9204_v10  ;;  %v9216_v26 = vld [vmem:[#allocation9 + $0x2c0] sm:$0xff] }
 0x38f   :  { %v3374_v1 = vrot.slane %v3373_v62, 4  ;;  %v14730_v17 = vadd.f32 %v3016_v52, %v18064_v40  ;;  %v3018_v47 = vpop.f32.mrb[130].mxu1  ;;  %12257 = vmatpush1.bf16.msra.mxu0 %v14084_v12  ;;  %v14109_v12 = vcombine.high %v9208_v60, %v9212_v55  ;;  %v9220_v25 = vld [vmem:[#allocation9 + $0x2e0] sm:$0xff]  ;;  %v4315_v29 = vsel %vm3461_vm4, %v4310_v2, %v4314_v0 }
 0x390   :  { %v3383_v54 = vrot.slane %v3382_v31, 4  ;;  %v14731_v53 = vadd.f32 %v3018_v47, %v18060_v49  ;;  %v3020_v34 = vpop.f32.mrb[131].mxu1  ;;  %12258 = vmatprep.subr.bf16.mxu0 %v14093_v19  ;;  %v3125_v14 = vmax.f32 %v14729_v44, 0.0  ;;  %v4320_v44 = vrot.slane %v17583_v16, 1  ;;  %v9228_v2 = vld [vmem:[#allocation9 + $0x320] sm:$0xff] }
 0x391   :  { %v3375_v7 = vmax.f32 %v3373_v62, %v3374_v1  ;;  %v14732_v11 = vadd.f32 %v3020_v34, %v18064_v40  ;;  %5440 = vmatmul.mubr.bf16.gmra.mrb[176].mxu0 %v4311_v20  ;;  %v3126_v23 = vmax.f32 %v14730_v17, 0.0  ;;  %v14108_v17 = vcombine.low %v9208_v60, %v9212_v55  ;;  %v20149_v20 = vld [vmem:[#allocation64_spill] sm:$0xff] }
 0x392   :  { %v3384_v59 = vmax.f32 %v3382_v31, %v3383_v54  ;;  %v3127_v63 = vmax.f32 %v14731_v53, 0.0  ;;  %5449 = vmatprep.mubr.bf16.mxu0 %v4317_v56  ;;  %v14117_v34 = vcombine.high %v9216_v26, %v9220_v25  ;;  %vm3176_vm7 = vcmp.lt.s32.totalorder %v20149_v20, 28 }
 0x393   :  { %v3376_v4 = vrot.slane %v3375_v7, 2  ;;  %v3128_v61 = vmax.f32 %v14732_v11, 0.0  ;;  %12259 = vmatpush1.bf16.msra.mxu0 %v14092_v24  ;;  %v4321_v60 = vsel %vm3461_vm4, %v4316_v57, %v4320_v44 }
 0x394   :  { %v3385_v51 = vrot.slane %v3384_v59, 2  ;;  %v3389_v15 = vmax.f32 %v3125_v14, %v3127_v63  ;;  %12260 = vmatprep.subr.bf16.mxu0 %v14101_v35 }
 0x395   :  { %v3377_v21 = vmax.f32 %v3375_v7, %v3376_v4  ;;  %v3398_v19 = vmax.f32 %v3126_v23, %v3128_v61  ;;  %v3024_v62 = vpop.f32.mrb[132].mxu1  ;;  %v14116_v61 = vcombine.low %v9216_v26, %v9220_v25 }
 0x396   :  { %v3386_v31 = vmax.f32 %v3384_v59, %v3385_v51  ;;  %v14733_v50 = vadd.f32 %v3024_v62, %v18060_v49  ;;  %v3026_v6 = vpop.f32.mrb[133].mxu1  ;;  %v9224_v59 = vld [vmem:[#allocation9 + $0x300] sm:$0xff] }
 0x397   :  { %v3378_v52 = vrot.slane %v3377_v21, 1  ;;  %v14734_v10 = vadd.f32 %v3026_v6, %v18064_v40  ;;  %v3028_v1 = vpop.f32.mrb[134].mxu1  ;;  %12261 = vmatpush1.bf16.msra.mxu0 %v14100_v48  ;;  %v14125_v18 = vcombine.high %v9224_v59, %v9228_v2 }
 0x398   :  { %v3387_v47 = vrot.slane %v3386_v31, 1  ;;  %v3129_v24 = vmax.f32 %v14733_v50, 0.0  ;;  %v14735_v54 = vadd.f32 %v3028_v1, %v18060_v49  ;;  %v3030_v53 = vpop.f32.mrb[135].mxu1  ;;  %12262 = vmatprep.subr.bf16.mxu0 %v14109_v12  ;;  %v4318_v12 = vrot.slane %v17580_v43, 1 }
 0x399   :  { %v3379_v35 = vmax.f32 %v3377_v21, %v3378_v52  ;;  %v3130_v7 = vmax.f32 %v14734_v10, 0.0  ;;  %v14736_v11 = vadd.f32 %v3030_v53, %v18064_v40  ;;  %5450 = vmatmul.mubr.bf16.gmra.mrb[180].mxu0 %v4315_v29  ;;  %v9232_v21 = vld [vmem:[#allocation9 + $0x340] sm:$0xff]  ;;  %v14124_v52 = vcombine.low %v9224_v59, %v9228_v2 }
 0x39a   :  { %v3388_v14 = vmax.f32 %v3386_v31, %v3387_v47  ;;  %v3390_v56 = vmax.f32 %v3389_v15, %v3129_v24  ;;  %v3131_v55 = vmax.f32 %v14735_v54, 0.0  ;;  %5459 = vmatprep.mubr.bf16.mxu0 %v4321_v60  ;;  %v4319_v47 = vsel %vm3461_vm4, %v4314_v0, %v4318_v12  ;;  %v9240_v54 = vld [vmem:[#allocation9 + $0x380] sm:$0xff] }
 0x39b   :  { %v18243_v63 = vsel %vm9005_vm15, %v3379_v35, %v18202_v45  ;;  %v3399_v4 = vmax.f32 %v3398_v19, %v3130_v7  ;;  %v3132_v23 = vmax.f32 %v14736_v11, 0.0  ;;  %12263 = vmatpush1.bf16.msra.mxu0 %v14108_v17  ;;  %v9236_v19 = vld [vmem:[#allocation9 + $0x360] sm:$0xff] }
 0x39c   :  { %v18247_v48 = vsel %vm9005_vm15, %v3388_v14, %v18206_v37  ;;  %v3291_v51 = vsel %vm3176_vm7, %v3131_v55, 0.0  ;;  %12264 = vmatprep.subr.bf16.mxu0 %v14117_v34  ;;  %v4324_v37 = vrot.slane %v17613_v3, 1  ;;  %v14133_v43 = vcombine.high %v9232_v21, %v9236_v19  ;;  %v9244_v53 = vld [vmem:[#allocation9 + $0x3a0] sm:$0xff] }
 0x39d   :  { %v3391_v57 = vmax.f32 %v3390_v56, %v3291_v51  ;;  %v3292_v15 = vsel %vm3176_vm7, %v3132_v23, 0.0  ;;  %v3034_v45 = vpop.f32.mrb[136].mxu1  ;;  %v4322_v3 = vrot.slane %v17609_v9, 1  ;;  %v14132_v0 = vcombine.low %v9232_v21, %v9236_v19  ;;  %v9252_v51 = vld [vmem:[#allocation9 + $0x3e0] sm:$0xff] }
 0x39e   :  { %v3400_v62 = vmax.f32 %v3399_v4, %v3292_v15  ;;  %v14737_v26 = vadd.f32 %v3034_v45, %v18060_v49  ;;  %v3036_v25 = vpop.f32.mrb[137].mxu1  ;;  %v4325_v7 = vsel %vm3461_vm4, %v4320_v44, %v4324_v37  ;;  %v14141_v60 = vcombine.high %v9240_v54, %v9244_v53 }
 0x39f   :  { %v3392_v31 = vrot.slane %v3391_v57, 4  ;;  %v14738_v50 = vadd.f32 %v3036_v25, %v18064_v40  ;;  %v3038_v6 = vpop.f32.mrb[138].mxu1  ;;  %12265 = vmatpush1.bf16.msra.mxu0 %v14116_v61  ;;  %v4328_v23 = vrot.slane %v17636_v33, 1  ;;  %v9248_v61 = vld [vmem:[#allocation9 + $0x3c0] sm:$0xff]  ;;  %v4323_v15 = vsel %vm3461_vm4, %v4318_v12, %v4322_v3 }
 0x3a0   :  { %v3401_v29 = vrot.slane %v3400_v62, 4  ;;  %v14739_v10 = vadd.f32 %v3038_v6, %v18060_v49  ;;  %v3040_v1 = vpop.f32.mrb[139].mxu1  ;;  %12266 = vmatprep.subr.bf16.mxu0 %v14125_v18  ;;  %v3133_v35 = vmax.f32 %v14737_v26, 0.0  ;;  %v14140_v19 = vcombine.low %v9240_v54, %v9244_v53 }
 0x3a1   :  { %v3393_v17 = vmax.f32 %v3391_v57, %v3392_v31  ;;  %v14740_v24 = vadd.f32 %v3040_v1, %v18064_v40  ;;  %5460 = vmatmul.mubr.bf16.gmra.mrb[184].mxu0 %v4319_v47  ;;  %v3134_v2 = vmax.f32 %v14738_v50, 0.0  ;;  %v14149_v31 = vcombine.high %v9248_v61, %v9252_v51 }
 0x3a2   :  { %v3402_v34 = vmax.f32 %v3400_v62, %v3401_v29  ;;  %v3135_v11 = vmax.f32 %v14739_v10, 0.0  ;;  %5469 = vmatprep.mubr.bf16.mxu0 %v4325_v7  ;;  %v4329_v6 = vsel %vm3461_vm4, %v4324_v37, %v4328_v23  ;;  %v14157_v37 = vcombine.high %v18129_v13, %v18133_v58 }
 0x3a3   :  { %v3394_v59 = vrot.slane %v3393_v17, 2  ;;  %v3136_v36 = vmax.f32 %v14740_v24, 0.0  ;;  %12267 = vmatpush1.bf16.msra.mxu0 %v14124_v52  ;;  %v20150_v52 = vld [vmem:[#allocation65_spill] sm:$0xff]  ;;  %v14148_v24 = vcombine.low %v9248_v61, %v9252_v51  ;;  %v4330_v9 = vrot.slane %v20110_v39, 1 }
 0x3a4   :  { %v3403_v14 = vrot.slane %v3402_v34, 2  ;;  %v3407_v56 = vmax.f32 %v3133_v35, %v3135_v11  ;;  %12268 = vmatprep.subr.bf16.mxu0 %v14133_v43  ;;  %vm3180_vm10 = vcmp.lt.s32.totalorder %v20150_v52, 28  ;;  %v4326_v11 = vrot.slane %v17632_v22, 1 }
 0x3a5   :  { %v3416_v55 = vmax.f32 %v3134_v2, %v3136_v36  ;;  %v3044_v4 = vpop.f32.mrb[140].mxu1  ;;  %v3395_v16 = vmax.f32 %v3393_v17, %v3394_v59  ;;  %v4332_v59 = vrot.slane %v20108_v27, 1 }
 0x3a6   :  { %v3404_v18 = vmax.f32 %v3402_v34, %v3403_v14  ;;  %v14741_v44 = vadd.f32 %v3044_v4, %v18060_v49  ;;  %v3046_v57 = vpop.f32.mrb[141].mxu1  ;;  %v4327_v22 = vsel %vm3461_vm4, %v4322_v3, %v4326_v11 }
 0x3a7   :  { %v14742_v45 = vadd.f32 %v3046_v57, %v18064_v40  ;;  %v3048_v21 = vpop.f32.mrb[142].mxu1  ;;  %12269 = vmatpush1.bf16.msra.mxu0 %v14132_v0  ;;  %v3396_v12 = vrot.slane %v3395_v16, 1  ;;  %v4333_v27 = vsel %vm3461_vm4, %v4328_v23, %v4332_v59 }
 0x3a8   :  { %v3405_v62 = vrot.slane %v3404_v18, 1  ;;  %v3137_v26 = vmax.f32 %v14741_v44, 0.0  ;;  %v14743_v33 = vadd.f32 %v3048_v21, %v18060_v49  ;;  %v3050_v25 = vpop.f32.mrb[143].mxu1  ;;  %12270 = vmatprep.subr.bf16.mxu0 %v14141_v60 }
 0x3a9   :  { %v3138_v50 = vmax.f32 %v14742_v45, 0.0  ;;  %v14744_v29 = vadd.f32 %v3050_v25, %v18064_v40  ;;  %5470 = vmatmul.mubr.bf16.gmra.mrb[188].mxu0 %v4323_v15  ;;  %v3397_v2 = vmax.f32 %v3395_v16, %v3396_v12 }
 0x3aa   :  { %v3406_v10 = vmax.f32 %v3404_v18, %v3405_v62  ;;  %v3408_v1 = vmax.f32 %v3407_v56, %v3137_v26  ;;  %v3139_v43 = vmax.f32 %v14743_v33, 0.0  ;;  %5479 = vmatprep.mubr.bf16.mxu0 %v4329_v6 }
 0x3ab   :  { %v3417_v17 = vmax.f32 %v3416_v55, %v3138_v50  ;;  %v3140_v47 = vmax.f32 %v14744_v29, 0.0  ;;  %12271 = vmatpush1.bf16.msra.mxu0 %v14140_v19  ;;  %v9043_v15 = vsel %vm9007_vm2, %v3397_v2, %v18243_v63 }
 0x3ac   :  { %v3299_v54 = vsel %vm3180_vm10, %v3139_v43, 0.0  ;;  %12272 = vmatprep.subr.bf16.mxu0 %v14149_v31  ;;  %v18282_v53 = vsel %vm9007_vm2, %v3406_v10, %v18247_v48 }
 0x3ad   :  { %v3409_v34 = vmax.f32 %v3408_v1, %v3299_v54  ;;  %v3300_v35 = vsel %vm3180_vm10, %v3140_v47, 0.0  ;;  %v3054_v7 = vpop.f32.mrb[144].mxu1  ;;  %v4331_v1 = vsel %vm3461_vm4, %v4326_v11, %v4330_v9 }
 0x3ae   :  { %v3418_v36 = vmax.f32 %v3417_v17, %v3300_v35  ;;  %v14745_v0 = vadd.f32 %v3054_v7, %v18060_v49  ;;  %v3056_v14 = vpop.f32.mrb[145].mxu1  ;;  %v20152_v35 = vrot.slane %v17682_v28, 1 }
 0x3af   :  { %v3410_v56 = vrot.slane %v3409_v34, 4  ;;  %v14746_v60 = vadd.f32 %v3056_v14, %v18064_v40  ;;  %v3058_v55 = vpop.f32.mrb[146].mxu1  ;;  %12273 = vmatpush1.bf16.msra.mxu0 %v14148_v24  ;;  %v20151_v24 = vld [vmem:[#allocation66_spill] sm:$0xff] }
 0x3b0   :  { %v3419_v48 = vrot.slane %v3418_v36, 4  ;;  %v14747_v4 = vadd.f32 %v3058_v55, %v18060_v49  ;;  %v3060_v61 = vpop.f32.mrb[147].mxu1  ;;  %12283 = vmatprep.subr.bf16.mxu0 %v14157_v37  ;;  %v3141_v44 = vmax.f32 %v14745_v0, 0.0  ;;  %vm3184_vm8 = vcmp.lt.s32.totalorder %v20151_v24, 28 }
 0x3b1   :  { %v3411_v51 = vmax.f32 %v3409_v34, %v3410_v56  ;;  %v14748_v16 = vadd.f32 %v3060_v61, %v18064_v40  ;;  %5480 = vmatmul.mubr.bf16.gmra.mrb[192].mxu0 %v4327_v22  ;;  %v3142_v21 = vmax.f32 %v14746_v60, 0.0  ;;  %v4337_v7 = vsel %vm3461_vm4, %v4332_v59, %v20152_v35 }
 0x3b2   :  { %v3420_v18 = vmax.f32 %v3418_v36, %v3419_v48  ;;  %v3143_v57 = vmax.f32 %v14747_v4, 0.0  ;;  %5489 = vmatprep.mubr.bf16.mxu0 %v4333_v27 }
 0x3b3   :  { %v3412_v45 = vrot.slane %v3411_v51, 2  ;;  %v3144_v19 = vmax.f32 %v14748_v16, 0.0 }
 0x3b4   :  { %v3421_v62 = vrot.slane %v3420_v18, 2  ;;  %v3425_v26 = vmax.f32 %v3141_v44, %v3143_v57  ;;  %v20153_v57 = vrot.slane %v17680_v38, 1 }
 0x3b5   :  { %v3413_v3 = vmax.f32 %v3411_v51, %v3412_v45  ;;  %v3434_v33 = vmax.f32 %v3142_v21, %v3144_v19  ;;  %v3064_v23 = vpop.f32.mrb[148].mxu1 }
 0x3b6   :  { %v3422_v25 = vmax.f32 %v3420_v18, %v3421_v62  ;;  %v14749_v31 = vadd.f32 %v3064_v23, %v18060_v49  ;;  %v3066_v50 = vpop.f32.mrb[149].mxu1 }
 0x3b7   :  { %v3414_v6 = vrot.slane %v3413_v3, 1  ;;  %v14750_v29 = vadd.f32 %v3066_v50, %v18064_v40  ;;  %v3068_v12 = vpop.f32.mrb[150].mxu1 }
 0x3b8   :  { %v3423_v63 = vrot.slane %v3422_v25, 1  ;;  %v3145_v10 = vmax.f32 %v14749_v31, 0.0  ;;  %v14751_v43 = vadd.f32 %v3068_v12, %v18060_v49  ;;  %v3070_v17 = vpop.f32.mrb[151].mxu1 }
 0x3b9   :  { %v3415_v47 = vmax.f32 %v3413_v3, %v3414_v6  ;;  %v3146_v39 = vmax.f32 %v14750_v29, 0.0  ;;  %v14752_v54 = vadd.f32 %v3070_v17, %v18064_v40  ;;  %5490 = vmatmul.mubr.bf16.gmra.mrb[196].mxu0 %v4331_v1 }
 0x3ba   :  { %v3424_v37 = vmax.f32 %v3422_v25, %v3423_v63  ;;  %v3426_v34 = vmax.f32 %v3425_v26, %v3145_v10  ;;  %v3147_v2 = vmax.f32 %v14751_v43, 0.0  ;;  %5499 = vmatprep.mubr.bf16.mxu0 %v4337_v7  ;;  %v6099_v10 = vld [vmem:[#allocation4 + $0x3] ss:$4 sm:$0x3] }
 0x3bb   :  { %v3435_v36 = vmax.f32 %v3434_v33, %v3146_v39  ;;  %v3148_v11 = vmax.f32 %v14752_v54, 0.0  ;;  %v9044_v0 = vsel %vm9009_vm9, %v3415_v47, %v9043_v15  ;;  %v20154_v54 = vld [vmem:[#allocation43_spill] sm:$0xff] }
 0x3bc   :  { %v3307_v14 = vsel %vm3184_vm8, %v3147_v2, 0.0  ;;  %v9051_v56 = vsel %vm9009_vm9, %v3424_v37, %v18282_v53  ;;  %v4335_v53 = vsel %vm3461_vm4, %v4330_v9, %v20153_v57  ;;  %vm3188_vm12 = vcmp.lt.s32.totalorder %v20154_v54, 28 }
 0x3bd   :  { %v3427_v60 = vmax.f32 %v3426_v34, %v3307_v14  ;;  %v3308_v55 = vsel %vm3184_vm8, %v3148_v11, 0.0  ;;  %v3074_v48 = vpop.f32.mrb[152].mxu1  ;;  %v18326_v2 = vrot.slane %v6099_v10, %v20118_v46  ;;  %vm5635_vm8 = vcmp.lt.s32.totalorder %v20141_v42, 26 }
 0x3be   :  { %v3436_v4 = vmax.f32 %v3435_v36, %v3308_v55  ;;  %v14753_v61 = vadd.f32 %v3074_v48, %v18060_v49  ;;  %v3076_v51 = vpop.f32.mrb[153].mxu1 }
 0x3bf   :  { %v3428_v28 = vrot.slane %v3427_v60, 4  ;;  %v14754_v59 = vadd.f32 %v3076_v51, %v18064_v40  ;;  %v3078_v22 = vpop.f32.mrb[154].mxu1 }
 0x3c0   :  { %v3437_v27 = vrot.slane %v3436_v4, 4  ;;  %v14755_v16 = vadd.f32 %v3078_v22, %v18060_v49  ;;  %v3080_v18 = vpop.f32.mrb[155].mxu1  ;;  %v3149_v21 = vmax.f32 %v14753_v61, 0.0 }
 0x3c1   :  { %v3429_v44 = vmax.f32 %v3427_v60, %v3428_v28  ;;  %v14756_v15 = vadd.f32 %v3080_v18, %v18064_v40  ;;  %5500 = vmatmul.mubr.bf16.gmra.mrb[200].mxu0 %v4335_v53  ;;  %v3150_v26 = vmax.f32 %v14754_v59, 0.0 }
 0x3c2   :  { %v3438_v45 = vmax.f32 %v3436_v4, %v3437_v27  ;;  %v3151_v19 = vmax.f32 %v14755_v16, 0.0  ;;  %5509 = vmatprep.mubr.bf16.mxu0 %v17938_v32 }
 0x3c3   :  { %v3430_v62 = vrot.slane %v3429_v44, 2  ;;  %v3152_v3 = vmax.f32 %v14756_v15, 0.0 }
 0x3c4   :  { %v3439_v33 = vrot.slane %v3438_v45, 2  ;;  %v3443_v23 = vmax.f32 %v3149_v21, %v3151_v19 }
 0x3c5   :  { %v3431_v25 = vmax.f32 %v3429_v44, %v3430_v62  ;;  %v3452_v31 = vmax.f32 %v3150_v26, %v3152_v3  ;;  %v3084_v50 = vpop.f32.mrb[156].mxu1 }
 0x3c6   :  { %v3440_v6 = vmax.f32 %v3438_v45, %v3439_v33  ;;  %v14757_v38 = vadd.f32 %v3084_v50, %v18060_v49  ;;  %v3086_v9 = vpop.f32.mrb[157].mxu1  ;;  %v20156_v45 = vld [vmem:[#allocation25_spill] sm:$0xff] }
 0x3c7   :  { %v3432_v29 = vrot.slane %v3431_v25, 1  ;;  %v14758_v12 = vadd.f32 %v3086_v9, %v18064_v40  ;;  %v3088_v63 = vpop.f32.mrb[158].mxu1 }
 0x3c8   :  { %v3441_v1 = vrot.slane %v3440_v6, 1  ;;  %v3153_v43 = vmax.f32 %v14757_v38, 0.0  ;;  %v14759_v17 = vadd.f32 %v3088_v63, %v18060_v49  ;;  %v3090_v32 = vpop.f32.mrb[159].mxu1  ;;  %v18330_v49 = vrot.slane %v6099_v10, %v20120_v8  ;;  %v15747_v38 = vld [vmem:[#allocation6 + $0x714] ss:$8 sps:$4 sm:$0xff]  }
 0x3c9   :  { %v3433_v47 = vmax.f32 %v3431_v25, %v3432_v29  ;;  %v3154_v39 = vmax.f32 %v14758_v12, 0.0  ;;  %v14760_v37 = vadd.f32 %v3090_v32, %v18064_v40  ;;  %5510 = vmatmul.mubr.bf16.gmra.mrb[204].mxu0 %v17947_v5  ;;  %v15742_v25 = vld [vmem:[#allocation6 + $0x700] ss:$8 sps:$4 sm:$0xff]   ;;  %v15745_v32 = vld [vmem:[#allocation6 + $0x710] ss:$8 sps:$4 sm:$0xff]  }
 0x3ca   :  { %v3442_v34 = vmax.f32 %v3440_v6, %v3441_v1  ;;  %v3444_v35 = vmax.f32 %v3443_v23, %v3153_v43  ;;  %v3155_v7 = vmax.f32 %v14759_v17, 0.0  ;;  %5519 = vmatprep.mubr.bf16.mxu0 %v17950_v41 }
 0x3cb   :  { %v3453_v36 = vmax.f32 %v3452_v31, %v3154_v39  ;;  %v3156_v11 = vmax.f32 %v14760_v37, 0.0  ;;  %v9045_v14 = vsel %vm9011_vm13, %v3433_v47, %v9044_v0  ;;  %v20159_v39 = vld [vmem:[#allocation38_spill] sm:$0xff] }
 0x3cc   :  { %v3315_v60 = vsel %vm3188_vm12, %v3155_v7, 0.0  ;;  %v9052_v40 = vsel %vm9011_vm13, %v3442_v34, %v9051_v56  ;;  %v20155_v56 = vld [vmem:[#allocation39_spill] sm:$0xff]  ;;  %v20160_v7 = vld [vmem:[#allocation26_spill] sm:$0xff] }
 0x3cd   :  { %v3445_v55 = vmax.f32 %v3444_v35, %v3315_v60  ;;  %v3316_v48 = vsel %vm3188_vm12, %v3156_v11, 0.0  ;;  %v6225_v4 = vpop.f32.mrb[160].mxu1  ;;  %v15750_v35 = vld [vmem:[#allocation6 + $0x724] ss:$8 sps:$4 sm:$0xff]  }
 0x3ce   :  { %v3454_v5 = vmax.f32 %v3453_v36, %v3316_v48  ;;  %v6226_v61 = vadd.f32 %v6225_v4, %v18326_v2  ;;  %v6227_v51 = vpop.f32.mrb[161].mxu1 }
 0x3cf   :  { %v3446_v28 = vrot.slane %v3445_v55, 4  ;;  %v6228_v59 = vadd.f32 %v6227_v51, %v18330_v49  ;;  %v6229_v41 = vpop.f32.mrb[162].mxu1 }
 0x3d0   :  { %v3455_v22 = vrot.slane %v3454_v5, 4  ;;  %v6230_v27 = vadd.f32 %v6229_v41, %v18326_v2  ;;  %v6231_v16 = vpop.f32.mrb[163].mxu1  ;;  %v6384_v57 = vmax.f32 %v6226_v61, 0.0  ;;  %v15748_v61 = vld [vmem:[#allocation6 + $0x720] ss:$8 sps:$4 sm:$0xff]  }
 0x3d1   :  { %v3447_v18 = vmax.f32 %v3445_v55, %v3446_v28  ;;  %v6232_v0 = vadd.f32 %v6231_v16, %v18330_v49  ;;  %5520 = vmatmul.mubr.bf16.gmra.mrb[208].mxu0 %v20155_v56  ;;  %v6385_v21 = vmax.f32 %v6228_v59, 0.0  ;;  %v15753_v59 = vld [vmem:[#allocation6 + $0x734] ss:$8 sps:$4 sm:$0xff]   ;;  %v20163_v56 = vld [vmem:[#allocation27_spill] sm:$0xff] }
 0x3d2   :  { %v3456_v44 = vmax.f32 %v3454_v5, %v3455_v22  ;;  %v6386_v53 = vmax.f32 %v6230_v27, 0.0  ;;  %5529 = vmatprep.mubr.bf16.mxu0 %v20156_v45  ;;  %v15756_v45 = vld [vmem:[#allocation6 + $0x744] ss:$8 sps:$4 sm:$0xff]  }
 0x3d3   :  { %v3448_v15 = vrot.slane %v3447_v18, 2  ;;  %v6387_v19 = vmax.f32 %v6232_v0, 0.0  ;;  %v15751_v0 = vld [vmem:[#allocation6 + $0x730] ss:$8 sps:$4 sm:$0xff]  }
 0x3d4   :  { %v3457_v62 = vrot.slane %v3456_v44, 2  ;;  %v18340_v26 = vpack.c.bf16 %v6386_v53, %v6384_v57 }
 0x3d5   :  { %v3449_v3 = vmax.f32 %v3447_v18, %v3448_v15  ;;  %v18342_v33 = vpack.c.bf16 %v6387_v19, %v6385_v21  ;;  %v6235_v23 = vpop.f32.mrb[164].mxu1  ;;  %v20164_v21 = vld [vmem:[#allocation68_spill] sm:$0xff] }
 0x3d6   :  { %20157 = vst [vmem:[#allocation28_spill] sm:$0xff] %v18340_v26  ;;  %v3458_v31 = vmax.f32 %v3456_v44, %v3457_v62  ;;  %v6236_v50 = vadd.f32 %v6235_v23, %v18326_v2  ;;  %v6237_v6 = vpop.f32.mrb[165].mxu1  ;;  %v6483_v41 = vshll.u32 %v18340_v26, 16  ;;  %v6481_v44 = vshrl.u32 %v18340_v26, 16 }
 0x3d7   :  { %20158 = vst [vmem:[#allocation29_spill] sm:$0xff] %v18342_v33  ;;  %v3450_v9 = vrot.slane %v3449_v3, 1  ;;  %v6238_v29 = vadd.f32 %v6237_v6, %v18330_v49  ;;  %v6239_v12 = vpop.f32.mrb[166].mxu1  ;;  %7877 = vmatprep.mubr.bf16.mxu1 %v18342_v33  ;;  %v6495_v62 = vshll.u32 %v18342_v33, 16 }
 0x3d8   :  { %v3459_v63 = vrot.slane %v3458_v31, 1  ;;  %v6240_v10 = vadd.f32 %v6239_v12, %v18326_v2  ;;  %v6241_v1 = vpop.f32.mrb[167].mxu1  ;;  %7878 = vmatmul.mubr.bf16.vlgmr.msra.gmra.mrb[224].mxu1 %v18340_v26  ;;  %v6388_v37 = vmax.f32 %v6236_v50, 0.0  ;;  %v18377_v23 = vrot.slane %v6483_v41, 1 }
 0x3d9   :  { %v3451_v43 = vmax.f32 %v3449_v3, %v3450_v9  ;;  %v6242_v17 = vadd.f32 %v6241_v1, %v18330_v49  ;;  %8039 = vmatpush1.bf16.msra.mxu1 %v15742_v25  ;;  %5530 = vmatmul.mubr.bf16.gmra.mrb[212].mxu0 %v20159_v39  ;;  %v6389_v36 = vmax.f32 %v6238_v29, 0.0  ;;  %v15754_v9 = vld [vmem:[#allocation6 + $0x740] ss:$8 sps:$4 sm:$0xff]   ;;  %v18388_v29 = vrot.slane %v6495_v62, 1 }
 0x3da   :  { %v3460_v47 = vmax.f32 %v3458_v31, %v3459_v63  ;;  %v6390_v34 = vmax.f32 %v6240_v10, 0.0  ;;  %8040 = vmatprep.subr.bf16.mxu1 %v15747_v38  ;;  %5539 = vmatprep.mubr.bf16.mxu0 %v20160_v7  ;;  %20165 = vst [vmem:[#allocation67_spill] sm:$0xff] %v18377_v23  ;;  %v6493_v31 = vshrl.u32 %v18342_v33, 16  ;;  %v6486_v63 = vor.u32 %v18377_v23, %v6481_v44  ;;  %v9376_v23 = vld [vmem:[#allocation9 + $0x7c0] sm:$0xff] }
 0x3db   :  { %v6391_v11 = vmax.f32 %v6242_v17, 0.0  ;;  %v18353_v60 = vsel %vm9013_vm1, %v3451_v43, %v9045_v14  ;;  %20166 = vst [vmem:[#allocation32_spill] sm:$0xff] %v18388_v29  ;;  %v15759_v43 = vld [vmem:[#allocation6 + $0x754] ss:$8 sps:$4 sm:$0xff]  }
 0x3dc   :  { %v18355_v55 = vpack.c.bf16 %v6390_v34, %v6388_v37  ;;  %v18358_v48 = vsel %vm9013_vm1, %v3460_v47, %v9052_v40  ;;  %v6498_v39 = vor.u32 %v18388_v29, %v6493_v31  ;;  %v20167_v34 = vld [vmem:[#allocation71_spill] sm:$0xff] }
 0x3dd   :  { %v18360_v4 = vpack.c.bf16 %v6391_v11, %v6389_v36  ;;  %v6245_v5 = vpop.f32.mrb[168].mxu1  ;;  %8041 = vmatpush1.bf16.msra.mxu1 %v15745_v32 }
 0x3de   :  { %20161 = vst [vmem:[#allocation30_spill] sm:$0xff] %v18355_v55  ;;  %v6246_v51 = vadd.f32 %v6245_v5, %v18326_v2  ;;  %v6247_v28 = vpop.f32.mrb[169].mxu1  ;;  %8042 = vmatprep.subr.bf16.mxu1 %v15750_v35  ;;  %v6488_v40 = vshll.u32 %v18355_v55, 16  ;;  %v18404_v35 = vpack.c.bf16 %v20167_v34, %v20167_v34 }
 0x3df   :  { %20162 = vst [vmem:[#allocation31_spill] sm:$0xff] %v18360_v4  ;;  %v6248_v14 = vadd.f32 %v6247_v28, %v18330_v49  ;;  %v6249_v22 = vpop.f32.mrb[170].mxu1  ;;  %7887 = vmatprep.mubr.bf16.mxu1 %v18360_v4  ;;  %v6500_v3 = vshll.u32 %v18360_v4, 16  ;;  %v6512_v17 = vshrl.u32 %v18360_v4, 16  ;;  %v15757_v28 = vld [vmem:[#allocation6 + $0x750] ss:$8 sps:$4 sm:$0xff]  }
 0x3e0   :  { %v6250_v27 = vadd.f32 %v6249_v22, %v18326_v2  ;;  %v6251_v16 = vpop.f32.mrb[171].mxu1  ;;  %7888 = vmatmul.mubr.bf16.gmra.mrb[228].mxu1 %v18355_v55  ;;  %v6392_v57 = vmax.f32 %v6246_v51, 0.0  ;;  %v18384_v50 = vrot.slane %v6488_v40, 1  ;;  %20168 = vst [vmem:[#allocation44_spill] sm:$0xff] %v18404_v35  ;;  %v20169_v22 = vld [vmem:[#allocation69_spill] sm:$0xff] }
 0x3e1   :  { %v6252_v18 = vadd.f32 %v6251_v16, %v18330_v49  ;;  %8043 = vmatpush1.bf16.msra.mxu1 %v15748_v61  ;;  %5540 = vmatmul.mubr.bf16.gmra.mrb[216].mxu0 %v20163_v56  ;;  %v6393_v53 = vmax.f32 %v6248_v14, 0.0  ;;  %v6502_v12 = vrot.slane %v6500_v3, 1  ;;  %v6909_v14 = vrot.slane %v6493_v31, 1  ;;  %v15762_v16 = vld [vmem:[#allocation6 + $0x764] ss:$8 sps:$4 sm:$0xff]  }
 0x3e2   :  { %v6394_v15 = vmax.f32 %v6250_v27, 0.0  ;;  %8044 = vmatprep.subr.bf16.mxu1 %v15753_v59  ;;  %5549 = vmatprep.mubr.bf16.mxu0 %v20164_v21  ;;  %v18400_v37 = vsel %vm1450_vm0, %v6486_v63, %v18384_v50  ;;  %v6902_v56 = vrot.slane %v6481_v44, 1  ;;  %v18425_v21 = vld [vmem:[#allocation9 + $0x480] sm:$0xff] }
 0x3e3   :  { %v6395_v19 = vmax.f32 %v6252_v18, 0.0  ;;  %v6514_v11 = vor.u32 %v6512_v17, %v6502_v12  ;;  %v18413_v59 = vsel %vm1450_vm0, %v6498_v39, %v6502_v12  ;;  %v18435_v44 = vld [vmem:[#allocation9 + $0x4e0] sm:$0xff] }
 0x3e4   :  { %v18379_v25 = vpack.c.bf16 %v6394_v15, %v6392_v57  ;;  %v18421_v15 = vld [vmem:[#allocation9 + $0x440] sm:$0xff] }
 0x3e5   :  { %v18386_v6 = vpack.c.bf16 %v6395_v19, %v6393_v53  ;;  %v6255_v38 = vpop.f32.mrb[172].mxu1  ;;  %8045 = vmatpush1.bf16.msra.mxu1 %v15751_v0  ;;  %v6910_v0 = vrot.slane %v6495_v62, 2  ;;  %v6903_v19 = vrot.slane %v6483_v41, 2 }
 0x3e6   :  { %v6256_v10 = vadd.f32 %v6255_v38, %v18326_v2  ;;  %v6257_v1 = vpop.f32.mrb[173].mxu1  ;;  %8046 = vmatprep.subr.bf16.mxu1 %v15756_v45  ;;  %v18423_v45 = vld [vmem:[#allocation9 + $0x460] sm:$0xff] }
 0x3e7   :  { %v6258_v32 = vadd.f32 %v6257_v1, %v18330_v49  ;;  %v6259_v47 = vpop.f32.mrb[174].mxu1  ;;  %7897 = vmatprep.mubr.bf16.mxu1 %v18386_v6  ;;  %v19927_v5 = vshll.u32 %v18386_v6, 16  ;;  %v18431_v38 = vld [vmem:[#allocation9 + $0x4a0] sm:$0xff]  ;;  %v18441_v12 = vor.u32 %v6910_v0, %v6909_v14  ;;  %v18453_v39 = vor.u32 %v6903_v19, %v6902_v56 }
 0x3e8   :  { %v6260_v7 = vadd.f32 %v6259_v47, %v18326_v2  ;;  %v6261_v36 = vpop.f32.mrb[175].mxu1  ;;  %7898 = vmatmul.mubr.bf16.gmra.mrb[232].mxu1 %v18379_v25  ;;  %v6396_v61 = vmax.f32 %v6256_v10, 0.0  ;;  %v20171_v1 = vld [vmem:[#allocation70_spill] sm:$0xff] }
 0x3e9   :  { %v6262_v51 = vadd.f32 %v6261_v36, %v18330_v49  ;;  %8047 = vmatpush1.bf16.msra.mxu1 %v15754_v9  ;;  %5550 = vmatmul.mubr.bf16.gmra.mrb[220].mxu0 %v20169_v22  ;;  %v18418_v18 = vrot.slane %v19927_v5, 1  ;;  %v6397_v57 = vmax.f32 %v6258_v32, 0.0  ;;  %v18433_v9 = vld [vmem:[#allocation9 + $0x4c0] sm:$0xff]  ;;  %20170 = vst [vmem:[#allocation33_spill] sm:$0xff] %v18441_v12  ;;  %v18447_v41 = vpack.c.bf16 %v20171_v1, %v20171_v1 }
 0x3ea   :  { %v6398_v27 = vmax.f32 %v6260_v7, 0.0  ;;  %8048 = vmatprep.subr.bf16.mxu1 %v15759_v43  ;;  %12274 = vmatprep.mubr.bf16.mxu0 %v18404_v35  ;;  %v18449_v43 = vld [vmem:[#allocation9 + $0x500] sm:$0xff]  ;;  %20173 = vst [vmem:[#allocation49_spill] sm:$0xff] %v18453_v39  ;;  %v14164_v36 = vcombine.low %v18421_v15, %v18423_v45  ;;  %v6912_v5 = vrot.slane %v6512_v17, 1  ;;  %v15777_v35 = vld [vmem:[#allocation6 + $0x7b4] ss:$8 sps:$4 sm:$0xff]  }
 0x3eb   :  { %v6399_v53 = vmax.f32 %v6262_v51, 0.0  ;;  %v18439_v62 = vsel %vm1450_vm0, %v6514_v11, %v18418_v18  ;;  %20172 = vst [vmem:[#allocation48_spill] sm:$0xff] %v18447_v41  ;;  %v18451_v32 = vld [vmem:[#allocation9 + $0x520] sm:$0xff]  ;;  %v14165_v11 = vcombine.high %v18421_v15, %v18423_v45  ;;  %v6504_v51 = vshrl.u32 %v18355_v55, 16 }
 0x3ec   :  { %v18429_v31 = vpack.c.bf16 %v6398_v27, %v6396_v61  ;;  %v15760_v47 = vld [vmem:[#allocation6 + $0x760] ss:$8 sps:$4 sm:$0xff]   ;;  %v15765_v61 = vld [vmem:[#allocation6 + $0x774] ss:$8 sps:$4 sm:$0xff]   ;;  %v14173_v27 = vcombine.high %v18425_v21, %v18431_v38  ;;  %v15768_v0 = vld [vmem:[#allocation6 + $0x784] ss:$8 sps:$4 sm:$0xff]  }
 0x3ed   :  { %v18443_v63 = vpack.c.bf16 %v6399_v53, %v6397_v57  ;;  %v6265_v10 = vpop.f32.mrb[176].mxu1  ;;  %8049 = vmatpush1.bf16.msra.mxu1 %v15757_v28  ;;  %v18477_v45 = vld [vmem:[#allocation9 + $0x540] sm:$0xff]  ;;  %v6913_v57 = vrot.slane %v6500_v3, 2  ;;  %v19929_v3 = vshll.u32 %v18379_v25, 16 }
 0x3ee   :  { %v6266_v34 = vadd.f32 %v6265_v10, %v18326_v2  ;;  %v6267_v7 = vpop.f32.mrb[177].mxu1  ;;  %8050 = vmatprep.subr.bf16.mxu1 %v15762_v16  ;;  %v18479_v19 = vld [vmem:[#allocation9 + $0x560] sm:$0xff]  ;;  %v18483_v10 = vpack.c.bf16 %v18358_v48, %v18358_v48  ;;  %v6906_v48 = vrot.slane %v6488_v40, 2  ;;  %v19930_v40 = vshrl.u32 %v18386_v6, 16 }
 0x3ef   :  { %v6268_v14 = vadd.f32 %v6267_v7, %v18330_v49  ;;  %v6269_v22 = vpop.f32.mrb[178].mxu1  ;;  %7907 = vmatprep.mubr.bf16.mxu1 %v18443_v63  ;;  %v15763_v7 = vld [vmem:[#allocation6 + $0x770] ss:$8 sps:$4 sm:$0xff]   ;;  %v18505_v28 = vor.u32 %v6913_v57, %v6912_v5  ;;  %v6510_v5 = vrot.slane %v19929_v3, 1 }
 0x3f0   :  { %v6270_v56 = vadd.f32 %v6269_v22, %v18326_v2  ;;  %v6271_v16 = vpop.f32.mrb[179].mxu1  ;;  %7908 = vmatmul.mubr.bf16.gmra.mrb[236].mxu1 %v18429_v31  ;;  %20174 = vst [vmem:[#allocation34_spill] sm:$0xff] %v18483_v10  ;;  %v6905_v22 = vrot.slane %v6504_v51, 1  ;;  %v6400_v53 = vmax.f32 %v6266_v34, 0.0  ;;  %v6530_v57 = vor.u32 %v19930_v40, %v18418_v18 }
 0x3f1   :  { %v6272_v1 = vadd.f32 %v6271_v16, %v18330_v49  ;;  %8051 = vmatpush1.bf16.msra.mxu1 %v15760_v47  ;;  %12275 = vmatmul.mubr.bf16.vlgmr.msra.gmra.mrb[224].mxu0 %v18447_v41  ;;  %v20175_v47 = vcombine.low %v18129_v13, %v18133_v58  ;;  %v6401_v16 = vmax.f32 %v6268_v14, 0.0  ;;  %20176 = vst [vmem:[#allocation53_spill] sm:$0xff] %v18505_v28  ;;  %v15766_v14 = vld [vmem:[#allocation6 + $0x780] ss:$8 sps:$4 sm:$0xff]  }
 0x3f2   :  { %v6402_v15 = vmax.f32 %v6270_v56, 0.0  ;;  %8052 = vmatprep.subr.bf16.mxu1 %v15765_v61  ;;  %12315 = vmatprep.mubr.bf16.mxu0 %v18483_v10  ;;  %v18511_v34 = vor.u32 %v6906_v48, %v6905_v22  ;;  %v6506_v61 = vor.u32 %v6504_v51, %v18384_v50  ;;  %v19933_v50 = vshll.u32 %v18429_v31, 16 }
 0x3f3   :  { %12284 = vmatpush1.bf16.msra.mxu0 %v20175_v47  ;;  %v6403_v17 = vmax.f32 %v6272_v1, 0.0  ;;  %v19928_v1 = vshll.u32 %v18443_v63, 16  ;;  %v20178_v10 = vcombine.low %v18425_v21, %v18431_v38  ;;  %v20181_v21 = vshrl.u32 %v18443_v63, 16 }
 0x3f4   :  { %v18501_v56 = vpack.c.bf16 %v6402_v15, %v6400_v53  ;;  %12285 = vmatprep.subr.bf16.mxu0 %v14165_v11  ;;  %20177 = vst [vmem:[#allocation35_spill] sm:$0xff] %v18511_v34  ;;  %v15771_v15 = vld [vmem:[#allocation6 + $0x794] ss:$8 sps:$4 sm:$0xff]   ;;  %v18529_v18 = vsel %vm1450_vm0, %v6506_v61, %v6510_v5  ;;  %v18543_v61 = vrot.slane %v19933_v50, 1  ;;  %v6808_v50 = vrot.slane %v18379_v25, 1 }
 0x3f5   :  { %v18507_v13 = vpack.c.bf16 %v6403_v17, %v6401_v16  ;;  %v6275_v58 = vpop.f32.mrb[180].mxu1  ;;  %8053 = vmatpush1.bf16.msra.mxu1 %v15763_v7  ;;  %v6534_v22 = vrot.slane %v19928_v1, 1  ;;  %v18536_v1 = vld [vmem:[#allocation9 + $0x5a0] sm:$0xff] }
 0x3f6   :  { %v6276_v53 = vadd.f32 %v6275_v58, %v18326_v2  ;;  %v6277_v11 = vpop.f32.mrb[181].mxu1  ;;  %8054 = vmatprep.subr.bf16.mxu1 %v15768_v0  ;;  %v6520_v0 = vshrl.u32 %v18379_v25, 16  ;;  %v15774_v17 = vld [vmem:[#allocation6 + $0x7a4] ss:$8 sps:$4 sm:$0xff]  }
 0x3f7   :  { %12286 = vmatpush1.bf16.msra.mxu0 %v14164_v36  ;;  %v6278_v7 = vadd.f32 %v6277_v11, %v18330_v49  ;;  %v6279_v16 = vpop.f32.mrb[182].mxu1  ;;  %7917 = vmatprep.mubr.bf16.mxu1 %v18507_v13  ;;  %v18534_v11 = vld [vmem:[#allocation9 + $0x580] sm:$0xff]  ;;  %v6546_v38 = vor.u32 %v20181_v21, %v6534_v22 }
 0x3f8   :  { %12287 = vmatprep.subr.bf16.mxu0 %v14173_v27  ;;  %v6280_v51 = vadd.f32 %v6279_v16, %v18326_v2  ;;  %v6281_v48 = vpop.f32.mrb[183].mxu1  ;;  %7918 = vmatmul.mubr.bf16.gmra.mrb[240].mxu1 %v18501_v56  ;;  %v15769_v27 = vld [vmem:[#allocation6 + $0x790] ss:$8 sps:$4 sm:$0xff]   ;;  %v18539_v16 = vsel %vm1450_vm0, %v6530_v57, %v6534_v22  ;;  %v6522_v3 = vor.u32 %v6520_v0, %v6510_v5  ;;  %v6404_v40 = vmax.f32 %v6276_v53, 0.0 }
 0x3f9   :  { %v6282_v58 = vadd.f32 %v6281_v48, %v18330_v49  ;;  %8055 = vmatpush1.bf16.msra.mxu1 %v15766_v14  ;;  %v6405_v47 = vmax.f32 %v6278_v7, 0.0  ;;  %v19934_v48 = vshll.u32 %v18507_v13, 16  ;;  %v6810_v5 = vrot.slane %v18386_v6, 1 }
 0x3fa   :  { %v6406_v36 = vmax.f32 %v6280_v51, 0.0  ;;  %8056 = vmatprep.subr.bf16.mxu1 %v15771_v15  ;;  %v18551_v57 = vsel %vm1450_vm0, %v6522_v3, %v18543_v61  ;;  %v20180_v15 = vcombine.high %v18433_v9, %v18435_v44  ;;  %v20184_v22 = vrot.slane %v18355_v55, 1 }
 0x3fb   :  { %12288 = vmatpush1.bf16.msra.mxu0 %v20178_v10  ;;  %v6407_v14 = vmax.f32 %v6282_v58, 0.0  ;;  %v18566_v10 = vrot.slane %v19934_v48, 1  ;;  %v18570_v58 = vld [vmem:[#allocation9 + $0x5c0] sm:$0xff] }
 0x3fc   :  { %v18555_v53 = vpack.c.bf16 %v6406_v36, %v6404_v40  ;;  %12289 = vmatprep.subr.bf16.mxu0 %v20180_v15  ;;  %v18572_v40 = vld [vmem:[#allocation9 + $0x5e0] sm:$0xff]  ;;  %v20182_v15 = vrot.slane %v18360_v4, 1  ;;  %v18582_v21 = vsel %vm3461_vm4, %v20184_v22, %v6808_v50  ;;  %v20187_v22 = vcombine.low %v18433_v9, %v18435_v44 }
 0x3fd   :  { %v18568_v3 = vpack.c.bf16 %v6407_v14, %v6405_v47  ;;  %v6285_v51 = vpop.f32.mrb[184].mxu1  ;;  %8057 = vmatpush1.bf16.msra.mxu1 %v15769_v27  ;;  %v15772_v36 = vld [vmem:[#allocation6 + $0x7a0] ss:$8 sps:$4 sm:$0xff]   ;;  %20185 = vst [vmem:[#allocation36_spill] sm:$0xff] %v18582_v21  ;;  %v20186_v47 = vshrl.u32 %v18386_v6, 16  ;;  %v6916_v21 = vrot.slane %v6520_v0, 1 }
 0x3fe   :  { %20179 = vst [vmem:[#allocation54_spill] sm:$0xff] %v18555_v53  ;;  %v18577_v7 = vsel %vm3461_vm4, %v20182_v15, %v6810_v5  ;;  %v6286_v48 = vadd.f32 %v6285_v51, %v18326_v2  ;;  %v6287_v41 = vpop.f32.mrb[185].mxu1  ;;  %8058 = vmatprep.subr.bf16.mxu1 %v15774_v17  ;;  %v18591_v15 = vsel %vm1450_vm0, %v6546_v38, %v18566_v10  ;;  %v19944_v51 = vrot.slane %v18443_v63, 1 }
 0x3ff   :  { %20183 = vst [vmem:[#allocation57_spill] sm:$0xff] %v18577_v7  ;;  %v6920_v14 = vrot.slane %v20186_v47, 1  ;;  %12290 = vmatpush1.bf16.msra.mxu0 %v20187_v22  ;;  %v6288_v47 = vadd.f32 %v6287_v41, %v18330_v49  ;;  %v6289_v12 = vpop.f32.mrb[186].mxu1  ;;  %7927 = vmatprep.mubr.bf16.mxu1 %v18568_v3  ;;  %v20188_v17 = vshll.u32 %v18386_v6, 16  ;;  %v20189_v38 = vcombine.high %v18449_v43, %v18451_v32 }
 0x400   :  { %v6290_v39 = vadd.f32 %v6289_v12, %v18326_v2  ;;  %v6291_v7 = vpop.f32.mrb[187].mxu1  ;;  %7928 = vmatmul.mubr.bf16.gmra.mrb[244].mxu1 %v18555_v53  ;;  %v20190_v44 = vrot.slane %v18429_v31, 1  ;;  %v20192_v6 = vshll.u32 %v18379_v25, 16  ;;  %v6536_v12 = vshrl.u32 %v18429_v31, 16 }
 0x401   :  { %v6921_v27 = vrot.slane %v20188_v17, 2  ;;  %12291 = vmatprep.subr.bf16.mxu0 %v20189_v38  ;;  %v6292_v22 = vadd.f32 %v6291_v7, %v18330_v49  ;;  %8059 = vmatpush1.bf16.msra.mxu1 %v15772_v36  ;;  %v15775_v17 = vld [vmem:[#allocation6 + $0x7b0] ss:$8 sps:$4 sm:$0xff]   ;;  %v18621_v38 = vsel %vm3461_vm4, %v6810_v5, %v19944_v51  ;;  %v6408_v55 = vmax.f32 %v6286_v48, 0.0 }
 0x402   :  { %v18612_v41 = vsel %vm3461_vm4, %v6808_v50, %v20190_v44  ;;  %v6917_v0 = vrot.slane %v20192_v6, 2  ;;  %20193 = vst [vmem:[#allocation56_spill] sm:$0xff] %v18621_v38  ;;  %v6410_v26 = vmax.f32 %v6290_v39, 0.0  ;;  %8060 = vmatprep.subr.bf16.mxu1 %v15777_v35  ;;  %v15780_v50 = vld [vmem:[#allocation6 + $0x7c4] ss:$8 sps:$4 sm:$0xff]   ;;  %v20194_v25 = vshrl.u32 %v18443_v63, 16 }
 0x403   :  { %20191 = vst [vmem:[#allocation37_spill] sm:$0xff] %v18612_v41  ;;  %v18623_v9 = vor.u32 %v6921_v27, %v6920_v14  ;;  %v20195_v36 = vcombine.low %v18449_v43, %v18451_v32  ;;  %v6409_v6 = vmax.f32 %v6288_v47, 0.0  ;;  %v6411_v41 = vmax.f32 %v6292_v22, 0.0  ;;  %v15778_v22 = vld [vmem:[#allocation6 + $0x7c0] ss:$8 sps:$4 sm:$0xff]  }
 0x404   :  { %v18625_v44 = vor.u32 %v6917_v0, %v6916_v21  ;;  %v6928_v7 = vrot.slane %v20194_v25, 1  ;;  %v20197_v39 = vshll.u32 %v18443_v63, 16  ;;  %v18639_v48 = vpack.c.bf16 %v6410_v26, %v6408_v55  ;;  %v18655_v55 = vld [vmem:[#allocation9 + $0x600] sm:$0xff] }
 0x405   :  { %12292 = vmatpush1.bf16.msra.mxu0 %v20195_v36  ;;  %v18635_v5 = vsel %vm5928_vm5, %v18505_v28, %v18623_v9  ;;  %v20198_v21 = vcombine.high %v18477_v45, %v18479_v19  ;;  %v19946_v14 = vshll.u32 %v18501_v56, 16  ;;  %v19947_v43 = vshrl.u32 %v18507_v13, 16  ;;  %v6295_v47 = vpop.f32.mrb[188].mxu1  ;;  %v18657_v0 = vld [vmem:[#allocation9 + $0x620] sm:$0xff]  ;;  %8061 = vmatpush1.bf16.msra.mxu1 %v15775_v17 }
 0x406   :  { %20196 = vst [vmem:[#allocation40_spill] sm:$0xff] %v18635_v5  ;;  %v6929_v35 = vrot.slane %v20197_v39, 2  ;;  %v18649_v32 = vsel %vm5928_vm5, %v18511_v34, %v18625_v44  ;;  %v18651_v27 = vpack.c.bf16 %v6411_v41, %v6409_v6  ;;  %v14213_v26 = vcombine.high %v18570_v58, %v18572_v40  ;;  %8062 = vmatprep.subr.bf16.mxu1 %v15780_v50  ;;  %v15783_v41 = vld [vmem:[#allocation6 + $0x7d4] ss:$8 sps:$4 sm:$0xff]   ;;  %v15786_v28 = vld [vmem:[#allocation6 + $0x7e4] ss:$8 sps:$4 sm:$0xff]  }
 0x407   :  { %12293 = vmatprep.subr.bf16.mxu0 %v20198_v21  ;;  %20199 = vst [vmem:[#allocation46_spill] sm:$0xff] %v18649_v32  ;;  %v19945_v25 = vshll.u32 %v18568_v3, 16  ;;  %v6296_v39 = vadd.f32 %v6295_v47, %v18326_v2  ;;  %v6297_v21 = vpop.f32.mrb[189].mxu1  ;;  %v6538_v6 = vor.u32 %v6536_v12, %v18543_v61  ;;  %v6542_v51 = vrot.slane %v19946_v14, 1  ;;  %v18691_v14 = vld [vmem:[#allocation9 + $0x640] sm:$0xff] }
 0x408   :  { %v18660_v36 = vor.u32 %v6929_v35, %v6928_v7  ;;  %v6562_v32 = vor.u32 %v19947_v43, %v18566_v10  ;;  %v20200_v17 = vcombine.low %v18477_v45, %v18479_v19  ;;  %v6298_v7 = vadd.f32 %v6297_v21, %v18330_v49  ;;  %v6299_v35 = vpop.f32.mrb[190].mxu1  ;;  %7937 = vmatprep.mubr.bf16.mxu1 %v18651_v27  ;;  %v18693_v43 = vld [vmem:[#allocation9 + $0x660] sm:$0xff]  ;;  %v15781_v47 = vld [vmem:[#allocation6 + $0x7d0] ss:$8 sps:$4 sm:$0xff]  }
 0x409   :  { %v18676_v50 = vrot.slane %v19945_v25, 1  ;;  %v19951_v61 = vshrl.u32 %v18501_v56, 16  ;;  %v20201_v10 = vcombine.high %v18534_v11, %v18536_v1  ;;  %v6300_v45 = vadd.f32 %v6299_v35, %v18326_v2  ;;  %v6301_v19 = vpop.f32.mrb[191].mxu1  ;;  %7938 = vmatmul.mubr.bf16.gmra.mrb[248].mxu1 %v18639_v48 }
 0x40a   :  { %12294 = vmatpush1.bf16.msra.mxu0 %v20200_v17  ;;  %v18688_v17 = vsel %vm1450_vm0, %v6538_v6, %v6542_v51  ;;  %v6302_v25 = vadd.f32 %v6301_v19, %v18330_v49  ;;  %8063 = vmatpush1.bf16.msra.mxu1 %v15778_v22  ;;  %v20202_v21 = vshll.u32 %v18555_v53, 16  ;;  %v6412_v6 = vmax.f32 %v6296_v39, 0.0 }
 0x40b   :  { %12295 = vmatprep.subr.bf16.mxu0 %v20201_v10  ;;  %v18697_v35 = vsel %vm1450_vm0, %v6562_v32, %v18676_v50  ;;  %v6554_v10 = vor.u32 %v19951_v61, %v6542_v51  ;;  %v6413_v34 = vmax.f32 %v6298_v7, 0.0  ;;  %v6414_v19 = vmax.f32 %v6300_v45, 0.0  ;;  %8064 = vmatprep.subr.bf16.mxu1 %v15783_v41  ;;  %v15784_v45 = vld [vmem:[#allocation6 + $0x7e0] ss:$8 sps:$4 sm:$0xff]  }
 0x40c   :  { %v18703_v5 = vrot.slane %v20202_v21, 1  ;;  %v6924_v38 = vrot.slane %v6536_v12, 1  ;;  %v20204_v22 = vcombine.low %v18534_v11, %v18536_v1  ;;  %v6415_v4 = vmax.f32 %v6302_v25, 0.0 }
 0x40d   :  { %v6818_v51 = vrot.slane %v18507_v13, 1  ;;  %v6816_v21 = vrot.slane %v18501_v56, 1  ;;  %v18714_v61 = vpack.c.bf16 %v6414_v19, %v6412_v6  ;;  %v14221_v39 = vcombine.high %v18655_v55, %v18657_v0  ;;  %v6305_v41 = vpop.f32.mrb[192].mxu1 }
 0x40e   :  { %20203 = vst [vmem:[#allocation55_spill] sm:$0xff] %v18703_v5  ;;  %12296 = vmatpush1.bf16.msra.mxu0 %v20204_v22  ;;  %v18710_v32 = vsel %vm1450_vm0, %v6554_v10, %v18703_v5  ;;  %v18721_v1 = vsel %vm5928_vm5, %v18623_v9, %v18660_v36  ;;  %v20207_v11 = vshll.u32 %v18429_v31, 16  ;;  %v18725_v25 = vpack.c.bf16 %v6415_v4, %v6413_v34  ;;  %v6307_v4 = vpop.f32.mrb[193].mxu1  ;;  %v15789_v34 = vld [vmem:[#allocation6 + $0x7f4] ss:$8 sps:$4 sm:$0xff]  }
 0x40f   :  { %20205 = vst [vmem:[#allocation59_spill] sm:$0xff] %v18710_v32  ;;  %12297 = vmatprep.subr.bf16.mxu0 %v14213_v26  ;;  %20206 = vst [vmem:[#allocation41_spill] sm:$0xff] %v18721_v1  ;;  %v14228_v7 = vcombine.low %v18691_v14, %v18693_v43  ;;  %8065 = vmatpush1.bf16.msra.mxu1 %v15781_v47  ;;  %v20208_v26 = vrot.slane %v18443_v63, 1  ;;  %v20210_v6 = vrot.slane %v18429_v31, 1  ;;  %v20214_v22 = vshll.u32 %v18507_v13, 16 }
 0x410   :  { %v6925_v12 = vrot.slane %v20207_v11, 2  ;;  %v6306_v19 = vadd.f32 %v6305_v41, %v18326_v2  ;;  %8066 = vmatprep.subr.bf16.mxu1 %v15786_v28  ;;  %v20212_v11 = vshrl.u32 %v18507_v13, 16  ;;  %v6308_v31 = vadd.f32 %v6307_v4, %v18330_v49  ;;  %7947 = vmatprep.mubr.bf16.mxu1 %v18725_v25  ;;  %v15787_v13 = vld [vmem:[#allocation6 + $0x7f0] ss:$8 sps:$4 sm:$0xff]  }
 0x411   :  { %v18732_v10 = vsel %vm3461_vm4, %v20208_v26, %v6818_v51  ;;  %v18737_v9 = vsel %vm3461_vm4, %v20210_v6, %v6816_v21  ;;  %v20213_v26 = vcombine.low %v18570_v58, %v18572_v40  ;;  %v6309_v6 = vpop.f32.mrb[194].mxu1  ;;  %v19952_v41 = vrot.slane %v18568_v3, 1  ;;  %7948 = vmatmul.mubr.bf16.gmra.mrb[252].mxu1 %v18714_v61 }
 0x412   :  { %20209 = vst [vmem:[#allocation45_spill] sm:$0xff] %v18732_v10  ;;  %20211 = vst [vmem:[#allocation58_spill] sm:$0xff] %v18737_v9  ;;  %v6936_v63 = vrot.slane %v20212_v11, 1  ;;  %v18750_v28 = vor.u32 %v6925_v12, %v6924_v38  ;;  %v6937_v1 = vrot.slane %v20214_v22, 2  ;;  %v6310_v47 = vadd.f32 %v6309_v6, %v18326_v2  ;;  %v6311_v11 = vpop.f32.mrb[195].mxu1  ;;  %v9336_v12 = vld [vmem:[#allocation9 + $0x680] sm:$0xff] }
 0x413   :  { %12298 = vmatpush1.bf16.msra.mxu0 %v20213_v26  ;;  %v14229_v58 = vcombine.high %v18691_v14, %v18693_v43  ;;  %v20215_v40 = vrot.slane %v18555_v53, 1  ;;  %v6312_v38 = vadd.f32 %v6311_v11, %v18330_v49  ;;  %v9340_v26 = vld [vmem:[#allocation9 + $0x6a0] sm:$0xff]  ;;  %8067 = vmatpush1.bf16.msra.mxu1 %v15784_v45  ;;  %v20219_v43 = vshrl.u32 %v18501_v56, 16 }
 0x414   :  { %12299 = vmatprep.subr.bf16.mxu0 %v14221_v39  ;;  %v18767_v39 = vsel %vm3461_vm4, %v6818_v51, %v19952_v41  ;;  %v18772_v14 = vsel %vm5928_vm5, %v18625_v44, %v18750_v28  ;;  %v6416_v22 = vmax.f32 %v6306_v19, 0.0  ;;  %v6418_v6 = vmax.f32 %v6310_v47, 0.0  ;;  %8068 = vmatprep.subr.bf16.mxu1 %v15789_v34  ;;  %v15792_v11 = vld [vmem:[#allocation6 + $0x804] ss:$8 sps:$4 sm:$0xff]  }
 0x415   :  { %v18761_v4 = vsel %vm3461_vm4, %v6816_v21, %v20215_v40  ;;  %20217 = vst [vmem:[#allocation60_spill] sm:$0xff] %v18767_v39  ;;  %20218 = vst [vmem:[#allocation42_spill] sm:$0xff] %v18772_v14  ;;  %v6932_v21 = vrot.slane %v20219_v43, 1  ;;  %v6938_v40 = vor.u32 %v6937_v1, %v6936_v63  ;;  %v20220_v45 = vshll.u32 %v18501_v56, 16  ;;  %v9348_v47 = vld [vmem:[#allocation9 + $0x6e0] sm:$0xff] }
 0x416   :  { %20216 = vst [vmem:[#allocation61_spill] sm:$0xff] %v18761_v4  ;;  %v20221_v51 = vcombine.low %v18655_v55, %v18657_v0  ;;  %v6417_v41 = vmax.f32 %v6308_v31, 0.0  ;;  %v6419_v39 = vmax.f32 %v6312_v38, 0.0  ;;  %v20222_v44 = vshrl.u32 %v18568_v3, 16  ;;  %v6315_v55 = vpop.f32.mrb[196].mxu1  ;;  %v9344_v0 = vld [vmem:[#allocation9 + $0x6c0] sm:$0xff] }
 0x417   :  { %v6933_v4 = vrot.slane %v20220_v45, 2  ;;  %v20223_v9 = vshll.u32 %v18568_v3, 16  ;;  %v18785_v19 = vpack.c.bf16 %v6418_v6, %v6416_v22  ;;  %v14237_v34 = vcombine.high %v9336_v12, %v9340_v26  ;;  %8069 = vmatpush1.bf16.msra.mxu1 %v15787_v13  ;;  %v6317_v38 = vpop.f32.mrb[197].mxu1 }
 0x418   :  { %12300 = vmatpush1.bf16.msra.mxu0 %v20221_v51  ;;  %v6944_v14 = vrot.slane %v20222_v44, 1  ;;  %v18789_v56 = vsel %vm5928_vm5, %v18660_v36, %v6938_v40  ;;  %v18791_v1 = vpack.c.bf16 %v6419_v39, %v6417_v41  ;;  %8231 = vmatprep.subr.bf16.mxu1 %v15792_v11  ;;  %v6318_v22 = vadd.f32 %v6317_v38, %v18330_v49  ;;  %v6319_v36 = vpop.f32.mrb[198].mxu1  ;;  %v9364_v38 = vld [vmem:[#allocation9 + $0x760] sm:$0xff] }
 0x419   :  { %v6945_v43 = vrot.slane %v20223_v9, 2  ;;  %20224 = vst [vmem:[#allocation62_spill] sm:$0xff] %v18785_v19  ;;  %12301 = vmatprep.subr.bf16.mxu0 %v14229_v58  ;;  %20225 = vst [vmem:[#allocation51_spill] sm:$0xff] %v18789_v56  ;;  %v18793_v63 = vor.u32 %v6933_v4, %v6932_v21  ;;  %v6316_v9 = vadd.f32 %v6315_v55, %v18326_v2  ;;  %v6321_v39 = vpop.f32.mrb[199].mxu1  ;;  %v9356_v21 = vld [vmem:[#allocation9 + $0x720] sm:$0xff]  ;;  %v6826_v45 = vrot.slane %v18651_v27, 1 }
 0x41a   :  { %20226 = vst [vmem:[#allocation63_spill] sm:$0xff] %v18791_v1  ;;  %v14236_v58 = vcombine.low %v9336_v12, %v9340_v26  ;;  %7957 = vmatprep.mubr.bf16.mxu1 %v18791_v1  ;;  %v6320_v41 = vadd.f32 %v6319_v36, %v18326_v2  ;;  %v14245_v4 = vcombine.high %v9344_v0, %v9348_v47  ;;  %v6421_v12 = vmax.f32 %v6318_v22, 0.0 }
 0x41b   :  { %v18795_v31 = vor.u32 %v6945_v43, %v6944_v14  ;;  %7958 = vmatmul.mubr.bf16.gmra.mrb[0].mxu1 %v18785_v19  ;;  %v6322_v13 = vadd.f32 %v6321_v39, %v18330_v49  ;;  %v9352_v14 = vld [vmem:[#allocation9 + $0x700] sm:$0xff]  ;;  %v6420_v6 = vmax.f32 %v6316_v9, 0.0  ;;  %v19953_v51 = vrot.slane %v18639_v48, 1 }
 0x41c   :  { %12302 = vmatpush1.bf16.msra.mxu0 %v14228_v7  ;;  %v6422_v11 = vmax.f32 %v6320_v41, 0.0  ;;  %v14244_v7 = vcombine.low %v9344_v0, %v9348_v47  ;;  %v14253_v43 = vcombine.high %v9352_v14, %v9356_v21  ;;  %v9360_v9 = vld [vmem:[#allocation9 + $0x740] sm:$0xff]  ;;  %v20233_v36 = vrot.slane %v18555_v53, 1 }
 0x41d   :  { %20227 = vst [vmem:[#allocation39_spill] sm:$0xff] %v18795_v31  ;;  %12303 = vmatprep.subr.bf16.mxu0 %v14237_v34  ;;  %v6423_v26 = vmax.f32 %v6322_v13, 0.0  ;;  %v18810_v34 = vsel %vm5928_vm5, %v18750_v28, %v18793_v63  ;;  %v18814_v55 = vsel %vm5928_vm5, %v6938_v40, %v18795_v31  ;;  %v6325_v47 = vpop.f32.mrb[200].mxu1 }
 0x41e   :  { %v18805_v44 = vpack.c.bf16 %v6422_v11, %v6420_v6  ;;  %20228 = vst [vmem:[#allocation25_spill] sm:$0xff] %v18810_v34  ;;  %20229 = vst [vmem:[#allocation38_spill] sm:$0xff] %v18814_v55  ;;  %v18828_v28 = vsel %vm3461_vm4, %v20233_v36, %v19953_v51  ;;  %v6327_v39 = vpop.f32.mrb[201].mxu1  ;;  %v6326_v13 = vadd.f32 %v6325_v47, %v18326_v2  ;;  %v9372_v47 = vld [vmem:[#allocation9 + $0x7a0] sm:$0xff] }
 0x41f   :  { %v18816_v0 = vpack.c.bf16 %v6423_v26, %v6421_v12  ;;  %20234 = vst [vmem:[#allocation68_spill] sm:$0xff] %v18828_v28  ;;  %v6328_v6 = vadd.f32 %v6327_v39, %v18330_v49  ;;  %v6329_v11 = vpop.f32.mrb[202].mxu1  ;;  %v19957_v12 = vrot.slane %v18725_v25, 1  ;;  %v14261_v51 = vcombine.high %v9360_v9, %v9364_v38 }
 0x420   :  { %12304 = vmatpush1.bf16.msra.mxu0 %v14236_v58  ;;  %v20231_v58 = vrot.slane %v18568_v3, 1  ;;  %v6620_v40 = vshll.u32 %v18805_v44, 16  ;;  %v19955_v41 = vshrl.u32 %v18805_v44, 16  ;;  %v6331_v36 = vpop.f32.mrb[203].mxu1  ;;  %v6424_v55 = vmax.f32 %v6326_v13, 0.0 }
 0x421   :  { %12305 = vmatprep.subr.bf16.mxu0 %v14245_v4  ;;  %20230 = vst [vmem:[#allocation26_spill] sm:$0xff] %v18816_v0  ;;  %v14252_v4 = vcombine.low %v9352_v14, %v9356_v21  ;;  %7967 = vmatprep.mubr.bf16.mxu1 %v18816_v0  ;;  %v6330_v14 = vadd.f32 %v6329_v11, %v18326_v2  ;;  %v19961_v11 = vshrl.u32 %v18555_v53, 16  ;;  %v20238_v54 = vshrl.u32 %v18805_v44, 16 }
 0x422   :  { %v18821_v22 = vsel %vm3461_vm4, %v20231_v58, %v6826_v45  ;;  %v6972_v26 = vrot.slane %v19955_v41, 1  ;;  %v6973_v58 = vrot.slane %v6620_v40, 2  ;;  %v6332_v21 = vadd.f32 %v6331_v36, %v18330_v49 }
 0x423   :  { %20232 = vst [vmem:[#allocation27_spill] sm:$0xff] %v18821_v22  ;;  %7968 = vmatmul.mubr.bf16.gmra.mrb[4].mxu1 %v18805_v44  ;;  %v18844_v39 = vsel %vm3461_vm4, %v6826_v45, %v19957_v12  ;;  %v14260_v41 = vcombine.low %v9360_v9, %v9364_v38  ;;  %v6426_v34 = vmax.f32 %v6330_v14, 0.0  ;;  %v9380_v45 = vld [vmem:[#allocation9 + $0x7e0] sm:$0xff]  ;;  %v6940_v14 = vrot.slane %v19961_v11, 1 }
 0x424   :  { %12306 = vmatpush1.bf16.msra.mxu0 %v14244_v7  ;;  %v9368_v7 = vld [vmem:[#allocation9 + $0x780] sm:$0xff]  ;;  %20235 = vst [vmem:[#allocation71_spill] sm:$0xff] %v18844_v39  ;;  %v18846_v31 = vor.u32 %v6973_v58, %v6972_v26  ;;  %v6427_v56 = vmax.f32 %v6332_v21, 0.0  ;;  %v14277_v13 = vcombine.high %v9376_v23, %v9380_v45  ;;  %v18862_v21 = vrot.slane %v6620_v40, 1 }
 0x425   :  { %12307 = vmatprep.subr.bf16.mxu0 %v14253_v43  ;;  %v6425_v43 = vmax.f32 %v6328_v6, 0.0  ;;  %v14269_v28 = vcombine.high %v9368_v7, %v9372_v47  ;;  %v18849_v36 = vpack.c.bf16 %v6426_v34, %v6424_v55  ;;  %v6335_v10 = vpop.f32.mrb[204].mxu1  ;;  %v9388_v6 = vld [vmem:[#allocation9 + $0x820] sm:$0xff]  ;;  %v14276_v39 = vcombine.low %v9376_v23, %v9380_v45 }
 0x426   :  { %v6336_v26 = vadd.f32 %v6335_v10, %v18326_v2  ;;  %v6337_v58 = vpop.f32.mrb[205].mxu1  ;;  %v9384_v10 = vld [vmem:[#allocation9 + $0x800] sm:$0xff]  ;;  %20236 = vst [vmem:[#allocation69_spill] sm:$0xff] %v18862_v21  ;;  %v19967_v23 = vrot.slane %v18791_v1, 1 }
 0x427   :  { %v18851_v22 = vpack.c.bf16 %v6427_v56, %v6425_v43  ;;  %v6636_v9 = vshll.u32 %v18849_v36, 16  ;;  %v19962_v38 = vshrl.u32 %v18849_v36, 16  ;;  %v6338_v34 = vadd.f32 %v6337_v58, %v18330_v49 }
 0x428   :  { %12308 = vmatpush1.bf16.msra.mxu0 %v14252_v4  ;;  %v14268_v4 = vcombine.low %v9368_v7, %v9372_v47  ;;  %v6428_v43 = vmax.f32 %v6336_v26, 0.0  ;;  %v14285_v33 = vcombine.high %v9384_v10, %v9388_v6  ;;  %v18879_v26 = vpack.c.bf16 %v18353_v60, %v18353_v60 }
 0x429   :  { %12309 = vmatprep.subr.bf16.mxu0 %v14261_v51  ;;  %v6339_v51 = vpop.f32.mrb[206].mxu1  ;;  %7977 = vmatprep.mubr.bf16.mxu1 %v18851_v22  ;;  %v6981_v7 = vrot.slane %v6636_v9, 2  ;;  %v6429_v29 = vmax.f32 %v6338_v34, 0.0  ;;  %v6638_v34 = vrot.slane %v6636_v9, 1 }
 0x42a   :  { %v6340_v56 = vadd.f32 %v6339_v51, %v18326_v2  ;;  %v6341_v55 = vpop.f32.mrb[207].mxu1  ;;  %20239 = vst [vmem:[#allocation70_spill] sm:$0xff] %v18879_v26 }
 0x42b   :  { %7978 = vmatmul.mubr.bf16.gmra.mrb[8].mxu1 %v18849_v36  ;;  %v6342_v51 = vadd.f32 %v6341_v55, %v18330_v49  ;;  %v9392_v55 = vld [vmem:[#allocation9 + $0x840] sm:$0xff] }
 0x42c   :  { %12310 = vmatpush1.bf16.msra.mxu0 %v14260_v41  ;;  %v6980_v41 = vrot.slane %v19962_v38, 1  ;;  %v6430_v58 = vmax.f32 %v6340_v56, 0.0  ;;  %v19964_v38 = vrot.slane %v18714_v61, 1 }
 0x42d   :  { %12311 = vmatprep.subr.bf16.mxu0 %v14269_v28  ;;  %v20237_v28 = vshll.u32 %v18555_v53, 16  ;;  %v6431_v40 = vmax.f32 %v6342_v51, 0.0  ;;  %v6345_v56 = vpop.f32.mrb[208].mxu1  ;;  %v14284_v51 = vcombine.low %v9384_v10, %v9388_v6  ;;  %v20243_v6 = vrot.slane %v18725_v25, 1 }
 0x42e   :  { %v18869_v12 = vor.u32 %v6981_v7, %v6980_v41  ;;  %v18871_v11 = vpack.c.bf16 %v6430_v58, %v6428_v43  ;;  %v6347_v43 = vpop.f32.mrb[209].mxu1 }
 0x42f   :  { %v6941_v47 = vrot.slane %v20237_v28, 2  ;;  %v6634_v28 = vor.u32 %v20238_v54, %v18862_v21  ;;  %v18886_v7 = vpack.c.bf16 %v6431_v40, %v6429_v29  ;;  %v6346_v54 = vadd.f32 %v6345_v56, %v18326_v2  ;;  %v6349_v58 = vpop.f32.mrb[210].mxu1 }
 0x430   :  { %12312 = vmatpush1.bf16.msra.mxu0 %v14268_v4  ;;  %v9396_v4 = vld [vmem:[#allocation9 + $0x860] sm:$0xff]  ;;  %v19963_v41 = vshrl.u32 %v18871_v11, 16  ;;  %v6348_v60 = vadd.f32 %v6347_v43, %v18330_v49  ;;  %v6350_v40 = vadd.f32 %v6349_v58, %v18326_v2  ;;  %v18908_v43 = vsel %vm3461_vm4, %v20243_v6, %v19967_v23 }
 0x431   :  { %12313 = vmatprep.subr.bf16.mxu0 %v14277_v13  ;;  %v18882_v45 = vor.u32 %v6941_v47, %v6940_v14  ;;  %v6652_v13 = vshll.u32 %v18871_v11, 16  ;;  %v20241_v14 = vrot.slane %v18639_v48, 1  ;;  %7987 = vmatprep.mubr.bf16.mxu1 %v18886_v7  ;;  %v14293_v56 = vcombine.high %v9392_v55, %v9396_v4  ;;  %20244 = vst [vmem:[#allocation74_spill] sm:$0xff] %v18908_v43 }
 0x432   :  { %v6988_v47 = vrot.slane %v19963_v41, 1  ;;  %v6432_v58 = vmax.f32 %v6346_v54, 0.0  ;;  %v6434_v41 = vmax.f32 %v6350_v40, 0.0  ;;  %v14292_v52 = vcombine.low %v9392_v55, %v9396_v4 }
 0x433   :  { %20240 = vst [vmem:[#allocation72_spill] sm:$0xff] %v18882_v45  ;;  %v18895_v9 = vsel %vm3461_vm4, %v20241_v14, %v19964_v38  ;;  %v6989_v29 = vrot.slane %v6652_v13, 2  ;;  %7988 = vmatmul.mubr.bf16.gmra.mrb[12].mxu1 %v18871_v11  ;;  %v9400_v38 = vld [vmem:[#allocation9 + $0x880] sm:$0xff]  ;;  %v20247_v54 = vshrl.u32 %v18849_v36, 16  ;;  %v6654_v43 = vrot.slane %v6652_v13, 1 }
 0x434   :  { %12314 = vmatpush1.bf16.msra.mxu0 %v14276_v39  ;;  %20242 = vst [vmem:[#allocation73_spill] sm:$0xff] %v18895_v9  ;;  %v6351_v39 = vpop.f32.mrb[211].mxu1  ;;  %v18914_v9 = vsel %vm1450_vm0, %v6634_v28, %v6638_v34  ;;  %v18916_v21 = vpack.c.bf16 %v6434_v41, %v6432_v58  ;;  %v6836_v55 = vrot.slane %v18805_v44, 1 }
 0x435   :  { %12324 = vmatprep.subr.bf16.mxu0 %v14285_v33  ;;  %v6352_v10 = vadd.f32 %v6351_v39, %v18330_v49  ;;  %v18910_v14 = vor.u32 %v6989_v29, %v6988_v47  ;;  %v9404_v33 = vld [vmem:[#allocation9 + $0x8a0] sm:$0xff]  ;;  %20246 = vst [vmem:[#allocation76_spill] sm:$0xff] %v18914_v9  ;;  %v6433_v39 = vmax.f32 %v6348_v60, 0.0  ;;  %v6355_v47 = vpop.f32.mrb[212].mxu1  ;;  %v6650_v40 = vor.u32 %v20247_v54, %v6638_v34 }
 0x436   :  { %v14301_v6 = vcombine.high %v9400_v38, %v9404_v33  ;;  %v9408_v29 = vld [vmem:[#allocation9 + $0x8c0] sm:$0xff]  ;;  %v6668_v28 = vshll.u32 %v18916_v21, 16  ;;  %v19970_v60 = vshrl.u32 %v18916_v21, 16  ;;  %v6356_v4 = vadd.f32 %v6355_v47, %v18326_v2 }
 0x437   :  { %20245 = vst [vmem:[#allocation75_spill] sm:$0xff] %v18910_v14  ;;  %12316 = vmatmul.mubr.bf16.vlgmr.msra.gmra.mrb[224].mxu0 %v18879_v26  ;;  %v6435_v24 = vmax.f32 %v6352_v10, 0.0  ;;  %v9412_v26 = vld [vmem:[#allocation9 + $0x8e0] sm:$0xff]  ;;  %v6357_v10 = vpop.f32.mrb[213].mxu1 }
 0x438   :  { %12325 = vmatpush1.bf16.msra.mxu0 %v14284_v51  ;;  %v6358_v41 = vadd.f32 %v6357_v10, %v18330_v49  ;;  %v14300_v51 = vcombine.low %v9400_v38, %v9404_v33  ;;  %v6996_v34 = vrot.slane %v19970_v60, 1  ;;  %v6997_v13 = vrot.slane %v6668_v28, 2  ;;  %v9416_v54 = vld [vmem:[#allocation9 + $0x900] sm:$0xff] }
 0x439   :  { %12326 = vmatprep.subr.bf16.mxu0 %v14293_v56  ;;  %v18918_v23 = vpack.c.bf16 %v6435_v24, %v6433_v39  ;;  %v6359_v24 = vpop.f32.mrb[214].mxu1  ;;  %v14309_v58 = vcombine.high %v9408_v29, %v9412_v26  ;;  %v6832_v39 = vrot.slane %v18785_v19, 1  ;;  %v9420_v10 = vld [vmem:[#allocation9 + $0x920] sm:$0xff]  ;;  %v14308_v33 = vcombine.low %v9408_v29, %v9412_v26 }
 0x43a   :  { %v6361_v56 = vpop.f32.mrb[215].mxu1  ;;  %v6360_v44 = vadd.f32 %v6359_v24, %v18326_v2  ;;  %v18935_v38 = vor.u32 %v6997_v13, %v6996_v34  ;;  %v18938_v60 = vsel %vm1450_vm0, %v6650_v40, %v6654_v43  ;;  %v6437_v9 = vmax.f32 %v6358_v41, 0.0  ;;  %v18953_v34 = vld [vmem:[#allocation9 + $0x940] sm:$0xff] }
 0x43b   :  { %7997 = vmatprep.mubr.bf16.mxu1 %v18918_v23  ;;  %v6362_v47 = vadd.f32 %v6361_v56, %v18330_v49  ;;  %20249 = vst [vmem:[#allocation78_spill] sm:$0xff] %v18938_v60  ;;  %v14317_v24 = vcombine.high %v9416_v54, %v9420_v10  ;;  %v20250_v56 = vrot.slane %v18714_v61, 1  ;;  %v6838_v26 = vrot.slane %v18816_v0, 1 }
 0x43c   :  { %12327 = vmatpush1.bf16.msra.mxu0 %v14292_v52  ;;  %7998 = vmatmul.mubr.bf16.gmra.mrb[16].mxu1 %v18916_v21  ;;  %20248 = vst [vmem:[#allocation77_spill] sm:$0xff] %v18935_v38  ;;  %v6438_v20 = vmax.f32 %v6360_v44, 0.0  ;;  %v18946_v52 = vsel %vm3461_vm4, %v6832_v39, %v6836_v55  ;;  %v6670_v29 = vrot.slane %v6668_v28, 1  ;;  %v20258_v28 = vshrl.u32 %v18871_v11, 16 }
 0x43d   :  { %12328 = vmatprep.subr.bf16.mxu0 %v14301_v6  ;;  %v6436_v6 = vmax.f32 %v6356_v4, 0.0  ;;  %v6439_v19 = vmax.f32 %v6362_v47, 0.0  ;;  %v18943_v14 = vsel %vm3461_vm4, %v20250_v56, %v6832_v39  ;;  %20252 = vst [vmem:[#allocation80_spill] sm:$0xff] %v18946_v52  ;;  %v6365_v41 = vpop.f32.mrb[216].mxu1  ;;  %v20253_v39 = vrot.slane %v18791_v1, 1 }
 0x43e   :  { %20251 = vst [vmem:[#allocation79_spill] sm:$0xff] %v18943_v14  ;;  %v6367_v44 = vpop.f32.mrb[217].mxu1  ;;  %v4489_v47 = vld [vmem:[#allocation7 + $0x2] ss:$4 sm:$0x3]  ;;  %v20264_v14 = vshll.u32 %v18918_v23, 16 }
 0x43f   :  { %v18949_v40 = vpack.c.bf16 %v6438_v20, %v6436_v6  ;;  %v18951_v4 = vpack.c.bf16 %v6439_v19, %v6437_v9  ;;  %v18960_v56 = vsel %vm3461_vm4, %v20253_v39, %v6838_v26  ;;  %v20255_v20 = vrot.slane %v18849_v36, 1  ;;  %v6369_v52 = vpop.f32.mrb[218].mxu1 }
 0x440   :  { %12329 = vmatpush1.bf16.msra.mxu0 %v14300_v51  ;;  %v9428_v51 = vld [vmem:[#allocation9 + $0x960] sm:$0xff]  ;;  %20254 = vst [vmem:[#allocation81_spill] sm:$0xff] %v18960_v56  ;;  %v18970_v9 = vsel %vm5928_vm5, %v18793_v63, %v18882_v45  ;;  %v6666_v6 = vor.u32 %v20258_v28, %v6654_v43  ;;  %v14316_v39 = vcombine.low %v9416_v54, %v9420_v10  ;;  %v20259_v45 = vrot.slane %v18851_v22, 1 }
 0x441   :  { %12330 = vmatprep.subr.bf16.mxu0 %v14309_v58  ;;  %v6366_v58 = vadd.f32 %v6365_v41, %v18326_v2  ;;  %v18965_v19 = vsel %vm3461_vm4, %v6836_v55, %v20255_v20  ;;  %20257 = vst [vmem:[#allocation83_spill] sm:$0xff] %v18970_v9  ;;  %v6684_v41 = vshll.u32 %v18949_v40, 16  ;;  %v19976_v13 = vshrl.u32 %v18949_v40, 16  ;;  %8007 = vmatprep.mubr.bf16.mxu1 %v18951_v4  ;;  %v6371_v20 = vpop.f32.mrb[219].mxu1  ;;  %v9432_v63 = vld [vmem:[#allocation9 + $0x980] sm:$0xff] }
 0x442   :  { %20256 = vst [vmem:[#allocation82_spill] sm:$0xff] %v18965_v19  ;;  %v6370_v55 = vadd.f32 %v6369_v52, %v18326_v2  ;;  %v14325_v19 = vcombine.high %v18953_v34, %v9428_v51  ;;  %v18983_v43 = vsel %vm3461_vm4, %v6838_v26, %v20259_v45  ;;  %v18989_v54 = vrot.slane %v4489_v47, %v20118_v46  ;;  %v9436_v56 = vld [vmem:[#allocation9 + $0x9a0] sm:$0xff] }
 0x443   :  { %20260 = vst [vmem:[#allocation84_spill] sm:$0xff] %v18983_v43  ;;  %v7004_v28 = vrot.slane %v19976_v13, 1  ;;  %v7005_v9 = vrot.slane %v6684_v41, 2  ;;  %v6440_v10 = vmax.f32 %v6366_v58, 0.0  ;;  %v18994_v45 = vsel %vm1450_vm0, %v6666_v6, %v6670_v29 }
 0x444   :  { %12331 = vmatpush1.bf16.msra.mxu0 %v14308_v33  ;;  %v6368_v33 = vadd.f32 %v6367_v44, %v18330_v49  ;;  %8008 = vmatmul.mubr.bf16.gmra.mrb[20].mxu1 %v18949_v40  ;;  %v6442_v52 = vmax.f32 %v6370_v55, 0.0  ;;  %20261 = vst [vmem:[#allocation85_spill] sm:$0xff] %v18994_v45  ;;  %v20262_v26 = vshrl.u32 %v18916_v21, 16  ;;  %v19003_v44 = vrot.slane %v4489_v47, %v20120_v8  ;;  %v19006_v55 = vld [vmem:[#allocation9 + $0x9c0] sm:$0xff] }
 0x445   :  { %12332 = vmatprep.subr.bf16.mxu0 %v14317_v24  ;;  %v6372_v24 = vadd.f32 %v6371_v20, %v18330_v49  ;;  %v19000_v43 = vor.u32 %v7005_v9, %v7004_v28  ;;  %v14324_v58 = vcombine.low %v18953_v34, %v9428_v51  ;;  %v19008_v20 = vld [vmem:[#allocation9 + $0x9e0] sm:$0xff]  ;;  %v14333_v9 = vcombine.high %v9432_v63, %v9436_v56 }
 0x446   :  { %v18998_v13 = vor.u32 %v20262_v26, %v6670_v29  ;;  %v19010_v46 = vpack.c.bf16 %v6442_v52, %v6440_v10  ;;  %v19014_v29 = vrot.slane %v20264_v14, 1  ;;  %v19016_v28 = vrot.slane %v6684_v41, 1  ;;  %v5401_v26 = vpop.f32.mrb[160].mxu0  ;;  %v19024_v45 = vld [vmem:[#allocation9 + $0xa00] sm:$0xff] }
 0x447   :  { %20263 = vst [vmem:[#allocation86_spill] sm:$0xff] %v19000_v43  ;;  %v6443_v6 = vmax.f32 %v6372_v24, 0.0  ;;  %v6441_v47 = vmax.f32 %v6368_v33, 0.0  ;;  %v14332_v8 = vcombine.low %v9432_v63, %v9436_v56  ;;  %v14761_v52 = vadd.f32 %v5401_v26, %v18989_v54  ;;  %v19026_v41 = vld [vmem:[#allocation9 + $0xa20] sm:$0xff] }
 0x448   :  { %12333 = vmatpush1.bf16.msra.mxu0 %v14316_v39  ;;  %20265 = vst [vmem:[#allocation87_spill] sm:$0xff] %v19014_v29  ;;  %v6375_v39 = vpop.f32.mrb[220].mxu1  ;;  %v6700_v51 = vshll.u32 %v19010_v46, 16  ;;  %v14340_v14 = vcombine.low %v19006_v55, %v19008_v20  ;;  %v14341_v10 = vcombine.high %v19006_v55, %v19008_v20  ;;  %v20266_v60 = vshrl.u32 %v19010_v46, 16 }
 0x449   :  { %12334 = vmatprep.subr.bf16.mxu0 %v14325_v19  ;;  %v5403_v19 = vpop.f32.mrb[161].mxu0  ;;  %v6377_v24 = vpop.f32.mrb[221].mxu1  ;;  %v19028_v33 = vpack.c.bf16 %v6443_v6, %v6441_v47  ;;  %v6376_v32 = vadd.f32 %v6375_v39, %v18326_v2  ;;  %v20267_v55 = vshrl.u32 %v18918_v23, 16  ;;  %v5560_v39 = vmax.f32 %v14761_v52, 0.0  ;;  %v9460_v52 = vld [vmem:[#allocation9 + $0xa60] sm:$0xff] }
 0x44a   :  { %v14762_v56 = vadd.f32 %v5403_v19, %v19003_v44  ;;  %v5405_v63 = vpop.f32.mrb[162].mxu0  ;;  %v6379_v34 = vpop.f32.mrb[222].mxu1  ;;  %v7012_v43 = vrot.slane %v20266_v60, 1  ;;  %v7013_v0 = vrot.slane %v6700_v51, 2  ;;  %v6378_v6 = vadd.f32 %v6377_v24, %v18330_v49 }
 0x44b   :  { %v5407_v38 = vpop.f32.mrb[163].mxu0  ;;  %v6381_v47 = vpop.f32.mrb[223].mxu1  ;;  %v14763_v19 = vadd.f32 %v5405_v63, %v18989_v54  ;;  %8017 = vmatprep.mubr.bf16.mxu1 %v19028_v33  ;;  %v6690_v20 = vor.u32 %v20267_v55, %v19014_v29  ;;  %v14349_v60 = vcombine.high %v19024_v45, %v19026_v41  ;;  %v6380_v24 = vadd.f32 %v6379_v34, %v18326_v2 }
 0x44c   :  { %12335 = vmatpush1.bf16.msra.mxu0 %v14324_v58  ;;  %v14764_v58 = vadd.f32 %v5407_v38, %v19003_v44  ;;  %v19046_v26 = vor.u32 %v7013_v0, %v7012_v43  ;;  %v5561_v30 = vmax.f32 %v14762_v56, 0.0  ;;  %8018 = vmatmul.mubr.bf16.gmra.mrb[24].mxu1 %v19010_v46  ;;  %v6382_v1 = vadd.f32 %v6381_v47, %v18330_v49  ;;  %v9456_v43 = vld [vmem:[#allocation9 + $0xa40] sm:$0xff] }
 0x44d   :  { %12336 = vmatprep.subr.bf16.mxu0 %v14333_v9  ;;  %v20268_v9 = vld [vmem:[#allocation47_spill] sm:$0xff]  ;;  %v5562_v38 = vmax.f32 %v14763_v19, 0.0  ;;  %v20269_v55 = vshll.u32 %v18951_v4, 16  ;;  %v6444_v53 = vmax.f32 %v6376_v32, 0.0  ;;  %v6445_v5 = vmax.f32 %v6378_v6, 0.0  ;;  %v5411_v19 = vpop.f32.mrb[164].mxu0 }
 0x44e   :  { %vm5627_vm7 = vcmp.lt.s32.totalorder %v20268_v9, 26  ;;  %v5563_v63 = vmax.f32 %v14764_v58, 0.0  ;;  %v6446_v0 = vmax.f32 %v6380_v24, 0.0  ;;  %v19057_v2 = vsel %vm1450_vm0, %v18998_v13, %v19016_v28  ;;  %v5413_v6 = vpop.f32.mrb[165].mxu0  ;;  %v15790_v9 = vld [vmem:[#allocation6 + $0x800] ss:$8 sps:$4 sm:$0xff]  }
 0x44f   :  { %v6694_v29 = vrot.slane %v20269_v55, 1  ;;  %20270 = vst [vmem:[#allocation47_spill] sm:$0xff] %v19057_v2  ;;  %v5784_v34 = vmax.f32 %v5560_v39, %v5562_v38  ;;  %v6447_v58 = vmax.f32 %v6382_v1, 0.0  ;;  %v19062_v49 = vrot.slane %v6700_v51, 1 }
 0x450   :  { %12337 = vmatpush1.bf16.msra.mxu0 %v14332_v8  ;;  %v5793_v56 = vmax.f32 %v5561_v30, %v5563_v63  ;;  %v19064_v32 = vpack.c.bf16 %v6446_v0, %v6444_v53  ;;  %v14348_v47 = vcombine.low %v19024_v45, %v19026_v41  ;;  %v14766_v13 = vadd.f32 %v5413_v6, %v19003_v44  ;;  %v5415_v30 = vpop.f32.mrb[166].mxu0 }
 0x451   :  { %12338 = vmatprep.subr.bf16.mxu0 %v14341_v10  ;;  %v19060_v8 = vsel %vm1450_vm0, %v6690_v20, %v6694_v29  ;;  %v14765_v10 = vadd.f32 %v5411_v19, %v18989_v54  ;;  %v19069_v24 = vpack.c.bf16 %v6447_v58, %v6445_v5  ;;  %v14357_v1 = vcombine.high %v9456_v43, %v9460_v52  ;;  %v5417_v38 = vpop.f32.mrb[167].mxu0  ;;  %v9464_v58 = vld [vmem:[#allocation9 + $0xa80] sm:$0xff] }
 0x452   :  { %v19990_v20 = vshll.u32 %v19028_v33, 16  ;;  %v6716_v51 = vshll.u32 %v19064_v32, 16  ;;  %v19989_v53 = vshrl.u32 %v19064_v32, 16  ;;  %v19991_v63 = vshrl.u32 %v18951_v4, 16 }
 0x453   :  { %v5564_v39 = vmax.f32 %v14765_v10, 0.0  ;;  %v5565_v55 = vmax.f32 %v14766_v13, 0.0  ;;  %v14767_v5 = vadd.f32 %v5415_v30, %v18989_v54  ;;  %v14768_v45 = vadd.f32 %v5417_v38, %v19003_v44  ;;  %8027 = vmatprep.mubr.bf16.mxu1 %v19069_v24  ;;  %v9468_v10 = vld [vmem:[#allocation9 + $0xaa0] sm:$0xff] }
 0x454   :  { %12339 = vmatpush1.bf16.msra.mxu0 %v14340_v14  ;;  %v14356_v14 = vcombine.low %v9456_v43, %v9460_v52  ;;  %v7020_v41 = vrot.slane %v19989_v53, 1  ;;  %v7021_v0 = vrot.slane %v6716_v51, 2  ;;  %8028 = vmatmul.mubr.bf16.gmra.mrb[28].mxu1 %v19064_v32  ;;  %v6710_v43 = vrot.slane %v19990_v20, 1  ;;  %v20276_v20 = vld [vmem:[#allocation50_spill] sm:$0xff] }
 0x455   :  { %12340 = vmatprep.subr.bf16.mxu0 %v14349_v60  ;;  %v5785_v19 = vmax.f32 %v5784_v34, %v5564_v39  ;;  %v6706_v60 = vor.u32 %v19991_v63, %v6694_v29  ;;  %v5794_v6 = vmax.f32 %v5793_v56, %v5565_v55  ;;  %v5566_v13 = vmax.f32 %v14767_v5, 0.0  ;;  %8070 = vmatprep.mubr.bf16.mxu1 %v18413_v59  ;;  %v5421_v55 = vpop.f32.mrb[168].mxu0 }
 0x456   :  { %v5567_v30 = vmax.f32 %v14768_v45, 0.0  ;;  %v19087_v52 = vor.u32 %v7021_v0, %v7020_v41  ;;  %v14365_v34 = vcombine.high %v9464_v58, %v9468_v10  ;;  %v20272_v39 = vshrl.u32 %v18949_v40, 16  ;;  %v5423_v41 = vpop.f32.mrb[169].mxu0  ;;  %v19102_v0 = vld [vmem:[#allocation9 + $0xac0] sm:$0xff] }
 0x457   :  { %v5726_v29 = vsel %vm5627_vm7, %v5566_v13, 0.0  ;;  %v19097_v59 = vsel %vm1450_vm0, %v6706_v60, %v6710_v43  ;;  %v14770_v13 = vadd.f32 %v5423_v41, %v19003_v44  ;;  %v14364_v53 = vcombine.low %v9464_v58, %v9468_v10  ;;  %v19126_v10 = vld [vmem:[#allocation9 + $0xb00] sm:$0xff] }
 0x458   :  { %12341 = vmatpush1.bf16.msra.mxu0 %v14348_v47  ;;  %20271 = vst [vmem:[#allocation88_spill] sm:$0xff] %v19087_v52  ;;  %v6698_v38 = vor.u32 %v20272_v39, %v19016_v28  ;;  %v5727_v56 = vsel %vm5627_vm7, %v5567_v30, 0.0  ;;  %20273 = vst [vmem:[#allocation89_spill] sm:$0xff] %v19097_v59  ;;  %v19099_v47 = vrot.slane %v6716_v51, 1  ;;  %v5786_v5 = vmax.f32 %v5785_v19, %v5726_v29  ;;  %v19104_v28 = vld [vmem:[#allocation9 + $0xae0] sm:$0xff]  ;;  %v5425_v39 = vpop.f32.mrb[170].mxu0 }
 0x459   :  { %12342 = vmatprep.subr.bf16.mxu0 %v14357_v1  ;;  %v5795_v45 = vmax.f32 %v5794_v6, %v5727_v56  ;;  %v14769_v1 = vadd.f32 %v5421_v55, %v18989_v54  ;;  %v19992_v51 = vshrl.u32 %v19028_v33, 16  ;;  %v19993_v19 = vshll.u32 %v19069_v24, 16  ;;  %v5427_v56 = vpop.f32.mrb[171].mxu0  ;;  %v15795_v55 = vld [vmem:[#allocation6 + $0x814] ss:$8 sps:$4 sm:$0xff]  }
 0x45a   :  { %20274 = vst [vmem:[#allocation90_spill] sm:$0xff] %v19099_v47  ;;  %v19109_v60 = vsel %vm1450_vm0, %v6698_v38, %v19062_v49  ;;  %v5787_v6 = vrot.slane %v5786_v5, 4  ;;  %v14771_v29 = vadd.f32 %v5425_v39, %v18989_v54  ;;  %v14772_v41 = vadd.f32 %v5427_v56, %v19003_v44 }
 0x45b   :  { %20275 = vst [vmem:[#allocation91_spill] sm:$0xff] %v19109_v60  ;;  %v5796_v30 = vrot.slane %v5795_v45, 4  ;;  %vm5631_vm10 = vcmp.lt.s32.totalorder %v20276_v20, 26  ;;  %v6722_v38 = vor.u32 %v19992_v51, %v6710_v43  ;;  %v19122_v63 = vrot.slane %v19993_v19, 1  ;;  %v15798_v19 = vld [vmem:[#allocation6 + $0x824] ss:$8 sps:$4 sm:$0xff]  }
 0x45c   :  { %12343 = vmatpush1.bf16.msra.mxu0 %v14356_v14  ;;  %v14373_v14 = vcombine.high %v19102_v0, %v19104_v28  ;;  %v5788_v60 = vmax.f32 %v5786_v5, %v5787_v6  ;;  %v5568_v39 = vmax.f32 %v14769_v1, 0.0  ;;  %v5570_v59 = vmax.f32 %v14771_v29, 0.0  ;;  %8071 = vmatmul.mubr.bf16.vlgmr.msra.gmra.mrb[224].mxu1 %v18400_v37  ;;  %v15793_v5 = vld [vmem:[#allocation6 + $0x810] ss:$8 sps:$4 sm:$0xff]  }
 0x45d   :  { %12344 = vmatprep.subr.bf16.mxu0 %v14365_v34  ;;  %v19128_v34 = vld [vmem:[#allocation9 + $0xb20] sm:$0xff]  ;;  %v20277_v56 = vshrl.u32 %v19010_v46, 16  ;;  %v5569_v43 = vmax.f32 %v14770_v13, 0.0  ;;  %v5571_v51 = vmax.f32 %v14772_v41, 0.0  ;;  %8232 = vmatpush1.bf16.msra.mxu1 %v15790_v9  ;;  %v19136_v1 = vsel %vm1450_vm0, %v6722_v38, %v19122_v63 }
 0x45e   :  { %8080 = vmatprep.mubr.bf16.mxu1 %v18439_v62  ;;  %v6844_v37 = vrot.slane %v18871_v11, 1  ;;  %v19139_v6 = vmax.f32 %v5795_v45, %v5796_v30  ;;  %v5802_v29 = vmax.f32 %v5568_v39, %v5570_v59  ;;  %8233 = vmatprep.subr.bf16.mxu1 %v15795_v55  ;;  %v6848_v13 = vrot.slane %v18916_v21, 1  ;;  %v5431_v62 = vpop.f32.mrb[172].mxu0  ;;  %v19146_v38 = vld [vmem:[#allocation9 + $0xb40] sm:$0xff] }
 0x45f   :  { %v6714_v2 = vor.u32 %v20277_v56, %v19062_v49  ;;  %v14372_v49 = vcombine.low %v19102_v0, %v19104_v28  ;;  %v5811_v9 = vmax.f32 %v5569_v43, %v5571_v51  ;;  %v14381_v41 = vcombine.high %v19126_v10, %v19128_v34  ;;  %v19148_v11 = vld [vmem:[#allocation9 + $0xb60] sm:$0xff]  ;;  %v5433_v28 = vpop.f32.mrb[173].mxu0 }
 0x460   :  { %12345 = vmatpush1.bf16.msra.mxu0 %v14364_v53  ;;  %v5789_v0 = vrot.slane %v5788_v60, 2  ;;  %v14773_v21 = vadd.f32 %v5431_v62, %v18989_v54  ;;  %v19157_v51 = vld [vmem:[#allocation9 + $0xb80] sm:$0xff]  ;;  %v5435_v39 = vpop.f32.mrb[174].mxu0  ;;  %v14380_v56 = vcombine.low %v19126_v10, %v19128_v34  ;;  %v6846_v43 = vrot.slane %v18886_v7, 1 }
 0x461   :  { %12346 = vmatprep.subr.bf16.mxu0 %v14373_v14  ;;  %v19152_v59 = vsel %vm1450_vm0, %v6714_v2, %v19099_v47  ;;  %v19159_v30 = vld [vmem:[#allocation9 + $0xba0] sm:$0xff]  ;;  %v14774_v14 = vadd.f32 %v5433_v28, %v19003_v44  ;;  %8234 = vmatpush1.bf16.msra.mxu1 %v15793_v5  ;;  %v5798_v58 = vrot.slane %v19139_v6, 2  ;;  %v14775_v45 = vadd.f32 %v5435_v39, %v18989_v54  ;;  %v5437_v53 = vpop.f32.mrb[175].mxu0  ;;  %v15801_v47 = vld [vmem:[#allocation6 + $0x834] ss:$8 sps:$4 sm:$0xff]  }
 0x462   :  { %20278 = vst [vmem:[#allocation50_spill] sm:$0xff] %v19152_v59  ;;  %v15796_v2 = vld [vmem:[#allocation6 + $0x820] ss:$8 sps:$4 sm:$0xff]   ;;  %v5572_v62 = vmax.f32 %v14773_v21, 0.0  ;;  %8235 = vmatprep.subr.bf16.mxu1 %v15798_v19  ;;  %v14388_v28 = vcombine.low %v19146_v38, %v19148_v11  ;;  %v14776_v5 = vadd.f32 %v5437_v53, %v19003_v44  ;;  %v14389_v10 = vcombine.high %v19146_v38, %v19148_v11 }
 0x463   :  { %v5573_v55 = vmax.f32 %v14774_v14, 0.0  ;;  %v19175_v21 = vmax.f32 %v5788_v60, %v5789_v0  ;;  %v5574_v59 = vmax.f32 %v14775_v45, 0.0  ;;  %v14397_v19 = vcombine.high %v19157_v51, %v19159_v30 }
 0x464   :  { %12347 = vmatpush1.bf16.msra.mxu0 %v14372_v49  ;;  %v5803_v39 = vmax.f32 %v5802_v29, %v5572_v62  ;;  %8081 = vmatmul.mubr.bf16.gmra.mrb[228].mxu1 %v18529_v18  ;;  %v5575_v14 = vmax.f32 %v14776_v5, 0.0  ;;  %v20279_v38 = vrot.slane %v18851_v22, 1  ;;  %v20280_v60 = vrot.slane %v18849_v36, 1  ;;  %v19207_v5 = vld [vmem:[#allocation9 + $0xbc0] sm:$0xff] }
 0x465   :  { %12348 = vmatprep.subr.bf16.mxu0 %v14381_v41  ;;  %v5812_v49 = vmax.f32 %v5811_v9, %v5573_v55  ;;  %8090 = vmatprep.mubr.bf16.mxu1 %v18539_v16  ;;  %v15799_v41 = vld [vmem:[#allocation6 + $0x830] ss:$8 sps:$4 sm:$0xff]   ;;  %v5734_v18 = vsel %vm5631_vm10, %v5574_v59, 0.0  ;;  %v15804_v9 = vld [vmem:[#allocation6 + $0x844] ss:$8 sps:$4 sm:$0xff]   ;;  %v6850_v16 = vrot.slane %v18918_v23, 1  ;;  %v19195_v53 = vsel %vm3461_vm4, %v6844_v37, %v6848_v13 }
 0x466   :  { %8236 = vmatpush1.bf16.msra.mxu1 %v15796_v2  ;;  %v19184_v11 = vsel %vm3461_vm4, %v20279_v38, %v6846_v43  ;;  %v19189_v29 = vsel %vm3461_vm4, %v20280_v60, %v6844_v37  ;;  %v6854_v45 = vrot.slane %v18951_v4, 1  ;;  %v5804_v0 = vmax.f32 %v5803_v39, %v5734_v18  ;;  %v5441_v55 = vpop.f32.mrb[176].mxu0  ;;  %v19209_v38 = vld [vmem:[#allocation9 + $0xbe0] sm:$0xff] }
 0x467   :  { %8237 = vmatprep.subr.bf16.mxu1 %v15801_v47  ;;  %v5735_v36 = vsel %vm5631_vm10, %v5575_v14, 0.0  ;;  %v20281_v2 = vrot.slane %v18949_v40, 1  ;;  %v6858_v47 = vrot.slane %v19028_v33, 1  ;;  %v14777_v62 = vadd.f32 %v5441_v55, %v18989_v54  ;;  %v5443_v37 = vpop.f32.mrb[177].mxu0  ;;  %v15802_v60 = vld [vmem:[#allocation6 + $0x840] ss:$8 sps:$4 sm:$0xff]  }
 0x468   :  { %12349 = vmatpush1.bf16.msra.mxu0 %v14380_v56  ;;  %v5813_v56 = vmax.f32 %v5812_v49, %v5735_v36  ;;  %v19212_v20 = vsel %vm3461_vm4, %v6846_v43, %v6850_v16  ;;  %v5805_v39 = vrot.slane %v5804_v0, 4  ;;  %v5445_v14 = vpop.f32.mrb[178].mxu0  ;;  %v20283_v18 = vrot.slane %v19010_v46, 1 }
 0x469   :  { %12350 = vmatprep.subr.bf16.mxu0 %v14389_v10  ;;  %v19203_v59 = vsel %vm3461_vm4, %v6848_v13, %v20281_v2  ;;  %v19215_v10 = vsel %vm3461_vm4, %v6850_v16, %v6854_v45  ;;  %v14778_v13 = vadd.f32 %v5443_v37, %v19003_v44  ;;  %v19219_v49 = vsel %vm3461_vm4, %v6854_v45, %v6858_v47  ;;  %v5447_v34 = vpop.f32.mrb[179].mxu0  ;;  %v15807_v37 = vld [vmem:[#allocation6 + $0x854] ss:$8 sps:$4 sm:$0xff]  }
 0x46a   :  { %8238 = vmatpush1.bf16.msra.mxu1 %v15799_v41  ;;  %20282 = vst [vmem:[#allocation92_spill] sm:$0xff] %v19219_v49  ;;  %v20284_v36 = vmov %v20281_v2  ;;  %v5799_v43 = vmax.f32 %v19139_v6, %v5798_v58  ;;  %v5814_v16 = vrot.slane %v5813_v56, 4  ;;  %v14779_v2 = vadd.f32 %v5445_v14, %v18989_v54 }
 0x46b   :  { %v19226_v55 = vsel %vm3461_vm4, %v20284_v36, %v20283_v18  ;;  %8239 = vmatprep.subr.bf16.mxu1 %v15804_v9  ;;  %v19995_v41 = vrot.slane %v19069_v24, 1  ;;  %v5806_v45 = vmax.f32 %v5804_v0, %v5805_v39  ;;  %v14780_v49 = vadd.f32 %v5447_v34, %v19003_v44 }
 0x46c   :  { %12351 = vmatpush1.bf16.msra.mxu0 %v14388_v28  ;;  %v14405_v40 = vcombine.high %v19207_v5, %v19209_v38  ;;  %v20285_v18 = vrot.slane %v19064_v32, 1  ;;  %v20286_v58 = vrot.slane %v19010_v46, 1  ;;  %v5815_v14 = vmax.f32 %v5813_v56, %v5814_v16  ;;  %8091 = vmatmul.mubr.bf16.gmra.mrb[232].mxu1 %v18551_v57  ;;  %v15805_v46 = vld [vmem:[#allocation6 + $0x850] ss:$8 sps:$4 sm:$0xff]   ;;  %v15810_v57 = vld [vmem:[#allocation6 + $0x864] ss:$8 sps:$4 sm:$0xff]  }
 0x46d   :  { %12352 = vmatprep.subr.bf16.mxu0 %v14397_v19  ;;  %v5576_v9 = vmax.f32 %v14777_v62, 0.0  ;;  %v5578_v36 = vmax.f32 %v14779_v2, 0.0  ;;  %v19245_v28 = vsel %vm3461_vm4, %v6858_v47, %v19995_v41  ;;  %v5807_v34 = vrot.slane %v5806_v45, 2  ;;  %8100 = vmatprep.mubr.bf16.mxu1 %v18591_v15  ;;  %v5451_v16 = vpop.f32.mrb[180].mxu0 }
 0x46e   :  { %v19239_v6 = vsel %vm3461_vm4, %v20286_v58, %v20285_v18  ;;  %v5577_v19 = vmax.f32 %v14778_v13, 0.0  ;;  %v5579_v0 = vmax.f32 %v14780_v49, 0.0  ;;  %8240 = vmatpush1.bf16.msra.mxu1 %v15802_v60  ;;  %v19251_v56 = vsel %vm5928_vm5, %v18846_v31, %v18869_v12 }
 0x46f   :  { %20287 = vst [vmem:[#allocation93_spill] sm:$0xff] %v19251_v56  ;;  %v5816_v62 = vrot.slane %v5815_v14, 2  ;;  %v5820_v39 = vmax.f32 %v5576_v9, %v5578_v36  ;;  %8241 = vmatprep.subr.bf16.mxu1 %v15807_v37  ;;  %v20288_v47 = vcombine.low %v19157_v51, %v19159_v30  ;;  %v14404_v13 = vcombine.low %v19207_v5, %v19209_v38  ;;  %v5453_v9 = vpop.f32.mrb[181].mxu0 }
 0x470   :  { %v5791_v15 = vrot.slane %v19175_v21, 1  ;;  %v5808_v60 = vmax.f32 %v5806_v45, %v5807_v34  ;;  %v5829_v49 = vmax.f32 %v5577_v19, %v5579_v0  ;;  %v5800_v2 = vrot.slane %v5799_v43, 1  ;;  %v5455_v30 = vpop.f32.mrb[182].mxu0 }
 0x471   :  { %12353 = vmatpush1.bf16.msra.mxu0 %v20288_v47  ;;  %v5817_v18 = vmax.f32 %v5815_v14, %v5816_v62  ;;  %v14781_v58 = vadd.f32 %v5451_v16, %v18989_v54  ;;  %v14782_v51 = vadd.f32 %v5453_v9, %v19003_v44  ;;  %v20289_v5 = vshrl.u32 %v18568_v3, 16  ;;  %v5457_v0 = vpop.f32.mrb[183].mxu0  ;;  %v15813_v47 = vld [vmem:[#allocation6 + $0x874] ss:$8 sps:$4 sm:$0xff]  }
 0x472   :  { %12354 = vmatprep.subr.bf16.mxu0 %v14405_v40  ;;  %v5809_v37 = vrot.slane %v5808_v60, 1  ;;  %v20290_v45 = vshll.u32 %v18651_v27, 16  ;;  %8242 = vmatpush1.bf16.msra.mxu1 %v15805_v46  ;;  %v15808_v40 = vld [vmem:[#allocation6 + $0x860] ss:$8 sps:$4 sm:$0xff]   ;;  %v14783_v19 = vadd.f32 %v5455_v30, %v18989_v54  ;;  %v5792_v16 = vmax.f32 %v19175_v21, %v5791_v15 }
 0x473   :  { %v6578_v38 = vor.u32 %v20289_v5, %v18676_v50  ;;  %v5818_v34 = vrot.slane %v5817_v18, 1  ;;  %v5580_v14 = vmax.f32 %v14781_v58, 0.0  ;;  %8243 = vmatprep.subr.bf16.mxu1 %v15810_v57  ;;  %v5581_v3 = vmax.f32 %v14782_v51, 0.0  ;;  %v15811_v57 = vld [vmem:[#allocation6 + $0x870] ss:$8 sps:$4 sm:$0xff]  }
 0x474   :  { %v6582_v36 = vrot.slane %v20290_v45, 1  ;;  %v5810_v9 = vmax.f32 %v5808_v60, %v5809_v37  ;;  %v14784_v50 = vadd.f32 %v5457_v0, %v19003_v44  ;;  %v5801_v5 = vmax.f32 %v5799_v43, %v5800_v2  ;;  %8101 = vmatmul.mubr.bf16.gmra.mrb[236].mxu1 %v18688_v17  ;;  %v15816_v17 = vld [vmem:[#allocation6 + $0x884] ss:$8 sps:$4 sm:$0xff]  }
 0x475   :  { %12355 = vmatpush1.bf16.msra.mxu0 %v14404_v13  ;;  %v5819_v45 = vmax.f32 %v5817_v18, %v5818_v34  ;;  %v5821_v46 = vmax.f32 %v5820_v39, %v5580_v14  ;;  %v5582_v41 = vmax.f32 %v14783_v19, 0.0  ;;  %v5830_v30 = vmax.f32 %v5829_v49, %v5581_v3  ;;  %8110 = vmatprep.mubr.bf16.mxu1 %v18697_v35  ;;  %v5461_v49 = vpop.f32.mrb[184].mxu0 }
 0x476   :  { %v19273_v58 = vsel %vm9001_vm11, %v5810_v9, %v5792_v16  ;;  %v5583_v62 = vmax.f32 %v14784_v50, 0.0  ;;  %8244 = vmatpush1.bf16.msra.mxu1 %v15808_v40  ;;  %v6583_v39 = vsel %vm1450_vm0, %v6578_v38, %v6582_v36  ;;  %v19996_v13 = vshll.u32 %v18725_v25, 16  ;;  %v5463_v51 = vpop.f32.mrb[185].mxu0  ;;  %v20292_v40 = vld [vmem:[#allocation54_spill] sm:$0xff] }
 0x477   :  { %v19277_v21 = vsel %vm9001_vm11, %v5819_v45, %v5801_v5  ;;  %v5742_v43 = vsel %vm5635_vm8, %v5582_v41, 0.0  ;;  %8245 = vmatprep.subr.bf16.mxu1 %v15813_v47  ;;  %v19997_v35 = vshrl.u32 %v18651_v27, 16  ;;  %v19998_v2 = vshll.u32 %v18714_v61, 16  ;;  %v20291_v41 = vld [vmem:[#allocation55_spill] sm:$0xff] }
 0x478   :  { %v5822_v15 = vmax.f32 %v5821_v46, %v5742_v43  ;;  %v5743_v60 = vsel %vm5635_vm8, %v5583_v62, 0.0  ;;  %v14785_v37 = vadd.f32 %v5461_v49, %v18989_v54  ;;  %v20293_v38 = vshrl.u32 %v20292_v40, 16  ;;  %v5465_v62 = vpop.f32.mrb[186].mxu0  ;;  %v15814_v9 = vld [vmem:[#allocation6 + $0x880] ss:$8 sps:$4 sm:$0xff]  }
 0x479   :  { %v5831_v18 = vmax.f32 %v5830_v30, %v5743_v60  ;;  %v20294_v14 = vshll.u32 %v18639_v48, 16  ;;  %v14786_v42 = vadd.f32 %v5463_v51, %v19003_v44  ;;  %v6594_v47 = vor.u32 %v19997_v35, %v6582_v36  ;;  %v5467_v5 = vpop.f32.mrb[187].mxu0  ;;  %v20295_v46 = vld [vmem:[#allocation63_spill] sm:$0xff]  ;;  %v15819_v43 = vld [vmem:[#allocation6 + $0x894] ss:$8 sps:$4 sm:$0xff]  }
 0x47a   :  { %v6570_v34 = vor.u32 %v20293_v38, %v20291_v41  ;;  %v5823_v0 = vrot.slane %v5822_v15, 4  ;;  %v19999_v16 = vshrl.u32 %v18639_v48, 16  ;;  %8246 = vmatpush1.bf16.msra.mxu1 %v15811_v57  ;;  %v14787_v50 = vadd.f32 %v5465_v62, %v18989_v54  ;;  %v20296_v51 = vld [vmem:[#allocation52_spill] sm:$0xff]  ;;  %v20297_v62 = vld [vmem:[#allocation59_spill] sm:$0xff] }
 0x47b   :  { %v6574_v19 = vrot.slane %v20294_v14, 1  ;;  %v5832_v3 = vrot.slane %v5831_v18, 4  ;;  %v6598_v45 = vrot.slane %v19996_v13, 1  ;;  %v20000_v30 = vshll.u32 %v20295_v46, 16  ;;  %8247 = vmatprep.subr.bf16.mxu1 %v15816_v17  ;;  %v15817_v17 = vld [vmem:[#allocation6 + $0x890] ss:$8 sps:$4 sm:$0xff]  }
 0x47c   :  { %v5824_v60 = vmax.f32 %v5822_v15, %v5823_v0  ;;  %v14788_v49 = vadd.f32 %v5467_v5, %v19003_v44  ;;  %vm5639_vm12 = vcmp.lt.s32.totalorder %v20296_v51, 26  ;;  %v6590_v36 = vrot.slane %v19998_v2, 1  ;;  %8111 = vmatmul.mubr.bf16.gmra.mrb[240].mxu1 %v20297_v62  ;;  %v20298_v15 = vld [vmem:[#allocation75_spill] sm:$0xff]  ;;  %v20300_v5 = vld [vmem:[#allocation77_spill] sm:$0xff] }
 0x47d   :  { %v5833_v41 = vmax.f32 %v5831_v18, %v5832_v3  ;;  %v5584_v40 = vmax.f32 %v14785_v37, 0.0  ;;  %v5585_v38 = vmax.f32 %v14786_v42, 0.0  ;;  %v5586_v14 = vmax.f32 %v14787_v50, 0.0  ;;  %8120 = vmatprep.mubr.bf16.mxu1 %v6583_v39 }
 0x47e   :  { %v5825_v13 = vrot.slane %v5824_v60, 2  ;;  %v5587_v35 = vmax.f32 %v14788_v49, 0.0  ;;  %8248 = vmatpush1.bf16.msra.mxu1 %v15814_v9  ;;  %v19310_v0 = vsel %vm5928_vm5, %v18869_v12, %v20298_v15  ;;  %v19315_v2 = vsel %vm5928_vm5, %v20298_v15, %v20300_v5  ;;  %v15822_v9 = vld [vmem:[#allocation6 + $0x8a4] ss:$8 sps:$4 sm:$0xff]   ;;  %v5471_v12 = vpop.f32.mrb[188].mxu0 }
 0x47f   :  { %20299 = vst [vmem:[#allocation55_spill] sm:$0xff] %v19310_v0  ;;  %20301 = vst [vmem:[#allocation54_spill] sm:$0xff] %v19315_v2  ;;  %v5834_v18 = vrot.slane %v5833_v41, 2  ;;  %v5838_v37 = vmax.f32 %v5584_v40, %v5586_v14  ;;  %v6586_v42 = vor.u32 %v19999_v16, %v6574_v19  ;;  %v19321_v39 = vrot.slane %v20000_v30, 1  ;;  %8249 = vmatprep.subr.bf16.mxu1 %v15819_v43  ;;  %v5473_v40 = vpop.f32.mrb[189].mxu0 }
 0x480   :  { %v5826_v3 = vmax.f32 %v5824_v60, %v5825_v13  ;;  %v5847_v50 = vmax.f32 %v5585_v38, %v5587_v35  ;;  %v6575_v49 = vsel %vm1450_vm0, %v6570_v34, %v6574_v19  ;;  %v6599_v62 = vsel %vm1450_vm0, %v6594_v47, %v6598_v45  ;;  %v5475_v13 = vpop.f32.mrb[190].mxu0  ;;  %v20303_v60 = vld [vmem:[#allocation62_spill] sm:$0xff] }
 0x481   :  { %v5835_v15 = vmax.f32 %v5833_v41, %v5834_v18  ;;  %v14789_v57 = vadd.f32 %v5471_v12, %v18989_v54  ;;  %v19327_v14 = vsel %vm1450_vm0, %v6586_v42, %v6590_v36  ;;  %v20302_v16 = vshrl.u32 %v18725_v25, 16  ;;  %v15820_v19 = vld [vmem:[#allocation6 + $0x8a0] ss:$8 sps:$4 sm:$0xff]   ;;  %v5477_v18 = vpop.f32.mrb[191].mxu0 }
 0x482   :  { %v5827_v2 = vrot.slane %v5826_v3, 1  ;;  %v14790_v43 = vadd.f32 %v5473_v40, %v19003_v44  ;;  %v20001_v35 = vshrl.u32 %v18714_v61, 16  ;;  %8250 = vmatpush1.bf16.msra.mxu1 %v15817_v17  ;;  %v14791_v38 = vadd.f32 %v5475_v13, %v18989_v54 }
 0x483   :  { %v6610_v30 = vor.u32 %v20302_v16, %v6598_v45  ;;  %v5836_v47 = vrot.slane %v5835_v15, 1  ;;  %v5588_v41 = vmax.f32 %v14789_v57, 0.0  ;;  %8251 = vmatprep.subr.bf16.mxu1 %v15822_v9  ;;  %v15825_v16 = vld [vmem:[#allocation6 + $0x8b4] ss:$8 sps:$4 sm:$0xff]   ;;  %v14792_v40 = vadd.f32 %v5477_v18, %v19003_v44 }
 0x484   :  { %v5828_v45 = vmax.f32 %v5826_v3, %v5827_v2  ;;  %v5589_v12 = vmax.f32 %v14790_v43, 0.0  ;;  %v19340_v0 = vor.u32 %v20001_v35, %v6590_v36  ;;  %v5590_v56 = vmax.f32 %v14791_v38, 0.0  ;;  %8121 = vmatmul.mubr.bf16.gmra.mrb[244].mxu1 %v6575_v49  ;;  %v15823_v36 = vld [vmem:[#allocation6 + $0x8b0] ss:$8 sps:$4 sm:$0xff]   ;;  %v20307_v38 = vld [vmem:[#allocation26_spill] sm:$0xff] }
 0x485   :  { %v6615_v42 = vsel %vm1450_vm0, %v6610_v30, %v19321_v39  ;;  %v5837_v17 = vmax.f32 %v5835_v15, %v5836_v47  ;;  %v5839_v34 = vmax.f32 %v5838_v37, %v5588_v41  ;;  %v5591_v9 = vmax.f32 %v14792_v40, 0.0  ;;  %8130 = vmatprep.mubr.bf16.mxu1 %v6599_v62  ;;  %v15828_v15 = vld [vmem:[#allocation6 + $0x8c4] ss:$8 sps:$4 sm:$0xff]   ;;  %v5481_v41 = vpop.f32.mrb[192].mxu0 }
 0x486   :  { %v19345_v13 = vsel %vm9003_vm14, %v5828_v45, %v19273_v58  ;;  %v5848_v30 = vmax.f32 %v5847_v50, %v5589_v12  ;;  %v20304_v2 = vshll.u32 %v20303_v60, 16  ;;  %8252 = vmatpush1.bf16.msra.mxu1 %v15820_v19  ;;  %v5750_v49 = vsel %vm5639_vm12, %v5590_v56, 0.0 }
 0x487   :  { %v19353_v37 = vsel %vm9003_vm14, %v5837_v17, %v19277_v21  ;;  %8253 = vmatprep.subr.bf16.mxu1 %v15825_v16  ;;  %v20305_v58 = vshrl.u32 %v18918_v23, 16  ;;  %v20306_v62 = vshll.u32 %v18918_v23, 16  ;;  %v5840_v47 = vmax.f32 %v5839_v34, %v5750_v49  ;;  %v5483_v16 = vpop.f32.mrb[193].mxu0 }
 0x488   :  { %v19349_v3 = vrot.slane %v20304_v2, 1  ;;  %v5751_v19 = vsel %vm5639_vm12, %v5591_v9, 0.0  ;;  %v20308_v21 = vshrl.u32 %v18951_v4, 16  ;;  %v14793_v56 = vadd.f32 %v5481_v41, %v18989_v54  ;;  %v5485_v51 = vpop.f32.mrb[194].mxu0  ;;  %v15826_v9 = vld [vmem:[#allocation6 + $0x8c0] ss:$8 sps:$4 sm:$0xff]  }
 0x489   :  { %v7000_v50 = vrot.slane %v20305_v58, 1  ;;  %v7001_v43 = vrot.slane %v20306_v62, 2  ;;  %v5849_v12 = vmax.f32 %v5848_v30, %v5751_v19  ;;  %v20003_v40 = vshrl.u32 %v19069_v24, 16  ;;  %v20310_v58 = vld [vmem:[#allocation86_spill] sm:$0xff] }
 0x48a   :  { %v7008_v45 = vrot.slane %v20308_v21, 1  ;;  %v20309_v17 = vshll.u32 %v18951_v4, 16  ;;  %v5841_v2 = vrot.slane %v5840_v47, 4  ;;  %v14794_v34 = vadd.f32 %v5483_v16, %v19003_v44  ;;  %8254 = vmatpush1.bf16.msra.mxu1 %v15823_v36  ;;  %v5487_v21 = vpop.f32.mrb[195].mxu0  ;;  %v15831_v4 = vld [vmem:[#allocation6 + $0x8d4] ss:$8 sps:$4 sm:$0xff]  }
 0x48b   :  { %v19371_v49 = vor.u32 %v7001_v43, %v7000_v50  ;;  %v19376_v30 = vsel %vm5928_vm5, %v20300_v5, %v20310_v58  ;;  %v5850_v62 = vrot.slane %v5849_v12, 4  ;;  %v5592_v19 = vmax.f32 %v14793_v56, 0.0  ;;  %8255 = vmatprep.subr.bf16.mxu1 %v15828_v15  ;;  %v20312_v43 = vld [vmem:[#allocation64_spill] sm:$0xff] }
 0x48c   :  { %v7009_v23 = vrot.slane %v20309_v17, 2  ;;  %v14795_v41 = vadd.f32 %v5485_v51, %v18989_v54  ;;  %v20311_v17 = vshrl.u32 %v19028_v33, 16  ;;  %v5842_v35 = vmax.f32 %v5840_v47, %v5841_v2  ;;  %8131 = vmatmul.mubr.bf16.gmra.mrb[248].mxu1 %v19327_v14  ;;  %v15829_v2 = vld [vmem:[#allocation6 + $0x8d0] ss:$8 sps:$4 sm:$0xff]  }
 0x48d   :  { %v5593_v36 = vmax.f32 %v14794_v34, 0.0  ;;  %v14796_v50 = vadd.f32 %v5487_v21, %v19003_v44  ;;  %vm5643_vm7 = vcmp.lt.s32.totalorder %v20312_v43, 26  ;;  %v5851_v57 = vmax.f32 %v5849_v12, %v5850_v62  ;;  %8140 = vmatprep.mubr.bf16.mxu1 %v6615_v42  ;;  %v5491_v62 = vpop.f32.mrb[196].mxu0 }
 0x48e   :  { %v7016_v16 = vrot.slane %v20311_v17, 1  ;;  %v7010_v18 = vor.u32 %v7009_v23, %v7008_v45  ;;  %v5594_v5 = vmax.f32 %v14795_v41, 0.0  ;;  %v20313_v56 = vshll.u32 %v19028_v33, 16  ;;  %8256 = vmatpush1.bf16.msra.mxu1 %v15826_v9  ;;  %v15834_v23 = vld [vmem:[#allocation6 + $0x8e4] ss:$8 sps:$4 sm:$0xff]  }
 0x48f   :  { %v19389_v15 = vsel %vm5928_vm5, %v20310_v58, %v19046_v26  ;;  %v5843_v17 = vrot.slane %v5842_v35, 2  ;;  %v5595_v47 = vmax.f32 %v14796_v50, 0.0  ;;  %v19398_v14 = vsel %vm5928_vm5, %v19046_v26, %v19087_v52  ;;  %8257 = vmatprep.subr.bf16.mxu1 %v15831_v4 }
 0x490   :  { %v7017_v51 = vrot.slane %v20313_v56, 2  ;;  %v19393_v45 = vsel %vm5928_vm5, %v19371_v49, %v7010_v18  ;;  %v5852_v33 = vrot.slane %v5851_v57, 2  ;;  %v5856_v12 = vmax.f32 %v5592_v19, %v5594_v5  ;;  %v5493_v19 = vpop.f32.mrb[197].mxu0 }
 0x491   :  { %v7024_v58 = vrot.slane %v20003_v40, 1  ;;  %v5844_v42 = vmax.f32 %v5842_v35, %v5843_v17  ;;  %v5865_v9 = vmax.f32 %v5593_v36, %v5595_v47  ;;  %v20314_v41 = vshrl.u32 %v20295_v46, 16  ;;  %v15832_v17 = vld [vmem:[#allocation6 + $0x8e0] ss:$8 sps:$4 sm:$0xff]  }
 0x492   :  { %v7018_v34 = vor.u32 %v7017_v51, %v7016_v16  ;;  %v20315_v50 = vshll.u32 %v19069_v24, 16  ;;  %v5853_v26 = vmax.f32 %v5851_v57, %v5852_v33  ;;  %v14797_v52 = vadd.f32 %v5491_v62, %v18989_v54  ;;  %v5495_v51 = vpop.f32.mrb[198].mxu0  ;;  %8258 = vmatpush1.bf16.msra.mxu1 %v15829_v2 }
 0x493   :  { %v6626_v21 = vor.u32 %v20314_v41, %v19321_v39  ;;  %v20316_v4 = vshll.u32 %v20307_v38, 16  ;;  %v5845_v35 = vrot.slane %v5844_v42, 1  ;;  %v14798_v36 = vadd.f32 %v5493_v19, %v19003_v44  ;;  %v5497_v41 = vpop.f32.mrb[199].mxu0  ;;  %8259 = vmatprep.subr.bf16.mxu1 %v15834_v23 }
 0x494   :  { %v7025_v56 = vrot.slane %v20315_v50, 2  ;;  %v19411_v5 = vsel %vm5928_vm5, %v7010_v18, %v7018_v34  ;;  %v6607_v39 = vsel %vm1450_vm0, %v19340_v0, %v19349_v3  ;;  %v5854_v47 = vrot.slane %v5853_v26, 1  ;;  %v15837_v50 = vld [vmem:[#allocation6 + $0x8f4] ss:$8 sps:$4 sm:$0xff]  }
 0x495   :  { %v6630_v16 = vrot.slane %v20316_v4, 1  ;;  %v5596_v33 = vmax.f32 %v14797_v52, 0.0  ;;  %v14799_v62 = vadd.f32 %v5495_v51, %v18989_v54  ;;  %v5846_v4 = vmax.f32 %v5844_v42, %v5845_v35  ;;  %8141 = vmatmul.mubr.bf16.gmra.mrb[252].mxu1 %v6607_v39  ;;  %v15835_v42 = vld [vmem:[#allocation6 + $0x8f0] ss:$8 sps:$4 sm:$0xff]  }
 0x496   :  { %v19417_v57 = vor.u32 %v7025_v56, %v7024_v58  ;;  %v5597_v19 = vmax.f32 %v14798_v36, 0.0  ;;  %v14800_v40 = vadd.f32 %v5497_v41, %v19003_v44  ;;  %v5855_v2 = vmax.f32 %v5853_v26, %v5854_v47  ;;  %8260 = vmatpush1.bf16.msra.mxu1 %v15832_v17 }
 0x497   :  { %v5857_v58 = vmax.f32 %v5856_v12, %v5596_v33  ;;  %v5598_v56 = vmax.f32 %v14799_v62, 0.0  ;;  %v6631_v52 = vsel %vm1450_vm0, %v6626_v21, %v6630_v16  ;;  %v19429_v51 = vsel %vm9005_vm15, %v5846_v4, %v19345_v13  ;;  %8261 = vmatprep.subr.bf16.mxu1 %v15837_v50  ;;  %v15840_v21 = vld [vmem:[#allocation6 + $0x904] ss:$8 sps:$4 sm:$0xff]  }
 0x498   :  { %v19424_v0 = vsel %vm5928_vm5, %v7018_v34, %v19417_v57  ;;  %v5866_v23 = vmax.f32 %v5865_v9, %v5597_v19  ;;  %v5599_v18 = vmax.f32 %v14800_v40, 0.0  ;;  %8150 = vmatprep.mubr.bf16.mxu1 %v6631_v52  ;;  %v19433_v35 = vsel %vm9005_vm15, %v5855_v2, %v19353_v37  ;;  %v5501_v9 = vpop.f32.mrb[200].mxu0 }
 0x499   :  { %v5758_v12 = vsel %vm5643_vm7, %v5598_v56, 0.0  ;;  %v6616_v34 = vshrl.u32 %v20303_v60, 16  ;;  %v6640_v40 = vshrl.u32 %v20307_v38, 16  ;;  %v20317_v36 = vshll.u32 %v18851_v22, 16  ;;  %v5503_v47 = vpop.f32.mrb[201].mxu0  ;;  %v20318_v56 = vld [vmem:[#allocation69_spill] sm:$0xff] }
 0x49a   :  { %v5858_v26 = vmax.f32 %v5857_v58, %v5758_v12  ;;  %v5759_v13 = vsel %vm5643_vm7, %v5599_v18, 0.0  ;;  %v14801_v37 = vadd.f32 %v5501_v9, %v18989_v54  ;;  %v14802_v41 = vadd.f32 %v5503_v47, %v19003_v44  ;;  %v5505_v50 = vpop.f32.mrb[202].mxu0  ;;  %8262 = vmatpush1.bf16.msra.mxu1 %v15835_v42 }
 0x49b   :  { %v6646_v39 = vrot.slane %v20317_v36, 1  ;;  %v5867_v17 = vmax.f32 %v5866_v23, %v5759_v13  ;;  %v6618_v62 = vor.u32 %v6616_v34, %v19349_v3  ;;  %v6642_v43 = vor.u32 %v6640_v40, %v6630_v16  ;;  %v5507_v19 = vpop.f32.mrb[203].mxu0  ;;  %8424 = vmatprep.subr.bf16.mxu1 %v15840_v21 }
 0x49c   :  { %v5859_v33 = vrot.slane %v5858_v26, 4  ;;  %v14803_v4 = vadd.f32 %v5505_v50, %v18989_v54  ;;  %v14804_v58 = vadd.f32 %v5507_v19, %v19003_v44  ;;  %v5600_v12 = vmax.f32 %v14801_v37, 0.0  ;;  %v5511_v50 = vpop.f32.mrb[204].mxu0 }
 0x49d   :  { %v5868_v18 = vrot.slane %v5867_v17, 4  ;;  %v6623_v52 = vsel %vm1450_vm0, %v6618_v62, %v20318_v56  ;;  %v6647_v3 = vsel %vm1450_vm0, %v6642_v43, %v6646_v39  ;;  %v20004_v16 = vshll.u32 %v18886_v7, 16  ;;  %v5513_v56 = vpop.f32.mrb[205].mxu0 }
 0x49e   :  { %v5860_v2 = vmax.f32 %v5858_v26, %v5859_v33  ;;  %v5602_v13 = vmax.f32 %v14803_v4, 0.0  ;;  %8151 = vmatmul.mubr.bf16.gmra.mrb[0].mxu1 %v6623_v52  ;;  %v5601_v9 = vmax.f32 %v14802_v41, 0.0  ;;  %v5603_v36 = vmax.f32 %v14804_v58, 0.0  ;;  %v5515_v41 = vpop.f32.mrb[206].mxu0 }
 0x49f   :  { %v5869_v23 = vmax.f32 %v5867_v17, %v5868_v18  ;;  %8160 = vmatprep.mubr.bf16.mxu1 %v6647_v3  ;;  %v14805_v62 = vadd.f32 %v5511_v50, %v18989_v54  ;;  %v20005_v17 = vshrl.u32 %v18851_v22, 16  ;;  %v6662_v37 = vrot.slane %v20004_v16, 1  ;;  %v20320_v50 = vld [vmem:[#allocation76_spill] sm:$0xff] }
 0x4a0   :  { %v5861_v42 = vrot.slane %v5860_v2, 2  ;;  %v5874_v21 = vmax.f32 %v5600_v12, %v5602_v13  ;;  %v5883_v33 = vmax.f32 %v5601_v9, %v5603_v36  ;;  %v14806_v18 = vadd.f32 %v5513_v56, %v19003_v44  ;;  %v20319_v13 = vld [vmem:[#allocation65_spill] sm:$0xff] }
 0x4a1   :  { %v5870_v47 = vrot.slane %v5869_v23, 2  ;;  %v5604_v58 = vmax.f32 %v14805_v62, 0.0  ;;  %v14807_v52 = vadd.f32 %v5515_v41, %v18989_v54  ;;  %v6658_v3 = vor.u32 %v20005_v17, %v6646_v39 }
 0x4a2   :  { %v5862_v26 = vmax.f32 %v5860_v2, %v5861_v42  ;;  %v5517_v2 = vpop.f32.mrb[207].mxu0  ;;  %v5605_v12 = vmax.f32 %v14806_v18, 0.0  ;;  %vm5647_vm10 = vcmp.lt.s32.totalorder %v20319_v13, 26 }
 0x4a3   :  { %v5871_v19 = vmax.f32 %v5869_v23, %v5870_v47  ;;  %v14808_v42 = vadd.f32 %v5517_v2, %v19003_v44  ;;  %v5875_v36 = vmax.f32 %v5874_v21, %v5604_v58  ;;  %v5606_v47 = vmax.f32 %v14807_v52, 0.0 }
 0x4a4   :  { %v5863_v43 = vrot.slane %v5862_v26, 1  ;;  %v6663_v56 = vsel %vm1450_vm0, %v6658_v3, %v6662_v37  ;;  %v5884_v62 = vmax.f32 %v5883_v33, %v5605_v12  ;;  %v5521_v2 = vpop.f32.mrb[208].mxu0  ;;  %v6672_v58 = vshrl.u32 %v18886_v7, 16 }
 0x4a5   :  { %v5872_v4 = vrot.slane %v5871_v19, 1  ;;  %v5607_v16 = vmax.f32 %v14808_v42, 0.0  ;;  %v5766_v39 = vsel %vm5647_vm10, %v5606_v47, 0.0  ;;  %v14809_v21 = vadd.f32 %v5521_v2, %v18989_v54  ;;  %v20321_v47 = vld [vmem:[#allocation78_spill] sm:$0xff] }
 0x4a6   :  { %v5864_v23 = vmax.f32 %v5862_v26, %v5863_v43  ;;  %8161 = vmatmul.mubr.bf16.gmra.mrb[4].mxu1 %v20320_v50  ;;  %v5876_v43 = vmax.f32 %v5875_v36, %v5766_v39  ;;  %v20322_v50 = vld [vmem:[#allocation87_spill] sm:$0xff] }
 0x4a7   :  { %v5873_v9 = vmax.f32 %v5871_v19, %v5872_v4  ;;  %8170 = vmatprep.mubr.bf16.mxu1 %v6663_v56  ;;  %v5767_v18 = vsel %vm5647_vm10, %v5607_v16, 0.0  ;;  %v5523_v4 = vpop.f32.mrb[209].mxu0 }
 0x4a8   :  { %v9075_v41 = vsel %vm9007_vm2, %v5864_v23, %v19429_v51  ;;  %v5885_v19 = vmax.f32 %v5884_v62, %v5767_v18  ;;  %v5877_v52 = vrot.slane %v5876_v43, 4  ;;  %v14810_v33 = vadd.f32 %v5523_v4, %v19003_v44  ;;  %v5525_v3 = vpop.f32.mrb[210].mxu0 }
 0x4a9   :  { %v9082_v26 = vsel %vm9007_vm2, %v5873_v9, %v19433_v35  ;;  %v14811_v51 = vadd.f32 %v5525_v3, %v18989_v54  ;;  %v5527_v23 = vpop.f32.mrb[211].mxu0  ;;  %v6674_v35 = vor.u32 %v6672_v58, %v6662_v37  ;;  %v5608_v9 = vmax.f32 %v14809_v21, 0.0 }
 0x4aa   :  { %v5886_v12 = vrot.slane %v5885_v19, 4  ;;  %v5878_v13 = vmax.f32 %v5876_v43, %v5877_v52  ;;  %v14812_v16 = vadd.f32 %v5527_v23, %v19003_v44  ;;  %v5609_v39 = vmax.f32 %v14810_v33, 0.0 }
 0x4ab   :  { %v5610_v36 = vmax.f32 %v14811_v51, 0.0  ;;  %v6679_v56 = vsel %vm1450_vm0, %v6674_v35, %v20322_v50 }
 0x4ac   :  { %v5887_v42 = vmax.f32 %v5885_v19, %v5886_v12  ;;  %v5879_v62 = vrot.slane %v5878_v13, 2  ;;  %v5611_v18 = vmax.f32 %v14812_v16, 0.0  ;;  %v5531_v37 = vpop.f32.mrb[212].mxu0 }
 0x4ad   :  { %v5892_v4 = vmax.f32 %v5608_v9, %v5610_v36  ;;  %v14813_v52 = vadd.f32 %v5531_v37, %v18989_v54  ;;  %v5533_v19 = vpop.f32.mrb[213].mxu0 }
 0x4ae   :  { %8171 = vmatmul.mubr.bf16.gmra.mrb[8].mxu1 %v20321_v47  ;;  %v5888_v2 = vrot.slane %v5887_v42, 2  ;;  %v5880_v3 = vmax.f32 %v5878_v13, %v5879_v62  ;;  %v5901_v17 = vmax.f32 %v5609_v39, %v5611_v18  ;;  %v14814_v12 = vadd.f32 %v5533_v19, %v19003_v44  ;;  %v5535_v51 = vpop.f32.mrb[214].mxu0  ;;  %v20324_v62 = vld [vmem:[#allocation85_spill] sm:$0xff] }
 0x4af   :  { %8180 = vmatprep.mubr.bf16.mxu1 %v6679_v56  ;;  %v5612_v47 = vmax.f32 %v14813_v52, 0.0  ;;  %v14815_v35 = vadd.f32 %v5535_v51, %v18989_v54  ;;  %v5537_v33 = vpop.f32.mrb[215].mxu0  ;;  %v20323_v56 = vld [vmem:[#allocation66_spill] sm:$0xff] }
 0x4b0   :  { %v5889_v43 = vmax.f32 %v5887_v42, %v5888_v2  ;;  %v5881_v21 = vrot.slane %v5880_v3, 1  ;;  %v5613_v50 = vmax.f32 %v14814_v12, 0.0  ;;  %vm5651_vm0 = vcmp.lt.s32.totalorder %v20323_v56, 26  ;;  %v20325_v56 = vld [vmem:[#allocation47_spill] sm:$0xff] }
 0x4b1   :  { %v14816_v13 = vadd.f32 %v5537_v33, %v19003_v44  ;;  %v5893_v42 = vmax.f32 %v5892_v4, %v5612_v47  ;;  %v5614_v36 = vmax.f32 %v14815_v35, 0.0 }
 0x4b2   :  { %v5890_v23 = vrot.slane %v5889_v43, 1  ;;  %v5882_v16 = vmax.f32 %v5880_v3, %v5881_v21  ;;  %v5902_v39 = vmax.f32 %v5901_v17, %v5613_v50 }
 0x4b3   :  { %v5615_v18 = vmax.f32 %v14816_v13, 0.0  ;;  %v5774_v37 = vsel %vm5651_vm0, %v5614_v36, 0.0  ;;  %v20326_v36 = vld [vmem:[#allocation89_spill] sm:$0xff] }
 0x4b4   :  { %v5891_v9 = vmax.f32 %v5889_v43, %v5890_v23  ;;  %v9076_v2 = vsel %vm9009_vm9, %v5882_v16, %v9075_v41  ;;  %v5894_v3 = vmax.f32 %v5893_v42, %v5774_v37  ;;  %v5541_v21 = vpop.f32.mrb[216].mxu0 }
 0x4b5   :  { %v5775_v19 = vsel %vm5651_vm0, %v5615_v18, 0.0  ;;  %v14817_v51 = vadd.f32 %v5541_v21, %v18989_v54  ;;  %v5543_v43 = vpop.f32.mrb[217].mxu0 }
 0x4b6   :  { %8181 = vmatmul.mubr.bf16.gmra.mrb[12].mxu1 %v20324_v62  ;;  %v9083_v52 = vsel %vm9009_vm9, %v5891_v9, %v9082_v26  ;;  %v5903_v12 = vmax.f32 %v5902_v39, %v5775_v19  ;;  %v5895_v4 = vrot.slane %v5894_v3, 4  ;;  %v14818_v23 = vadd.f32 %v5543_v43, %v19003_v44  ;;  %v5545_v47 = vpop.f32.mrb[218].mxu0 }
 0x4b7   :  { %8190 = vmatprep.mubr.bf16.mxu1 %v19060_v8  ;;  %v14819_v35 = vadd.f32 %v5545_v47, %v18989_v54  ;;  %v5547_v8 = vpop.f32.mrb[219].mxu0  ;;  %v5616_v26 = vmax.f32 %v14817_v51, 0.0 }
 0x4b8   :  { %v5904_v17 = vrot.slane %v5903_v12, 4  ;;  %v5896_v33 = vmax.f32 %v5894_v3, %v5895_v4  ;;  %v14820_v41 = vadd.f32 %v5547_v8, %v19003_v44  ;;  %v5617_v9 = vmax.f32 %v14818_v23, 0.0 }
 0x4b9   :  { %v5618_v50 = vmax.f32 %v14819_v35, 0.0 }
 0x4ba   :  { %v5905_v16 = vmax.f32 %v5903_v12, %v5904_v17  ;;  %v5897_v13 = vrot.slane %v5896_v33, 2  ;;  %v5619_v42 = vmax.f32 %v14820_v41, 0.0 }
 0x4bb   :  { %v5910_v39 = vmax.f32 %v5616_v26, %v5618_v50 }
 0x4bc   :  { %v5906_v62 = vrot.slane %v5905_v16, 2  ;;  %v5898_v18 = vmax.f32 %v5896_v33, %v5897_v13  ;;  %v5919_v37 = vmax.f32 %v5617_v9, %v5619_v42  ;;  %v5551_v19 = vpop.f32.mrb[220].mxu0  ;;  %v20328_v13 = vld [vmem:[#allocation91_spill] sm:$0xff] }
 0x4bd   :  { %v14821_v3 = vadd.f32 %v5551_v19, %v18989_v54  ;;  %v5553_v43 = vpop.f32.mrb[221].mxu0 }
 0x4be   :  { %8191 = vmatmul.mubr.bf16.gmra.mrb[16].mxu1 %v20325_v56  ;;  %v5907_v21 = vmax.f32 %v5905_v16, %v5906_v62  ;;  %v5899_v4 = vrot.slane %v5898_v18, 1  ;;  %v14822_v12 = vadd.f32 %v5553_v43, %v19003_v44  ;;  %v5555_v51 = vpop.f32.mrb[222].mxu0  ;;  %v20327_v56 = vld [vmem:[#allocation43_spill] sm:$0xff] }
 0x4bf   :  { %8200 = vmatprep.mubr.bf16.mxu1 %v20326_v36  ;;  %v5620_v17 = vmax.f32 %v14821_v3, 0.0  ;;  %v14823_v23 = vadd.f32 %v5555_v51, %v18989_v54  ;;  %v5557_v35 = vpop.f32.mrb[223].mxu0  ;;  %vm5655_vm8 = vcmp.lt.s32.totalorder %v20327_v56, 26  ;;  %v20331_v51 = vld [vmem:[#allocation32_spill] sm:$0xff] }
 0x4c0   :  { %v5908_v47 = vrot.slane %v5907_v21, 1  ;;  %v5900_v8 = vmax.f32 %v5898_v18, %v5899_v4  ;;  %v5621_v41 = vmax.f32 %v14822_v12, 0.0  ;;  %v14824_v33 = vadd.f32 %v5557_v35, %v19003_v44 }
 0x4c1   :  { %v5911_v16 = vmax.f32 %v5910_v39, %v5620_v17  ;;  %v5622_v50 = vmax.f32 %v14823_v23, 0.0  ;;  %v20329_v44 = vshrl.u32 %v19069_v24, 16  ;;  %v20333_v17 = vld [vmem:[#allocation90_spill] sm:$0xff]  ;;  %v20334_v23 = vshrl.u32 %v19064_v32, 16 }
 0x4c2   :  { %v5909_v26 = vmax.f32 %v5907_v21, %v5908_v47  ;;  %v5920_v9 = vmax.f32 %v5919_v37, %v5621_v41  ;;  %v5623_v42 = vmax.f32 %v14824_v33, 0.0  ;;  %v9077_v36 = vsel %vm9011_vm13, %v5900_v8, %v9076_v2  ;;  %v20330_v37 = vld [vmem:[#allocation50_spill] sm:$0xff]  ;;  %v20335_v33 = vld [vmem:[#allocation29_spill] sm:$0xff] }
 0x4c3   :  { %v5782_v62 = vsel %vm5655_vm8, %v5622_v50, 0.0  ;;  %v6733_v21 = vor.u32 %v20329_v44, %v19122_v63  ;;  %v6730_v35 = vor.u32 %v20334_v23, %v20333_v17  ;;  %v20336_v50 = vld [vmem:[#allocation67_spill] sm:$0xff]  ;;  %v20343_v17 = vld [vmem:[#allocation36_spill] sm:$0xff] }
 0x4c4   :  { %v9084_v54 = vsel %vm9011_vm13, %v5909_v26, %v9083_v52  ;;  %v5912_v18 = vmax.f32 %v5911_v16, %v5782_v62  ;;  %v5783_v19 = vsel %vm5655_vm8, %v5623_v42, 0.0  ;;  %v6805_v26 = vrot.slane %v20335_v33, 1  ;;  %v20337_v42 = vld [vmem:[#allocation31_spill] sm:$0xff]  ;;  %v20344_v23 = vld [vmem:[#allocation56_spill] sm:$0xff] }
 0x4c5   :  { %v5921_v3 = vmax.f32 %v5920_v9, %v5783_v19  ;;  %v6769_v2 = vsel %vm16539_vm3, %v6733_v21, %v20331_v51  ;;  %v20338_v62 = vrot.slane %v20337_v42, 1  ;;  %v15861_v42 = vld [vmem:[#allocation6 + $0x974] ss:$8 sps:$4 sm:$0xff]  }
 0x4c6   :  { %8201 = vmatmul.mubr.bf16.gmra.mrb[20].mxu1 %v20328_v13  ;;  %v5913_v39 = vrot.slane %v5912_v18, 4  ;;  %v6768_v13 = vsel %vm16539_vm3, %v6730_v35, %v20336_v50  ;;  %v15847_v35 = vld [vmem:[#allocation6 + $0x930] ss:$8 sps:$4 sm:$0xff]  }
 0x4c7   :  { %8210 = vmatprep.mubr.bf16.mxu1 %v19136_v1  ;;  %v5922_v43 = vrot.slane %v5921_v3, 4  ;;  %v15841_v1 = vld [vmem:[#allocation6 + $0x910] ss:$8 sps:$4 sm:$0xff]  }
 0x4c8   :  { %v5914_v4 = vmax.f32 %v5912_v18, %v5913_v39  ;;  %v6807_v18 = vsel %vm3461_vm4, %v6805_v26, %v20338_v62  ;;  %v15838_v39 = vld [vmem:[#allocation6 + $0x900] ss:$8 sps:$4 sm:$0xff]   ;;  %v15853_v50 = vld [vmem:[#allocation6 + $0x950] ss:$8 sps:$4 sm:$0xff]  }
 0x4c9   :  { %v5923_v12 = vmax.f32 %v5921_v3, %v5922_v43  ;;  %v20339_v43 = vld [vmem:[#allocation28_spill] sm:$0xff]  ;;  %v20347_v62 = vld [vmem:[#allocation58_spill] sm:$0xff] }
 0x4ca   :  { %v5915_v47 = vrot.slane %v5914_v4, 2  ;;  %v9142_v33 = vld [vmem:[#allocation9 + $0x70] sm:$0xff] }
 0x4cb   :  { %v5924_v52 = vrot.slane %v5923_v12, 2 }
 0x4cc   :  { %v5916_v8 = vmax.f32 %v5914_v4, %v5915_v47  ;;  %v6802_v4 = vrot.slane %v20339_v43, 1  ;;  %v15844_v47 = vld [vmem:[#allocation6 + $0x920] ss:$8 sps:$4 sm:$0xff]  }
 0x4cd   :  { %v5925_v41 = vmax.f32 %v5923_v12, %v5924_v52  ;;  %v15843_v12 = vld [vmem:[#allocation6 + $0x914] ss:$8 sps:$4 sm:$0xff]  }
 0x4ce   :  { %8211 = vmatmul.mubr.bf16.gmra.mrb[24].mxu1 %v20330_v37  ;;  %v5917_v63 = vrot.slane %v5916_v8, 1  ;;  %v20340_v37 = vld [vmem:[#allocation30_spill] sm:$0xff]  ;;  %v15849_v52 = vld [vmem:[#allocation6 + $0x934] ss:$8 sps:$4 sm:$0xff]  }
 0x4cf   :  { %8220 = vmatprep.mubr.bf16.mxu1 %v6769_v2  ;;  %v5926_v56 = vrot.slane %v5925_v41, 1  ;;  %v20341_v51 = vrot.slane %v20340_v37, 1  ;;  %v15846_v2 = vld [vmem:[#allocation6 + $0x924] ss:$8 sps:$4 sm:$0xff]   ;;  %v20349_v37 = vld [vmem:[#allocation61_spill] sm:$0xff] }
 0x4d0   :  { %v5918_v16 = vmax.f32 %v5916_v8, %v5917_v63  ;;  %v15852_v8 = vld [vmem:[#allocation6 + $0x944] ss:$8 sps:$4 sm:$0xff]   ;;  %v15855_v63 = vld [vmem:[#allocation6 + $0x954] ss:$8 sps:$4 sm:$0xff]  }
 0x4d1   :  { %v5927_v9 = vmax.f32 %v5925_v41, %v5926_v56  ;;  %v15850_v41 = vld [vmem:[#allocation6 + $0x940] ss:$8 sps:$4 sm:$0xff]  }
 0x4d2   :  { %v9078_v19 = vsel %vm9013_vm1, %v5918_v16, %v9077_v36  ;;  %v6804_v36 = vsel %vm3461_vm4, %v6802_v4, %v20341_v51  ;;  %v20345_v56 = vld [vmem:[#allocation37_spill] sm:$0xff]  ;;  %v20350_v51 = vld [vmem:[#allocation27_spill] sm:$0xff] }
 0x4d3   :  { %v9085_v3 = vsel %vm9013_vm1, %v5927_v9, %v9084_v54  ;;  %v19529_v21 = vpack.c.bf16 %v9078_v19, %v9078_v19  ;;  %v20342_v54 = vld [vmem:[#allocation57_spill] sm:$0xff] }
 0x4d4   :  { %v19527_v44 = vpack.c.bf16 %v9085_v3, %v9085_v3  ;;  %v20346_v16 = vld [vmem:[#allocation45_spill] sm:$0xff]  ;;  %v15864_v3 = vld [vmem:[#allocation6 + $0x984] ss:$8 sps:$4 sm:$0xff]  }
 0x4d5   :  { %v15856_v9 = vld [vmem:[#allocation6 + $0x960] ss:$8 sps:$4 sm:$0xff]   ;;  %v15859_v19 = vld [vmem:[#allocation6 + $0x970] ss:$8 sps:$4 sm:$0xff]  }
 0x4d6   :  { %8221 = vmatmul.mubr.bf16.gmra.mrb[28].mxu1 %v6768_v13  ;;  %12356 = vmatprep.mubr.bf16.mxu0 %v19527_v44  ;;  %v15858_v13 = vld [vmem:[#allocation6 + $0x964] ss:$8 sps:$4 sm:$0xff]  }
 0x4d7   :  { %8263 = vmatprep.mubr.bf16.mxu1 %v6807_v18  ;;  %12357 = vmatmul.mubr.bf16.vlgmr.msra.gmra.mrb[224].mxu0 %v19529_v21  ;;  %v20348_v18 = vld [vmem:[#allocation60_spill] sm:$0xff] }
 0x4de   :  { %8264 = vmatmul.mubr.bf16.vlgmr.msra.gmra.mrb[224].mxu1 %v6804_v36  ;;  %v15865_v36 = vld [vmem:[#allocation6 + $0x990] ss:$8 sps:$4 sm:$0xff]  }
 0x4df   :  { %8425 = vmatpush1.bf16.msra.mxu1 %v15838_v39  ;;  %8273 = vmatprep.mubr.bf16.mxu1 %v20342_v54  ;;  %v15862_v39 = vld [vmem:[#allocation6 + $0x980] ss:$8 sps:$4 sm:$0xff]   ;;  %v15870_v54 = vld [vmem:[#allocation6 + $0x9a4] ss:$8 sps:$4 sm:$0xff]  }
 0x4e0   :  { %8426 = vmatprep.subr.bf16.mxu1 %v15843_v12  ;;  %v15867_v12 = vld [vmem:[#allocation6 + $0x994] ss:$8 sps:$4 sm:$0xff]  }
 0x4e3   :  { %8427 = vmatpush1.bf16.msra.mxu1 %v15841_v1  ;;  %v15868_v1 = vld [vmem:[#allocation6 + $0x9a0] ss:$8 sps:$4 sm:$0xff]  }
 0x4e4   :  { %8428 = vmatprep.subr.bf16.mxu1 %v15846_v2  ;;  %v15873_v2 = vld [vmem:[#allocation6 + $0x9b4] ss:$8 sps:$4 sm:$0xff]  }
 0x4e6   :  { %8274 = vmatmul.mubr.bf16.gmra.mrb[228].mxu1 %v20343_v17  ;;  %v15871_v17 = vld [vmem:[#allocation6 + $0x9b0] ss:$8 sps:$4 sm:$0xff]  }
 0x4e7   :  { %8283 = vmatprep.mubr.bf16.mxu1 %v20344_v23  ;;  %8429 = vmatpush1.bf16.msra.mxu1 %v15844_v47  ;;  %v20351_v47 = vld [vmem:[#allocation68_spill] sm:$0xff]  ;;  %v15876_v23 = vld [vmem:[#allocation6 + $0x9c4] ss:$8 sps:$4 sm:$0xff]  }
 0x4e8   :  { %8430 = vmatprep.subr.bf16.mxu1 %v15849_v52  ;;  %v20352_v52 = vld [vmem:[#allocation71_spill] sm:$0xff] }
 0x4eb   :  { %8431 = vmatpush1.bf16.msra.mxu1 %v15847_v35  ;;  %v15874_v35 = vld [vmem:[#allocation6 + $0x9c0] ss:$8 sps:$4 sm:$0xff]  }
 0x4ec   :  { %8432 = vmatprep.subr.bf16.mxu1 %v15852_v8  ;;  %v15879_v8 = vld [vmem:[#allocation6 + $0x9d4] ss:$8 sps:$4 sm:$0xff]  }
 0x4ee   :  { %8284 = vmatmul.mubr.bf16.gmra.mrb[232].mxu1 %v20345_v56  ;;  %v15877_v56 = vld [vmem:[#allocation6 + $0x9d0] ss:$8 sps:$4 sm:$0xff]  }
 0x4ef   :  { %8293 = vmatprep.mubr.bf16.mxu1 %v20346_v16  ;;  %8433 = vmatpush1.bf16.msra.mxu1 %v15850_v41  ;;  %v20353_v41 = vld [vmem:[#allocation73_spill] sm:$0xff]  ;;  %v15882_v16 = vld [vmem:[#allocation6 + $0x9e4] ss:$8 sps:$4 sm:$0xff]  }
 0x4f0   :  { %8434 = vmatprep.subr.bf16.mxu1 %v15855_v63  ;;  %v20354_v63 = vld [vmem:[#allocation74_spill] sm:$0xff] }
 0x4f3   :  { %8435 = vmatpush1.bf16.msra.mxu1 %v15853_v50  ;;  %v15880_v50 = vld [vmem:[#allocation6 + $0x9e0] ss:$8 sps:$4 sm:$0xff]  }
 0x4f4   :  { %8436 = vmatprep.subr.bf16.mxu1 %v15858_v13  ;;  %v15885_v13 = vld [vmem:[#allocation6 + $0x9f4] ss:$8 sps:$4 sm:$0xff]  }
 0x4f6   :  { %8294 = vmatmul.mubr.bf16.gmra.mrb[236].mxu1 %v20347_v62  ;;  %v15883_v62 = vld [vmem:[#allocation6 + $0x9f0] ss:$8 sps:$4 sm:$0xff]  }
 0x4f7   :  { %8303 = vmatprep.mubr.bf16.mxu1 %v20348_v18  ;;  %8437 = vmatpush1.bf16.msra.mxu1 %v15856_v9  ;;  %v20355_v9 = vld [vmem:[#allocation79_spill] sm:$0xff]  ;;  %v9130_v18 = vld [vmem:[#allocation9 + $0x10] sm:$0xff] }
 0x4f8   :  { %8438 = vmatprep.subr.bf16.mxu1 %v15861_v42  ;;  %v20356_v42 = vld [vmem:[#allocation81_spill] sm:$0xff] }
 0x4fb   :  { %8439 = vmatpush1.bf16.msra.mxu1 %v15859_v19  ;;  %v9134_v19 = vld [vmem:[#allocation9 + $0x30] sm:$0xff] }
 0x4fc   :  { %8440 = vmatprep.subr.bf16.mxu1 %v15864_v3  ;;  %v14032_v3 = vcombine.low %v9130_v18, %v9134_v19 }
 0x4fe   :  { %8304 = vmatmul.mubr.bf16.gmra.mrb[240].mxu1 %v20349_v37  ;;  %v20358_v37 = vld [vmem:[#allocation84_spill] sm:$0xff] }
 0x4ff   :  { %8313 = vmatprep.mubr.bf16.mxu1 %v20350_v51  ;;  %8441 = vmatpush1.bf16.msra.mxu1 %v15862_v39  ;;  %v14033_v39 = vcombine.high %v9130_v18, %v9134_v19  ;;  %v20359_v51 = vld [vmem:[#allocation82_spill] sm:$0xff] }
 0x500   :  { %8442 = vmatprep.subr.bf16.mxu1 %v15867_v12  ;;  %v20357_v12 = vld [vmem:[#allocation80_spill] sm:$0xff] }
 0x503   :  { %8443 = vmatpush1.bf16.msra.mxu1 %v15865_v36  ;;  %v20360_v36 = vld [vmem:[#allocation92_spill] sm:$0xff] }
 0x504   :  { %8444 = vmatprep.subr.bf16.mxu1 %v15870_v54  ;;  %v20365_v54 = vld [vmem:[#allocation35_spill] sm:$0xff] }
 0x506   :  { %8314 = vmatmul.mubr.bf16.gmra.mrb[244].mxu1 %v20351_v47  ;;  %v20367_v47 = vld [vmem:[#allocation40_spill] sm:$0xff] }
 0x507   :  { %8323 = vmatprep.mubr.bf16.mxu1 %v20352_v52  ;;  %8445 = vmatpush1.bf16.msra.mxu1 %v15868_v1  ;;  %v9146_v1 = vld [vmem:[#allocation9 + $0x90] sm:$0xff] }
 0x508   :  { %8446 = vmatprep.subr.bf16.mxu1 %v15873_v2  ;;  %v9150_v2 = vld [vmem:[#allocation9 + $0xb0] sm:$0xff] }
 0x50b   :  { %8447 = vmatpush1.bf16.msra.mxu1 %v15871_v17  ;;  %v14049_v17 = vcombine.high %v9146_v1, %v9150_v2 }
 0x50c   :  { %8448 = vmatprep.subr.bf16.mxu1 %v15876_v23  ;;  %v9154_v23 = vld [vmem:[#allocation9 + $0xd0] sm:$0xff] }
 0x50e   :  { %8324 = vmatmul.mubr.bf16.gmra.mrb[248].mxu1 %v20353_v41 }
 0x50f   :  { %8333 = vmatprep.mubr.bf16.mxu1 %v20354_v63  ;;  %8449 = vmatpush1.bf16.msra.mxu1 %v15874_v35  ;;  %v9158_v35 = vld [vmem:[#allocation9 + $0xf0] sm:$0xff] }
 0x510   :  { %8450 = vmatprep.subr.bf16.mxu1 %v15879_v8  ;;  %v14048_v8 = vcombine.low %v9146_v1, %v9150_v2  ;;  %v14057_v41 = vcombine.high %v9154_v23, %v9158_v35  ;;  %v9162_v63 = vld [vmem:[#allocation9 + $0x110] sm:$0xff]  ;;  %v20375_v1 = vld [vmem:[#allocation38_spill] sm:$0xff] }
 0x513   :  { %8451 = vmatpush1.bf16.msra.mxu1 %v15877_v56  ;;  %v9166_v56 = vld [vmem:[#allocation9 + $0x130] sm:$0xff] }
 0x514   :  { %8452 = vmatprep.subr.bf16.mxu1 %v15882_v16  ;;  %v20368_v16 = vld [vmem:[#allocation46_spill] sm:$0xff]  ;;  %v14064_v18 = vcombine.low %v9162_v63, %v9166_v56 }
 0x516   :  { %8334 = vmatmul.mubr.bf16.gmra.mrb[252].mxu1 %v20355_v9  ;;  %v14065_v9 = vcombine.high %v9162_v63, %v9166_v56  ;;  %v20377_v56 = vshll.u32 %v18639_v48, 16 }
 0x517   :  { %8343 = vmatprep.mubr.bf16.mxu1 %v20356_v42  ;;  %8453 = vmatpush1.bf16.msra.mxu1 %v15880_v50  ;;  %v20369_v50 = vld [vmem:[#allocation41_spill] sm:$0xff] }
 0x518   :  { %8454 = vmatprep.subr.bf16.mxu1 %v15885_v13  ;;  %v14056_v13 = vcombine.low %v9154_v23, %v9158_v35  ;;  %v9170_v42 = vld [vmem:[#allocation9 + $0x150] sm:$0xff] }
 0x51b   :  { %8455 = vmatpush1.bf16.msra.mxu1 %v15883_v62  ;;  %v9174_v62 = vld [vmem:[#allocation9 + $0x170] sm:$0xff] }
 0x51c   :  { %12570 = vmatprep.subr.bf16.mxu1 %v14033_v39  ;;  %v14073_v19 = vcombine.high %v9170_v42, %v9174_v62  ;;  %v9182_v39 = vld [vmem:[#allocation9 + $0x1b0] sm:$0xff] }
 0x51e   :  { %8344 = vmatmul.mubr.bf16.gmra.mrb[0].mxu1 %v20357_v12  ;;  %v20370_v12 = vld [vmem:[#allocation42_spill] sm:$0xff] }
 0x51f   :  { %8353 = vmatprep.mubr.bf16.mxu1 %v20358_v37  ;;  %v20371_v37 = vld [vmem:[#allocation51_spill] sm:$0xff] }
 0x526   :  { %8354 = vmatmul.mubr.bf16.gmra.mrb[4].mxu1 %v20359_v51  ;;  %v14072_v51 = vcombine.low %v9170_v42, %v9174_v62  ;;  %v20380_v62 = vshrl.u32 %v18725_v25, 16 }
 0x527   :  { %8363 = vmatprep.mubr.bf16.mxu1 %v19184_v11  ;;  %v20361_v11 = vrot.slane %v19069_v24, 1  ;;  %v9138_v24 = vld [vmem:[#allocation9 + $0x50] sm:$0xff] }
 0x528   :  { %v14041_v43 = vcombine.high %v9138_v24, %v9142_v33  ;;  %v14040_v52 = vcombine.low %v9138_v24, %v9142_v33  ;;  %v20372_v24 = vld [vmem:[#allocation25_spill] sm:$0xff]  ;;  %v20373_v33 = vshrl.u32 %v18651_v27, 16 }
 0x52e   :  { %8364 = vmatmul.mubr.bf16.gmra.mrb[8].mxu1 %v19189_v29  ;;  %v6900_v29 = vsel %vm3461_vm4, %v20361_v11, %v6805_v26  ;;  %v9186_v11 = vld [vmem:[#allocation9 + $0x1d0] sm:$0xff] }
 0x52f   :  { %8373 = vmatprep.mubr.bf16.mxu1 %v19212_v20  ;;  %v20363_v20 = vld [vmem:[#allocation53_spill] sm:$0xff] }
 0x536   :  { %8374 = vmatmul.mubr.bf16.gmra.mrb[12].mxu1 %v19195_v53  ;;  %v20362_v53 = vrot.slane %v19064_v32, 1  ;;  %v20366_v32 = vld [vmem:[#allocation49_spill] sm:$0xff] }
 0x537   :  { %8383 = vmatprep.mubr.bf16.mxu1 %v19215_v10  ;;  %v20364_v10 = vld [vmem:[#allocation33_spill] sm:$0xff] }
 0x53e   :  { %8384 = vmatmul.mubr.bf16.gmra.mrb[16].mxu1 %v19203_v59  ;;  %v6896_v59 = vsel %vm3461_vm4, %v20362_v53, %v6802_v4  ;;  %v6908_v4 = vsel %vm5928_vm5, %v20366_v32, %v20365_v54  ;;  %v20374_v54 = vshll.u32 %v18651_v27, 16  ;;  %v6949_v27 = vrot.slane %v20377_v56, 2 }
 0x53f   :  { %8393 = vmatprep.mubr.bf16.mxu1 %v20360_v36 }
 0x546   :  { %8394 = vmatmul.mubr.bf16.gmra.mrb[20].mxu1 %v19226_v55  ;;  %v6915_v55 = vsel %vm5928_vm5, %v20364_v10, %v20363_v20  ;;  %v9194_v20 = vld [vmem:[#allocation9 + $0x210] sm:$0xff] }
 0x547   :  { %8403 = vmatprep.mubr.bf16.mxu1 %v19245_v28  ;;  %v19582_v28 = vld [vmem:[#allocation9 + $0x430] sm:$0xff] }
 0x54e   :  { %8404 = vmatmul.mubr.bf16.gmra.mrb[24].mxu1 %v19239_v6  ;;  %v19580_v6 = vld [vmem:[#allocation9 + $0x410] sm:$0xff] }
 0x54f   :  { %8413 = vmatprep.mubr.bf16.mxu1 %v6900_v29  ;;  %v14160_v26 = vcombine.low %v19580_v6, %v19582_v28  ;;  %v9190_v29 = vld [vmem:[#allocation9 + $0x1f0] sm:$0xff] }
 0x550   :  { %v14088_v2 = vcombine.low %v9186_v11, %v9190_v29 }
 0x556   :  { %8414 = vmatmul.mubr.bf16.gmra.mrb[28].mxu1 %v6896_v59  ;;  %v14089_v59 = vcombine.high %v9186_v11, %v9190_v29 }
 0x557   :  { %8456 = vmatprep.mubr.bf16.mxu1 %v6915_v55  ;;  %v9198_v55 = vld [vmem:[#allocation9 + $0x230] sm:$0xff] }
 0x558   :  { %v14096_v35 = vcombine.low %v9194_v20, %v9198_v55 }
 0x55e   :  { %8457 = vmatmul.mubr.bf16.vlgmr.msra.gmra.mrb[224].mxu1 %v6908_v4  ;;  %v6953_v4 = vrot.slane %v20374_v54, 2 }
 0x55f   :  { %8466 = vmatprep.mubr.bf16.mxu1 %v20367_v47  ;;  %12571 = vmatpush1.bf16.msra.mxu1 %v14032_v3  ;;  %v9178_v3 = vld [vmem:[#allocation9 + $0x190] sm:$0xff]  ;;  %v14097_v47 = vcombine.high %v9194_v20, %v9198_v55  ;;  %v20383_v20 = vshrl.u32 %v18714_v61, 16  ;;  %v20384_v55 = vshll.u32 %v18714_v61, 16 }
 0x560   :  { %12572 = vmatprep.subr.bf16.mxu1 %v14041_v43  ;;  %v14081_v36 = vcombine.high %v9178_v3, %v9182_v39  ;;  %v14080_v53 = vcombine.low %v9178_v3, %v9182_v39  ;;  %v6952_v43 = vrot.slane %v20373_v33, 1  ;;  %v9226_v33 = vld [vmem:[#allocation9 + $0x310] sm:$0xff] }
 0x561   :  { %v9238_v61 = vld [vmem:[#allocation9 + $0x370] sm:$0xff] }
 0x562   :  { %v6954_v23 = vor.u32 %v6953_v4, %v6952_v43  ;;  %v9230_v43 = vld [vmem:[#allocation9 + $0x330] sm:$0xff]  ;;  %v20385_v4 = vshrl.u32 %v20295_v46, 16 }
 0x563   :  { %12573 = vmatpush1.bf16.msra.mxu1 %v14040_v52  ;;  %v9202_v52 = vld [vmem:[#allocation9 + $0x250] sm:$0xff] }
 0x564   :  { %12574 = vmatprep.subr.bf16.mxu1 %v14049_v17  ;;  %v9206_v17 = vld [vmem:[#allocation9 + $0x270] sm:$0xff] }
 0x565   :  { %v14104_v39 = vcombine.low %v9202_v52, %v9206_v17 }
 0x566   :  { %8467 = vmatmul.mubr.bf16.gmra.mrb[228].mxu1 %v20368_v16  ;;  %v9210_v16 = vld [vmem:[#allocation9 + $0x290] sm:$0xff] }
 0x567   :  { %8476 = vmatprep.mubr.bf16.mxu1 %v20369_v50  ;;  %12575 = vmatpush1.bf16.msra.mxu1 %v14048_v8  ;;  %v14105_v8 = vcombine.high %v9202_v52, %v9206_v17  ;;  %v9214_v50 = vld [vmem:[#allocation9 + $0x2b0] sm:$0xff]  ;;  %v14129_v17 = vcombine.high %v9226_v33, %v9230_v43 }
 0x568   :  { %12576 = vmatprep.subr.bf16.mxu1 %v14057_v41  ;;  %v20376_v41 = vshrl.u32 %v18639_v48, 16  ;;  %v14112_v11 = vcombine.low %v9210_v16, %v9214_v50 }
 0x56a   :  { %v6948_v63 = vrot.slane %v20376_v41, 1 }
 0x56b   :  { %12577 = vmatpush1.bf16.msra.mxu1 %v14056_v13  ;;  %v20378_v13 = vld [vmem:[#allocation83_spill] sm:$0xff] }
 0x56c   :  { %12578 = vmatprep.subr.bf16.mxu1 %v14065_v9  ;;  %v20379_v9 = vld [vmem:[#allocation39_spill] sm:$0xff]  ;;  %v6950_v48 = vor.u32 %v6949_v27, %v6948_v63  ;;  %v14128_v63 = vcombine.low %v9226_v33, %v9230_v43  ;;  %v6964_v27 = vrot.slane %v6616_v34, 1 }
 0x56d   :  { %v6955_v42 = vsel %vm5928_vm5, %v20379_v9, %v6954_v23 }
 0x56e   :  { %8477 = vmatmul.mubr.bf16.gmra.mrb[232].mxu1 %v20370_v12  ;;  %v14113_v12 = vcombine.high %v9210_v16, %v9214_v50  ;;  %v9242_v50 = vld [vmem:[#allocation9 + $0x390] sm:$0xff] }
 0x56f   :  { %8486 = vmatprep.mubr.bf16.mxu1 %v20371_v37  ;;  %12579 = vmatpush1.bf16.msra.mxu1 %v14064_v18  ;;  %v6960_v18 = vrot.slane %v20380_v62, 1  ;;  %v9218_v37 = vld [vmem:[#allocation9 + $0x2d0] sm:$0xff]  ;;  %v20388_v62 = vshll.u32 %v20307_v38, 16  ;;  %v20389_v38 = vshrl.u32 %v18851_v22, 16 }
 0x570   :  { %12580 = vmatprep.subr.bf16.mxu1 %v14073_v19  ;;  %v20381_v19 = vshll.u32 %v18725_v25, 16  ;;  %v6956_v25 = vrot.slane %v20383_v20, 1 }
 0x572   :  { %v6961_v3 = vrot.slane %v20381_v19, 2 }
 0x573   :  { %12581 = vmatpush1.bf16.msra.mxu1 %v14072_v51  ;;  %v9222_v51 = vld [vmem:[#allocation9 + $0x2f0] sm:$0xff] }
 0x574   :  { %12582 = vmatprep.subr.bf16.mxu1 %v14081_v36  ;;  %v6962_v36 = vor.u32 %v6961_v3, %v6960_v18  ;;  %v14121_v29 = vcombine.high %v9218_v37, %v9222_v51  ;;  %v14120_v52 = vcombine.low %v9218_v37, %v9222_v51  ;;  %v6977_v18 = vrot.slane %v20388_v62, 2 }
 0x576   :  { %8487 = vmatmul.mubr.bf16.gmra.mrb[236].mxu1 %v20372_v24  ;;  %v6957_v24 = vrot.slane %v20384_v55, 2  ;;  %v6963_v54 = vsel %vm5928_vm5, %v6954_v23, %v6962_v36 }
 0x577   :  { %8496 = vmatprep.mubr.bf16.mxu1 %v20375_v1  ;;  %12583 = vmatpush1.bf16.msra.mxu1 %v14080_v53  ;;  %v20382_v53 = vld [vmem:[#allocation72_spill] sm:$0xff]  ;;  %v6968_v1 = vrot.slane %v20385_v4, 1 }
 0x578   :  { %12584 = vmatprep.subr.bf16.mxu1 %v14089_v59  ;;  %v6951_v59 = vsel %vm5928_vm5, %v20382_v53, %v6950_v48 }
 0x57b   :  { %12585 = vmatpush1.bf16.msra.mxu1 %v14088_v2  ;;  %v20386_v2 = vshll.u32 %v20295_v46, 16  ;;  %v20387_v46 = vshll.u32 %v20303_v60, 16  ;;  %v9254_v60 = vld [vmem:[#allocation9 + $0x3f0] sm:$0xff] }
 0x57c   :  { %12586 = vmatprep.subr.bf16.mxu1 %v14097_v47 }
 0x57d   :  { %v6969_v47 = vrot.slane %v20386_v2, 2  ;;  %v6965_v16 = vrot.slane %v20387_v46, 2  ;;  %v20394_v2 = vld [vmem:[#allocation54_spill] sm:$0xff]  ;;  %v9306_v46 = vld [vmem:[#allocation9 + $0x590] sm:$0xff] }
 0x57e   :  { %8497 = vmatmul.mubr.bf16.gmra.mrb[240].mxu1 %v20378_v13  ;;  %v9246_v13 = vld [vmem:[#allocation9 + $0x3b0] sm:$0xff] }
 0x57f   :  { %8506 = vmatprep.mubr.bf16.mxu1 %v6955_v42  ;;  %12587 = vmatpush1.bf16.msra.mxu1 %v14096_v35  ;;  %v6958_v35 = vor.u32 %v6957_v24, %v6956_v25  ;;  %v6970_v41 = vor.u32 %v6969_v47, %v6968_v1  ;;  %v6976_v42 = vrot.slane %v6640_v40, 1  ;;  %v14145_v3 = vcombine.high %v9242_v50, %v9246_v13  ;;  %v20393_v1 = vld [vmem:[#allocation55_spill] sm:$0xff] }
 0x580   :  { %12588 = vmatprep.subr.bf16.mxu1 %v14105_v8  ;;  %v9234_v8 = vld [vmem:[#allocation9 + $0x350] sm:$0xff]  ;;  %v6966_v34 = vor.u32 %v6965_v16, %v6964_v27  ;;  %v20391_v24 = vshll.u32 %v18886_v7, 16  ;;  %v9516_v7 = vld [vmem:[#allocation9 + $0xc20] sm:$0xff] }
 0x581   :  { %v14137_v56 = vcombine.high %v9234_v8, %v9238_v61  ;;  %v6959_v23 = vsel %vm5928_vm5, %v6950_v48, %v6958_v35  ;;  %v6971_v9 = vsel %vm5928_vm5, %v6962_v36, %v6970_v41  ;;  %v14136_v19 = vcombine.low %v9234_v8, %v9238_v61  ;;  %v9298_v27 = vld [vmem:[#allocation9 + $0x550] sm:$0xff] }
 0x582   :  { %v14144_v48 = vcombine.low %v9242_v50, %v9246_v13  ;;  %v6967_v51 = vsel %vm5928_vm5, %v6958_v35, %v6966_v34  ;;  %v6984_v36 = vrot.slane %v20389_v38, 1  ;;  %v6975_v25 = vsel %vm5928_vm5, %v6966_v34, %v18846_v31  ;;  %v9286_v35 = vld [vmem:[#allocation9 + $0x4f0] sm:$0xff] }
 0x583   :  { %12589 = vmatpush1.bf16.msra.mxu1 %v14104_v39  ;;  %v9250_v39 = vld [vmem:[#allocation9 + $0x3d0] sm:$0xff]  ;;  %v6993_v33 = vrot.slane %v20391_v24, 2 }
 0x584   :  { %12590 = vmatprep.subr.bf16.mxu1 %v14113_v12  ;;  %v6978_v12 = vor.u32 %v6977_v18, %v6976_v42  ;;  %v14153_v37 = vcombine.high %v9250_v39, %v9254_v60  ;;  %v14152_v53 = vcombine.low %v9250_v39, %v9254_v60  ;;  %v9310_v16 = vld [vmem:[#allocation9 + $0x5b0] sm:$0xff] }
 0x585   :  { %v14209_v13 = vcombine.high %v9306_v46, %v9310_v16  ;;  %v9318_v42 = vld [vmem:[#allocation9 + $0x5f0] sm:$0xff]  ;;  %v14208_v62 = vcombine.low %v9306_v46, %v9310_v16  ;;  %v9532_v46 = vld [vmem:[#allocation9 + $0xca0] sm:$0xff] }
 0x586   :  { %8507 = vmatmul.mubr.bf16.gmra.mrb[244].mxu1 %v6951_v59  ;;  %v6979_v40 = vsel %vm5928_vm5, %v6970_v41, %v6978_v12  ;;  %v14161_v59 = vcombine.high %v19580_v6, %v19582_v28  ;;  %v9290_v41 = vld [vmem:[#allocation9 + $0x510] sm:$0xff]  ;;  %v20400_v16 = vld [vmem:[#allocation70_spill] sm:$0xff] }
 0x587   :  { %8516 = vmatprep.mubr.bf16.mxu1 %v6963_v54  ;;  %12591 = vmatpush1.bf16.msra.mxu1 %v14112_v11  ;;  %v20390_v11 = vshll.u32 %v18851_v22, 16  ;;  %v6992_v22 = vrot.slane %v6672_v58, 1  ;;  %v20392_v54 = vld [vmem:[#allocation93_spill] sm:$0xff]  ;;  %v20396_v58 = vld [vmem:[#allocation88_spill] sm:$0xff] }
 0x588   :  { %12592 = vmatprep.subr.bf16.mxu1 %v14121_v29  ;;  %v9302_v6 = vld [vmem:[#allocation9 + $0x570] sm:$0xff] }
 0x589   :  { %v6985_v29 = vrot.slane %v20390_v11, 2  ;;  %v6994_v43 = vor.u32 %v6993_v33, %v6992_v22  ;;  %v14200_v50 = vcombine.low %v9298_v27, %v9302_v6  ;;  %v9330_v60 = vld [vmem:[#allocation9 + $0x650] sm:$0xff] }
 0x58a   :  { %v9346_v11 = vld [vmem:[#allocation9 + $0x6d0] sm:$0xff] }
 0x58b   :  { %12593 = vmatpush1.bf16.msra.mxu1 %v14120_v52  ;;  %v6986_v20 = vor.u32 %v6985_v29, %v6984_v36  ;;  %v7003_v31 = vsel %vm5928_vm5, %v6994_v43, %v19371_v49  ;;  %v7063_v49 = vsel %vm16739_vm6, %v19417_v57, %v20364_v10  ;;  %v9278_v52 = vld [vmem:[#allocation9 + $0x4b0] sm:$0xff]  ;;  %v20399_v57 = vld [vmem:[#allocation34_spill] sm:$0xff] }
 0x58c   :  { %12594 = vmatprep.subr.bf16.mxu1 %v14129_v17  ;;  %v9350_v29 = vld [vmem:[#allocation9 + $0x6f0] sm:$0xff] }
 0x58d   :  { %v6987_v55 = vsel %vm5928_vm5, %v6978_v12, %v6986_v20  ;;  %v6995_v4 = vsel %vm5928_vm5, %v6986_v20, %v6994_v43  ;;  %v9334_v12 = vld [vmem:[#allocation9 + $0x670] sm:$0xff] }
 0x58e   :  { %8517 = vmatmul.mubr.bf16.gmra.mrb[248].mxu1 %v6959_v23  ;;  %v14232_v38 = vcombine.low %v9330_v60, %v9334_v12  ;;  %v9354_v20 = vld [vmem:[#allocation9 + $0x710] sm:$0xff] }
 0x58f   :  { %8526 = vmatprep.mubr.bf16.mxu1 %v6971_v9  ;;  %12595 = vmatpush1.bf16.msra.mxu1 %v14128_v63  ;;  %v9294_v63 = vld [vmem:[#allocation9 + $0x530] sm:$0xff] }
 0x590   :  { %12596 = vmatprep.subr.bf16.mxu1 %v14137_v56  ;;  %v14193_v23 = vcombine.high %v9290_v41, %v9294_v63  ;;  %v14192_v28 = vcombine.low %v9290_v41, %v9294_v63  ;;  %v9314_v9 = vld [vmem:[#allocation9 + $0x5d0] sm:$0xff] }
 0x591   :  { %v14217_v18 = vcombine.high %v9314_v9, %v9318_v42  ;;  %v14216_v34 = vcombine.low %v9314_v9, %v9318_v42  ;;  %v9362_v24 = vld [vmem:[#allocation9 + $0x750] sm:$0xff]  ;;  %v9536_v9 = vld [vmem:[#allocation9 + $0xcc0] sm:$0xff] }
 0x592   :  { %v9366_v33 = vld [vmem:[#allocation9 + $0x770] sm:$0xff]  ;;  %v9540_v42 = vld [vmem:[#allocation9 + $0xce0] sm:$0xff] }
 0x593   :  { %12597 = vmatpush1.bf16.msra.mxu1 %v14136_v19  ;;  %v9322_v19 = vld [vmem:[#allocation9 + $0x610] sm:$0xff] }
 0x594   :  { %12598 = vmatprep.subr.bf16.mxu1 %v14145_v3  ;;  %v9326_v3 = vld [vmem:[#allocation9 + $0x630] sm:$0xff] }
 0x595   :  { %v14225_v39 = vcombine.high %v9322_v19, %v9326_v3  ;;  %v9394_v63 = vld [vmem:[#allocation9 + $0x850] sm:$0xff] }
 0x596   :  { %8527 = vmatmul.mubr.bf16.gmra.mrb[252].mxu1 %v6967_v51  ;;  %v9338_v51 = vld [vmem:[#allocation9 + $0x690] sm:$0xff] }
 0x597   :  { %8536 = vmatprep.mubr.bf16.mxu1 %v6979_v40  ;;  %12599 = vmatpush1.bf16.msra.mxu1 %v14144_v48  ;;  %v14224_v48 = vcombine.low %v9322_v19, %v9326_v3  ;;  %v9342_v40 = vld [vmem:[#allocation9 + $0x6b0] sm:$0xff]  ;;  %v14437_v3 = vcombine.high %v9536_v9, %v9540_v42 }
 0x598   :  { %12600 = vmatprep.subr.bf16.mxu1 %v14153_v37  ;;  %v14233_v37 = vcombine.high %v9330_v60, %v9334_v12  ;;  %v14241_v36 = vcombine.high %v9338_v51, %v9342_v40  ;;  %v9414_v60 = vld [vmem:[#allocation9 + $0x8f0] sm:$0xff]  ;;  %v14436_v12 = vcombine.low %v9536_v9, %v9540_v42 }
 0x59b   :  { %12601 = vmatpush1.bf16.msra.mxu1 %v14152_v53  ;;  %v14240_v53 = vcombine.low %v9338_v51, %v9342_v40  ;;  %v9552_v51 = vld [vmem:[#allocation9 + $0xd40] sm:$0xff] }
 0x59c   :  { %12611 = vmatprep.subr.bf16.mxu1 %v14161_v59  ;;  %v14249_v59 = vcombine.high %v9346_v11, %v9350_v29  ;;  %v9556_v40 = vld [vmem:[#allocation9 + $0xd60] sm:$0xff] }
 0x59e   :  { %8537 = vmatmul.mubr.bf16.gmra.mrb[0].mxu1 %v6975_v25  ;;  %v9358_v25 = vld [vmem:[#allocation9 + $0x730] sm:$0xff] }
 0x59f   :  { %8546 = vmatprep.mubr.bf16.mxu1 %v6987_v55  ;;  %v14248_v55 = vcombine.low %v9346_v11, %v9350_v29  ;;  %v14257_v22 = vcombine.high %v9354_v20, %v9358_v25  ;;  %v14256_v43 = vcombine.low %v9354_v20, %v9358_v25  ;;  %v9422_v11 = vld [vmem:[#allocation9 + $0x930] sm:$0xff] }
 0x5a0   :  { %v9426_v25 = vld [vmem:[#allocation9 + $0x950] sm:$0xff] }
 0x5a6   :  { %8547 = vmatmul.mubr.bf16.gmra.mrb[4].mxu1 %v20392_v54  ;;  %v14265_v54 = vcombine.high %v9362_v24, %v9366_v33 }
 0x5a7   :  { %8556 = vmatprep.mubr.bf16.mxu1 %v6995_v4  ;;  %v9370_v4 = vld [vmem:[#allocation9 + $0x790] sm:$0xff] }
 0x5ae   :  { %8557 = vmatmul.mubr.bf16.gmra.mrb[8].mxu1 %v20393_v1  ;;  %v9374_v1 = vld [vmem:[#allocation9 + $0x7b0] sm:$0xff] }
 0x5af   :  { %8566 = vmatprep.mubr.bf16.mxu1 %v7003_v31  ;;  %v14264_v31 = vcombine.low %v9362_v24, %v9366_v33  ;;  %v7193_v33 = vld [vmem:[#allocation7 + $0x3] ss:$4 sm:$0x3] }
 0x5b6   :  { %8567 = vmatmul.mubr.bf16.gmra.mrb[12].mxu1 %v20394_v2  ;;  %v9512_v2 = vld [vmem:[#allocation9 + $0xc00] sm:$0xff] }
 0x5b7   :  { %8576 = vmatprep.mubr.bf16.mxu1 %v19393_v45  ;;  %v7062_v45 = vsel %vm16739_vm6, %v20396_v58, %v20366_v32  ;;  %v9282_v32 = vld [vmem:[#allocation9 + $0x4d0] sm:$0xff]  ;;  %v14412_v58 = vcombine.low %v9512_v2, %v9516_v7 }
 0x5b8   :  { %v14185_v61 = vcombine.high %v9282_v32, %v9286_v35  ;;  %v14184_v56 = vcombine.low %v9282_v32, %v9286_v35  ;;  %v9386_v35 = vld [vmem:[#allocation9 + $0x810] sm:$0xff] }
 0x5be   :  { %8577 = vmatmul.mubr.bf16.gmra.mrb[16].mxu1 %v19376_v30  ;;  %v20397_v30 = vld [vmem:[#allocation44_spill] sm:$0xff] }
 0x5bf   :  { %8586 = vmatprep.mubr.bf16.mxu1 %v19411_v5  ;;  %v9266_v5 = vld [vmem:[#allocation9 + $0x450] sm:$0xff] }
 0x5c6   :  { %8587 = vmatmul.mubr.bf16.gmra.mrb[20].mxu1 %v19389_v15  ;;  %v9270_v15 = vld [vmem:[#allocation9 + $0x470] sm:$0xff] }
 0x5c7   :  { %8596 = vmatprep.mubr.bf16.mxu1 %v19424_v0  ;;  %v14169_v47 = vcombine.high %v9266_v5, %v9270_v15  ;;  %v9274_v0 = vld [vmem:[#allocation9 + $0x490] sm:$0xff]  ;;  %v14168_v10 = vcombine.low %v9266_v5, %v9270_v15  ;;  %v9520_v5 = vld [vmem:[#allocation9 + $0xc40] sm:$0xff] }
 0x5c8   :  { %v14177_v17 = vcombine.high %v9274_v0, %v9278_v52  ;;  %v14176_v8 = vcombine.low %v9274_v0, %v9278_v52  ;;  %v9524_v15 = vld [vmem:[#allocation9 + $0xc60] sm:$0xff]  ;;  %v9382_v0 = vld [vmem:[#allocation9 + $0x7f0] sm:$0xff] }
 0x5c9   :  { %v14421_v52 = vcombine.high %v9520_v5, %v9524_v15 }
 0x5ce   :  { %8597 = vmatmul.mubr.bf16.gmra.mrb[24].mxu1 %v19398_v14  ;;  %v20398_v14 = vld [vmem:[#allocation48_spill] sm:$0xff] }
 0x5cf   :  { %8606 = vmatprep.mubr.bf16.mxu1 %v7063_v49  ;;  %v14273_v49 = vcombine.high %v9370_v4, %v9374_v1 }
 0x5d6   :  { %8607 = vmatmul.mubr.bf16.gmra.mrb[28].mxu1 %v7062_v45  ;;  %v14413_v45 = vcombine.high %v9512_v2, %v9516_v7  ;;  %v20401_v2 = vld [vmem:[#allocation23_spill] sm:$0xff] }
 0x5d7   :  { %12602 = vmatprep.mubr.bf16.mxu1 %v20397_v30  ;;  %v19676_v7 = vrot.slane %v7193_v33, %v20401_v2 }
 0x5d8   :  { %12365 = vmatprep.subr.bf16.mxu0 %v14413_v45  ;;  %v9568_v45 = vld [vmem:[#allocation9 + $0xdc0] sm:$0xff] }
 0x5d9   :  { %12366 = vmatpush1.bf16.msra.mxu0 %v14412_v58 }
 0x5da   :  { %12367 = vmatprep.subr.bf16.mxu0 %v14421_v52 }
 0x5de   :  { %12603 = vmatmul.mubr.bf16.vlgmr.msra.gmra.mrb[32].mxu1 %v20398_v14 }
 0x5df   :  { %12612 = vmatpush1.bf16.msra.mxu1 %v14160_v26  ;;  %12643 = vmatprep.mubr.bf16.mxu1 %v20399_v57  ;;  %v14201_v26 = vcombine.high %v9298_v27, %v9302_v6  ;;  %v9402_v6 = vld [vmem:[#allocation9 + $0x890] sm:$0xff] }
 0x5e0   :  { %12613 = vmatprep.subr.bf16.mxu1 %v14169_v47  ;;  %v9378_v47 = vld [vmem:[#allocation9 + $0x7d0] sm:$0xff] }
 0x5e1   :  { %v14281_v32 = vcombine.high %v9378_v47, %v9382_v0 }
 0x5e3   :  { %12614 = vmatpush1.bf16.msra.mxu1 %v14168_v10  ;;  %v14272_v10 = vcombine.low %v9370_v4, %v9374_v1  ;;  %v9438_v4 = vld [vmem:[#allocation9 + $0x9b0] sm:$0xff]  ;;  %v9560_v1 = vld [vmem:[#allocation9 + $0xd80] sm:$0xff] }
 0x5e4   :  { %12615 = vmatprep.subr.bf16.mxu1 %v14177_v17  ;;  %v14420_v17 = vcombine.low %v9520_v5, %v9524_v15  ;;  %v9572_v5 = vld [vmem:[#allocation9 + $0xde0] sm:$0xff] }
 0x5e5   :  { %v14469_v52 = vcombine.high %v9568_v45, %v9572_v5 }
 0x5e6   :  { %12368 = vmatpush1.bf16.msra.mxu0 %v14420_v17 }
 0x5e7   :  { %12616 = vmatpush1.bf16.msra.mxu1 %v14176_v8  ;;  %v9390_v8 = vld [vmem:[#allocation9 + $0x830] sm:$0xff] }
 0x5e8   :  { %12617 = vmatprep.subr.bf16.mxu1 %v14185_v61  ;;  %v14280_v61 = vcombine.low %v9378_v47, %v9382_v0  ;;  %v14289_v41 = vcombine.high %v9386_v35, %v9390_v8  ;;  %v20402_v47 = vld [vmem:[#allocation24_spill] sm:$0xff] }
 0x5e9   :  { %v19679_v0 = vrot.slane %v7193_v33, %v20402_v47 }
 0x5eb   :  { %12618 = vmatpush1.bf16.msra.mxu1 %v14184_v56  ;;  %v9398_v56 = vld [vmem:[#allocation9 + $0x870] sm:$0xff] }
 0x5ec   :  { %12619 = vmatprep.subr.bf16.mxu1 %v14193_v23  ;;  %v14288_v23 = vcombine.low %v9386_v35, %v9390_v8  ;;  %v14297_v27 = vcombine.high %v9394_v63, %v9398_v56  ;;  %v9442_v8 = vld [vmem:[#allocation9 + $0x9d0] sm:$0xff] }
 0x5ef   :  { %12620 = vmatpush1.bf16.msra.mxu1 %v14192_v28  ;;  %v9406_v28 = vld [vmem:[#allocation9 + $0x8b0] sm:$0xff] }
 0x5f0   :  { %12621 = vmatprep.subr.bf16.mxu1 %v14201_v26  ;;  %v9528_v26 = vld [vmem:[#allocation9 + $0xc80] sm:$0xff]  ;;  %v14305_v19 = vcombine.high %v9402_v6, %v9406_v28 }
 0x5f3   :  { %12622 = vmatpush1.bf16.msra.mxu1 %v14200_v50  ;;  %v14428_v50 = vcombine.low %v9528_v26, %v9532_v46 }
 0x5f4   :  { %12623 = vmatprep.subr.bf16.mxu1 %v14209_v13  ;;  %v14429_v13 = vcombine.high %v9528_v26, %v9532_v46  ;;  %v9584_v26 = vld [vmem:[#allocation9 + $0xe40] sm:$0xff] }
 0x5f5   :  { %v9588_v46 = vld [vmem:[#allocation9 + $0xe60] sm:$0xff] }
 0x5f6   :  { %12369 = vmatprep.subr.bf16.mxu0 %v14429_v13 }
 0x5f7   :  { %12624 = vmatpush1.bf16.msra.mxu1 %v14208_v62  ;;  %v14296_v62 = vcombine.low %v9394_v63, %v9398_v56  ;;  %12370 = vmatpush1.bf16.msra.mxu0 %v14428_v50 }
 0x5f8   :  { %12625 = vmatprep.subr.bf16.mxu1 %v14217_v18  ;;  %v9544_v18 = vld [vmem:[#allocation9 + $0xd00] sm:$0xff]  ;;  %12371 = vmatprep.subr.bf16.mxu0 %v14437_v3 }
 0x5fb   :  { %12626 = vmatpush1.bf16.msra.mxu1 %v14216_v34  ;;  %v9548_v34 = vld [vmem:[#allocation9 + $0xd20] sm:$0xff]  ;;  %12372 = vmatpush1.bf16.msra.mxu0 %v14436_v12 }
 0x5fc   :  { %12627 = vmatprep.subr.bf16.mxu1 %v14225_v39  ;;  %v9410_v39 = vld [vmem:[#allocation9 + $0x8d0] sm:$0xff]  ;;  %v14444_v29 = vcombine.low %v9544_v18, %v9548_v34 }
 0x5ff   :  { %12628 = vmatpush1.bf16.msra.mxu1 %v14224_v48  ;;  %v14445_v48 = vcombine.high %v9544_v18, %v9548_v34  ;;  %v9454_v18 = vld [vmem:[#allocation9 + $0xa30] sm:$0xff] }
 0x600   :  { %12629 = vmatprep.subr.bf16.mxu1 %v14233_v37  ;;  %v14304_v37 = vcombine.low %v9402_v6, %v9406_v28 }
 0x601   :  { %12373 = vmatprep.subr.bf16.mxu0 %v14445_v48 }
 0x602   :  { %12374 = vmatpush1.bf16.msra.mxu0 %v14444_v29  ;;  %v14484_v29 = vcombine.low %v9584_v26, %v9588_v46 }
 0x603   :  { %12630 = vmatpush1.bf16.msra.mxu1 %v14232_v38  ;;  %v14313_v38 = vcombine.high %v9410_v39, %v9414_v60 }
 0x604   :  { %12631 = vmatprep.subr.bf16.mxu1 %v14241_v36  ;;  %v9418_v36 = vld [vmem:[#allocation9 + $0x910] sm:$0xff] }
 0x605   :  { %v14321_v20 = vcombine.high %v9418_v36, %v9422_v11  ;;  %v14320_v24 = vcombine.low %v9418_v36, %v9422_v11  ;;  %v9458_v36 = vld [vmem:[#allocation9 + $0xa50] sm:$0xff] }
 0x606   :  { %v9462_v11 = vld [vmem:[#allocation9 + $0xa70] sm:$0xff] }
 0x607   :  { %12632 = vmatpush1.bf16.msra.mxu1 %v14240_v53  ;;  %v14453_v53 = vcombine.high %v9552_v51, %v9556_v40  ;;  %v14361_v33 = vcombine.high %v9458_v36, %v9462_v11 }
 0x608   :  { %12633 = vmatprep.subr.bf16.mxu1 %v14249_v59  ;;  %v14312_v59 = vcombine.low %v9410_v39, %v9414_v60  ;;  %v14485_v39 = vcombine.high %v9584_v26, %v9588_v46 }
 0x609   :  { %12375 = vmatprep.subr.bf16.mxu0 %v14453_v53 }
 0x60b   :  { %12634 = vmatpush1.bf16.msra.mxu1 %v14248_v55  ;;  %v9430_v55 = vld [vmem:[#allocation9 + $0x970] sm:$0xff] }
 0x60c   :  { %12635 = vmatprep.subr.bf16.mxu1 %v14257_v22  ;;  %v14452_v22 = vcombine.low %v9552_v51, %v9556_v40  ;;  %v14328_v15 = vcombine.low %v9426_v25, %v9430_v55 }
 0x60e   :  { %12376 = vmatpush1.bf16.msra.mxu0 %v14452_v22 }
 0x60f   :  { %12636 = vmatpush1.bf16.msra.mxu1 %v14256_v43  ;;  %v14329_v43 = vcombine.high %v9426_v25, %v9430_v55 }
 0x610   :  { %12637 = vmatprep.subr.bf16.mxu1 %v14265_v54  ;;  %v9434_v54 = vld [vmem:[#allocation9 + $0x990] sm:$0xff] }
 0x611   :  { %v14337_v17 = vcombine.high %v9434_v54, %v9438_v4  ;;  %v14336_v28 = vcombine.low %v9434_v54, %v9438_v4  ;;  %v9470_v4 = vld [vmem:[#allocation9 + $0xab0] sm:$0xff] }
 0x613   :  { %12638 = vmatpush1.bf16.msra.mxu1 %v14264_v31  ;;  %v9564_v31 = vld [vmem:[#allocation9 + $0xda0] sm:$0xff] }
 0x614   :  { %12639 = vmatprep.subr.bf16.mxu1 %v14273_v49  ;;  %v14460_v49 = vcombine.low %v9560_v1, %v9564_v31  ;;  %v14461_v58 = vcombine.high %v9560_v1, %v9564_v31  ;;  %v9592_v1 = vld [vmem:[#allocation9 + $0xe80] sm:$0xff] }
 0x615   :  { %v9596_v31 = vld [vmem:[#allocation9 + $0xea0] sm:$0xff] }
 0x616   :  { %12377 = vmatprep.subr.bf16.mxu0 %v14461_v58  ;;  %v14492_v58 = vcombine.low %v9592_v1, %v9596_v31 }
 0x617   :  { %12640 = vmatpush1.bf16.msra.mxu1 %v14272_v10  ;;  %v9576_v10 = vld [vmem:[#allocation9 + $0xe00] sm:$0xff]  ;;  %12378 = vmatpush1.bf16.msra.mxu0 %v14460_v49 }
 0x618   :  { %12641 = vmatprep.subr.bf16.mxu1 %v14281_v32  ;;  %v9580_v32 = vld [vmem:[#allocation9 + $0xe20] sm:$0xff]  ;;  %12379 = vmatprep.subr.bf16.mxu0 %v14469_v52 }
 0x61b   :  { %12642 = vmatpush1.bf16.msra.mxu1 %v14280_v61  ;;  %v9446_v61 = vld [vmem:[#allocation9 + $0x9f0] sm:$0xff] }
 0x61c   :  { %12652 = vmatprep.subr.bf16.mxu1 %v14289_v41  ;;  %v14468_v41 = vcombine.low %v9568_v45, %v9572_v5  ;;  %v14345_v9 = vcombine.high %v9442_v8, %v9446_v61  ;;  %v14344_v48 = vcombine.low %v9442_v8, %v9446_v61  ;;  %v14493_v45 = vcombine.high %v9592_v1, %v9596_v31  ;;  %v9600_v5 = vld [vmem:[#allocation9 + $0xec0] sm:$0xff] }
 0x61d   :  { %v9612_v8 = vld [vmem:[#allocation9 + $0xf20] sm:$0xff] }
 0x61e   :  { %12644 = vmatmul.mubr.bf16.vlgmr.msra.gmra.mrb[32].mxu1 %v20400_v16  ;;  %12380 = vmatpush1.bf16.msra.mxu0 %v14468_v41  ;;  %v9474_v41 = vld [vmem:[#allocation9 + $0xad0] sm:$0xff] }
 0x61f   :  { %12653 = vmatpush1.bf16.msra.mxu1 %v14288_v23  ;;  %12684 = vmatprep.mubr.bf16.mxu1 %v19527_v44  ;;  %v14477_v23 = vcombine.high %v9576_v10, %v9580_v32 }
 0x620   :  { %12654 = vmatprep.subr.bf16.mxu1 %v14297_v27 }
 0x621   :  { %12381 = vmatprep.subr.bf16.mxu0 %v14477_v23 }
 0x623   :  { %12655 = vmatpush1.bf16.msra.mxu1 %v14296_v62  ;;  %v9450_v62 = vld [vmem:[#allocation9 + $0xa10] sm:$0xff] }
 0x624   :  { %12656 = vmatprep.subr.bf16.mxu1 %v14305_v19  ;;  %v14476_v19 = vcombine.low %v9576_v10, %v9580_v32  ;;  %v14353_v51 = vcombine.high %v9450_v62, %v9454_v18  ;;  %v14352_v55 = vcombine.low %v9450_v62, %v9454_v18  ;;  %v14360_v10 = vcombine.low %v9458_v36, %v9462_v11 }
 0x626   :  { %12382 = vmatpush1.bf16.msra.mxu0 %v14476_v19 }
 0x627   :  { %12657 = vmatpush1.bf16.msra.mxu1 %v14304_v37  ;;  %12383 = vmatprep.subr.bf16.mxu0 %v14485_v39  ;;  %v9486_v39 = vld [vmem:[#allocation9 + $0xb30] sm:$0xff] }
 0x628   :  { %12658 = vmatprep.subr.bf16.mxu1 %v14313_v38 }
 0x62a   :  { %12384 = vmatpush1.bf16.msra.mxu0 %v14484_v29  ;;  %v9624_v29 = vld [vmem:[#allocation9 + $0xf80] sm:$0xff] }
 0x62b   :  { %12659 = vmatpush1.bf16.msra.mxu1 %v14312_v59  ;;  %12385 = vmatprep.subr.bf16.mxu0 %v14493_v45 }
 0x62c   :  { %12660 = vmatprep.subr.bf16.mxu1 %v14321_v20 }
 0x62e   :  { %12386 = vmatpush1.bf16.msra.mxu0 %v14492_v58 }
 0x62f   :  { %12661 = vmatpush1.bf16.msra.mxu1 %v14320_v24 }
 0x630   :  { %12662 = vmatprep.subr.bf16.mxu1 %v14329_v43  ;;  %v9466_v43 = vld [vmem:[#allocation9 + $0xa90] sm:$0xff] }
 0x631   :  { %v8458_v35 = vpop.f32.mrb[224].mxu1  ;;  %v14369_v32 = vcombine.high %v9466_v43, %v9470_v4  ;;  %v14368_v46 = vcombine.low %v9466_v43, %v9470_v4  ;;  %v9494_v43 = vld [vmem:[#allocation9 + $0xb70] sm:$0xff] }
 0x632   :  { %v14825_v63 = vadd.f32 %v8458_v35, %v19676_v7  ;;  %v8460_v56 = vpop.f32.mrb[225].mxu1 }
 0x633   :  { %v14826_v27 = vadd.f32 %v8460_v56, %v19679_v0  ;;  %12663 = vmatpush1.bf16.msra.mxu1 %v14328_v15  ;;  %v8462_v6 = vpop.f32.mrb[226].mxu1  ;;  %v9604_v15 = vld [vmem:[#allocation9 + $0xee0] sm:$0xff] }
 0x634   :  { %v14827_v50 = vadd.f32 %v8462_v6, %v19676_v7  ;;  %v8464_v13 = vpop.f32.mrb[227].mxu1  ;;  %12664 = vmatprep.subr.bf16.mxu1 %v14337_v17  ;;  %v8617_v3 = vmax.f32 %v14825_v63, 0.0  ;;  %v9608_v17 = vld [vmem:[#allocation9 + $0xf00] sm:$0xff]  ;;  %v14501_v35 = vcombine.high %v9600_v5, %v9604_v15  ;;  %v9478_v63 = vld [vmem:[#allocation9 + $0xaf0] sm:$0xff]  ;;  %v14500_v56 = vcombine.low %v9600_v5, %v9604_v15 }
 0x635   :  { %v14828_v42 = vadd.f32 %v8464_v13, %v19679_v0  ;;  %v8618_v60 = vmax.f32 %v14826_v27, 0.0  ;;  %v14509_v6 = vcombine.high %v9608_v17, %v9612_v8  ;;  %v9620_v13 = vld [vmem:[#allocation9 + $0xf60] sm:$0xff]  ;;  %v14377_v18 = vcombine.high %v9474_v41, %v9478_v63 }
 0x636   :  { %v8619_v34 = vmax.f32 %v14827_v50, 0.0  ;;  %12387 = vmatprep.subr.bf16.mxu0 %v14501_v35  ;;  %v9616_v50 = vld [vmem:[#allocation9 + $0xf40] sm:$0xff]  ;;  %v14376_v11 = vcombine.low %v9474_v41, %v9478_v63  ;;  %v9498_v41 = vld [vmem:[#allocation9 + $0xb90] sm:$0xff] }
 0x637   :  { %v8620_v12 = vmax.f32 %v14828_v42, 0.0  ;;  %12665 = vmatpush1.bf16.msra.mxu1 %v14336_v28  ;;  %12388 = vmatpush1.bf16.msra.mxu0 %v14500_v56  ;;  %v9632_v15 = vld [vmem:[#allocation9 + $0xfc0] sm:$0xff]  ;;  %v9502_v63 = vld [vmem:[#allocation9 + $0xbb0] sm:$0xff] }
 0x638   :  { %v8841_v37 = vmax.f32 %v8617_v3, %v8619_v34  ;;  %12666 = vmatprep.subr.bf16.mxu1 %v14345_v9  ;;  %v9482_v34 = vld [vmem:[#allocation9 + $0xb10] sm:$0xff]  ;;  %12389 = vmatprep.subr.bf16.mxu0 %v14509_v6 }
 0x639   :  { %v8850_v40 = vmax.f32 %v8618_v60, %v8620_v12  ;;  %v8468_v38 = vpop.f32.mrb[228].mxu1  ;;  %v14508_v60 = vcombine.low %v9608_v17, %v9612_v8  ;;  %v14384_v5 = vcombine.low %v9482_v34, %v9486_v39 }
 0x63a   :  { %v14829_v53 = vadd.f32 %v8468_v38, %v19676_v7  ;;  %v8470_v59 = vpop.f32.mrb[229].mxu1 }
 0x63b   :  { %v14830_v20 = vadd.f32 %v8470_v59, %v19679_v0  ;;  %12667 = vmatpush1.bf16.msra.mxu1 %v14344_v48  ;;  %v8472_v25 = vpop.f32.mrb[230].mxu1  ;;  %12390 = vmatpush1.bf16.msra.mxu0 %v14508_v60 }
 0x63c   :  { %v8621_v22 = vmax.f32 %v14829_v53, 0.0  ;;  %v8474_v24 = vpop.f32.mrb[231].mxu1  ;;  %12668 = vmatprep.subr.bf16.mxu1 %v14353_v51  ;;  %v19697_v51 = vld [vmem:[#allocation9 + $0x8] sm:$0xff]  ;;  %v9628_v53 = vld [vmem:[#allocation9 + $0xfa0] sm:$0xff]  ;;  %v14385_v25 = vcombine.high %v9482_v34, %v9486_v39 }
 0x63d   :  { %v8622_v54 = vmax.f32 %v14830_v20, 0.0  ;;  %v14524_v56 = vcombine.low %v9624_v29, %v9628_v53 }
 0x63e   :  { %v19687_v49 = vmax.f32 %v8841_v37, %v8621_v22  ;;  %v14517_v37 = vcombine.high %v9616_v50, %v9620_v13 }
 0x63f   :  { %v19689_v52 = vmax.f32 %v8850_v40, %v8622_v54  ;;  %12669 = vmatpush1.bf16.msra.mxu1 %v14352_v55  ;;  %v19699_v40 = vld [vmem:[#allocation9 + $0x28] sm:$0xff]  ;;  %v14516_v54 = vcombine.low %v9616_v50, %v9620_v13  ;;  %v14401_v50 = vcombine.high %v9498_v41, %v9502_v63 }
 0x640   :  { %12670 = vmatprep.subr.bf16.mxu1 %v14361_v33  ;;  %v8843_v9 = vmax.f32 %v19687_v49, 0.0  ;;  %v9490_v33 = vld [vmem:[#allocation9 + $0xb50] sm:$0xff]  ;;  %v14030_v4 = vcombine.low %v19697_v51, %v19699_v40  ;;  %12391 = vmatprep.subr.bf16.mxu0 %v14517_v37  ;;  %v14525_v49 = vcombine.high %v9624_v29, %v9628_v53  ;;  %v14031_v60 = vcombine.high %v19697_v51, %v19699_v40  ;;  %v9173_v51 = vld [vmem:[#allocation9 + $0x168] sm:$0xff] }
 0x641   :  { %v8478_v61 = vpop.f32.mrb[232].mxu1  ;;  %v8852_v19 = vmax.f32 %v19689_v52, 0.0  ;;  %v9636_v52 = vld [vmem:[#allocation9 + $0xfe0] sm:$0xff]  ;;  %v14393_v35 = vcombine.high %v9490_v33, %v9494_v43  ;;  %12392 = vmatpush1.bf16.msra.mxu0 %v14516_v54 }
 0x642   :  { %v14831_v23 = vadd.f32 %v8478_v61, %v19676_v7  ;;  %v8480_v27 = vpop.f32.mrb[233].mxu1  ;;  %v8844_v59 = vrot.slane %v8843_v9, 4  ;;  %12393 = vmatprep.subr.bf16.mxu0 %v14525_v49 }
 0x643   :  { %v14832_v28 = vadd.f32 %v8480_v27, %v19679_v0  ;;  %12671 = vmatpush1.bf16.msra.mxu1 %v14360_v10  ;;  %v8482_v26 = vpop.f32.mrb[234].mxu1  ;;  %v8853_v55 = vrot.slane %v8852_v19, 4  ;;  %v14533_v27 = vcombine.high %v9632_v15, %v9636_v52 }
 0x644   :  { %v14833_v42 = vadd.f32 %v8482_v26, %v19676_v7  ;;  %v8484_v62 = vpop.f32.mrb[235].mxu1  ;;  %12672 = vmatprep.subr.bf16.mxu1 %v14369_v32  ;;  %v8625_v12 = vmax.f32 %v14831_v23, 0.0  ;;  %v8845_v10 = vmax.f32 %v8843_v9, %v8844_v59 }
 0x645   :  { %v14834_v3 = vadd.f32 %v8484_v62, %v19679_v0  ;;  %v8626_v38 = vmax.f32 %v14832_v28, 0.0  ;;  %v8854_v8 = vmax.f32 %v8852_v19, %v8853_v55  ;;  %v14392_v28 = vcombine.low %v9490_v33, %v9494_v43  ;;  %v9506_v62 = vld [vmem:[#allocation9 + $0xbd0] sm:$0xff]  ;;  %12394 = vmatpush1.bf16.msra.mxu0 %v14524_v56 }
 0x646   :  { %v8627_v48 = vmax.f32 %v14833_v42, 0.0  ;;  %v8846_v26 = vrot.slane %v8845_v10, 2  ;;  %v14532_v19 = vcombine.low %v9632_v15, %v9636_v52  ;;  %12395 = vmatprep.subr.bf16.mxu0 %v14533_v27 }
 0x647   :  { %v8628_v36 = vmax.f32 %v14834_v3, 0.0  ;;  %12673 = vmatpush1.bf16.msra.mxu1 %v14368_v46  ;;  %v8855_v13 = vrot.slane %v8854_v8, 2 }
 0x648   :  { %v8859_v20 = vmax.f32 %v8625_v12, %v8627_v48  ;;  %12674 = vmatprep.subr.bf16.mxu1 %v14377_v18  ;;  %v9510_v18 = vld [vmem:[#allocation9 + $0xbf0] sm:$0xff] }
 0x649   :  { %v8868_v22 = vmax.f32 %v8626_v38, %v8628_v36  ;;  %v8488_v24 = vpop.f32.mrb[236].mxu1  ;;  %v14400_v38 = vcombine.low %v9498_v41, %v9502_v63  ;;  %v8847_v36 = vmax.f32 %v8845_v10, %v8846_v26  ;;  %v14409_v59 = vcombine.high %v9506_v62, %v9510_v18  ;;  %12396 = vmatpush1.bf16.msra.mxu0 %v14532_v19  ;;  %v9530_v19 = vld [vmem:[#allocation9 + $0xc90] sm:$0xff] }
 0x64a   :  { %v14835_v1 = vadd.f32 %v8488_v24, %v19676_v7  ;;  %v8490_v31 = vpop.f32.mrb[237].mxu1  ;;  %v9518_v24 = vld [vmem:[#allocation9 + $0xc30] sm:$0xff]  ;;  %12406 = vmatprep.subr.bf16.mxu0 %v14031_v60 }
 0x64b   :  { %v14836_v58 = vadd.f32 %v8490_v31, %v19679_v0  ;;  %12675 = vmatpush1.bf16.msra.mxu1 %v14376_v11  ;;  %v8492_v45 = vpop.f32.mrb[238].mxu1 }
 0x64c   :  { %v8629_v17 = vmax.f32 %v14835_v1, 0.0  ;;  %v8494_v32 = vpop.f32.mrb[239].mxu1  ;;  %12676 = vmatprep.subr.bf16.mxu1 %v14385_v25  ;;  %v8848_v45 = vrot.slane %v8847_v36, 1 }
 0x64d   :  { %v8630_v61 = vmax.f32 %v14836_v58, 0.0  ;;  %v14408_v58 = vcombine.low %v9506_v62, %v9510_v18 }
 0x64e   :  { %v8860_v23 = vmax.f32 %v8859_v20, %v8629_v17  ;;  %v8856_v20 = vmax.f32 %v8854_v8, %v8855_v13  ;;  %v9522_v8 = vld [vmem:[#allocation9 + $0xc50] sm:$0xff]  ;;  %v8849_v26 = vmax.f32 %v8847_v36, %v8848_v45 }
 0x64f   :  { %v8869_v6 = vmax.f32 %v8868_v22, %v8630_v61  ;;  %12677 = vmatpush1.bf16.msra.mxu1 %v14384_v5  ;;  %v9514_v22 = vld [vmem:[#allocation9 + $0xc10] sm:$0xff] }
 0x650   :  { %v8861_v46 = vmax.f32 %v8860_v23, 0.0  ;;  %12678 = vmatprep.subr.bf16.mxu1 %v14393_v35  ;;  %v14417_v52 = vcombine.high %v9514_v22, %v9518_v24  ;;  %v8857_v10 = vrot.slane %v8856_v20, 1  ;;  %v9526_v61 = vld [vmem:[#allocation9 + $0xc70] sm:$0xff] }
 0x651   :  { %v8870_v9 = vmax.f32 %v8869_v6, 0.0  ;;  %v8498_v42 = vpop.f32.mrb[240].mxu1  ;;  %v9546_v45 = vld [vmem:[#allocation9 + $0xd10] sm:$0xff] }
 0x652   :  { %v8862_v3 = vrot.slane %v8861_v46, 4  ;;  %v14837_v34 = vadd.f32 %v8498_v42, %v19676_v7  ;;  %v8500_v39 = vpop.f32.mrb[241].mxu1  ;;  %v8858_v42 = vmax.f32 %v8856_v20, %v8857_v10 }
 0x653   :  { %v8871_v12 = vrot.slane %v8870_v9, 4  ;;  %v14838_v48 = vadd.f32 %v8500_v39, %v19679_v0  ;;  %12679 = vmatpush1.bf16.msra.mxu1 %v14392_v28  ;;  %v8502_v37 = vpop.f32.mrb[242].mxu1  ;;  %v14416_v28 = vcombine.low %v9514_v22, %v9518_v24 }
 0x654   :  { %v8863_v11 = vmax.f32 %v8861_v46, %v8862_v3  ;;  %v14839_v29 = vadd.f32 %v8502_v37, %v19676_v7  ;;  %v8504_v53 = vpop.f32.mrb[243].mxu1  ;;  %12680 = vmatprep.subr.bf16.mxu1 %v14401_v50  ;;  %v8633_v43 = vmax.f32 %v14837_v34, 0.0  ;;  %v9534_v3 = vld [vmem:[#allocation9 + $0xcb0] sm:$0xff] }
 0x655   :  { %v8872_v25 = vmax.f32 %v8870_v9, %v8871_v12  ;;  %v14840_v55 = vadd.f32 %v8504_v53, %v19679_v0  ;;  %v8634_v31 = vmax.f32 %v14838_v48, 0.0  ;;  %v14425_v9 = vcombine.high %v9522_v8, %v9526_v61  ;;  %v9542_v53 = vld [vmem:[#allocation9 + $0xcf0] sm:$0xff] }
 0x656   :  { %v8864_v33 = vrot.slane %v8863_v11, 2  ;;  %v8635_v54 = vmax.f32 %v14839_v29, 0.0  ;;  %v14424_v48 = vcombine.low %v9522_v8, %v9526_v61  ;;  %v9538_v29 = vld [vmem:[#allocation9 + $0xcd0] sm:$0xff] }
 0x657   :  { %v8873_v1 = vrot.slane %v8872_v25, 2  ;;  %v8636_v49 = vmax.f32 %v14840_v55, 0.0  ;;  %12681 = vmatpush1.bf16.msra.mxu1 %v14400_v38  ;;  %v14433_v38 = vcombine.high %v9530_v19, %v9534_v3  ;;  %v14440_v8 = vcombine.low %v9538_v29, %v9542_v53 }
 0x658   :  { %v8865_v5 = vmax.f32 %v8863_v11, %v8864_v33  ;;  %v8877_v15 = vmax.f32 %v8633_v43, %v8635_v54  ;;  %12682 = vmatprep.subr.bf16.mxu1 %v14409_v59  ;;  %v14432_v33 = vcombine.low %v9530_v19, %v9534_v3 }
 0x659   :  { %v8874_v17 = vmax.f32 %v8872_v25, %v8873_v1  ;;  %v8886_v32 = vmax.f32 %v8634_v31, %v8636_v49  ;;  %v8508_v35 = vpop.f32.mrb[244].mxu1  ;;  %v14441_v31 = vcombine.high %v9538_v29, %v9542_v53 }
 0x65a   :  { %v8866_v41 = vrot.slane %v8865_v5, 1  ;;  %v14841_v63 = vadd.f32 %v8508_v35, %v19676_v7  ;;  %v8510_v56 = vpop.f32.mrb[245].mxu1 }
 0x65b   :  { %v8875_v23 = vrot.slane %v8874_v17, 1  ;;  %v14842_v27 = vadd.f32 %v8510_v56, %v19679_v0  ;;  %12683 = vmatpush1.bf16.msra.mxu1 %v14408_v58  ;;  %v8512_v6 = vpop.f32.mrb[246].mxu1 }
 0x65c   :  { %v8867_v46 = vmax.f32 %v8865_v5, %v8866_v41  ;;  %v8637_v50 = vmax.f32 %v14841_v63, 0.0  ;;  %v8514_v13 = vpop.f32.mrb[247].mxu1  ;;  %12693 = vmatprep.subr.bf16.mxu1 %v14417_v52  ;;  %v9550_v5 = vld [vmem:[#allocation9 + $0xd30] sm:$0xff] }
 0x65d   :  { %v8876_v62 = vmax.f32 %v8874_v17, %v8875_v23  ;;  %v8638_v18 = vmax.f32 %v14842_v27, 0.0  ;;  %v14449_v63 = vcombine.high %v9546_v45, %v9550_v5  ;;  %v9554_v6 = vld [vmem:[#allocation9 + $0xd50] sm:$0xff] }
 0x65e   :  { %v19714_v34 = vsel %vm9001_vm11, %v8867_v46, %v8849_v26  ;;  %v8878_v39 = vmax.f32 %v8877_v15, %v8637_v50  ;;  %12685 = vmatmul.mubr.bf16.vlgmr.msra.gmra.mrb[32].mxu1 %v19529_v21 }
 0x65f   :  { %v19718_v60 = vsel %vm9001_vm11, %v8876_v62, %v8858_v42  ;;  %v8887_v12 = vmax.f32 %v8886_v32, %v8638_v18  ;;  %12694 = vmatpush1.bf16.msra.mxu1 %v14416_v28  ;;  %v9558_v28 = vld [vmem:[#allocation9 + $0xd70] sm:$0xff]  ;;  %v14448_v62 = vcombine.low %v9546_v45, %v9550_v5 }
 0x660   :  { %v8879_v37 = vmax.f32 %v8878_v39, 0.0  ;;  %12695 = vmatprep.subr.bf16.mxu1 %v14425_v9  ;;  %v14457_v39 = vcombine.high %v9554_v6, %v9558_v28 }
 0x661   :  { %v8888_v36 = vmax.f32 %v8887_v12, 0.0  ;;  %v8518_v11 = vpop.f32.mrb[248].mxu1 }
 0x662   :  { %v8880_v59 = vrot.slane %v8879_v37, 4  ;;  %v14843_v20 = vadd.f32 %v8518_v11, %v19676_v7  ;;  %v8520_v25 = vpop.f32.mrb[249].mxu1 }
 0x663   :  { %v8889_v55 = vrot.slane %v8888_v36, 4  ;;  %v14844_v22 = vadd.f32 %v8520_v25, %v19679_v0  ;;  %v8522_v24 = vpop.f32.mrb[250].mxu1  ;;  %12696 = vmatpush1.bf16.msra.mxu1 %v14424_v48 }
 0x664   :  { %v8881_v43 = vmax.f32 %v8879_v37, %v8880_v59  ;;  %v14845_v54 = vadd.f32 %v8522_v24, %v19676_v7  ;;  %v8524_v1 = vpop.f32.mrb[251].mxu1  ;;  %12697 = vmatprep.subr.bf16.mxu1 %v14433_v38  ;;  %v8641_v52 = vmax.f32 %v14843_v20, 0.0  ;;  %v9562_v37 = vld [vmem:[#allocation9 + $0xd90] sm:$0xff]  ;;  %v14456_v59 = vcombine.low %v9554_v6, %v9558_v28 }
 0x665   :  { %v8890_v49 = vmax.f32 %v8888_v36, %v8889_v55  ;;  %v14846_v58 = vadd.f32 %v8524_v1, %v19679_v0  ;;  %v8642_v32 = vmax.f32 %v14844_v22, 0.0  ;;  %v9566_v38 = vld [vmem:[#allocation9 + $0xdb0] sm:$0xff] }
 0x666   :  { %v8882_v15 = vrot.slane %v8881_v43, 2  ;;  %v8643_v10 = vmax.f32 %v14845_v54, 0.0  ;;  %v14465_v25 = vcombine.high %v9562_v37, %v9566_v38  ;;  %v9570_v24 = vld [vmem:[#allocation9 + $0xdd0] sm:$0xff] }
 0x667   :  { %v8891_v17 = vrot.slane %v8890_v49, 2  ;;  %v8644_v35 = vmax.f32 %v14846_v58, 0.0  ;;  %12698 = vmatpush1.bf16.msra.mxu1 %v14432_v33  ;;  %v9574_v33 = vld [vmem:[#allocation9 + $0xdf0] sm:$0xff] }
 0x668   :  { %v8883_v61 = vmax.f32 %v8881_v43, %v8882_v15  ;;  %v8895_v41 = vmax.f32 %v8641_v52, %v8643_v10  ;;  %12699 = vmatprep.subr.bf16.mxu1 %v14441_v31  ;;  %v14473_v15 = vcombine.high %v9570_v24, %v9574_v33 }
 0x669   :  { %v8892_v56 = vmax.f32 %v8890_v49, %v8891_v17  ;;  %v8904_v23 = vmax.f32 %v8642_v32, %v8644_v35  ;;  %v8528_v27 = vpop.f32.mrb[252].mxu1  ;;  %v9578_v17 = vld [vmem:[#allocation9 + $0xe10] sm:$0xff] }
 0x66a   :  { %v8884_v26 = vrot.slane %v8883_v61, 1  ;;  %v14847_v46 = vadd.f32 %v8528_v27, %v19676_v7  ;;  %v8530_v50 = vpop.f32.mrb[253].mxu1  ;;  %v9582_v32 = vld [vmem:[#allocation9 + $0xe30] sm:$0xff] }
 0x66b   :  { %v8893_v13 = vrot.slane %v8892_v56, 1  ;;  %v14848_v9 = vadd.f32 %v8530_v50, %v19679_v0  ;;  %v8532_v42 = vpop.f32.mrb[254].mxu1  ;;  %12700 = vmatpush1.bf16.msra.mxu1 %v14440_v8  ;;  %v14481_v28 = vcombine.high %v9578_v17, %v9582_v32 }
 0x66c   :  { %v8885_v18 = vmax.f32 %v8883_v61, %v8884_v26  ;;  %v8645_v19 = vmax.f32 %v14847_v46, 0.0  ;;  %v8534_v3 = vpop.f32.mrb[255].mxu1  ;;  %12701 = vmatprep.subr.bf16.mxu1 %v14449_v63 }
 0x66d   :  { %v8894_v12 = vmax.f32 %v8892_v56, %v8893_v13  ;;  %v8646_v48 = vmax.f32 %v14848_v9, 0.0  ;;  %v9586_v13 = vld [vmem:[#allocation9 + $0xe50] sm:$0xff] }
 0x66e   :  { %v19728_v36 = vsel %vm9003_vm14, %v8885_v18, %v19714_v34  ;;  %v8896_v11 = vmax.f32 %v8895_v41, %v8645_v19  ;;  %v9590_v9 = vld [vmem:[#allocation9 + $0xe70] sm:$0xff] }
 0x66f   :  { %v19732_v29 = vsel %vm9003_vm14, %v8894_v12, %v19718_v60  ;;  %v8905_v53 = vmax.f32 %v8904_v23, %v8646_v48  ;;  %12702 = vmatpush1.bf16.msra.mxu1 %v14448_v62  ;;  %v14464_v60 = vcombine.low %v9562_v37, %v9566_v38  ;;  %v14472_v23 = vcombine.low %v9570_v24, %v9574_v33 }
 0x670   :  { %v8897_v20 = vmax.f32 %v8896_v11, 0.0  ;;  %12703 = vmatprep.subr.bf16.mxu1 %v14457_v39  ;;  %v14480_v12 = vcombine.low %v9578_v17, %v9582_v32  ;;  %v14489_v11 = vcombine.high %v9586_v13, %v9590_v9 }
 0x671   :  { %v8906_v55 = vmax.f32 %v8905_v53, 0.0  ;;  %v8538_v22 = vpop.f32.mrb[0].mxu1 }
 0x672   :  { %v8898_v43 = vrot.slane %v8897_v20, 4  ;;  %v14849_v54 = vadd.f32 %v8538_v22, %v19676_v7  ;;  %v8540_v34 = vpop.f32.mrb[1].mxu1 }
 0x673   :  { %v8907_v1 = vrot.slane %v8906_v55, 4  ;;  %v14850_v31 = vadd.f32 %v8540_v34, %v19679_v0  ;;  %v8542_v49 = vpop.f32.mrb[2].mxu1  ;;  %12704 = vmatpush1.bf16.msra.mxu1 %v14456_v59 }
 0x674   :  { %v8899_v58 = vmax.f32 %v8897_v20, %v8898_v43  ;;  %v14851_v45 = vadd.f32 %v8542_v49, %v19676_v7  ;;  %v8544_v5 = vpop.f32.mrb[3].mxu1  ;;  %12705 = vmatprep.subr.bf16.mxu1 %v14465_v25  ;;  %v8649_v8 = vmax.f32 %v14849_v54, 0.0  ;;  %v9594_v20 = vld [vmem:[#allocation9 + $0xe90] sm:$0xff]  ;;  %v14488_v43 = vcombine.low %v9586_v13, %v9590_v9 }
 0x675   :  { %v8908_v52 = vmax.f32 %v8906_v55, %v8907_v1  ;;  %v14852_v10 = vadd.f32 %v8544_v5, %v19679_v0  ;;  %v8650_v63 = vmax.f32 %v14850_v31, 0.0  ;;  %v9598_v25 = vld [vmem:[#allocation9 + $0xeb0] sm:$0xff] }
 0x676   :  { %v8900_v35 = vrot.slane %v8899_v58, 2  ;;  %v8651_v61 = vmax.f32 %v14851_v45, 0.0  ;;  %v14497_v34 = vcombine.high %v9594_v20, %v9598_v25  ;;  %v9602_v49 = vld [vmem:[#allocation9 + $0xed0] sm:$0xff] }
 0x677   :  { %v8909_v41 = vrot.slane %v8908_v52, 2  ;;  %v8652_v56 = vmax.f32 %v14852_v10, 0.0  ;;  %12706 = vmatpush1.bf16.msra.mxu1 %v14464_v60  ;;  %v9606_v60 = vld [vmem:[#allocation9 + $0xef0] sm:$0xff] }
 0x678   :  { %v8901_v27 = vmax.f32 %v8899_v58, %v8900_v35  ;;  %v8913_v6 = vmax.f32 %v8649_v8, %v8651_v61  ;;  %12707 = vmatprep.subr.bf16.mxu1 %v14473_v15  ;;  %v14505_v35 = vcombine.high %v9602_v49, %v9606_v60 }
 0x679   :  { %v8910_v26 = vmax.f32 %v8908_v52, %v8909_v41  ;;  %v8922_v46 = vmax.f32 %v8650_v63, %v8652_v56  ;;  %v8548_v50 = vpop.f32.mrb[4].mxu1  ;;  %v9610_v41 = vld [vmem:[#allocation9 + $0xf10] sm:$0xff] }
 0x67a   :  { %v8902_v42 = vrot.slane %v8901_v27, 1  ;;  %v14853_v62 = vadd.f32 %v8548_v50, %v19676_v7  ;;  %v8550_v18 = vpop.f32.mrb[5].mxu1  ;;  %v9614_v63 = vld [vmem:[#allocation9 + $0xf30] sm:$0xff] }
 0x67b   :  { %v8911_v19 = vrot.slane %v8910_v26, 1  ;;  %v14854_v3 = vadd.f32 %v8550_v18, %v19679_v0  ;;  %v8552_v39 = vpop.f32.mrb[6].mxu1  ;;  %12708 = vmatpush1.bf16.msra.mxu1 %v14472_v23  ;;  %v14513_v9 = vcombine.high %v9610_v41, %v9614_v63 }
 0x67c   :  { %v8903_v48 = vmax.f32 %v8901_v27, %v8902_v42  ;;  %v8653_v37 = vmax.f32 %v14853_v62, 0.0  ;;  %v8554_v38 = vpop.f32.mrb[7].mxu1  ;;  %12709 = vmatprep.subr.bf16.mxu1 %v14481_v28 }
 0x67d   :  { %v8912_v53 = vmax.f32 %v8910_v26, %v8911_v19  ;;  %v8654_v59 = vmax.f32 %v14854_v3, 0.0  ;;  %v9618_v19 = vld [vmem:[#allocation9 + $0xf50] sm:$0xff] }
 0x67e   :  { %v19742_v55 = vsel %vm9005_vm15, %v8903_v48, %v19728_v36  ;;  %v8914_v22 = vmax.f32 %v8913_v6, %v8653_v37  ;;  %v9622_v3 = vld [vmem:[#allocation9 + $0xf70] sm:$0xff] }
 0x67f   :  { %v19746_v24 = vsel %vm9005_vm15, %v8912_v53, %v19732_v29  ;;  %v8923_v33 = vmax.f32 %v8922_v46, %v8654_v59  ;;  %12710 = vmatpush1.bf16.msra.mxu1 %v14480_v12  ;;  %v14496_v29 = vcombine.low %v9594_v20, %v9598_v25  ;;  %v14504_v46 = vcombine.low %v9602_v49, %v9606_v60 }
 0x680   :  { %v8915_v54 = vmax.f32 %v8914_v22, 0.0  ;;  %12711 = vmatprep.subr.bf16.mxu1 %v14489_v11  ;;  %v14512_v53 = vcombine.low %v9610_v41, %v9614_v63  ;;  %v14521_v22 = vcombine.high %v9618_v19, %v9622_v3 }
 0x681   :  { %v8924_v1 = vmax.f32 %v8923_v33, 0.0  ;;  %v8558_v31 = vpop.f32.mrb[8].mxu1 }
 0x682   :  { %v8916_v58 = vrot.slane %v8915_v54, 4  ;;  %v14855_v45 = vadd.f32 %v8558_v31, %v19676_v7  ;;  %v8560_v36 = vpop.f32.mrb[9].mxu1 }
 0x683   :  { %v8925_v5 = vrot.slane %v8924_v1, 4  ;;  %v14856_v15 = vadd.f32 %v8560_v36, %v19679_v0  ;;  %v8562_v52 = vpop.f32.mrb[10].mxu1  ;;  %12712 = vmatpush1.bf16.msra.mxu1 %v14488_v43 }
 0x684   :  { %v8917_v10 = vmax.f32 %v8915_v54, %v8916_v58  ;;  %v14857_v17 = vadd.f32 %v8562_v52, %v19676_v7  ;;  %v8564_v32 = vpop.f32.mrb[11].mxu1  ;;  %12713 = vmatprep.subr.bf16.mxu1 %v14497_v34  ;;  %v8657_v23 = vmax.f32 %v14855_v45, 0.0  ;;  %v9626_v54 = vld [vmem:[#allocation9 + $0xf90] sm:$0xff]  ;;  %v14520_v58 = vcombine.low %v9618_v19, %v9622_v3 }
 0x685   :  { %v8926_v8 = vmax.f32 %v8924_v1, %v8925_v5  ;;  %v14858_v61 = vadd.f32 %v8564_v32, %v19679_v0  ;;  %v8658_v28 = vmax.f32 %v14856_v15, 0.0  ;;  %v9630_v34 = vld [vmem:[#allocation9 + $0xfb0] sm:$0xff] }
 0x686   :  { %v8918_v56 = vrot.slane %v8917_v10, 2  ;;  %v8659_v27 = vmax.f32 %v14857_v17, 0.0  ;;  %v14529_v36 = vcombine.high %v9626_v54, %v9630_v34  ;;  %v9634_v52 = vld [vmem:[#allocation9 + $0xfd0] sm:$0xff] }
 0x687   :  { %v8927_v6 = vrot.slane %v8926_v8, 2  ;;  %v8660_v26 = vmax.f32 %v14858_v61, 0.0  ;;  %12714 = vmatpush1.bf16.msra.mxu1 %v14496_v29  ;;  %v9638_v29 = vld [vmem:[#allocation9 + $0xff0] sm:$0xff] }
 0x688   :  { %v8919_v50 = vmax.f32 %v8917_v10, %v8918_v56  ;;  %v8931_v13 = vmax.f32 %v8657_v23, %v8659_v27  ;;  %12715 = vmatprep.subr.bf16.mxu1 %v14505_v35  ;;  %v14537_v56 = vcombine.high %v9634_v52, %v9638_v29 }
 0x689   :  { %v8928_v42 = vmax.f32 %v8926_v8, %v8927_v6  ;;  %v8940_v62 = vmax.f32 %v8658_v28, %v8660_v26  ;;  %v8568_v18 = vpop.f32.mrb[12].mxu1 }
 0x68a   :  { %v8920_v39 = vrot.slane %v8919_v50, 1  ;;  %v14859_v12 = vadd.f32 %v8568_v18, %v19676_v7  ;;  %v8570_v48 = vpop.f32.mrb[13].mxu1 }
 0x68b   :  { %v8929_v37 = vrot.slane %v8928_v42, 1  ;;  %v14860_v38 = vadd.f32 %v8570_v48, %v19679_v0  ;;  %v8572_v11 = vpop.f32.mrb[14].mxu1  ;;  %12716 = vmatpush1.bf16.msra.mxu1 %v14504_v46 }
 0x68c   :  { %v8921_v59 = vmax.f32 %v8919_v50, %v8920_v39  ;;  %v8661_v20 = vmax.f32 %v14859_v12, 0.0  ;;  %v8574_v25 = vpop.f32.mrb[15].mxu1  ;;  %12717 = vmatprep.subr.bf16.mxu1 %v14513_v9  ;;  %v14536_v9 = vcombine.low %v9634_v52, %v9638_v29 }
 0x68d   :  { %v8930_v33 = vmax.f32 %v8928_v42, %v8929_v37  ;;  %v8662_v43 = vmax.f32 %v14860_v38, 0.0 }
 0x68e   :  { %v9107_v1 = vsel %vm9007_vm2, %v8921_v59, %v19742_v55  ;;  %v8932_v31 = vmax.f32 %v8931_v13, %v8661_v20 }
 0x68f   :  { %v9114_v49 = vsel %vm9007_vm2, %v8930_v33, %v19746_v24  ;;  %v8941_v60 = vmax.f32 %v8940_v62, %v8662_v43  ;;  %12718 = vmatpush1.bf16.msra.mxu1 %v14512_v53  ;;  %v14528_v24 = vcombine.low %v9626_v54, %v9630_v34 }
 0x690   :  { %v8933_v45 = vmax.f32 %v8932_v31, 0.0  ;;  %12719 = vmatprep.subr.bf16.mxu1 %v14521_v22 }
 0x691   :  { %v8942_v5 = vmax.f32 %v8941_v60, 0.0  ;;  %v8578_v15 = vpop.f32.mrb[16].mxu1 }
 0x692   :  { %v8934_v10 = vrot.slane %v8933_v45, 4  ;;  %v14861_v17 = vadd.f32 %v8578_v15, %v19676_v7  ;;  %v8580_v32 = vpop.f32.mrb[17].mxu1 }
 0x693   :  { %v8943_v35 = vrot.slane %v8942_v5, 4  ;;  %v14862_v55 = vadd.f32 %v8580_v32, %v19679_v0  ;;  %v8582_v8 = vpop.f32.mrb[18].mxu1  ;;  %12720 = vmatpush1.bf16.msra.mxu1 %v14520_v58 }
 0x694   :  { %v8935_v61 = vmax.f32 %v8933_v45, %v8934_v10  ;;  %v14863_v41 = vadd.f32 %v8582_v8, %v19676_v7  ;;  %v8584_v63 = vpop.f32.mrb[19].mxu1  ;;  %12721 = vmatprep.subr.bf16.mxu1 %v14529_v36  ;;  %v8665_v28 = vmax.f32 %v14861_v17, 0.0 }
 0x695   :  { %v8944_v23 = vmax.f32 %v8942_v5, %v8943_v35  ;;  %v14864_v27 = vadd.f32 %v8584_v63, %v19679_v0  ;;  %v8666_v50 = vmax.f32 %v14862_v55, 0.0 }
 0x696   :  { %v8936_v6 = vrot.slane %v8935_v61, 2  ;;  %v8667_v26 = vmax.f32 %v14863_v41, 0.0 }
 0x697   :  { %v8945_v46 = vrot.slane %v8944_v23, 2  ;;  %v8668_v13 = vmax.f32 %v14864_v27, 0.0  ;;  %12722 = vmatpush1.bf16.msra.mxu1 %v14528_v24 }
 0x698   :  { %v8937_v42 = vmax.f32 %v8935_v61, %v8936_v6  ;;  %v8949_v62 = vmax.f32 %v8665_v28, %v8667_v26  ;;  %12723 = vmatprep.subr.bf16.mxu1 %v14537_v56 }
 0x699   :  { %v8946_v18 = vmax.f32 %v8944_v23, %v8945_v46  ;;  %v8958_v19 = vmax.f32 %v8666_v50, %v8668_v13  ;;  %v8588_v3 = vpop.f32.mrb[20].mxu1 }
 0x69a   :  { %v8938_v39 = vrot.slane %v8937_v42, 1  ;;  %v14865_v12 = vadd.f32 %v8588_v3, %v19676_v7  ;;  %v8590_v48 = vpop.f32.mrb[21].mxu1 }
 0x69b   :  { %v8947_v37 = vrot.slane %v8946_v18, 1  ;;  %v14866_v38 = vadd.f32 %v8590_v48, %v19679_v0  ;;  %v8592_v11 = vpop.f32.mrb[22].mxu1  ;;  %12724 = vmatpush1.bf16.msra.mxu1 %v14536_v9 }
 0x69c   :  { %v8939_v53 = vmax.f32 %v8937_v42, %v8938_v39  ;;  %v8669_v59 = vmax.f32 %v14865_v12, 0.0  ;;  %v8594_v20 = vpop.f32.mrb[23].mxu1 }
 0x69d   :  { %v8948_v25 = vmax.f32 %v8946_v18, %v8947_v37  ;;  %v8670_v22 = vmax.f32 %v14866_v38, 0.0 }
 0x69e   :  { %v8950_v33 = vmax.f32 %v8949_v62, %v8669_v59  ;;  %v9108_v43 = vsel %vm9009_vm9, %v8939_v53, %v9107_v1 }
 0x69f   :  { %v8959_v54 = vmax.f32 %v8958_v19, %v8670_v22  ;;  %v9115_v34 = vsel %vm9009_vm9, %v8948_v25, %v9114_v49 }
 0x6a0   :  { %v8951_v31 = vmax.f32 %v8950_v33, 0.0 }
 0x6a1   :  { %v8960_v60 = vmax.f32 %v8959_v54, 0.0  ;;  %v8598_v58 = vpop.f32.mrb[24].mxu1 }
 0x6a2   :  { %v8952_v45 = vrot.slane %v8951_v31, 4  ;;  %v14867_v36 = vadd.f32 %v8598_v58, %v19676_v7  ;;  %v8600_v5 = vpop.f32.mrb[25].mxu1 }
 0x6a3   :  { %v8961_v15 = vrot.slane %v8960_v60, 4  ;;  %v14868_v52 = vadd.f32 %v8600_v5, %v19679_v0  ;;  %v8602_v29 = vpop.f32.mrb[26].mxu1 }
 0x6a4   :  { %v8953_v10 = vmax.f32 %v8951_v31, %v8952_v45  ;;  %v14869_v17 = vadd.f32 %v8602_v29, %v19676_v7  ;;  %v8604_v32 = vpop.f32.mrb[27].mxu1  ;;  %v8673_v49 = vmax.f32 %v14867_v36, 0.0  ;;  %v9141_v36 = vld [vmem:[#allocation9 + $0x68] sm:$0xff] }
 0x6a5   :  { %v8962_v35 = vmax.f32 %v8960_v60, %v8961_v15  ;;  %v14870_v1 = vadd.f32 %v8604_v32, %v19679_v0  ;;  %v8674_v61 = vmax.f32 %v14868_v52, 0.0  ;;  %v9145_v29 = vld [vmem:[#allocation9 + $0x88] sm:$0xff] }
 0x6a6   :  { %v8954_v55 = vrot.slane %v8953_v10, 2  ;;  %v8675_v8 = vmax.f32 %v14869_v17, 0.0 }
 0x6a7   :  { %v8963_v24 = vrot.slane %v8962_v35, 2  ;;  %v8676_v41 = vmax.f32 %v14870_v1, 0.0  ;;  %v9157_v1 = vld [vmem:[#allocation9 + $0xe8] sm:$0xff] }
 0x6a8   :  { %v8955_v63 = vmax.f32 %v8953_v10, %v8954_v55  ;;  %v8967_v56 = vmax.f32 %v8673_v49, %v8675_v8  ;;  %v9149_v10 = vld [vmem:[#allocation9 + $0xa8] sm:$0xff] }
 0x6a9   :  { %v8964_v23 = vmax.f32 %v8962_v35, %v8963_v24  ;;  %v8976_v27 = vmax.f32 %v8674_v61, %v8676_v41  ;;  %v8608_v6 = vpop.f32.mrb[28].mxu1  ;;  %v14047_v32 = vcombine.high %v9145_v29, %v9149_v10  ;;  %v9153_v35 = vld [vmem:[#allocation9 + $0xc8] sm:$0xff]  ;;  %v14046_v55 = vcombine.low %v9145_v29, %v9149_v10 }
 0x6aa   :  { %v8956_v28 = vrot.slane %v8955_v63, 1  ;;  %v14871_v26 = vadd.f32 %v8608_v6, %v19676_v7  ;;  %v8610_v46 = vpop.f32.mrb[29].mxu1  ;;  %v14055_v49 = vcombine.high %v9153_v35, %v9157_v1  ;;  %v9161_v8 = vld [vmem:[#allocation9 + $0x108] sm:$0xff]  ;;  %v14054_v61 = vcombine.low %v9153_v35, %v9157_v1 }
 0x6ab   :  { %v8965_v50 = vrot.slane %v8964_v23, 1  ;;  %v14872_v13 = vadd.f32 %v8610_v46, %v19679_v0  ;;  %v8612_v9 = vpop.f32.mrb[30].mxu1  ;;  %v9165_v24 = vld [vmem:[#allocation9 + $0x128] sm:$0xff] }
 0x6ac   :  { %v8957_v42 = vmax.f32 %v8955_v63, %v8956_v28  ;;  %v8677_v62 = vmax.f32 %v14871_v26, 0.0  ;;  %v8614_v18 = vpop.f32.mrb[31].mxu1  ;;  %v14063_v41 = vcombine.high %v9161_v8, %v9165_v24  ;;  %v9169_v63 = vld [vmem:[#allocation9 + $0x148] sm:$0xff]  ;;  %v14062_v40 = vcombine.low %v9161_v8, %v9165_v24 }
 0x6ad   :  { %v8966_v19 = vmax.f32 %v8964_v23, %v8965_v50  ;;  %v8678_v3 = vmax.f32 %v14872_v13, 0.0  ;;  %v9181_v23 = vld [vmem:[#allocation9 + $0x1a8] sm:$0xff] }
 0x6ae   :  { %v8968_v39 = vmax.f32 %v8967_v56, %v8677_v62  ;;  %v9109_v12 = vsel %vm9011_vm13, %v8957_v42, %v9108_v43  ;;  %v9137_v43 = vld [vmem:[#allocation9 + $0x48] sm:$0xff] }
 0x6af   :  { %v8977_v48 = vmax.f32 %v8976_v27, %v8678_v3  ;;  %v9116_v37 = vsel %vm9011_vm13, %v8966_v19, %v9115_v34  ;;  %v14039_v52 = vcombine.high %v9137_v43, %v9141_v36  ;;  %v14038_v17 = vcombine.low %v9137_v43, %v9141_v36  ;;  %v9177_v56 = vld [vmem:[#allocation9 + $0x188] sm:$0xff] }
 0x6b0   :  { %v8969_v38 = vmax.f32 %v8968_v39, 0.0  ;;  %v14070_v27 = vcombine.low %v9169_v63, %v9173_v51  ;;  %v14079_v6 = vcombine.high %v9177_v56, %v9181_v23  ;;  %v9185_v28 = vld [vmem:[#allocation9 + $0x1c8] sm:$0xff]  ;;  %v14078_v46 = vcombine.low %v9177_v56, %v9181_v23  ;;  %v15889_v56 = vld [vmem:[#allocation12 + $0x8] sm:$0xff]  }
 0x6b1   :  { %v8978_v11 = vmax.f32 %v8977_v48, 0.0  ;;  %v9189_v26 = vld [vmem:[#allocation9 + $0x1e8] sm:$0xff] }
 0x6b2   :  { %v8970_v53 = vrot.slane %v8969_v38, 4  ;;  %v14087_v50 = vcombine.high %v9185_v28, %v9189_v26  ;;  %v9193_v13 = vld [vmem:[#allocation9 + $0x208] sm:$0xff]  ;;  %v14086_v42 = vcombine.low %v9185_v28, %v9189_v26  ;;  %v15890_v26 = vld [vmem:[#allocation12 + $0x50] sm:$0xff]  }
 0x6b3   :  { %v8979_v7 = vrot.slane %v8978_v11, 4  ;;  %v9197_v9 = vld [vmem:[#allocation9 + $0x228] sm:$0xff] }
 0x6b4   :  { %v8971_v59 = vmax.f32 %v8969_v38, %v8970_v53  ;;  %v14095_v62 = vcombine.high %v9193_v13, %v9197_v9  ;;  %v9201_v18 = vld [vmem:[#allocation9 + $0x248] sm:$0xff]  ;;  %v14094_v3 = vcombine.low %v9193_v13, %v9197_v9 }
 0x6b5   :  { %v8980_v20 = vmax.f32 %v8978_v11, %v8979_v7  ;;  %v9205_v19 = vld [vmem:[#allocation9 + $0x268] sm:$0xff] }
 0x6b6   :  { %v8972_v25 = vrot.slane %v8971_v59, 2  ;;  %v14103_v39 = vcombine.high %v9201_v18, %v9205_v19  ;;  %v9213_v48 = vld [vmem:[#allocation9 + $0x2a8] sm:$0xff] }
 0x6b7   :  { %v8981_v0 = vrot.slane %v8980_v20, 2  ;;  %v9217_v11 = vld [vmem:[#allocation9 + $0x2c8] sm:$0xff] }
 0x6b8   :  { %v8973_v22 = vmax.f32 %v8971_v59, %v8972_v25  ;;  %v9221_v53 = vld [vmem:[#allocation9 + $0x2e8] sm:$0xff] }
 0x6b9   :  { %v8982_v33 = vmax.f32 %v8980_v20, %v8981_v0  ;;  %v14119_v59 = vcombine.high %v9217_v11, %v9221_v53  ;;  %v9225_v20 = vld [vmem:[#allocation9 + $0x308] sm:$0xff]  ;;  %v14118_v0 = vcombine.low %v9217_v11, %v9221_v53 }
 0x6ba   :  { %v8974_v54 = vrot.slane %v8973_v22, 1  ;;  %v9229_v25 = vld [vmem:[#allocation9 + $0x328] sm:$0xff] }
 0x6bb   :  { %v8983_v31 = vrot.slane %v8982_v33, 1  ;;  %v15886_v24 = vld [vmem:[#allocation12 + $0x40] sm:$0xff]  }
 0x6bc   :  { %v8975_v60 = vmax.f32 %v8973_v22, %v8974_v54  ;;  %v14127_v22 = vcombine.high %v9225_v20, %v9229_v25  ;;  %v9237_v54 = vld [vmem:[#allocation9 + $0x368] sm:$0xff]  ;;  %14605 = vmatprep.subr.bf16.mxu1 %v15886_v24 }
 0x6bd   :  { %v8984_v58 = vmax.f32 %v8982_v33, %v8983_v31  ;;  %v9233_v33 = vld [vmem:[#allocation9 + $0x348] sm:$0xff]  ;;  %v14126_v31 = vcombine.low %v9225_v20, %v9229_v25  ;;  %v15897_v20 = vld [vmem:[#allocation12 + $0x28] sm:$0xff]  }
 0x6be   :  { %v9110_v45 = vsel %vm9013_vm1, %v8975_v60, %v9109_v12  ;;  %v9209_v12 = vld [vmem:[#allocation9 + $0x288] sm:$0xff]  ;;  %v14135_v60 = vcombine.high %v9233_v33, %v9237_v54  ;;  %v14134_v43 = vcombine.low %v9233_v33, %v9237_v54 }
 0x6bf   :  { %v9117_v34 = vsel %vm9013_vm1, %v8984_v58, %v9116_v37  ;;  %v19778_v15 = vpack.c.bf16 %v9110_v45, %v9110_v45  ;;  %v14102_v37 = vcombine.low %v9201_v18, %v9205_v19  ;;  %v14111_v38 = vcombine.high %v9209_v12, %v9213_v48  ;;  %v9241_v58 = vld [vmem:[#allocation9 + $0x388] sm:$0xff]  ;;  %v15893_v18 = vld [vmem:[#allocation12 + $0x18] sm:$0xff]  }
 0x6c0   :  { %v19776_v5 = vpack.c.bf16 %v9117_v34, %v9117_v34  ;;  %v14110_v7 = vcombine.low %v9209_v12, %v9213_v48  ;;  %v9245_v45 = vld [vmem:[#allocation9 + $0x3a8] sm:$0xff] }
 0x6c1   :  { %v14143_v36 = vcombine.high %v9241_v58, %v9245_v45  ;;  %v9249_v34 = vld [vmem:[#allocation9 + $0x3c8] sm:$0xff]  ;;  %v14142_v29 = vcombine.low %v9241_v58, %v9245_v45  ;;  %v15898_v45 = vld [vmem:[#allocation12 + $0x70] sm:$0xff]  }
 0x6c2   :  { %12397 = vmatprep.mubr.bf16.mxu0 %v19776_v5  ;;  %12725 = vmatprep.mubr.bf16.mxu1 %v19776_v5  ;;  %v9289_v13 = vld [vmem:[#allocation9 + $0x508] sm:$0xff] }
 0x6c3   :  { %12398 = vmatmul.mubr.bf16.vlgmr.msra.gmra.mrb[224].mxu0 %v19778_v15  ;;  %12726 = vmatmul.mubr.bf16.vlgmr.msra.gmra.mrb[32].mxu1 %v19778_v15  ;;  %v9293_v9 = vld [vmem:[#allocation9 + $0x528] sm:$0xff] }
 0x6c4   :  { %12407 = vmatpush1.bf16.msra.mxu0 %v14030_v4  ;;  %12438 = vmatprep.mubr.bf16.mxu0 %v20397_v30  ;;  %v14071_v4 = vcombine.high %v9169_v63, %v9173_v51  ;;  %v9273_v63 = vld [vmem:[#allocation9 + $0x488] sm:$0xff]  ;;  %v14191_v19 = vcombine.high %v9289_v13, %v9293_v9  ;;  %v14190_v12 = vcombine.low %v9289_v13, %v9293_v9 }
 0x6c5   :  { %12408 = vmatprep.subr.bf16.mxu0 %v14039_v52  ;;  %v9253_v52 = vld [vmem:[#allocation9 + $0x3e8] sm:$0xff] }
 0x6c6   :  { %v14151_v10 = vcombine.high %v9249_v34, %v9253_v52  ;;  %v14150_v35 = vcombine.low %v9249_v34, %v9253_v52  ;;  %v9277_v51 = vld [vmem:[#allocation9 + $0x4a8] sm:$0xff]  ;;  %v15900_v34 = vld [vmem:[#allocation12 + $0x78] sm:$0xff]  }
 0x6c7   :  { %v14175_v23 = vcombine.high %v9273_v63, %v9277_v51  ;;  %v14174_v28 = vcombine.low %v9273_v63, %v9277_v51  ;;  %v15894_v48 = vld [vmem:[#allocation12 + $0x60] sm:$0xff]  }
 0x6c8   :  { %12409 = vmatpush1.bf16.msra.mxu0 %v14038_v17  ;;  %v9257_v17 = vld [vmem:[#allocation9 + $0x408] sm:$0xff] }
 0x6c9   :  { %12410 = vmatprep.subr.bf16.mxu0 %v14047_v32  ;;  %v9261_v32 = vld [vmem:[#allocation9 + $0x428] sm:$0xff] }
 0x6ca   :  { %v14159_v1 = vcombine.high %v9257_v17, %v9261_v32  ;;  %v14158_v8 = vcombine.low %v9257_v17, %v9261_v32  ;;  %v9305_v11 = vld [vmem:[#allocation9 + $0x588] sm:$0xff] }
 0x6cb   :  { %v9309_v53 = vld [vmem:[#allocation9 + $0x5a8] sm:$0xff] }
 0x6cc   :  { %12411 = vmatpush1.bf16.msra.mxu0 %v14046_v55  ;;  %v9265_v55 = vld [vmem:[#allocation9 + $0x448] sm:$0xff]  ;;  %v14207_v25 = vcombine.high %v9305_v11, %v9309_v53  ;;  %v14206_v33 = vcombine.low %v9305_v11, %v9309_v53 }
 0x6cd   :  { %12412 = vmatprep.subr.bf16.mxu0 %v14055_v49  ;;  %v9269_v49 = vld [vmem:[#allocation9 + $0x468] sm:$0xff] }
 0x6ce   :  { %v9329_v52 = vld [vmem:[#allocation9 + $0x648] sm:$0xff] }
 0x6cf   :  { %v9349_v24 = vld [vmem:[#allocation9 + $0x6e8] sm:$0xff] }
 0x6d0   :  { %12413 = vmatpush1.bf16.msra.mxu0 %v14054_v61  ;;  %v15887_v61 = vld [vmem:[#allocation12] sm:$0xff]  }
 0x6d1   :  { %12414 = vmatprep.subr.bf16.mxu0 %v14063_v41  ;;  %v14167_v41 = vcombine.high %v9265_v55, %v9269_v49  ;;  %14606 = vmatpush3.bf16.msra.mxu1 %v15887_v61  ;;  %v9353_v63 = vld [vmem:[#allocation9 + $0x708] sm:$0xff] }
 0x6d2   :  { %v9357_v51 = vld [vmem:[#allocation9 + $0x728] sm:$0xff] }
 0x6d3   :  { %v9377_v13 = vld [vmem:[#allocation9 + $0x7c8] sm:$0xff] }
 0x6d4   :  { %12415 = vmatpush1.bf16.msra.mxu0 %v14062_v40  ;;  %v14166_v40 = vcombine.low %v9265_v55, %v9269_v49  ;;  %v9381_v9 = vld [vmem:[#allocation9 + $0x7e8] sm:$0xff] }
 0x6d5   :  { %12416 = vmatprep.subr.bf16.mxu0 %v14071_v4  ;;  %v15888_v4 = vld [vmem:[#allocation12 + $0x48] sm:$0xff]   ;;  %v9401_v11 = vld [vmem:[#allocation9 + $0x888] sm:$0xff] }
 0x6d6   :  { %14607 = vmatprep.subr.bf16.mxu1 %v15888_v4  ;;  %v14255_v4 = vcombine.high %v9353_v63, %v9357_v51  ;;  %v9405_v53 = vld [vmem:[#allocation9 + $0x8a8] sm:$0xff] }
 0x6d7   :  { %14608 = vmatpush3.bf16.msra.mxu1 %v15889_v56  ;;  %v9361_v56 = vld [vmem:[#allocation9 + $0x748] sm:$0xff] }
 0x6d8   :  { %12417 = vmatpush1.bf16.msra.mxu0 %v14070_v27  ;;  %v9281_v27 = vld [vmem:[#allocation9 + $0x4c8] sm:$0xff]  ;;  %14609 = vmatprep.subr.bf16.mxu1 %v15890_v26 }
 0x6d9   :  { %12418 = vmatprep.subr.bf16.mxu0 %v14079_v6  ;;  %v9285_v6 = vld [vmem:[#allocation9 + $0x4e8] sm:$0xff] }
 0x6da   :  { %v9373_v26 = vld [vmem:[#allocation9 + $0x7a8] sm:$0xff] }
 0x6dc   :  { %12419 = vmatpush1.bf16.msra.mxu0 %v14078_v46  ;;  %v15891_v46 = vld [vmem:[#allocation12 + $0x10] sm:$0xff]  }
 0x6dd   :  { %12420 = vmatprep.subr.bf16.mxu0 %v14087_v50  ;;  %v14183_v50 = vcombine.high %v9281_v27, %v9285_v6  ;;  %14610 = vmatpush3.bf16.msra.mxu1 %v15891_v46 }
 0x6e0   :  { %12421 = vmatpush1.bf16.msra.mxu0 %v14086_v42  ;;  %v14182_v42 = vcombine.low %v9281_v27, %v9285_v6  ;;  %v14254_v27 = vcombine.low %v9353_v63, %v9357_v51 }
 0x6e1   :  { %12422 = vmatprep.subr.bf16.mxu0 %v14095_v62  ;;  %v15892_v62 = vld [vmem:[#allocation12 + $0x58] sm:$0xff]  }
 0x6e2   :  { %14611 = vmatprep.subr.bf16.mxu1 %v15892_v62  ;;  %v14279_v62 = vcombine.high %v9377_v13, %v9381_v9 }
 0x6e3   :  { %14612 = vmatpush3.bf16.msra.mxu1 %v15893_v18  ;;  %v9385_v18 = vld [vmem:[#allocation9 + $0x808] sm:$0xff] }
 0x6e4   :  { %12423 = vmatpush1.bf16.msra.mxu0 %v14094_v3  ;;  %v9297_v3 = vld [vmem:[#allocation9 + $0x548] sm:$0xff]  ;;  %14613 = vmatprep.subr.bf16.mxu1 %v15894_v48 }
 0x6e5   :  { %12424 = vmatprep.subr.bf16.mxu0 %v14103_v39  ;;  %v9301_v39 = vld [vmem:[#allocation9 + $0x568] sm:$0xff] }
 0x6e6   :  { %v9397_v48 = vld [vmem:[#allocation9 + $0x868] sm:$0xff] }
 0x6e8   :  { %12425 = vmatpush1.bf16.msra.mxu0 %v14102_v37  ;;  %v15895_v37 = vld [vmem:[#allocation12 + $0x20] sm:$0xff]  }
 0x6e9   :  { %12426 = vmatprep.subr.bf16.mxu0 %v14111_v38  ;;  %v14199_v38 = vcombine.high %v9297_v3, %v9301_v39  ;;  %14614 = vmatpush3.bf16.msra.mxu1 %v15895_v37 }
 0x6ec   :  { %12427 = vmatpush1.bf16.msra.mxu0 %v14110_v7  ;;  %v14198_v7 = vcombine.low %v9297_v3, %v9301_v39  ;;  %v14278_v3 = vcombine.low %v9377_v13, %v9381_v9 }
 0x6ed   :  { %12428 = vmatprep.subr.bf16.mxu0 %v14119_v59  ;;  %v15896_v59 = vld [vmem:[#allocation12 + $0x68] sm:$0xff]  }
 0x6ee   :  { %14615 = vmatprep.subr.bf16.mxu1 %v15896_v59  ;;  %v14303_v59 = vcombine.high %v9401_v11, %v9405_v53 }
 0x6ef   :  { %14616 = vmatpush3.bf16.msra.mxu1 %v15897_v20  ;;  %v9409_v20 = vld [vmem:[#allocation9 + $0x8c8] sm:$0xff] }
 0x6f0   :  { %12429 = vmatpush1.bf16.msra.mxu0 %v14118_v0  ;;  %v9313_v0 = vld [vmem:[#allocation9 + $0x5c8] sm:$0xff]  ;;  %14617 = vmatprep.subr.bf16.mxu1 %v15898_v45 }
 0x6f1   :  { %12430 = vmatprep.subr.bf16.mxu0 %v14127_v22  ;;  %v9317_v22 = vld [vmem:[#allocation9 + $0x5e8] sm:$0xff] }
 0x6f2   :  { %v14215_v54 = vcombine.high %v9313_v0, %v9317_v22  ;;  %v14214_v58 = vcombine.low %v9313_v0, %v9317_v22  ;;  %v14302_v0 = vcombine.low %v9401_v11, %v9405_v53  ;;  %v9429_v45 = vld [vmem:[#allocation9 + $0x968] sm:$0xff] }
 0x6f4   :  { %12431 = vmatpush1.bf16.msra.mxu0 %v14126_v31  ;;  %v9321_v31 = vld [vmem:[#allocation9 + $0x608] sm:$0xff] }
 0x6f5   :  { %12432 = vmatprep.subr.bf16.mxu0 %v14135_v60  ;;  %v9325_v60 = vld [vmem:[#allocation9 + $0x628] sm:$0xff] }
 0x6f6   :  { %v14222_v17 = vcombine.low %v9321_v31, %v9325_v60 }
 0x6f8   :  { %12433 = vmatpush1.bf16.msra.mxu0 %v14134_v43  ;;  %v15899_v43 = vld [vmem:[#allocation12 + $0x30] sm:$0xff]  }
 0x6f9   :  { %12434 = vmatprep.subr.bf16.mxu0 %v14143_v36  ;;  %v14223_v36 = vcombine.high %v9321_v31, %v9325_v60  ;;  %14618 = vmatpush3.bf16.msra.mxu1 %v15899_v43 }
 0x6fa   :  { %14619 = vmatprep.subr.bf16.mxu1 %v15900_v34  ;;  %v9433_v34 = vld [vmem:[#allocation9 + $0x988] sm:$0xff] }
 0x6fc   :  { %12435 = vmatpush1.bf16.msra.mxu0 %v14142_v29  ;;  %v9333_v29 = vld [vmem:[#allocation9 + $0x668] sm:$0xff] }
 0x6fd   :  { %12436 = vmatprep.subr.bf16.mxu0 %v14151_v10  ;;  %v15901_v10 = vld [vmem:[#allocation12 + $0x38] sm:$0xff]   ;;  %v14231_v32 = vcombine.high %v9329_v52, %v9333_v29  ;;  %v14230_v55 = vcombine.low %v9329_v52, %v9333_v29  ;;  %v9437_v52 = vld [vmem:[#allocation9 + $0x9a8] sm:$0xff] }
 0x6fe   :  { %14620 = vmatpush3.bf16.msra.mxu1 %v15901_v10  ;;  %v14335_v10 = vcombine.high %v9433_v34, %v9437_v52 }
 0x700   :  { %12437 = vmatpush1.bf16.msra.mxu0 %v14150_v35  ;;  %v9337_v35 = vld [vmem:[#allocation9 + $0x688] sm:$0xff] }
 0x701   :  { %12447 = vmatprep.subr.bf16.mxu0 %v14159_v1  ;;  %v9341_v1 = vld [vmem:[#allocation9 + $0x6a8] sm:$0xff] }
 0x702   :  { %v14239_v49 = vcombine.high %v9337_v35, %v9341_v1  ;;  %v14238_v61 = vcombine.low %v9337_v35, %v9341_v1  ;;  %v14334_v35 = vcombine.low %v9433_v34, %v9437_v52 }
 0x703   :  { %12439 = vmatmul.mubr.bf16.vlgmr.msra.gmra.mrb[228].mxu0 %v20398_v14 }
 0x704   :  { %12448 = vmatpush1.bf16.msra.mxu0 %v14158_v8  ;;  %12479 = vmatprep.mubr.bf16.mxu0 %v20399_v57  ;;  %v9345_v8 = vld [vmem:[#allocation9 + $0x6c8] sm:$0xff] }
 0x705   :  { %12449 = vmatprep.subr.bf16.mxu0 %v14167_v41  ;;  %v14247_v41 = vcombine.high %v9345_v8, %v9349_v24 }
 0x708   :  { %12450 = vmatpush1.bf16.msra.mxu0 %v14166_v40  ;;  %v14246_v40 = vcombine.low %v9345_v8, %v9349_v24 }
 0x709   :  { %12451 = vmatprep.subr.bf16.mxu0 %v14175_v23  ;;  %v9365_v23 = vld [vmem:[#allocation9 + $0x768] sm:$0xff] }
 0x70a   :  { %v14263_v6 = vcombine.high %v9361_v56, %v9365_v23  ;;  %v14262_v46 = vcombine.low %v9361_v56, %v9365_v23 }
 0x70c   :  { %12452 = vmatpush1.bf16.msra.mxu0 %v14174_v28  ;;  %v9369_v28 = vld [vmem:[#allocation9 + $0x788] sm:$0xff] }
 0x70d   :  { %12453 = vmatprep.subr.bf16.mxu0 %v14183_v50  ;;  %v14271_v50 = vcombine.high %v9369_v28, %v9373_v26 }
 0x710   :  { %12454 = vmatpush1.bf16.msra.mxu0 %v14182_v42  ;;  %v14270_v42 = vcombine.low %v9369_v28, %v9373_v26 }
 0x711   :  { %12455 = vmatprep.subr.bf16.mxu0 %v14191_v19  ;;  %v9389_v19 = vld [vmem:[#allocation9 + $0x828] sm:$0xff] }
 0x712   :  { %v14287_v39 = vcombine.high %v9385_v18, %v9389_v19  ;;  %v14286_v37 = vcombine.low %v9385_v18, %v9389_v19 }
 0x714   :  { %12456 = vmatpush1.bf16.msra.mxu0 %v14190_v12  ;;  %v9393_v12 = vld [vmem:[#allocation9 + $0x848] sm:$0xff] }
 0x715   :  { %12457 = vmatprep.subr.bf16.mxu0 %v14199_v38  ;;  %v14295_v38 = vcombine.high %v9393_v12, %v9397_v48 }
 0x718   :  { %12458 = vmatpush1.bf16.msra.mxu0 %v14198_v7  ;;  %v14294_v7 = vcombine.low %v9393_v12, %v9397_v48 }
 0x719   :  { %12459 = vmatprep.subr.bf16.mxu0 %v14207_v25  ;;  %v9413_v25 = vld [vmem:[#allocation9 + $0x8e8] sm:$0xff] }
 0x71a   :  { %v14311_v22 = vcombine.high %v9409_v20, %v9413_v25  ;;  %v14310_v31 = vcombine.low %v9409_v20, %v9413_v25 }
 0x71c   :  { %12460 = vmatpush1.bf16.msra.mxu0 %v14206_v33  ;;  %v9417_v33 = vld [vmem:[#allocation9 + $0x908] sm:$0xff] }
 0x71d   :  { %12461 = vmatprep.subr.bf16.mxu0 %v14215_v54  ;;  %v9421_v54 = vld [vmem:[#allocation9 + $0x928] sm:$0xff] }
 0x71e   :  { %v14319_v60 = vcombine.high %v9417_v33, %v9421_v54  ;;  %v14318_v43 = vcombine.low %v9417_v33, %v9421_v54 }
 0x720   :  { %12462 = vmatpush1.bf16.msra.mxu0 %v14214_v58  ;;  %v9425_v58 = vld [vmem:[#allocation9 + $0x948] sm:$0xff] }
 0x721   :  { %12463 = vmatprep.subr.bf16.mxu0 %v14223_v36  ;;  %v14327_v36 = vcombine.high %v9425_v58, %v9429_v45  ;;  %v14326_v29 = vcombine.low %v9425_v58, %v9429_v45 }
 0x724   :  { %12464 = vmatpush1.bf16.msra.mxu0 %v14222_v17  ;;  %v9441_v17 = vld [vmem:[#allocation9 + $0x9c8] sm:$0xff] }
 0x725   :  { %12465 = vmatprep.subr.bf16.mxu0 %v14231_v32  ;;  %v9445_v32 = vld [vmem:[#allocation9 + $0x9e8] sm:$0xff] }
 0x726   :  { %v14343_v1 = vcombine.high %v9441_v17, %v9445_v32  ;;  %v14342_v8 = vcombine.low %v9441_v17, %v9445_v32 }
 0x728   :  { %12466 = vmatpush1.bf16.msra.mxu0 %v14230_v55  ;;  %v9449_v55 = vld [vmem:[#allocation9 + $0xa08] sm:$0xff] }
 0x729   :  { %12467 = vmatprep.subr.bf16.mxu0 %v14239_v49  ;;  %v9453_v49 = vld [vmem:[#allocation9 + $0xa28] sm:$0xff] }
 0x72a   :  { %v14351_v24 = vcombine.high %v9449_v55, %v9453_v49  ;;  %v14350_v63 = vcombine.low %v9449_v55, %v9453_v49  ;;  %v19794_v49 = vld [vmem:[#allocation10] sm:$0xff] }
 0x72c   :  { %12468 = vmatpush1.bf16.msra.mxu0 %v14238_v61  ;;  %v9457_v61 = vld [vmem:[#allocation9 + $0xa48] sm:$0xff] }
 0x72d   :  { %12469 = vmatprep.subr.bf16.mxu0 %v14247_v41  ;;  %v9461_v41 = vld [vmem:[#allocation9 + $0xa68] sm:$0xff] }
 0x72e   :  { %v14359_v51 = vcombine.high %v9457_v61, %v9461_v41  ;;  %v14358_v56 = vcombine.low %v9457_v61, %v9461_v41  ;;  %v9565_v61 = vld [vmem:[#allocation9 + $0xda8] sm:$0xff]  ;;  %v9645_v41 = vrot.slane %v19794_v49, %v20401_v2 }
 0x730   :  { %12470 = vmatpush1.bf16.msra.mxu0 %v14246_v40  ;;  %v9465_v40 = vld [vmem:[#allocation9 + $0xa88] sm:$0xff] }
 0x731   :  { %12471 = vmatprep.subr.bf16.mxu0 %v14255_v4  ;;  %v9469_v4 = vld [vmem:[#allocation9 + $0xaa8] sm:$0xff] }
 0x732   :  { %v14367_v23 = vcombine.high %v9465_v40, %v9469_v4  ;;  %v14366_v28 = vcombine.low %v9465_v40, %v9469_v4 }
 0x734   :  { %12472 = vmatpush1.bf16.msra.mxu0 %v14254_v27  ;;  %v9473_v27 = vld [vmem:[#allocation9 + $0xac8] sm:$0xff] }
 0x735   :  { %12473 = vmatprep.subr.bf16.mxu0 %v14263_v6  ;;  %v9477_v6 = vld [vmem:[#allocation9 + $0xae8] sm:$0xff] }
 0x736   :  { %v14375_v26 = vcombine.high %v9473_v27, %v9477_v6  ;;  %v14374_v13 = vcombine.low %v9473_v27, %v9477_v6  ;;  %v9573_v27 = vld [vmem:[#allocation9 + $0xde8] sm:$0xff] }
 0x738   :  { %12474 = vmatpush1.bf16.msra.mxu0 %v14262_v46  ;;  %v9481_v46 = vld [vmem:[#allocation9 + $0xb08] sm:$0xff] }
 0x739   :  { %12475 = vmatprep.subr.bf16.mxu0 %v14271_v50  ;;  %v9485_v50 = vld [vmem:[#allocation9 + $0xb28] sm:$0xff] }
 0x73a   :  { %v14383_v9 = vcombine.high %v9481_v46, %v9485_v50  ;;  %v14382_v18 = vcombine.low %v9481_v46, %v9485_v50 }
 0x73c   :  { %12476 = vmatpush1.bf16.msra.mxu0 %v14270_v42  ;;  %v9489_v42 = vld [vmem:[#allocation9 + $0xb48] sm:$0xff] }
 0x73d   :  { %12477 = vmatprep.subr.bf16.mxu0 %v14279_v62  ;;  %v9493_v62 = vld [vmem:[#allocation9 + $0xb68] sm:$0xff] }
 0x73e   :  { %v14391_v19 = vcombine.high %v9489_v42, %v9493_v62  ;;  %v14390_v12 = vcombine.low %v9489_v42, %v9493_v62 }
 0x740   :  { %12478 = vmatpush1.bf16.msra.mxu0 %v14278_v3  ;;  %v9497_v3 = vld [vmem:[#allocation9 + $0xb88] sm:$0xff] }
 0x741   :  { %12488 = vmatprep.subr.bf16.mxu0 %v14287_v39  ;;  %v9501_v39 = vld [vmem:[#allocation9 + $0xba8] sm:$0xff] }
 0x742   :  { %v14399_v48 = vcombine.high %v9497_v3, %v9501_v39  ;;  %v14398_v11 = vcombine.low %v9497_v3, %v9501_v39  ;;  %v9581_v3 = vld [vmem:[#allocation9 + $0xe28] sm:$0xff] }
 0x743   :  { %12480 = vmatmul.mubr.bf16.vlgmr.msra.gmra.mrb[228].mxu0 %v20400_v16 }
 0x744   :  { %12489 = vmatpush1.bf16.msra.mxu0 %v14286_v37  ;;  %12520 = vmatprep.mubr.bf16.mxu0 %v19527_v44  ;;  %v9505_v37 = vld [vmem:[#allocation9 + $0xbc8] sm:$0xff] }
 0x745   :  { %12490 = vmatprep.subr.bf16.mxu0 %v14295_v38  ;;  %v9509_v38 = vld [vmem:[#allocation9 + $0xbe8] sm:$0xff] }
 0x746   :  { %v14407_v53 = vcombine.high %v9505_v37, %v9509_v38  ;;  %v14406_v20 = vcombine.low %v9505_v37, %v9509_v38  ;;  %v9585_v38 = vld [vmem:[#allocation9 + $0xe48] sm:$0xff] }
 0x748   :  { %12491 = vmatpush1.bf16.msra.mxu0 %v14294_v7  ;;  %v9513_v7 = vld [vmem:[#allocation9 + $0xc08] sm:$0xff] }
 0x749   :  { %12492 = vmatprep.subr.bf16.mxu0 %v14303_v59  ;;  %v9517_v59 = vld [vmem:[#allocation9 + $0xc28] sm:$0xff] }
 0x74a   :  { %v14415_v25 = vcombine.high %v9513_v7, %v9517_v59  ;;  %v14414_v33 = vcombine.low %v9513_v7, %v9517_v59  ;;  %v9593_v59 = vld [vmem:[#allocation9 + $0xe88] sm:$0xff] }
 0x74c   :  { %12493 = vmatpush1.bf16.msra.mxu0 %v14302_v0  ;;  %v9521_v0 = vld [vmem:[#allocation9 + $0xc48] sm:$0xff] }
 0x74d   :  { %12494 = vmatprep.subr.bf16.mxu0 %v14311_v22  ;;  %v9525_v22 = vld [vmem:[#allocation9 + $0xc68] sm:$0xff] }
 0x74e   :  { %v14423_v54 = vcombine.high %v9521_v0, %v9525_v22  ;;  %v14422_v58 = vcombine.low %v9521_v0, %v9525_v22  ;;  %v9601_v22 = vld [vmem:[#allocation9 + $0xec8] sm:$0xff] }
 0x750   :  { %12495 = vmatpush1.bf16.msra.mxu0 %v14310_v31  ;;  %v9529_v31 = vld [vmem:[#allocation9 + $0xc88] sm:$0xff] }
 0x751   :  { %12496 = vmatprep.subr.bf16.mxu0 %v14319_v60  ;;  %v9533_v60 = vld [vmem:[#allocation9 + $0xca8] sm:$0xff] }
 0x752   :  { %v14431_v45 = vcombine.high %v9529_v31, %v9533_v60  ;;  %v14430_v34 = vcombine.low %v9529_v31, %v9533_v60  ;;  %v9609_v60 = vld [vmem:[#allocation9 + $0xf08] sm:$0xff] }
 0x754   :  { %12497 = vmatpush1.bf16.msra.mxu0 %v14318_v43  ;;  %v9537_v43 = vld [vmem:[#allocation9 + $0xcc8] sm:$0xff] }
 0x755   :  { %12498 = vmatprep.subr.bf16.mxu0 %v14327_v36  ;;  %v9541_v36 = vld [vmem:[#allocation9 + $0xce8] sm:$0xff] }
 0x756   :  { %v14439_v52 = vcombine.high %v9537_v43, %v9541_v36  ;;  %v14438_v17 = vcombine.low %v9537_v43, %v9541_v36  ;;  %v9617_v36 = vld [vmem:[#allocation9 + $0xf48] sm:$0xff] }
 0x758   :  { %12499 = vmatpush1.bf16.msra.mxu0 %v14326_v29  ;;  %v9545_v29 = vld [vmem:[#allocation9 + $0xd08] sm:$0xff] }
 0x759   :  { %12500 = vmatprep.subr.bf16.mxu0 %v14335_v10  ;;  %v9549_v10 = vld [vmem:[#allocation9 + $0xd28] sm:$0xff] }
 0x75a   :  { %v14447_v32 = vcombine.high %v9545_v29, %v9549_v10  ;;  %v14446_v55 = vcombine.low %v9545_v29, %v9549_v10  ;;  %v9625_v10 = vld [vmem:[#allocation9 + $0xf88] sm:$0xff] }
 0x75c   :  { %12501 = vmatpush1.bf16.msra.mxu0 %v14334_v35  ;;  %v9553_v35 = vld [vmem:[#allocation9 + $0xd48] sm:$0xff] }
 0x75d   :  { %12502 = vmatprep.subr.bf16.mxu0 %v14343_v1  ;;  %v9557_v1 = vld [vmem:[#allocation9 + $0xd68] sm:$0xff] }
 0x760   :  { %12503 = vmatpush1.bf16.msra.mxu0 %v14342_v8  ;;  %v14455_v8 = vcombine.high %v9553_v35, %v9557_v1 }
 0x761   :  { %12504 = vmatprep.subr.bf16.mxu0 %v14351_v24  ;;  %v9561_v24 = vld [vmem:[#allocation9 + $0xd88] sm:$0xff] }
 0x762   :  { %v14463_v40 = vcombine.high %v9561_v24, %v9565_v61 }
 0x764   :  { %12505 = vmatpush1.bf16.msra.mxu0 %v14350_v63  ;;  %v14454_v63 = vcombine.low %v9553_v35, %v9557_v1  ;;  %v9633_v1 = vld [vmem:[#allocation9 + $0xfc8] sm:$0xff] }
 0x765   :  { %12506 = vmatprep.subr.bf16.mxu0 %v14359_v51  ;;  %v9649_v51 = vrot.slane %v19794_v49, %v20402_v47 }
 0x768   :  { %12507 = vmatpush1.bf16.msra.mxu0 %v14358_v56 }
 0x769   :  { %12508 = vmatprep.subr.bf16.mxu0 %v14367_v23  ;;  %v9569_v23 = vld [vmem:[#allocation9 + $0xdc8] sm:$0xff] }
 0x76a   :  { %v14471_v47 = vcombine.high %v9569_v23, %v9573_v27 }
 0x76c   :  { %12509 = vmatpush1.bf16.msra.mxu0 %v14366_v28 }
 0x76d   :  { %12510 = vmatprep.subr.bf16.mxu0 %v14375_v26 }
 0x770   :  { %12511 = vmatpush1.bf16.msra.mxu0 %v14374_v13  ;;  %v14462_v13 = vcombine.low %v9561_v24, %v9565_v61  ;;  %v9131_v61 = vld [vmem:[#allocation9 + $0x18] sm:$0xff] }
 0x771   :  { %12512 = vmatprep.subr.bf16.mxu0 %v14383_v9 }
 0x774   :  { %12513 = vmatpush1.bf16.msra.mxu0 %v14382_v18 }
 0x775   :  { %12514 = vmatprep.subr.bf16.mxu0 %v14391_v19  ;;  %v9577_v19 = vld [vmem:[#allocation9 + $0xe08] sm:$0xff] }
 0x776   :  { %v14479_v37 = vcombine.high %v9577_v19, %v9581_v3 }
 0x778   :  { %12515 = vmatpush1.bf16.msra.mxu0 %v14390_v12  ;;  %v14470_v12 = vcombine.low %v9569_v23, %v9573_v27 }
 0x779   :  { %12516 = vmatprep.subr.bf16.mxu0 %v14399_v48 }
 0x77c   :  { %12517 = vmatpush1.bf16.msra.mxu0 %v14398_v11  ;;  %v9589_v11 = vld [vmem:[#allocation9 + $0xe68] sm:$0xff] }
 0x77d   :  { %12518 = vmatprep.subr.bf16.mxu0 %v14407_v53  ;;  %v14478_v53 = vcombine.low %v9577_v19, %v9581_v3  ;;  %v14487_v7 = vcombine.high %v9585_v38, %v9589_v11  ;;  %v9171_v3 = vld [vmem:[#allocation9 + $0x158] sm:$0xff] }
 0x780   :  { %12519 = vmatpush1.bf16.msra.mxu0 %v14406_v20  ;;  %v9597_v20 = vld [vmem:[#allocation9 + $0xea8] sm:$0xff] }
 0x781   :  { %12529 = vmatprep.subr.bf16.mxu0 %v14415_v25  ;;  %v14486_v25 = vcombine.low %v9585_v38, %v9589_v11  ;;  %v14495_v0 = vcombine.high %v9593_v59, %v9597_v20 }
 0x783   :  { %12521 = vmatmul.mubr.bf16.vlgmr.msra.gmra.mrb[228].mxu0 %v19529_v21 }
 0x784   :  { %12530 = vmatpush1.bf16.msra.mxu0 %v14414_v33  ;;  %12561 = vmatprep.mubr.bf16.mxu0 %v19776_v5  ;;  %v9605_v33 = vld [vmem:[#allocation9 + $0xee8] sm:$0xff] }
 0x785   :  { %12531 = vmatprep.subr.bf16.mxu0 %v14423_v54  ;;  %v14494_v54 = vcombine.low %v9593_v59, %v9597_v20  ;;  %v14503_v31 = vcombine.high %v9601_v22, %v9605_v33 }
 0x788   :  { %12532 = vmatpush1.bf16.msra.mxu0 %v14422_v58  ;;  %v9613_v58 = vld [vmem:[#allocation9 + $0xf28] sm:$0xff] }
 0x789   :  { %12533 = vmatprep.subr.bf16.mxu0 %v14431_v45  ;;  %v14502_v45 = vcombine.low %v9601_v22, %v9605_v33  ;;  %v14511_v43 = vcombine.high %v9609_v60, %v9613_v58 }
 0x78c   :  { %12534 = vmatpush1.bf16.msra.mxu0 %v14430_v34  ;;  %v9621_v34 = vld [vmem:[#allocation9 + $0xf68] sm:$0xff] }
 0x78d   :  { %12535 = vmatprep.subr.bf16.mxu0 %v14439_v52  ;;  %v14510_v52 = vcombine.low %v9609_v60, %v9613_v58  ;;  %v14519_v29 = vcombine.high %v9617_v36, %v9621_v34 }
 0x790   :  { %12536 = vmatpush1.bf16.msra.mxu0 %v14438_v17  ;;  %v9629_v17 = vld [vmem:[#allocation9 + $0xfa8] sm:$0xff] }
 0x791   :  { %12537 = vmatprep.subr.bf16.mxu0 %v14447_v32  ;;  %v14518_v32 = vcombine.low %v9617_v36, %v9621_v34  ;;  %v14527_v35 = vcombine.high %v9625_v10, %v9629_v17 }
 0x794   :  { %12538 = vmatpush1.bf16.msra.mxu0 %v14446_v55  ;;  %v9637_v55 = vld [vmem:[#allocation9 + $0xfe8] sm:$0xff] }
 0x795   :  { %12539 = vmatprep.subr.bf16.mxu0 %v14455_v8  ;;  %v14526_v8 = vcombine.low %v9625_v10, %v9629_v17  ;;  %v14535_v24 = vcombine.high %v9633_v1, %v9637_v55 }
 0x796   :  { %v12399_v4 = vpop.f32.mrb[224].mxu0  ;;  %v19800_v56 = vpop.f32.mrb[32].mxu1 }
 0x797   :  { %v14873_v6 = vadd.f32 %v12399_v4, %v9645_v41  ;;  %v12401_v28 = vpop.f32.mrb[225].mxu0  ;;  %v19802_v26 = vpop.f32.mrb[33].mxu1  ;;  %v9135_v41 = vld [vmem:[#allocation9 + $0x38] sm:$0xff] }
 0x798   :  { %v14874_v46 = vadd.f32 %v12401_v28, %v9649_v51  ;;  %12540 = vmatpush1.bf16.msra.mxu0 %v14454_v63  ;;  %v12403_v50 = vpop.f32.mrb[226].mxu0  ;;  %v12731_v2 = vpop.f32.mrb[34].mxu1  ;;  %v14534_v63 = vcombine.low %v9633_v1, %v9637_v55  ;;  %v14035_v51 = vcombine.high %v9131_v61, %v9135_v41  ;;  %v9143_v4 = vld [vmem:[#allocation9 + $0x78] sm:$0xff]  ;;  %v14034_v23 = vcombine.low %v9131_v61, %v9135_v41 }
 0x799   :  { %v12898_v9 = vmax.f32 %v14873_v6, 0.0  ;;  %v12404_v42 = vpop.f32.mrb[227].mxu0  ;;  %v12732_v62 = vpop.f32.mrb[35].mxu1  ;;  %12541 = vmatprep.subr.bf16.mxu0 %v14463_v40  ;;  %v9139_v40 = vld [vmem:[#allocation9 + $0x58] sm:$0xff] }
 0x79a   :  { %v12899_v18 = vmax.f32 %v14874_v46, 0.0  ;;  %v14043_v27 = vcombine.high %v9139_v40, %v9143_v4  ;;  %v9147_v6 = vld [vmem:[#allocation9 + $0x98] sm:$0xff]  ;;  %v14042_v46 = vcombine.low %v9139_v40, %v9143_v4 }
 0x79b   :  { %v12906_v48 = vpack.c.bf16 %v12898_v9, %v12898_v9  ;;  %v9151_v28 = vld [vmem:[#allocation9 + $0xb8] sm:$0xff] }
 0x79c   :  { %v12907_v39 = vpack.c.bf16 %v12899_v18, %v12899_v18  ;;  %12542 = vmatpush1.bf16.msra.mxu0 %v14462_v13  ;;  %v14051_v50 = vcombine.high %v9147_v6, %v9151_v28  ;;  %v9155_v2 = vld [vmem:[#allocation9 + $0xd8] sm:$0xff]  ;;  %v14050_v9 = vcombine.low %v9147_v6, %v9151_v28 }
 0x79d   :  { %12543 = vmatprep.subr.bf16.mxu0 %v14471_v47  ;;  %v9159_v13 = vld [vmem:[#allocation9 + $0xf8] sm:$0xff] }
 0x79e   :  { %13465 = vmatprep.mubr.bf16.mxu1 %v12907_v39  ;;  %v14059_v42 = vcombine.high %v9155_v2, %v9159_v13  ;;  %v9163_v62 = vld [vmem:[#allocation9 + $0x118] sm:$0xff]  ;;  %v14058_v18 = vcombine.low %v9155_v2, %v9159_v13  ;;  %v15902_v13 = vld [vmem:[#allocation12 + $0xc0] sm:$0xff]  }
 0x79f   :  { %13466 = vmatmul.mubr.bf16.vlgmr.msra.gmra.mrb[36].mxu1 %v12906_v48  ;;  %v9167_v47 = vld [vmem:[#allocation9 + $0x138] sm:$0xff]  ;;  %14627 = vmatprep.subr.bf16.mxu1 %v15902_v13 }
 0x7a0   :  { %12544 = vmatpush1.bf16.msra.mxu0 %v14470_v12  ;;  %v14067_v19 = vcombine.high %v9163_v62, %v9167_v47  ;;  %v9175_v39 = vld [vmem:[#allocation9 + $0x178] sm:$0xff]  ;;  %v14066_v12 = vcombine.low %v9163_v62, %v9167_v47 }
 0x7a1   :  { %12545 = vmatprep.subr.bf16.mxu0 %v14479_v37  ;;  %v9179_v48 = vld [vmem:[#allocation9 + $0x198] sm:$0xff]  ;;  %v14074_v38 = vcombine.low %v9171_v3, %v9175_v39 }
 0x7a2   :  { %v9183_v37 = vld [vmem:[#allocation9 + $0x1b8] sm:$0xff] }
 0x7a3   :  { %v14083_v11 = vcombine.high %v9179_v48, %v9183_v37  ;;  %v14082_v59 = vcombine.low %v9179_v48, %v9183_v37  ;;  %v9267_v62 = vld [vmem:[#allocation9 + $0x458] sm:$0xff] }
 0x7a4   :  { %12546 = vmatpush1.bf16.msra.mxu0 %v14478_v53  ;;  %v9187_v53 = vld [vmem:[#allocation9 + $0x1d8] sm:$0xff] }
 0x7a5   :  { %12547 = vmatprep.subr.bf16.mxu0 %v14487_v7  ;;  %v9191_v7 = vld [vmem:[#allocation9 + $0x1f8] sm:$0xff] }
 0x7a6   :  { %v14091_v20 = vcombine.high %v9187_v53, %v9191_v7  ;;  %v14090_v22 = vcombine.low %v9187_v53, %v9191_v7  ;;  %v9271_v47 = vld [vmem:[#allocation9 + $0x478] sm:$0xff] }
 0x7a7   :  { %v14170_v48 = vcombine.low %v9267_v62, %v9271_v47  ;;  %v15906_v37 = vld [vmem:[#allocation12 + $0xd0] sm:$0xff]  }
 0x7a8   :  { %12548 = vmatpush1.bf16.msra.mxu0 %v14486_v25  ;;  %v9195_v25 = vld [vmem:[#allocation9 + $0x218] sm:$0xff] }
 0x7a9   :  { %12549 = vmatprep.subr.bf16.mxu0 %v14495_v0  ;;  %v9199_v0 = vld [vmem:[#allocation9 + $0x238] sm:$0xff] }
 0x7aa   :  { %v14099_v33 = vcombine.high %v9195_v25, %v9199_v0  ;;  %v14098_v60 = vcombine.low %v9195_v25, %v9199_v0  ;;  %v9283_v53 = vld [vmem:[#allocation9 + $0x4d8] sm:$0xff] }
 0x7ab   :  { %v9287_v7 = vld [vmem:[#allocation9 + $0x4f8] sm:$0xff] }
 0x7ac   :  { %12550 = vmatpush1.bf16.msra.mxu0 %v14494_v54  ;;  %v9203_v54 = vld [vmem:[#allocation9 + $0x258] sm:$0xff]  ;;  %v14187_v25 = vcombine.high %v9283_v53, %v9287_v7 }
 0x7ad   :  { %12551 = vmatprep.subr.bf16.mxu0 %v14503_v31  ;;  %v9207_v31 = vld [vmem:[#allocation9 + $0x278] sm:$0xff] }
 0x7ae   :  { %v14107_v58 = vcombine.high %v9203_v54, %v9207_v31  ;;  %v14106_v36 = vcombine.low %v9203_v54, %v9207_v31  ;;  %v9291_v0 = vld [vmem:[#allocation9 + $0x518] sm:$0xff]  ;;  %v15911_v31 = vld [vmem:[#allocation12 + $0xa0] sm:$0xff]  }
 0x7b0   :  { %12552 = vmatpush1.bf16.msra.mxu0 %v14502_v45  ;;  %v9211_v45 = vld [vmem:[#allocation9 + $0x298] sm:$0xff] }
 0x7b1   :  { %12553 = vmatprep.subr.bf16.mxu0 %v14511_v43  ;;  %v9215_v43 = vld [vmem:[#allocation9 + $0x2b8] sm:$0xff] }
 0x7b2   :  { %v14115_v34 = vcombine.high %v9211_v45, %v9215_v43  ;;  %v14114_v10 = vcombine.low %v9211_v45, %v9215_v43  ;;  %v15912_v43 = vld [vmem:[#allocation12 + $0xe8] sm:$0xff]  }
 0x7b4   :  { %12554 = vmatpush1.bf16.msra.mxu0 %v14510_v52  ;;  %v9219_v52 = vld [vmem:[#allocation9 + $0x2d8] sm:$0xff] }
 0x7b5   :  { %12555 = vmatprep.subr.bf16.mxu0 %v14519_v29  ;;  %v9223_v29 = vld [vmem:[#allocation9 + $0x2f8] sm:$0xff] }
 0x7b6   :  { %v14123_v17 = vcombine.high %v9219_v52, %v9223_v29  ;;  %v14122_v1 = vcombine.low %v9219_v52, %v9223_v29  ;;  %v9307_v52 = vld [vmem:[#allocation9 + $0x598] sm:$0xff] }
 0x7b7   :  { %v9311_v29 = vld [vmem:[#allocation9 + $0x5b8] sm:$0xff] }
 0x7b8   :  { %12556 = vmatpush1.bf16.msra.mxu0 %v14518_v32  ;;  %v9227_v32 = vld [vmem:[#allocation9 + $0x318] sm:$0xff] }
 0x7b9   :  { %12557 = vmatprep.subr.bf16.mxu0 %v14527_v35  ;;  %v9231_v35 = vld [vmem:[#allocation9 + $0x338] sm:$0xff] }
 0x7ba   :  { %v14131_v55 = vcombine.high %v9227_v32, %v9231_v35  ;;  %v14130_v61 = vcombine.low %v9227_v32, %v9231_v35  ;;  %v9315_v32 = vld [vmem:[#allocation9 + $0x5d8] sm:$0xff] }
 0x7bb   :  { %v9319_v35 = vld [vmem:[#allocation9 + $0x5f8] sm:$0xff] }
 0x7bc   :  { %12558 = vmatpush1.bf16.msra.mxu0 %v14526_v8  ;;  %v9235_v8 = vld [vmem:[#allocation9 + $0x358] sm:$0xff] }
 0x7bd   :  { %12559 = vmatprep.subr.bf16.mxu0 %v14535_v24  ;;  %v9239_v24 = vld [vmem:[#allocation9 + $0x378] sm:$0xff] }
 0x7be   :  { %v14139_v41 = vcombine.high %v9235_v8, %v9239_v24  ;;  %v14138_v40 = vcombine.low %v9235_v8, %v9239_v24  ;;  %v9323_v8 = vld [vmem:[#allocation9 + $0x618] sm:$0xff] }
 0x7bf   :  { %v9327_v24 = vld [vmem:[#allocation9 + $0x638] sm:$0xff] }
 0x7c0   :  { %12560 = vmatpush1.bf16.msra.mxu0 %v14534_v63  ;;  %v9243_v63 = vld [vmem:[#allocation9 + $0x398] sm:$0xff] }
 0x7c1   :  { %12734 = vmatprep.subr.bf16.mxu0 %v14035_v51  ;;  %v9247_v51 = vld [vmem:[#allocation9 + $0x3b8] sm:$0xff] }
 0x7c2   :  { %v14147_v4 = vcombine.high %v9243_v63, %v9247_v51  ;;  %v14146_v6 = vcombine.low %v9243_v63, %v9247_v51  ;;  %v15915_v63 = vld [vmem:[#allocation12 + $0xb0] sm:$0xff]   ;;  %v14227_v51 = vcombine.high %v9323_v8, %v9327_v24 }
 0x7c3   :  { %12562 = vmatmul.mubr.bf16.vlgmr.msra.gmra.mrb[228].mxu0 %v19778_v15 }
 0x7c4   :  { %12735 = vmatpush1.bf16.msra.mxu0 %v14034_v23  ;;  %12766 = vmatprep.mubr.bf16.mxu0 %v20397_v30  ;;  %v14075_v30 = vcombine.high %v9171_v3, %v9175_v39  ;;  %v9251_v23 = vld [vmem:[#allocation9 + $0x3d8] sm:$0xff]  ;;  %v14171_v3 = vcombine.high %v9267_v62, %v9271_v47 }
 0x7c5   :  { %12736 = vmatprep.subr.bf16.mxu0 %v14043_v27  ;;  %v9255_v27 = vld [vmem:[#allocation9 + $0x3f8] sm:$0xff] }
 0x7c6   :  { %v14155_v28 = vcombine.high %v9251_v23, %v9255_v27  ;;  %v14154_v2 = vcombine.low %v9251_v23, %v9255_v27  ;;  %v9275_v39 = vld [vmem:[#allocation9 + $0x498] sm:$0xff]  ;;  %v15917_v27 = vld [vmem:[#allocation12 + $0xb8] sm:$0xff]  }
 0x7c7   :  { %v9335_v23 = vld [vmem:[#allocation9 + $0x678] sm:$0xff] }
 0x7c8   :  { %12737 = vmatpush1.bf16.msra.mxu0 %v14042_v46  ;;  %v9259_v46 = vld [vmem:[#allocation9 + $0x418] sm:$0xff] }
 0x7c9   :  { %12738 = vmatprep.subr.bf16.mxu0 %v14051_v50  ;;  %v9263_v50 = vld [vmem:[#allocation9 + $0x438] sm:$0xff] }
 0x7ca   :  { %v9351_v62 = vld [vmem:[#allocation9 + $0x6f8] sm:$0xff] }
 0x7cc   :  { %12739 = vmatpush1.bf16.msra.mxu0 %v14050_v9  ;;  %v14163_v9 = vcombine.high %v9259_v46, %v9263_v50 }
 0x7cd   :  { %12740 = vmatprep.subr.bf16.mxu0 %v14059_v42  ;;  %v15903_v42 = vld [vmem:[#allocation12 + $0x80] sm:$0xff]  }
 0x7ce   :  { %14628 = vmatpush3.bf16.msra.mxu1 %v15903_v42  ;;  %v9347_v42 = vld [vmem:[#allocation9 + $0x6d8] sm:$0xff] }
 0x7d0   :  { %12741 = vmatpush1.bf16.msra.mxu0 %v14058_v18  ;;  %v14162_v18 = vcombine.low %v9259_v46, %v9263_v50  ;;  %v9339_v50 = vld [vmem:[#allocation9 + $0x698] sm:$0xff] }
 0x7d1   :  { %12742 = vmatprep.subr.bf16.mxu0 %v14067_v19  ;;  %v15904_v19 = vld [vmem:[#allocation12 + $0xc8] sm:$0xff]  }
 0x7d2   :  { %14629 = vmatprep.subr.bf16.mxu1 %v15904_v19  ;;  %v9355_v19 = vld [vmem:[#allocation9 + $0x718] sm:$0xff] }
 0x7d4   :  { %12743 = vmatpush1.bf16.msra.mxu0 %v14066_v12  ;;  %v9279_v12 = vld [vmem:[#allocation9 + $0x4b8] sm:$0xff] }
 0x7d5   :  { %12744 = vmatprep.subr.bf16.mxu0 %v14075_v30  ;;  %v15905_v30 = vld [vmem:[#allocation12 + $0x88] sm:$0xff]  }
 0x7d6   :  { %14630 = vmatpush3.bf16.msra.mxu1 %v15905_v30  ;;  %v9363_v30 = vld [vmem:[#allocation9 + $0x758] sm:$0xff] }
 0x7d7   :  { %14631 = vmatprep.subr.bf16.mxu1 %v15906_v37 }
 0x7d8   :  { %12745 = vmatpush1.bf16.msra.mxu0 %v14074_v38  ;;  %v14179_v38 = vcombine.high %v9275_v39, %v9279_v12 }
 0x7d9   :  { %12746 = vmatprep.subr.bf16.mxu0 %v14083_v11  ;;  %v15907_v11 = vld [vmem:[#allocation12 + $0x90] sm:$0xff]  }
 0x7da   :  { %14632 = vmatpush3.bf16.msra.mxu1 %v15907_v11  ;;  %v9371_v11 = vld [vmem:[#allocation9 + $0x798] sm:$0xff] }
 0x7dc   :  { %12747 = vmatpush1.bf16.msra.mxu0 %v14082_v59  ;;  %v14178_v59 = vcombine.low %v9275_v39, %v9279_v12  ;;  %v14250_v39 = vcombine.low %v9347_v42, %v9351_v62 }
 0x7dd   :  { %12748 = vmatprep.subr.bf16.mxu0 %v14091_v20  ;;  %v15908_v20 = vld [vmem:[#allocation12 + $0xd8] sm:$0xff]  }
 0x7de   :  { %14633 = vmatprep.subr.bf16.mxu1 %v15908_v20  ;;  %v9379_v20 = vld [vmem:[#allocation9 + $0x7d8] sm:$0xff] }
 0x7e0   :  { %12749 = vmatpush1.bf16.msra.mxu0 %v14090_v22  ;;  %v9295_v22 = vld [vmem:[#allocation9 + $0x538] sm:$0xff] }
 0x7e1   :  { %12750 = vmatprep.subr.bf16.mxu0 %v14099_v33  ;;  %v15910_v33 = vld [vmem:[#allocation12 + $0xe0] sm:$0xff]   ;;  %v14195_v54 = vcombine.high %v9291_v0, %v9295_v22  ;;  %v14194_v45 = vcombine.low %v9291_v0, %v9295_v22  ;;  %v9387_v22 = vld [vmem:[#allocation9 + $0x818] sm:$0xff] }
 0x7e4   :  { %12751 = vmatpush1.bf16.msra.mxu0 %v14098_v60  ;;  %v9299_v60 = vld [vmem:[#allocation9 + $0x558] sm:$0xff] }
 0x7e5   :  { %12752 = vmatprep.subr.bf16.mxu0 %v14107_v58  ;;  %v9303_v58 = vld [vmem:[#allocation9 + $0x578] sm:$0xff] }
 0x7e8   :  { %12753 = vmatpush1.bf16.msra.mxu0 %v14106_v36  ;;  %v14203_v36 = vcombine.high %v9299_v60, %v9303_v58 }
 0x7e9   :  { %12754 = vmatprep.subr.bf16.mxu0 %v14115_v34  ;;  %v15913_v34 = vld [vmem:[#allocation12 + $0xa8] sm:$0xff]  }
 0x7ec   :  { %12755 = vmatpush1.bf16.msra.mxu0 %v14114_v10  ;;  %v14202_v10 = vcombine.low %v9299_v60, %v9303_v58  ;;  %v9399_v60 = vld [vmem:[#allocation9 + $0x878] sm:$0xff] }
 0x7ed   :  { %12756 = vmatprep.subr.bf16.mxu0 %v14123_v17  ;;  %v14211_v17 = vcombine.high %v9307_v52, %v9311_v29 }
 0x7f0   :  { %12757 = vmatpush1.bf16.msra.mxu0 %v14122_v1  ;;  %v14210_v1 = vcombine.low %v9307_v52, %v9311_v29  ;;  %v9411_v29 = vld [vmem:[#allocation9 + $0x8d8] sm:$0xff] }
 0x7f1   :  { %12758 = vmatprep.subr.bf16.mxu0 %v14131_v55  ;;  %v14219_v55 = vcombine.high %v9315_v32, %v9319_v35 }
 0x7f4   :  { %12759 = vmatpush1.bf16.msra.mxu0 %v14130_v61  ;;  %v15914_v61 = vld [vmem:[#allocation12 + $0xf0] sm:$0xff]  }
 0x7f5   :  { %12760 = vmatprep.subr.bf16.mxu0 %v14139_v41  ;;  %v14218_v41 = vcombine.low %v9315_v32, %v9319_v35  ;;  %v9419_v35 = vld [vmem:[#allocation9 + $0x918] sm:$0xff] }
 0x7f8   :  { %12761 = vmatpush1.bf16.msra.mxu0 %v14138_v40  ;;  %v15916_v40 = vld [vmem:[#allocation12 + $0xf8] sm:$0xff]  }
 0x7f9   :  { %12762 = vmatprep.subr.bf16.mxu0 %v14147_v4  ;;  %v9331_v4 = vld [vmem:[#allocation9 + $0x658] sm:$0xff] }
 0x7fa   :  { %v14235_v46 = vcombine.high %v9331_v4, %v9335_v23  ;;  %v14234_v13 = vcombine.low %v9331_v4, %v9335_v23  ;;  %v9443_v4 = vld [vmem:[#allocation9 + $0x9d8] sm:$0xff] }
 0x7fb   :  { %v9447_v23 = vld [vmem:[#allocation9 + $0x9f8] sm:$0xff] }
 0x7fc   :  { %12763 = vmatpush1.bf16.msra.mxu0 %v14146_v6  ;;  %v15918_v6 = vld [vmem:[#allocation12 + $0x140] sm:$0xff]  }
 0x7fd   :  { %12764 = vmatprep.subr.bf16.mxu0 %v14155_v28  ;;  %v14226_v28 = vcombine.low %v9323_v8, %v9327_v24  ;;  %v9427_v24 = vld [vmem:[#allocation9 + $0x958] sm:$0xff] }
 0x800   :  { %12765 = vmatpush1.bf16.msra.mxu0 %v14154_v2  ;;  %v9343_v2 = vld [vmem:[#allocation9 + $0x6b8] sm:$0xff] }
 0x801   :  { %12775 = vmatprep.subr.bf16.mxu0 %v14163_v9  ;;  %v14243_v9 = vcombine.high %v9339_v50, %v9343_v2  ;;  %v14242_v47 = vcombine.low %v9339_v50, %v9343_v2  ;;  %v14346_v50 = vcombine.low %v9443_v4, %v9447_v23 }
 0x803   :  { %12767 = vmatmul.mubr.bf16.vlgmr.msra.gmra.mrb[232].mxu0 %v20398_v14  ;;  %v15909_v14 = vld [vmem:[#allocation12 + $0x98] sm:$0xff]  }
 0x804   :  { %12776 = vmatpush1.bf16.msra.mxu0 %v14162_v18  ;;  %12807 = vmatprep.mubr.bf16.mxu0 %v20399_v57  ;;  %v14186_v57 = vcombine.low %v9283_v53, %v9287_v7  ;;  %v14251_v18 = vcombine.high %v9347_v42, %v9351_v62  ;;  %v9375_v53 = vld [vmem:[#allocation9 + $0x7b8] sm:$0xff] }
 0x805   :  { %12777 = vmatprep.subr.bf16.mxu0 %v14171_v3  ;;  %14634 = vmatpush3.bf16.msra.mxu1 %v15909_v14  ;;  %v9359_v3 = vld [vmem:[#allocation9 + $0x738] sm:$0xff]  ;;  %v14274_v14 = vcombine.low %v9371_v11, %v9375_v53 }
 0x806   :  { %14635 = vmatprep.subr.bf16.mxu1 %v15910_v33  ;;  %v14259_v12 = vcombine.high %v9355_v19, %v9359_v3  ;;  %v14258_v37 = vcombine.low %v9355_v19, %v9359_v3 }
 0x808   :  { %12778 = vmatpush1.bf16.msra.mxu0 %v14170_v48  ;;  %v9367_v48 = vld [vmem:[#allocation9 + $0x778] sm:$0xff] }
 0x809   :  { %12779 = vmatprep.subr.bf16.mxu0 %v14179_v38  ;;  %14636 = vmatpush3.bf16.msra.mxu1 %v15911_v31  ;;  %v14267_v38 = vcombine.high %v9363_v30, %v9367_v48  ;;  %v14266_v7 = vcombine.low %v9363_v30, %v9367_v48  ;;  %v9395_v31 = vld [vmem:[#allocation9 + $0x858] sm:$0xff] }
 0x80a   :  { %14637 = vmatprep.subr.bf16.mxu1 %v15912_v43  ;;  %v9403_v43 = vld [vmem:[#allocation9 + $0x898] sm:$0xff] }
 0x80c   :  { %12780 = vmatpush1.bf16.msra.mxu0 %v14178_v59  ;;  %v14275_v59 = vcombine.high %v9371_v11, %v9375_v53 }
 0x80d   :  { %12781 = vmatprep.subr.bf16.mxu0 %v14187_v25  ;;  %14638 = vmatpush3.bf16.msra.mxu1 %v15913_v34  ;;  %v9383_v25 = vld [vmem:[#allocation9 + $0x7f8] sm:$0xff]  ;;  %v14298_v34 = vcombine.low %v9395_v31, %v9399_v60 }
 0x80e   :  { %14639 = vmatprep.subr.bf16.mxu1 %v15914_v61  ;;  %v14283_v0 = vcombine.high %v9379_v20, %v9383_v25  ;;  %v14282_v33 = vcombine.low %v9379_v20, %v9383_v25 }
 0x810   :  { %12782 = vmatpush1.bf16.msra.mxu0 %v14186_v57  ;;  %v9391_v57 = vld [vmem:[#allocation9 + $0x838] sm:$0xff] }
 0x811   :  { %12783 = vmatprep.subr.bf16.mxu0 %v14195_v54  ;;  %14640 = vmatpush3.bf16.msra.mxu1 %v15915_v63  ;;  %v14291_v54 = vcombine.high %v9387_v22, %v9391_v57  ;;  %v14290_v58 = vcombine.low %v9387_v22, %v9391_v57  ;;  %v9439_v63 = vld [vmem:[#allocation9 + $0x9b8] sm:$0xff] }
 0x812   :  { %14641 = vmatprep.subr.bf16.mxu1 %v15916_v40  ;;  %v9503_v22 = vld [vmem:[#allocation9 + $0xbb8] sm:$0xff] }
 0x814   :  { %12784 = vmatpush1.bf16.msra.mxu0 %v14194_v45  ;;  %v14299_v45 = vcombine.high %v9395_v31, %v9399_v60 }
 0x815   :  { %12785 = vmatprep.subr.bf16.mxu0 %v14203_v36  ;;  %14642 = vmatpush3.bf16.msra.mxu1 %v15917_v27  ;;  %v9407_v36 = vld [vmem:[#allocation9 + $0x8b8] sm:$0xff] }
 0x816   :  { %14649 = vmatprep.subr.bf16.mxu1 %v15918_v6  ;;  %v14307_v52 = vcombine.high %v9403_v43, %v9407_v36  ;;  %v14347_v6 = vcombine.high %v9443_v4, %v9447_v23  ;;  %v9551_v4 = vld [vmem:[#allocation9 + $0xd38] sm:$0xff] }
 0x818   :  { %12786 = vmatpush1.bf16.msra.mxu0 %v14202_v10  ;;  %v9415_v10 = vld [vmem:[#allocation9 + $0x8f8] sm:$0xff] }
 0x819   :  { %12787 = vmatprep.subr.bf16.mxu0 %v14211_v17  ;;  %v14306_v17 = vcombine.low %v9403_v43, %v9407_v36  ;;  %v14315_v32 = vcombine.high %v9411_v29, %v9415_v10  ;;  %v9511_v43 = vld [vmem:[#allocation9 + $0xbf8] sm:$0xff] }
 0x81c   :  { %12788 = vmatpush1.bf16.msra.mxu0 %v14210_v1  ;;  %v9423_v1 = vld [vmem:[#allocation9 + $0x938] sm:$0xff] }
 0x81d   :  { %12789 = vmatprep.subr.bf16.mxu0 %v14219_v55  ;;  %v14314_v55 = vcombine.low %v9411_v29, %v9415_v10  ;;  %v14323_v8 = vcombine.high %v9419_v35, %v9423_v1  ;;  %v14322_v61 = vcombine.low %v9419_v35, %v9423_v1  ;;  %v9519_v29 = vld [vmem:[#allocation9 + $0xc38] sm:$0xff] }
 0x81e   :  { %v9527_v35 = vld [vmem:[#allocation9 + $0xc78] sm:$0xff] }
 0x820   :  { %12790 = vmatpush1.bf16.msra.mxu0 %v14218_v41  ;;  %v9435_v41 = vld [vmem:[#allocation9 + $0x998] sm:$0xff] }
 0x821   :  { %12791 = vmatprep.subr.bf16.mxu0 %v14227_v51  ;;  %v14339_v40 = vcombine.high %v9435_v41, %v9439_v63  ;;  %v14338_v27 = vcombine.low %v9435_v41, %v9439_v63  ;;  %v9543_v41 = vld [vmem:[#allocation9 + $0xcf8] sm:$0xff] }
 0x824   :  { %12792 = vmatpush1.bf16.msra.mxu0 %v14226_v28  ;;  %v9451_v28 = vld [vmem:[#allocation9 + $0xa18] sm:$0xff] }
 0x825   :  { %12793 = vmatprep.subr.bf16.mxu0 %v14235_v46  ;;  %v9455_v46 = vld [vmem:[#allocation9 + $0xa38] sm:$0xff] }
 0x826   :  { %v14355_v2 = vcombine.high %v9451_v28, %v9455_v46  ;;  %v14354_v42 = vcombine.low %v9451_v28, %v9455_v46  ;;  %v20403_v28 = vld [vmem:[#allocation22_spill] sm:$0xff] }
 0x827   :  { %v9664_v46 = vsub.s32 5, %v20403_v28 }
 0x828   :  { %12794 = vmatpush1.bf16.msra.mxu0 %v14234_v13  ;;  %v9459_v13 = vld [vmem:[#allocation9 + $0xa58] sm:$0xff] }
 0x829   :  { %12795 = vmatprep.subr.bf16.mxu0 %v14243_v9  ;;  %v9463_v9 = vld [vmem:[#allocation9 + $0xa78] sm:$0xff] }
 0x82a   :  { %v14363_v62 = vcombine.high %v9459_v13, %v9463_v9  ;;  %v14362_v19 = vcombine.low %v9459_v13, %v9463_v9  ;;  %v9563_v9 = vld [vmem:[#allocation9 + $0xd98] sm:$0xff] }
 0x82c   :  { %12796 = vmatpush1.bf16.msra.mxu0 %v14242_v47  ;;  %v9467_v47 = vld [vmem:[#allocation9 + $0xa98] sm:$0xff] }
 0x82d   :  { %12797 = vmatprep.subr.bf16.mxu0 %v14251_v18  ;;  %v9471_v18 = vld [vmem:[#allocation9 + $0xab8] sm:$0xff] }
 0x82e   :  { %v14371_v3 = vcombine.high %v9467_v47, %v9471_v18  ;;  %v14370_v30 = vcombine.low %v9467_v47, %v9471_v18 }
 0x830   :  { %12798 = vmatpush1.bf16.msra.mxu0 %v14250_v39  ;;  %v9475_v39 = vld [vmem:[#allocation9 + $0xad8] sm:$0xff] }
 0x831   :  { %12799 = vmatprep.subr.bf16.mxu0 %v14259_v12  ;;  %v9479_v12 = vld [vmem:[#allocation9 + $0xaf8] sm:$0xff] }
 0x832   :  { %v14379_v48 = vcombine.high %v9475_v39, %v9479_v12  ;;  %v14378_v11 = vcombine.low %v9475_v39, %v9479_v12  ;;  %v9571_v12 = vld [vmem:[#allocation9 + $0xdd8] sm:$0xff] }
 0x834   :  { %12800 = vmatpush1.bf16.msra.mxu0 %v14258_v37  ;;  %v9483_v37 = vld [vmem:[#allocation9 + $0xb18] sm:$0xff] }
 0x835   :  { %12801 = vmatprep.subr.bf16.mxu0 %v14267_v38  ;;  %v9487_v38 = vld [vmem:[#allocation9 + $0xb38] sm:$0xff] }
 0x836   :  { %v14387_v53 = vcombine.high %v9483_v37, %v9487_v38  ;;  %v14386_v20 = vcombine.low %v9483_v37, %v9487_v38 }
 0x838   :  { %12802 = vmatpush1.bf16.msra.mxu0 %v14266_v7  ;;  %v9491_v7 = vld [vmem:[#allocation9 + $0xb58] sm:$0xff] }
 0x839   :  { %12803 = vmatprep.subr.bf16.mxu0 %v14275_v59  ;;  %v9495_v59 = vld [vmem:[#allocation9 + $0xb78] sm:$0xff] }
 0x83a   :  { %v14395_v25 = vcombine.high %v9491_v7, %v9495_v59  ;;  %v14394_v31 = vcombine.low %v9491_v7, %v9495_v59 }
 0x83c   :  { %12804 = vmatpush1.bf16.msra.mxu0 %v14274_v14 }
 0x83d   :  { %12805 = vmatprep.subr.bf16.mxu0 %v14283_v0  ;;  %v9499_v0 = vld [vmem:[#allocation9 + $0xb98] sm:$0xff] }
 0x83e   :  { %v14402_v36 = vcombine.low %v9499_v0, %v9503_v22 }
 0x840   :  { %12806 = vmatpush1.bf16.msra.mxu0 %v14282_v33 }
 0x841   :  { %12816 = vmatprep.subr.bf16.mxu0 %v14291_v54 }
 0x843   :  { %12808 = vmatmul.mubr.bf16.vlgmr.msra.gmra.mrb[232].mxu0 %v20400_v16  ;;  %v9431_v16 = vld [vmem:[#allocation9 + $0x978] sm:$0xff] }
 0x844   :  { %12817 = vmatpush1.bf16.msra.mxu0 %v14290_v58  ;;  %12848 = vmatprep.mubr.bf16.mxu0 %v19527_v44  ;;  %v14331_v44 = vcombine.high %v9427_v24, %v9431_v16  ;;  %v14330_v51 = vcombine.low %v9427_v24, %v9431_v16  ;;  %v14403_v58 = vcombine.high %v9499_v0, %v9503_v22  ;;  %v9535_v24 = vld [vmem:[#allocation9 + $0xcb8] sm:$0xff] }
 0x845   :  { %12818 = vmatprep.subr.bf16.mxu0 %v14299_v45  ;;  %v9507_v45 = vld [vmem:[#allocation9 + $0xbd8] sm:$0xff] }
 0x846   :  { %v14410_v10 = vcombine.low %v9507_v45, %v9511_v43  ;;  %v9579_v0 = vld [vmem:[#allocation9 + $0xe18] sm:$0xff] }
 0x847   :  { %v9583_v22 = vld [vmem:[#allocation9 + $0xe38] sm:$0xff] }
 0x848   :  { %12819 = vmatpush1.bf16.msra.mxu0 %v14298_v34  ;;  %v14411_v34 = vcombine.high %v9507_v45, %v9511_v43  ;;  %v9587_v45 = vld [vmem:[#allocation9 + $0xe58] sm:$0xff] }
 0x849   :  { %12820 = vmatprep.subr.bf16.mxu0 %v14307_v52  ;;  %v9515_v52 = vld [vmem:[#allocation9 + $0xc18] sm:$0xff] }
 0x84a   :  { %v14418_v1 = vcombine.low %v9515_v52, %v9519_v29  ;;  %v9591_v43 = vld [vmem:[#allocation9 + $0xe78] sm:$0xff] }
 0x84c   :  { %12821 = vmatpush1.bf16.msra.mxu0 %v14306_v17  ;;  %v14419_v17 = vcombine.high %v9515_v52, %v9519_v29  ;;  %v15921_v52 = vld [vmem:[#allocation12 + $0x108] sm:$0xff]   ;;  %v15922_v29 = vld [vmem:[#allocation12 + $0x150] sm:$0xff]  }
 0x84d   :  { %12822 = vmatprep.subr.bf16.mxu0 %v14315_v32  ;;  %v9523_v32 = vld [vmem:[#allocation9 + $0xc58] sm:$0xff] }
 0x84e   :  { %v14426_v16 = vcombine.low %v9523_v32, %v9527_v35 }
 0x850   :  { %12823 = vmatpush1.bf16.msra.mxu0 %v14314_v55  ;;  %v14427_v55 = vcombine.high %v9523_v32, %v9527_v35  ;;  %v9599_v32 = vld [vmem:[#allocation9 + $0xeb8] sm:$0xff]  ;;  %v14490_v35 = vcombine.low %v9587_v45, %v9591_v43 }
 0x851   :  { %12824 = vmatprep.subr.bf16.mxu0 %v14323_v8  ;;  %v9531_v8 = vld [vmem:[#allocation9 + $0xc98] sm:$0xff] }
 0x852   :  { %v14434_v63 = vcombine.low %v9531_v8, %v9535_v24 }
 0x854   :  { %12825 = vmatpush1.bf16.msra.mxu0 %v14322_v61  ;;  %v14435_v61 = vcombine.high %v9531_v8, %v9535_v24  ;;  %v9603_v24 = vld [vmem:[#allocation9 + $0xed8] sm:$0xff] }
 0x855   :  { %12826 = vmatprep.subr.bf16.mxu0 %v14331_v44  ;;  %v9539_v44 = vld [vmem:[#allocation9 + $0xcd8] sm:$0xff] }
 0x856   :  { %v14442_v23 = vcombine.low %v9539_v44, %v9543_v41 }
 0x858   :  { %12827 = vmatpush1.bf16.msra.mxu0 %v14330_v51  ;;  %v14443_v51 = vcombine.high %v9539_v44, %v9543_v41  ;;  %v15925_v44 = vld [vmem:[#allocation12 + $0x118] sm:$0xff]   ;;  %v15926_v41 = vld [vmem:[#allocation12 + $0x160] sm:$0xff]  }
 0x859   :  { %12828 = vmatprep.subr.bf16.mxu0 %v14339_v40  ;;  %v9547_v40 = vld [vmem:[#allocation9 + $0xd18] sm:$0xff] }
 0x85c   :  { %12829 = vmatpush1.bf16.msra.mxu0 %v14338_v27  ;;  %v14451_v27 = vcombine.high %v9547_v40, %v9551_v4 }
 0x85d   :  { %12830 = vmatprep.subr.bf16.mxu0 %v14347_v6  ;;  %v9555_v6 = vld [vmem:[#allocation9 + $0xd58] sm:$0xff] }
 0x860   :  { %12831 = vmatpush1.bf16.msra.mxu0 %v14346_v50  ;;  %v14450_v50 = vcombine.low %v9547_v40, %v9551_v4  ;;  %v9615_v40 = vld [vmem:[#allocation9 + $0xf38] sm:$0xff] }
 0x861   :  { %12832 = vmatprep.subr.bf16.mxu0 %v14355_v2  ;;  %v9656_v2 = vsub.s32 3, %v20403_v28 }
 0x863   :  { %v9657_v18 = vrot.slane %v19794_v49, %v9656_v2  ;;  %v15929_v2 = vld [vmem:[#allocation12 + $0x128] sm:$0xff]  }
 0x864   :  { %12833 = vmatpush1.bf16.msra.mxu0 %v14354_v42  ;;  %v9567_v42 = vld [vmem:[#allocation9 + $0xdb8] sm:$0xff] }
 0x865   :  { %12834 = vmatprep.subr.bf16.mxu0 %v14363_v62  ;;  %v9665_v62 = vrot.slane %v19794_v49, %v9664_v46  ;;  %v14466_v7 = vcombine.low %v9563_v9, %v9567_v42  ;;  %v9619_v46 = vld [vmem:[#allocation9 + $0xf58] sm:$0xff] }
 0x868   :  { %12835 = vmatpush1.bf16.msra.mxu0 %v14362_v19 }
 0x869   :  { %12836 = vmatprep.subr.bf16.mxu0 %v14371_v3  ;;  %v14467_v3 = vcombine.high %v9563_v9, %v9567_v42  ;;  %v15930_v42 = vld [vmem:[#allocation12 + $0x170] sm:$0xff]  }
 0x86c   :  { %12837 = vmatpush1.bf16.msra.mxu0 %v14370_v30  ;;  %v9575_v30 = vld [vmem:[#allocation9 + $0xdf8] sm:$0xff] }
 0x86d   :  { %12838 = vmatprep.subr.bf16.mxu0 %v14379_v48  ;;  %v14878_v48 = vadd.f32 %v19802_v26, %v9665_v62  ;;  %v15920_v26 = vld [vmem:[#allocation12 + $0x148] sm:$0xff]  }
 0x870   :  { %12839 = vmatpush1.bf16.msra.mxu0 %v14378_v11 }
 0x871   :  { %12840 = vmatprep.subr.bf16.mxu0 %v14387_v53 }
 0x872   :  { %v14621_v14 = vpop.f32.mrb[36].mxu1 }
 0x873   :  { %v14622_v57 = vpop.f32.mrb[37].mxu1 }
 0x874   :  { %12841 = vmatpush1.bf16.msra.mxu0 %v14386_v20  ;;  %v19810_v33 = vadd.f32 %v14622_v57, %v14621_v14  ;;  %v14624_v54 = vpop.f32.mrb[38].mxu1 }
 0x875   :  { %v14625_v60 = vpop.f32.mrb[39].mxu1  ;;  %12842 = vmatprep.subr.bf16.mxu0 %v14395_v25  ;;  %v14475_v25 = vcombine.high %v9571_v12, %v9575_v30  ;;  %v14474_v54 = vcombine.low %v9571_v12, %v9575_v30  ;;  %v15932_v12 = vld [vmem:[#allocation12 + $0x178] sm:$0xff]  }
 0x878   :  { %12843 = vmatpush1.bf16.msra.mxu0 %v14394_v31  ;;  %v15919_v31 = vld [vmem:[#allocation12 + $0x100] sm:$0xff]  }
 0x879   :  { %12844 = vmatprep.subr.bf16.mxu0 %v14403_v58  ;;  %v14483_v58 = vcombine.high %v9579_v0, %v9583_v22 }
 0x87c   :  { %12845 = vmatpush1.bf16.msra.mxu0 %v14402_v36 }
 0x87d   :  { %12846 = vmatprep.subr.bf16.mxu0 %v14411_v34  ;;  %v14482_v34 = vcombine.low %v9579_v0, %v9583_v22  ;;  %v15938_v0 = vld [vmem:[#allocation12 + $0x1d0] sm:$0xff]  }
 0x87e   :  { %v15939_v22 = vld [vmem:[#allocation12 + $0x190] sm:$0xff]  }
 0x880   :  { %12847 = vmatpush1.bf16.msra.mxu0 %v14410_v10  ;;  %v14491_v10 = vcombine.high %v9587_v45, %v9591_v43  ;;  %v15947_v45 = vld [vmem:[#allocation12 + $0x1b0] sm:$0xff]   ;;  %v15948_v43 = vld [vmem:[#allocation12 + $0x1f8] sm:$0xff]  }
 0x881   :  { %12857 = vmatprep.subr.bf16.mxu0 %v14419_v17  ;;  %v9595_v17 = vld [vmem:[#allocation9 + $0xe98] sm:$0xff] }
 0x882   :  { %v14499_v8 = vcombine.high %v9595_v17, %v9599_v32 }
 0x883   :  { %12849 = vmatmul.mubr.bf16.vlgmr.msra.gmra.mrb[232].mxu0 %v19529_v21  ;;  %v9559_v21 = vld [vmem:[#allocation9 + $0xd78] sm:$0xff] }
 0x884   :  { %12858 = vmatpush1.bf16.msra.mxu0 %v14418_v1  ;;  %12889 = vmatprep.mubr.bf16.mxu0 %v19776_v5  ;;  %v9652_v5 = vsub.s32 2, %v20403_v28  ;;  %v14459_v13 = vcombine.high %v9555_v6, %v9559_v21  ;;  %v14458_v19 = vcombine.low %v9555_v6, %v9559_v21  ;;  %v15923_v1 = vld [vmem:[#allocation12 + $0x110] sm:$0xff]   ;;  %v15928_v6 = vld [vmem:[#allocation12 + $0x168] sm:$0xff]  }
 0x885   :  { %12859 = vmatprep.subr.bf16.mxu0 %v14427_v55  ;;  %v15924_v55 = vld [vmem:[#allocation12 + $0x158] sm:$0xff]  }
 0x886   :  { %v9653_v47 = vrot.slane %v19794_v49, %v9652_v5  ;;  %v12903_v49 = vmax.f32 %v14878_v48, 0.0  ;;  %v9623_v5 = vld [vmem:[#allocation9 + $0xf78] sm:$0xff] }
 0x887   :  { %v14523_v62 = vcombine.high %v9619_v46, %v9623_v5  ;;  %v9635_v48 = vld [vmem:[#allocation9 + $0xfd8] sm:$0xff] }
 0x888   :  { %12860 = vmatpush1.bf16.msra.mxu0 %v14426_v16  ;;  %v12911_v36 = vpack.c.bf16 %v12903_v49, %v12903_v49  ;;  %v9607_v16 = vld [vmem:[#allocation9 + $0xef8] sm:$0xff]  ;;  %v15937_v49 = vld [vmem:[#allocation12 + $0x188] sm:$0xff]  }
 0x889   :  { %12861 = vmatprep.subr.bf16.mxu0 %v14435_v61  ;;  %v14498_v61 = vcombine.low %v9595_v17, %v9599_v32  ;;  %v14506_v4 = vcombine.low %v9603_v24, %v9607_v16 }
 0x88c   :  { %12862 = vmatpush1.bf16.msra.mxu0 %v14434_v63  ;;  %v14507_v63 = vcombine.high %v9603_v24, %v9607_v16 }
 0x88d   :  { %12863 = vmatprep.subr.bf16.mxu0 %v14443_v51  ;;  %v9611_v51 = vld [vmem:[#allocation9 + $0xf18] sm:$0xff] }
 0x88e   :  { %v14515_v21 = vcombine.high %v9611_v51, %v9615_v40 }
 0x890   :  { %12864 = vmatpush1.bf16.msra.mxu0 %v14442_v23  ;;  %v15927_v23 = vld [vmem:[#allocation12 + $0x120] sm:$0xff]  }
 0x891   :  { %12865 = vmatprep.subr.bf16.mxu0 %v14451_v27  ;;  %v9660_v27 = vsub.s32 4, %v20403_v28 }
 0x894   :  { %12866 = vmatpush1.bf16.msra.mxu0 %v14450_v50  ;;  %v14514_v50 = vcombine.low %v9611_v51, %v9615_v40 }
 0x895   :  { %12867 = vmatprep.subr.bf16.mxu0 %v14459_v13  ;;  %v19822_v13 = vld [vmem:[#allocation10] sm:$0xff] }
 0x896   :  { %v12563_v39 = vpop.f32.mrb[228].mxu0  ;;  %v9661_v9 = vrot.slane %v19822_v13, %v9660_v27 }
 0x897   :  { %v14875_v37 = vadd.f32 %v12563_v39, %v9653_v47  ;;  %v12565_v38 = vpop.f32.mrb[229].mxu0  ;;  %v9627_v47 = vld [vmem:[#allocation9 + $0xf98] sm:$0xff] }
 0x898   :  { %v14876_v11 = vadd.f32 %v12565_v38, %v9657_v18  ;;  %v12567_v53 = vpop.f32.mrb[230].mxu0  ;;  %12868 = vmatpush1.bf16.msra.mxu0 %v14458_v19  ;;  %v9631_v18 = vld [vmem:[#allocation9 + $0xfb8] sm:$0xff]  ;;  %v14522_v19 = vcombine.low %v9619_v46, %v9623_v5  ;;  %v14877_v39 = vadd.f32 %v19800_v56, %v9661_v9  ;;  %v15934_v56 = vld [vmem:[#allocation12 + $0x1c0] sm:$0xff]  }
 0x899   :  { %v12900_v59 = vmax.f32 %v14875_v37, 0.0  ;;  %v12568_v20 = vpop.f32.mrb[231].mxu0  ;;  %12869 = vmatprep.subr.bf16.mxu0 %v14467_v3  ;;  %v15931_v3 = vld [vmem:[#allocation12 + $0x130] sm:$0xff]   ;;  %v14531_v30 = vcombine.high %v9627_v47, %v9631_v18  ;;  %v14530_v38 = vcombine.low %v9627_v47, %v9631_v18 }
 0x89a   :  { %v12901_v14 = vmax.f32 %v14876_v11, 0.0  ;;  %v9639_v37 = vld [vmem:[#allocation9 + $0xff8] sm:$0xff]  ;;  %v15933_v11 = vld [vmem:[#allocation12 + $0x138] sm:$0xff]   ;;  %v12902_v53 = vmax.f32 %v14877_v39, 0.0 }
 0x89b   :  { %v12908_v60 = vpack.c.bf16 %v12900_v59, %v12900_v59  ;;  %v14538_v59 = vcombine.low %v9635_v48, %v9639_v37 }
 0x89c   :  { %v12909_v57 = vpack.c.bf16 %v12901_v14, %v12901_v14  ;;  %12870 = vmatpush1.bf16.msra.mxu0 %v14466_v7  ;;  %v14539_v7 = vcombine.high %v9635_v48, %v9639_v37  ;;  %v12910_v20 = vpack.c.bf16 %v12902_v53, %v12902_v53  ;;  %v15936_v14 = vld [vmem:[#allocation12 + $0x1c8] sm:$0xff]  }
 0x89d   :  { %12871 = vmatprep.subr.bf16.mxu0 %v14475_v25  ;;  %v15935_v25 = vld [vmem:[#allocation12 + $0x180] sm:$0xff]  }
 0x89e   :  { %13505 = vmatprep.mubr.bf16.mxu1 %v12909_v57  ;;  %v15940_v57 = vld [vmem:[#allocation12 + $0x1d8] sm:$0xff]  }
 0x89f   :  { %13506 = vmatmul.mubr.bf16.vlgmr.msra.gmra.mrb[40].mxu1 %v12908_v60  ;;  %v15943_v60 = vld [vmem:[#allocation12 + $0x1a0] sm:$0xff]  }
 0x8a0   :  { %14650 = vmatpush3.bf16.msra.mxu1 %v15919_v31  ;;  %12872 = vmatpush1.bf16.msra.mxu0 %v14474_v54  ;;  %v15941_v54 = vld [vmem:[#allocation12 + $0x198] sm:$0xff]   ;;  %v15942_v31 = vld [vmem:[#allocation12 + $0x1e0] sm:$0xff]  }
 0x8a1   :  { %13545 = vmatprep.mubr.bf16.mxu1 %v12911_v36  ;;  %14651 = vmatprep.subr.bf16.mxu1 %v15920_v26  ;;  %v15945_v26 = vld [vmem:[#allocation12 + $0x1a8] sm:$0xff]   ;;  %v15949_v36 = vld [vmem:[#allocation12 + $0x1b8] sm:$0xff]  }
 0x8a2   :  { %12873 = vmatprep.subr.bf16.mxu0 %v14483_v58  ;;  %v15946_v58 = vld [vmem:[#allocation12 + $0x1f0] sm:$0xff]  }
 0x8a4   :  { %14652 = vmatpush3.bf16.msra.mxu1 %v15921_v52  ;;  %12874 = vmatpush1.bf16.msra.mxu0 %v14482_v34  ;;  %v14540_v34 = vld [vmem:[#allocation13] ss:$0 sm:$0xff] }
 0x8a5   :  { %14653 = vmatprep.subr.bf16.mxu1 %v15922_v29  ;;  %12875 = vmatprep.subr.bf16.mxu0 %v14491_v10  ;;  %v13468_v10 = vadd.f32 %v19810_v33, %v14540_v34 }
 0x8a8   :  { %14654 = vmatpush3.bf16.msra.mxu1 %v15923_v1  ;;  %12876 = vmatpush1.bf16.msra.mxu0 %v14490_v35 }
 0x8a9   :  { %14655 = vmatprep.subr.bf16.mxu1 %v15924_v55  ;;  %12877 = vmatprep.subr.bf16.mxu0 %v14499_v8  ;;  %v9668_v55 = vsub.s32 6, %v20403_v28  ;;  %v9672_v8 = vsub.s32 7, %v20403_v28 }
 0x8ac   :  { %14656 = vmatpush3.bf16.msra.mxu1 %v15925_v44  ;;  %12878 = vmatpush1.bf16.msra.mxu0 %v14498_v61  ;;  %v9669_v61 = vrot.slane %v19822_v13, %v9668_v55 }
 0x8ad   :  { %14657 = vmatprep.subr.bf16.mxu1 %v15926_v41  ;;  %12879 = vmatprep.subr.bf16.mxu0 %v14507_v63  ;;  %v9673_v63 = vrot.slane %v19822_v13, %v9672_v8 }
 0x8b0   :  { %14658 = vmatpush3.bf16.msra.mxu1 %v15927_v23  ;;  %12880 = vmatpush1.bf16.msra.mxu0 %v14506_v4 }
 0x8b1   :  { %14659 = vmatprep.subr.bf16.mxu1 %v15928_v6  ;;  %12881 = vmatprep.subr.bf16.mxu0 %v14515_v21 }
 0x8b4   :  { %14660 = vmatpush3.bf16.msra.mxu1 %v15929_v2  ;;  %12882 = vmatpush1.bf16.msra.mxu0 %v14514_v50 }
 0x8b5   :  { %14661 = vmatprep.subr.bf16.mxu1 %v15930_v42  ;;  %12883 = vmatprep.subr.bf16.mxu0 %v14523_v62 }
 0x8b8   :  { %14662 = vmatpush3.bf16.msra.mxu1 %v15931_v3  ;;  %12884 = vmatpush1.bf16.msra.mxu0 %v14522_v19 }
 0x8b9   :  { %14663 = vmatprep.subr.bf16.mxu1 %v15932_v12  ;;  %12885 = vmatprep.subr.bf16.mxu0 %v14531_v30 }
 0x8bc   :  { %14664 = vmatpush3.bf16.msra.mxu1 %v15933_v11  ;;  %12886 = vmatpush1.bf16.msra.mxu0 %v14530_v38 }
 0x8bd   :  { %12887 = vmatprep.subr.bf16.mxu0 %v14539_v7  ;;  %14671 = vmatprep.subr.bf16.mxu1 %v15934_v56 }
 0x8bf   :  { %13546 = vmatmul.mubr.bf16.vlgmr.msra.gmra.mrb[44].mxu1 %v12910_v20 }
 0x8c0   :  { %12888 = vmatpush1.bf16.msra.mxu0 %v14538_v59  ;;  %14672 = vmatpush3.bf16.msra.mxu1 %v15935_v25 }
 0x8c1   :  { %14673 = vmatprep.subr.bf16.mxu1 %v15936_v14 }
 0x8c3   :  { %12890 = vmatmul.mubr.bf16.vlgmr.msra.gmra.mrb[232].mxu0 %v19778_v15  ;;  %v15944_v15 = vld [vmem:[#allocation12 + $0x1e8] sm:$0xff]  }
 0x8c4   :  { %14674 = vmatpush3.bf16.msra.mxu1 %v15937_v49 }
 0x8c5   :  { %14675 = vmatprep.subr.bf16.mxu1 %v15938_v0 }
 0x8c8   :  { %14676 = vmatpush3.bf16.msra.mxu1 %v15939_v22 }
 0x8c9   :  { %14677 = vmatprep.subr.bf16.mxu1 %v15940_v57 }
 0x8cc   :  { %14678 = vmatpush3.bf16.msra.mxu1 %v15941_v54 }
 0x8cd   :  { %14679 = vmatprep.subr.bf16.mxu1 %v15942_v31 }
 0x8d0   :  { %14680 = vmatpush3.bf16.msra.mxu1 %v15943_v60 }
 0x8d1   :  { %14681 = vmatprep.subr.bf16.mxu1 %v15944_v15 }
 0x8d4   :  { %14682 = vmatpush3.bf16.msra.mxu1 %v15945_v26 }
 0x8d5   :  { %14683 = vmatprep.subr.bf16.mxu1 %v15946_v58 }
 0x8d8   :  { %14684 = vmatpush3.bf16.msra.mxu1 %v15947_v45 }
 0x8d9   :  { %14685 = vmatprep.subr.bf16.mxu1 %v15948_v43 }
 0x8dc   :  { %14686 = vmatpush3.bf16.msra.mxu1 %v15949_v36 }
 0x972   :  { %v14643_v52 = vpop.f32.mrb[40].mxu1 }
 0x973   :  { %v14644_v29 = vpop.f32.mrb[41].mxu1 }
 0x974   :  { %v14645_v17 = vadd.f32 %v14644_v29, %v14643_v52  ;;  %v14646_v32 = vpop.f32.mrb[42].mxu1 }
 0x975   :  { %v14647_v35 = vpop.f32.mrb[43].mxu1 }
 0x976   :  { %v13508_v1 = vadd.f32 %v14645_v17, %v13468_v10 }
 0x992   :  { %v14665_v24 = vpop.f32.mrb[44].mxu1 }
 0x993   :  { %v14666_v16 = vpop.f32.mrb[45].mxu1 }
 0x994   :  { %v14667_v44 = vadd.f32 %v14666_v16, %v14665_v24  ;;  %v14668_v41 = vpop.f32.mrb[46].mxu1 }
 0x995   :  { %v14669_v51 = vpop.f32.mrb[47].mxu1 }
 0x996   :  { %v13548_v40 = vadd.f32 %v14667_v44, %v13508_v1  ;;  %v12891_v4 = vpop.f32.mrb[232].mxu0 }
 0x997   :  { %v14879_v33 = vadd.f32 %v12891_v4, %v9669_v61  ;;  %v12893_v23 = vpop.f32.mrb[233].mxu0 }
 0x998   :  { %v14880_v27 = vadd.f32 %v12893_v23, %v9673_v63  ;;  %v12895_v6 = vpop.f32.mrb[234].mxu0 }
 0x999   :  { %v12904_v21 = vmax.f32 %v14879_v33, 0.0  ;;  %v12896_v46 = vpop.f32.mrb[235].mxu0 }
 0x99a   :  { %v12905_v5 = vmax.f32 %v14880_v27, 0.0 }
 0x99b   :  { %v12912_v28 = vpack.c.bf16 %v12904_v21, %v12904_v21 }
 0x99c   :  { %v12913_v50 = vpack.c.bf16 %v12905_v5, %v12905_v5 }
 0x99e   :  { %13585 = vmatprep.mubr.bf16.mxu1 %v12913_v50 }
 0x99f   :  { %13586 = vmatmul.mubr.bf16.vlgmr.msra.gmra.mrb[48].mxu1 %v12912_v28 }
 0xa72   :  { %v14687_v2 = vpop.f32.mrb[48].mxu1 }
 0xa73   :  { %v14688_v9 = vpop.f32.mrb[49].mxu1 }
 0xa74   :  { %v14689_v42 = vadd.f32 %v14688_v9, %v14687_v2  ;;  %v14690_v62 = vpop.f32.mrb[50].mxu1 }
 0xa75   :  { %v14691_v47 = vpop.f32.mrb[51].mxu1 }
 0xa76   :  { %v13588_v13 = vadd.f32 %v14689_v42, %v13548_v40 }
 0xa78   :  { %13593 = vst [vmem:[%s19844_s9] sm:$0xff] %v13588_v13 }
 0xa79   :  { %13598 = vsyncpa [#allocation3], 1 }
 0xa7a   :  { %13599 = vsyncpa [#allocation5], 1 }
 0xa7b   :  { %13600 = vsyncpa [#allocation8], 1 }
 0xa7c   :  { %13601 = vsyncpa [#allocation11], 1 }
 0xa7d   :  { %13602 = vsyncpa [#allocation14], 1 }

</bundles_post_ra>
